<compile_context>
chip_gen: v6e
topology: v6e:2x2x1
jax: 0.10.0
libtpu: 0.0.40
codegen_flags: <defaults>
</compile_context>

<pallas_src>
import functools

import jax
import jax.numpy as jnp
from jax.experimental import pallas as pl
from jax.experimental.pallas import tpu as pltpu

LANE = 128
VMEM_LIMIT = 32 * 1024 * 1024  # safe on v5e / v6e / v7x


def _round_up(x, m):
    return (x + m - 1) // m * m


@functools.lru_cache(maxsize=None)
def _tensorcore_count():
    """2 on v7x (megacore split pays); 1 otherwise (a forced split is pure
    per-step overhead on single-TC chips)."""
    try:
        kind = jax.devices()[0].device_kind.lower()
    except Exception:
        return 1
    return 2 if "v7" in kind else 1


# ----------------------------- Pallas kernels ------------------------------ #

def _conv_pool_kernel(x_ref, w_ref, b_ref, o_ref):
    """Fused conv-as-matmul + bias + ReLU + 2x2 max-pool.

    x_ref: (4, tm, K) bf16 -- the 4 pooling-window taps of the im2col patches.
    w_ref: (K, OCp) bf16, K and OCp multiples of 128 (lane-dense).
    b_ref: (1, OCp) f32.
    o_ref: (tm, OCp) bf16 -- pooled, activated output rows.
    max(relu(a+b), relu(c+b)) == relu(max(a,c)+b), so pooling commutes with the
    bias + ReLU epilogue.
    """
    w = w_ref[...]
    m = jnp.dot(x_ref[0], w, preferred_element_type=jnp.float32)
    for t in range(1, 4):  # static unroll over the 4 pool taps
        m = jnp.maximum(m, jnp.dot(x_ref[t], w,
                                   preferred_element_type=jnp.float32))
    o_ref[...] = jnp.maximum(m + b_ref[...], 0.0).astype(o_ref.dtype)


def _conv2_fc_kernel(p_ref, w2_ref, b2_ref, w3_ref, b3_ref, w4_ref, b4_ref,
                     o_ref, *, batch, n_pos):
    """conv2 (+bias+ReLU+pool) -> flatten -> fc1 -> ReLU -> fc2, one kernel.

    p_ref : (4, n_pos*batch, K2) bf16 pool-tap im2col planes, rows (pos, n).
    w2_ref: (K2, OCp) bf16; b2_ref: (1, OCp) f32.
    w3_ref: (n_pos*OCp, H1) bf16 (fc1, rows ordered (pos, channel)); b3: (1, H1).
    w4_ref: (H1, N2p) bf16; b4: (1, N2p) f32.
    o_ref : (batch, N2p) f32.
    The NHWC flatten feeding fc1 is an unrolled sum of per-position dots
    (g[pos] @ W1[pos]) -- no in-kernel reshape/relayout needed.
    """
    ocp = w2_ref.shape[1]
    w2 = w2_ref[...]
    g = jnp.dot(p_ref[0], w2, preferred_element_type=jnp.float32)
    for t in range(1, 4):  # static unroll over the 4 pool taps
        g = jnp.maximum(g, jnp.dot(p_ref[t], w2,
                                   preferred_element_type=jnp.float32))
    g = jnp.maximum(g + b2_ref[...], 0.0).astype(jnp.bfloat16)  # (n_pos*batch, OCp)

    h = jnp.zeros((batch, w3_ref.shape[1]), jnp.float32)
    for p in range(n_pos):  # static unroll: flatten realised as a sum of dots
        h = h + jnp.dot(g[p * batch:(p + 1) * batch, :],
                        w3_ref[p * ocp:(p + 1) * ocp, :],
                        preferred_element_type=jnp.float32)
    h = jnp.maximum(h + b3_ref[...], 0.0).astype(jnp.bfloat16)
    o = jnp.dot(h, w4_ref[...], preferred_element_type=jnp.float32)
    o_ref[...] = (o + b4_ref[...]).astype(o_ref.dtype)


# ------------------------------ kernel wrappers ----------------------------- #

def _conv_pool(patches, w, b):
    """patches:(4,M,K) bf16, w:(K,OCp) bf16, b:(1,OCp) f32 -> (M,OCp) bf16."""
    _, M, K = patches.shape
    OCp = w.shape[1]
    n_tc = _tensorcore_count()
    grid = n_tc if (n_tc > 1 and M % (8 * n_tc) == 0) else 1
    tm = M // grid
    return pl.pallas_call(
        _conv_pool_kernel,
        out_shape=jax.ShapeDtypeStruct((M, OCp), jnp.bfloat16),
        grid_spec=pltpu.PrefetchScalarGridSpec(
            num_scalar_prefetch=0,
            grid=(grid,),
            in_specs=[
                pl.BlockSpec((4, tm, K), lambda i: (0, i, 0)),
                pl.BlockSpec((K, OCp), lambda i: (0, 0)),
                pl.BlockSpec((1, OCp), lambda i: (0, 0)),
            ],
            out_specs=pl.BlockSpec((tm, OCp), lambda i: (i, 0)),
        ),
        compiler_params=pltpu.CompilerParams(
            dimension_semantics=("parallel",),
            vmem_limit_bytes=VMEM_LIMIT,
        ),
    )(patches, w, b)


def _conv2_fc_fused(patches, w2, b2, w3, b3, w4, b4, *, batch):
    """(4, n_pos*batch, K2) patches -> (batch, N2p) f32, one pallas_call."""
    _, M, K = patches.shape
    OCp = w2.shape[1]
    H1 = w3.shape[1]
    N2p = w4.shape[1]
    n_pos = M // batch
    assert n_pos * batch == M and w3.shape[0] == n_pos * OCp
    kernel = functools.partial(_conv2_fc_kernel, batch=batch, n_pos=n_pos)
    return pl.pallas_call(
        kernel,
        out_shape=jax.ShapeDtypeStruct((batch, N2p), jnp.float32),
        grid_spec=pltpu.PrefetchScalarGridSpec(
            num_scalar_prefetch=0,
            grid=(1,),
            in_specs=[
                pl.BlockSpec((4, M, K), lambda i: (0, 0, 0)),
                pl.BlockSpec((K, OCp), lambda i: (0, 0)),
                pl.BlockSpec((1, OCp), lambda i: (0, 0)),
                pl.BlockSpec((w3.shape[0], H1), lambda i: (0, 0)),
                pl.BlockSpec((1, H1), lambda i: (0, 0)),
                pl.BlockSpec((w4.shape[0], N2p), lambda i: (0, 0)),
                pl.BlockSpec((1, N2p), lambda i: (0, 0)),
            ],
            out_specs=pl.BlockSpec((batch, N2p), lambda i: (0, 0)),
        ),
        compiler_params=pltpu.CompilerParams(
            dimension_semantics=("arbitrary",),
            vmem_limit_bytes=VMEM_LIMIT,
        ),
    )(patches, w2, b2, w3, b3, w4, b4)


# --------------------------------- glue ------------------------------------ #

def _pool_tap_patches(x, kh, kw, row_major_batch, k_pad=None):
    """im2col grouped by 2x2 pool tap, built with 25 contiguous slices + one
    reshape/transpose (no strided slices, no per-tap slice fan-out).

    x: (N, H, W, C) bf16 -> (4, M, K) bf16 where plane t = ph*2 + pw holds the
    patches of conv-output pixel (2*oh2+ph, 2*ow2+pw); K features ordered
    (i, j, c) to match the prepared weights and optionally zero-padded to a
    multiple of 128.  Row order is (n, oh2, ow2) if row_major_batch else
    (oh2, ow2, n).
    """
    N, H, W, C = x.shape
    Ho, Wo = H - kh + 1, W - kw + 1
    Ho2, Wo2 = Ho // 2, Wo // 2                    # floor, matches F.max_pool2d(2)
    cols = [x[:, i:i + Ho, j:j + Wo, :] for i in range(kh) for j in range(kw)]
    p = jnp.concatenate(cols, axis=-1)             # (N, Ho, Wo, kh*kw*C)
    K = kh * kw * C
    if k_pad is not None and k_pad > K:            # lane-dense contraction dim
        p = jnp.pad(p, ((0, 0), (0, 0), (0, 0), (0, k_pad - K)))
        K = k_pad
    p = p[:, :2 * Ho2, :2 * Wo2, :]
    p = p.reshape(N, Ho2, 2, Wo2, 2, K)            # [n, oh2, ph, ow2, pw, k]
    if row_major_batch:
        p = p.transpose(2, 4, 0, 1, 3, 5).reshape(4, N * Ho2 * Wo2, K)
    else:
        p = p.transpose(2, 4, 1, 3, 0, 5).reshape(4, Ho2 * Wo2 * N, K)
    return p.astype(jnp.bfloat16)


def net_forward(kp, x_nchw):
    B = x_nchw.shape[0]
    x = jnp.transpose(x_nchw, (0, 2, 3, 1)).astype(jnp.bfloat16)   # NCHW -> NHWC
    # conv1 + ReLU + pool; output channels stay 128-lane-padded (no narrow slice).
    k1_pad = _round_up(5 * 5 * x.shape[-1], LANE)
    p1 = _pool_tap_patches(x, 5, 5, row_major_batch=True, k_pad=k1_pad)
    y1 = _conv_pool(p1, kp['conv1_w'], kp['conv1_b'])              # (B*Hp*Wp, 128) bf16
    Hp, Wp = (x.shape[1] - 4) // 2, (x.shape[2] - 4) // 2
    y1 = y1.reshape(B, Hp, Wp, -1)
    # conv2 + ReLU + pool + flatten + fc1 + ReLU + fc2 in one fused kernel.
    p2 = _pool_tap_patches(y1, 5, 5, row_major_batch=False)        # K2 = 25*128, lane-dense
    out = _conv2_fc_fused(p2, kp['conv2_w'], kp['conv2_b'],
                          kp['fc1_w'], kp['fc1_b'],
                          kp['fc2_w'], kp['fc2_b'], batch=B)
    return out[:, :3]                                              # drop fc2 lane padding


# ------------------------------ parameters ---------------------------------- #

def kaiming_uniform(key, shape, fan_in):
    # torch.nn.init.kaiming_uniform_(nonlinearity='relu'): bound = sqrt(6/fan_in)
    bound = (6.0 / fan_in) ** 0.5
    return jax.random.uniform(key, shape, jnp.float32, -bound, bound)


def init_torch_params(key, flat_features):
    k = jax.random.split(key, 4)
    return {
        'conv1_w': kaiming_uniform(k[0], (16, 3, 5, 5), 3 * 5 * 5),
        'conv1_b': jnp.zeros((16,), jnp.float32),
        'conv2_w': kaiming_uniform(k[1], (32, 16, 5, 5), 16 * 5 * 5),
        'conv2_b': jnp.zeros((32,), jnp.float32),
        'fc1_w': kaiming_uniform(k[2], (256, flat_features), flat_features),
        'fc1_b': jnp.zeros((256,), jnp.float32),
        'fc2_w': kaiming_uniform(k[3], (3, 256), 256),
        'fc2_b': jnp.zeros((3,), jnp.float32),
    }


def prepare_params(p, h2, w2_sp, c2):
    """Fold transposes, channel/lane zero-padding to 128 and the (c,h,w)->(h,w,c)
    column permutation of fc1 into the parameters (free at init time)."""
    def conv_w(w_oihw, ic_pad):
        oc, ic, kh, kw = w_oihw.shape
        w = jnp.pad(w_oihw, ((0, 0), (0, ic_pad - ic), (0, 0), (0, 0)))
        w = jnp.transpose(w, (2, 3, 1, 0)).reshape(kh * kw * ic_pad, oc)  # rows (i,j,c)
        kp_ = _round_up(w.shape[0], LANE)
        w = jnp.pad(w, ((0, kp_ - w.shape[0]), (0, _round_up(oc, LANE) - oc)))
        return w.astype(jnp.bfloat16)

    def pad_b(b):
        n = b.shape[0]
        return jnp.pad(b, (0, _round_up(n, LANE) - n)).reshape(1, -1).astype(jnp.float32)

    ocp = LANE  # conv1's lane-padded OC == conv2's padded input-channel count

    # fc1: torch weight is (256, c*h*w) with columns in (c,h,w) order; the fused
    # kernel consumes features ordered (h, w, c_padded) -> permute + pad once.
    fc1 = p['fc1_w'].reshape(256, c2, h2, w2_sp)
    fc1 = jnp.transpose(fc1, (2, 3, 1, 0))                       # (h, w, c, out)
    fc1 = jnp.pad(fc1, ((0, 0), (0, 0), (0, ocp - c2), (0, 0)))
    fc1 = fc1.reshape(h2 * w2_sp * ocp, 256).astype(jnp.bfloat16)

    fc2 = jnp.transpose(p['fc2_w'], (1, 0))                      # (256, 3)
    fc2 = jnp.pad(fc2, ((0, 0), (0, LANE - fc2.shape[1]))).astype(jnp.bfloat16)

    return {
        'conv1_w': conv_w(p['conv1_w'], p['conv1_w'].shape[1]),  # K: 75 -> 128
        'conv1_b': pad_b(p['conv1_b']),
        'conv2_w': conv_w(p['conv2_w'], ocp),                    # zero rows for padded in-channels
        'conv2_b': pad_b(p['conv2_b']),
        'fc1_w': fc1,
        'fc1_b': p['fc1_b'].reshape(1, -1).astype(jnp.float32),  # 256 = 2*128, lane-dense
        'fc2_w': fc2,
        'fc2_b': pad_b(p['fc2_b']),
    }


if __name__ == "__main__":
    key = jax.random.PRNGKey(0)
    kp_key, kx = jax.random.split(key)

    # small shapes: batch=2, 3x28x28 -> conv1 24 -> pool 12 -> conv2 8 -> pool 4
    B, H, W = 2, 28, 28
    H2 = W2 = 4
    C2 = 32
    flat = C2 * H2 * W2

    torch_params = init_torch_params(kp_key, flat)
    params = prepare_params(torch_params, H2, W2, C2)

    x = jax.random.normal(kx, (B, 3, H, W), jnp.float32)  # NCHW like PyTorch

    out = jax.jit(net_forward)(params, x)
    jax.block_until_ready(out)
    assert out.shape == (B, 3) and out.dtype == jnp.float32
    print("KERNEL_OK")
</pallas_src>

<mosaic_0001>
module attributes {stable_mosaic.version = 11 : i64} {
  func.func @_conv_pool_kernel(%arg0: i32, %arg1: memref<4x288x128xbf16, #tpu.memory_space<vmem>>, %arg2: memref<128x128xbf16, #tpu.memory_space<vmem>>, %arg3: memref<1x128xf32, #tpu.memory_space<vmem>>, %arg4: memref<288x128xbf16, #tpu.memory_space<vmem>>) attributes {dimension_semantics = [#tpu.dimension_semantics<parallel>], iteration_bounds = array<i64: 1>, scalar_prefetch = 0 : i64, scratch_operands = 0 : i64, tpu.core_type = #tpu.core_type<tc>, window_params = [{transform_indices = @transform_0, window_bounds = array<i64: 4, 288, 128>}, {pipeline_mode = #tpu.pipeline_mode<synchronous>, transform_indices = @transform_1, window_bounds = array<i64: 128, 128>}, {pipeline_mode = #tpu.pipeline_mode<synchronous>, transform_indices = @transform_2, window_bounds = array<i64: 1, 128>}, {transform_indices = @transform_3, window_bounds = array<i64: 288, 128>}]} {
    %c0 = arith.constant 0 : index
    %c0_0 = arith.constant 0 : index
    %0 = vector.load %arg2[%c0, %c0_0] : memref<128x128xbf16, #tpu.memory_space<vmem>>, vector<128x128xbf16>
    %c0_1 = arith.constant 0 : index
    %c0_2 = arith.constant 0 : index
    %c0_3 = arith.constant 0 : index
    %1 = vector.load %arg1[%c0_1, %c0_2, %c0_3] : memref<4x288x128xbf16, #tpu.memory_space<vmem>>, vector<1x288x128xbf16>
    %2 = vector.shape_cast %1 : vector<1x288x128xbf16> to vector<288x128xbf16>
    %cst = arith.constant dense<0.000000e+00> : vector<288x128xf32>
    %3 = tpu.matmul %2, %0, %cst {dimension_numbers = #tpu.dot_dimension_numbers<[1], [0], [0], [1], [0, 0, 1, 1], [], []>} : vector<288x128xbf16>, vector<128x128xbf16>, vector<288x128xf32> -> vector<288x128xf32>
    %c1 = arith.constant 1 : index
    %c0_4 = arith.constant 0 : index
    %c0_5 = arith.constant 0 : index
    %4 = vector.load %arg1[%c1, %c0_4, %c0_5] : memref<4x288x128xbf16, #tpu.memory_space<vmem>>, vector<1x288x128xbf16>
    %5 = vector.shape_cast %4 : vector<1x288x128xbf16> to vector<288x128xbf16>
    %cst_6 = arith.constant dense<0.000000e+00> : vector<288x128xf32>
    %6 = tpu.matmul %5, %0, %cst_6 {dimension_numbers = #tpu.dot_dimension_numbers<[1], [0], [0], [1], [0, 0, 1, 1], [], []>} : vector<288x128xbf16>, vector<128x128xbf16>, vector<288x128xf32> -> vector<288x128xf32>
    %7 = arith.maximumf %3, %6 : vector<288x128xf32>
    %c2 = arith.constant 2 : index
    %c0_7 = arith.constant 0 : index
    %c0_8 = arith.constant 0 : index
    %8 = vector.load %arg1[%c2, %c0_7, %c0_8] : memref<4x288x128xbf16, #tpu.memory_space<vmem>>, vector<1x288x128xbf16>
    %9 = vector.shape_cast %8 : vector<1x288x128xbf16> to vector<288x128xbf16>
    %cst_9 = arith.constant dense<0.000000e+00> : vector<288x128xf32>
    %10 = tpu.matmul %9, %0, %cst_9 {dimension_numbers = #tpu.dot_dimension_numbers<[1], [0], [0], [1], [0, 0, 1, 1], [], []>} : vector<288x128xbf16>, vector<128x128xbf16>, vector<288x128xf32> -> vector<288x128xf32>
    %11 = arith.maximumf %7, %10 : vector<288x128xf32>
    %c3 = arith.constant 3 : index
    %c0_10 = arith.constant 0 : index
    %c0_11 = arith.constant 0 : index
    %12 = vector.load %arg1[%c3, %c0_10, %c0_11] : memref<4x288x128xbf16, #tpu.memory_space<vmem>>, vector<1x288x128xbf16>
    %13 = vector.shape_cast %12 : vector<1x288x128xbf16> to vector<288x128xbf16>
    %cst_12 = arith.constant dense<0.000000e+00> : vector<288x128xf32>
    %14 = tpu.matmul %13, %0, %cst_12 {dimension_numbers = #tpu.dot_dimension_numbers<[1], [0], [0], [1], [0, 0, 1, 1], [], []>} : vector<288x128xbf16>, vector<128x128xbf16>, vector<288x128xf32> -> vector<288x128xf32>
    %15 = arith.maximumf %11, %14 : vector<288x128xf32>
    %c0_13 = arith.constant 0 : index
    %c0_14 = arith.constant 0 : index
    %16 = vector.load %arg3[%c0_13, %c0_14] : memref<1x128xf32, #tpu.memory_space<vmem>>, vector<1x128xf32>
    %17 = vector.broadcast %16 : vector<1x128xf32> to vector<288x128xf32>
    %18 = arith.addf %15, %17 : vector<288x128xf32>
    %cst_15 = arith.constant 0.000000e+00 : f32
    %19 = vector.broadcast %cst_15 : f32 to vector<288x128xf32>
    %20 = arith.maximumf %18, %19 : vector<288x128xf32>
    %21 = arith.truncf %20 : vector<288x128xf32> to vector<288x128xbf16>
    %c0_16 = arith.constant 0 : index
    %c0_17 = arith.constant 0 : index
    %22 = vector.load %arg4[%c0_16, %c0_17] : memref<288x128xbf16, #tpu.memory_space<vmem>>, vector<288x128xbf16>
    tpu.vector_store %arg4[%c0_16, %c0_17], %21 {strides = array<i32>} : memref<288x128xbf16, #tpu.memory_space<vmem>>, vector<288x128xbf16>,
    return
  }
  func.func @transform_0(%arg0: i32) -> (i32, i32, i32) {
    %c0_i32 = arith.constant 0 : i32
    %c0_i32_0 = arith.constant 0 : i32
    %c0_i32_1 = arith.constant 0 : i32
    return %c0_i32, %arg0, %c0_i32_0 : i32, i32, i32
  }
  func.func @transform_1(%arg0: i32) -> (i32, i32) {
    %c0_i32 = arith.constant 0 : i32
    %c0_i32_0 = arith.constant 0 : i32
    %c0_i32_1 = arith.constant 0 : i32
    return %c0_i32, %c0_i32_0 : i32, i32
  }
  func.func @transform_2(%arg0: i32) -> (i32, i32) {
    %c0_i32 = arith.constant 0 : i32
    %c0_i32_0 = arith.constant 0 : i32
    %c0_i32_1 = arith.constant 0 : i32
    return %c0_i32, %c0_i32_0 : i32, i32
  }
  func.func @transform_3(%arg0: i32) -> (i32, i32) {
    %c0_i32 = arith.constant 0 : i32
    %c0_i32_0 = arith.constant 0 : i32
    return %arg0, %c0_i32 : i32, i32
  }
}

module attributes {stable_mosaic.version = 11 : i64} {
  func.func @_conv2_fc_kernel(%arg0: i32, %arg1: memref<4x32x3200xbf16, #tpu.memory_space<vmem>>, %arg2: memref<3200x128xbf16, #tpu.memory_space<vmem>>, %arg3: memref<1x128xf32, #tpu.memory_space<vmem>>, %arg4: memref<2048x256xbf16, #tpu.memory_space<vmem>>, %arg5: memref<1x256xf32, #tpu.memory_space<vmem>>, %arg6: memref<256x128xbf16, #tpu.memory_space<vmem>>, %arg7: memref<1x128xf32, #tpu.memory_space<vmem>>, %arg8: memref<2x128xf32, #tpu.memory_space<vmem>>) attributes {dimension_semantics = [#tpu.dimension_semantics<arbitrary>], iteration_bounds = array<i64: 1>, scalar_prefetch = 0 : i64, scratch_operands = 0 : i64, tpu.core_type = #tpu.core_type<tc>, window_params = [{pipeline_mode = #tpu.pipeline_mode<synchronous>, transform_indices = @transform_0, window_bounds = array<i64: 4, 32, 3200>}, {pipeline_mode = #tpu.pipeline_mode<synchronous>, transform_indices = @transform_1, window_bounds = array<i64: 3200, 128>}, {pipeline_mode = #tpu.pipeline_mode<synchronous>, transform_indices = @transform_2, window_bounds = array<i64: 1, 128>}, {pipeline_mode = #tpu.pipeline_mode<synchronous>, transform_indices = @transform_3, window_bounds = array<i64: 2048, 256>}, {pipeline_mode = #tpu.pipeline_mode<synchronous>, transform_indices = @transform_4, window_bounds = array<i64: 1, 256>}, {pipeline_mode = #tpu.pipeline_mode<synchronous>, transform_indices = @transform_5, window_bounds = array<i64: 256, 128>}, {pipeline_mode = #tpu.pipeline_mode<synchronous>, transform_indices = @transform_6, window_bounds = array<i64: 1, 128>}, {pipeline_mode = #tpu.pipeline_mode<synchronous>, transform_indices = @transform_7, window_bounds = array<i64: 2, 128>}]} {
    %c0 = arith.constant 0 : index
    %c0_0 = arith.constant 0 : index
    %0 = vector.load %arg2[%c0, %c0_0] : memref<3200x128xbf16, #tpu.memory_space<vmem>>, vector<3200x128xbf16>
    %c0_1 = arith.constant 0 : index
    %c0_2 = arith.constant 0 : index
    %c0_3 = arith.constant 0 : index
    %1 = vector.load %arg1[%c0_1, %c0_2, %c0_3] : memref<4x32x3200xbf16, #tpu.memory_space<vmem>>, vector<1x32x3200xbf16>
    %2 = vector.shape_cast %1 : vector<1x32x3200xbf16> to vector<32x3200xbf16>
    %cst = arith.constant dense<0.000000e+00> : vector<32x128xf32>
    %3 = tpu.matmul %2, %0, %cst {dimension_numbers = #tpu.dot_dimension_numbers<[1], [0], [0], [1], [0, 0, 1, 1], [], []>} : vector<32x3200xbf16>, vector<3200x128xbf16>, vector<32x128xf32> -> vector<32x128xf32>
    %c1 = arith.constant 1 : index
    %c0_4 = arith.constant 0 : index
    %c0_5 = arith.constant 0 : index
    %4 = vector.load %arg1[%c1, %c0_4, %c0_5] : memref<4x32x3200xbf16, #tpu.memory_space<vmem>>, vector<1x32x3200xbf16>
    %5 = vector.shape_cast %4 : vector<1x32x3200xbf16> to vector<32x3200xbf16>
    %cst_6 = arith.constant dense<0.000000e+00> : vector<32x128xf32>
    %6 = tpu.matmul %5, %0, %cst_6 {dimension_numbers = #tpu.dot_dimension_numbers<[1], [0], [0], [1], [0, 0, 1, 1], [], []>} : vector<32x3200xbf16>, vector<3200x128xbf16>, vector<32x128xf32> -> vector<32x128xf32>
    %7 = arith.maximumf %3, %6 : vector<32x128xf32>
    %c2 = arith.constant 2 : index
    %c0_7 = arith.constant 0 : index
    %c0_8 = arith.constant 0 : index
    %8 = vector.load %arg1[%c2, %c0_7, %c0_8] : memref<4x32x3200xbf16, #tpu.memory_space<vmem>>, vector<1x32x3200xbf16>
    %9 = vector.shape_cast %8 : vector<1x32x3200xbf16> to vector<32x3200xbf16>
    %cst_9 = arith.constant dense<0.000000e+00> : vector<32x128xf32>
    %10 = tpu.matmul %9, %0, %cst_9 {dimension_numbers = #tpu.dot_dimension_numbers<[1], [0], [0], [1], [0, 0, 1, 1], [], []>} : vector<32x3200xbf16>, vector<3200x128xbf16>, vector<32x128xf32> -> vector<32x128xf32>
    %11 = arith.maximumf %7, %10 : vector<32x128xf32>
    %c3 = arith.constant 3 : index
    %c0_10 = arith.constant 0 : index
    %c0_11 = arith.constant 0 : index
    %12 = vector.load %arg1[%c3, %c0_10, %c0_11] : memref<4x32x3200xbf16, #tpu.memory_space<vmem>>, vector<1x32x3200xbf16>
    %13 = vector.shape_cast %12 : vector<1x32x3200xbf16> to vector<32x3200xbf16>
    %cst_12 = arith.constant dense<0.000000e+00> : vector<32x128xf32>
    %14 = tpu.matmul %13, %0, %cst_12 {dimension_numbers = #tpu.dot_dimension_numbers<[1], [0], [0], [1], [0, 0, 1, 1], [], []>} : vector<32x3200xbf16>, vector<3200x128xbf16>, vector<32x128xf32> -> vector<32x128xf32>
    %15 = arith.maximumf %11, %14 : vector<32x128xf32>
    %c0_13 = arith.constant 0 : index
    %c0_14 = arith.constant 0 : index
    %16 = vector.load %arg3[%c0_13, %c0_14] : memref<1x128xf32, #tpu.memory_space<vmem>>, vector<1x128xf32>
    %17 = vector.broadcast %16 : vector<1x128xf32> to vector<32x128xf32>
    %18 = arith.addf %15, %17 : vector<32x128xf32>
    %cst_15 = arith.constant 0.000000e+00 : f32
    %19 = vector.broadcast %cst_15 : f32 to vector<32x128xf32>
    %20 = arith.maximumf %18, %19 : vector<32x128xf32>
    %21 = arith.truncf %20 : vector<32x128xf32> to vector<32x128xbf16>
    %cst_16 = arith.constant 0.000000e+00 : f32
    %22 = vector.broadcast %cst_16 : f32 to vector<2x256xf32>
    %23 = vector.extract_strided_slice %21 {offsets = [0, 0], sizes = [2, 128], strides = [1, 1]} : vector<32x128xbf16> to vector<2x128xbf16>
    %c0_17 = arith.constant 0 : index
    %c0_18 = arith.constant 0 : index
    %24 = vector.load %arg4[%c0_17, %c0_18] : memref<2048x256xbf16, #tpu.memory_space<vmem>>, vector<128x256xbf16>
    %cst_19 = arith.constant dense<0.000000e+00> : vector<2x256xf32>
    %25 = tpu.matmul %23, %24, %cst_19 {dimension_numbers = #tpu.dot_dimension_numbers<[1], [0], [0], [1], [0, 0, 1, 1], [], []>} : vector<2x128xbf16>, vector<128x256xbf16>, vector<2x256xf32> -> vector<2x256xf32>
    %26 = arith.addf %22, %25 : vector<2x256xf32>
    %27 = vector.extract_strided_slice %21 {offsets = [2, 0], sizes = [2, 128], strides = [1, 1]} : vector<32x128xbf16> to vector<2x128xbf16>
    %c128 = arith.constant 128 : index
    %c0_20 = arith.constant 0 : index
    %28 = vector.load %arg4[%c128, %c0_20] : memref<2048x256xbf16, #tpu.memory_space<vmem>>, vector<128x256xbf16>
    %cst_21 = arith.constant dense<0.000000e+00> : vector<2x256xf32>
    %29 = tpu.matmul %27, %28, %cst_21 {dimension_numbers = #tpu.dot_dimension_numbers<[1], [0], [0], [1], [0, 0, 1, 1], [], []>} : vector<2x128xbf16>, vector<128x256xbf16>, vector<2x256xf32> -> vector<2x256xf32>
    %30 = arith.addf %26, %29 : vector<2x256xf32>
    %31 = vector.extract_strided_slice %21 {offsets = [4, 0], sizes = [2, 128], strides = [1, 1]} : vector<32x128xbf16> to vector<2x128xbf16>
    %c256 = arith.constant 256 : index
    %c0_22 = arith.constant 0 : index
    %32 = vector.load %arg4[%c256, %c0_22] : memref<2048x256xbf16, #tpu.memory_space<vmem>>, vector<128x256xbf16>
    %cst_23 = arith.constant dense<0.000000e+00> : vector<2x256xf32>
    %33 = tpu.matmul %31, %32, %cst_23 {dimension_numbers = #tpu.dot_dimension_numbers<[1], [0], [0], [1], [0, 0, 1, 1], [], []>} : vector<2x128xbf16>, vector<128x256xbf16>, vector<2x256xf32> -> vector<2x256xf32>
    %34 = arith.addf %30, %33 : vector<2x256xf32>
    %35 = vector.extract_strided_slice %21 {offsets = [6, 0], sizes = [2, 128], strides = [1, 1]} : vector<32x128xbf16> to vector<2x128xbf16>
    %c384 = arith.constant 384 : index
    %c0_24 = arith.constant 0 : index
    %36 = vector.load %arg4[%c384, %c0_24] : memref<2048x256xbf16, #tpu.memory_space<vmem>>, vector<128x256xbf16>
    %cst_25 = arith.constant dense<0.000000e+00> : vector<2x256xf32>
    %37 = tpu.matmul %35, %36, %cst_25 {dimension_numbers = #tpu.dot_dimension_numbers<[1], [0], [0], [1], [0, 0, 1, 1], [], []>} : vector<2x128xbf16>, vector<128x256xbf16>, vector<2x256xf32> -> vector<2x256xf32>
    %38 = arith.addf %34, %37 : vector<2x256xf32>
    %39 = vector.extract_strided_slice %21 {offsets = [8, 0], sizes = [2, 128], strides = [1, 1]} : vector<32x128xbf16> to vector<2x128xbf16>
    %c512 = arith.constant 512 : index
    %c0_26 = arith.constant 0 : index
    %40 = vector.load %arg4[%c512, %c0_26] : memref<2048x256xbf16, #tpu.memory_space<vmem>>, vector<128x256xbf16>
    %cst_27 = arith.constant dense<0.000000e+00> : vector<2x256xf32>
    %41 = tpu.matmul %39, %40, %cst_27 {dimension_numbers = #tpu.dot_dimension_numbers<[1], [0], [0], [1], [0, 0, 1, 1], [], []>} : vector<2x128xbf16>, vector<128x256xbf16>, vector<2x256xf32> -> vector<2x256xf32>
    %42 = arith.addf %38, %41 : vector<2x256xf32>
    %43 = vector.extract_strided_slice %21 {offsets = [10, 0], sizes = [2, 128], strides = [1, 1]} : vector<32x128xbf16> to vector<2x128xbf16>
    %c640 = arith.constant 640 : index
    %c0_28 = arith.constant 0 : index
    %44 = vector.load %arg4[%c640, %c0_28] : memref<2048x256xbf16, #tpu.memory_space<vmem>>, vector<128x256xbf16>
    %cst_29 = arith.constant dense<0.000000e+00> : vector<2x256xf32>
    %45 = tpu.matmul %43, %44, %cst_29 {dimension_numbers = #tpu.dot_dimension_numbers<[1], [0], [0], [1], [0, 0, 1, 1], [], []>} : vector<2x128xbf16>, vector<128x256xbf16>, vector<2x256xf32> -> vector<2x256xf32>
    %46 = arith.addf %42, %45 : vector<2x256xf32>
    %47 = vector.extract_strided_slice %21 {offsets = [12, 0], sizes = [2, 128], strides = [1, 1]} : vector<32x128xbf16> to vector<2x128xbf16>
    %c768 = arith.constant 768 : index
    %c0_30 = arith.constant 0 : index
    %48 = vector.load %arg4[%c768, %c0_30] : memref<2048x256xbf16, #tpu.memory_space<vmem>>, vector<128x256xbf16>
    %cst_31 = arith.constant dense<0.000000e+00> : vector<2x256xf32>
    %49 = tpu.matmul %47, %48, %cst_31 {dimension_numbers = #tpu.dot_dimension_numbers<[1], [0], [0], [1], [0, 0, 1, 1], [], []>} : vector<2x128xbf16>, vector<128x256xbf16>, vector<2x256xf32> -> vector<2x256xf32>
    %50 = arith.addf %46, %49 : vector<2x256xf32>
    %51 = vector.extract_strided_slice %21 {offsets = [14, 0], sizes = [2, 128], strides = [1, 1]} : vector<32x128xbf16> to vector<2x128xbf16>
    %c896 = arith.constant 896 : index
    %c0_32 = arith.constant 0 : index
    %52 = vector.load %arg4[%c896, %c0_32] : memref<2048x256xbf16, #tpu.memory_space<vmem>>, vector<128x256xbf16>
    %cst_33 = arith.constant dense<0.000000e+00> : vector<2x256xf32>
    %53 = tpu.matmul %51, %52, %cst_33 {dimension_numbers = #tpu.dot_dimension_numbers<[1], [0], [0], [1], [0, 0, 1, 1], [], []>} : vector<2x128xbf16>, vector<128x256xbf16>, vector<2x256xf32> -> vector<2x256xf32>
    %54 = arith.addf %50, %53 : vector<2x256xf32>
    %55 = vector.extract_strided_slice %21 {offsets = [16, 0], sizes = [2, 128], strides = [1, 1]} : vector<32x128xbf16> to vector<2x128xbf16>
    %c1024 = arith.constant 1024 : index
    %c0_34 = arith.constant 0 : index
    %56 = vector.load %arg4[%c1024, %c0_34] : memref<2048x256xbf16, #tpu.memory_space<vmem>>, vector<128x256xbf16>
    %cst_35 = arith.constant dense<0.000000e+00> : vector<2x256xf32>
    %57 = tpu.matmul %55, %56, %cst_35 {dimension_numbers = #tpu.dot_dimension_numbers<[1], [0], [0], [1], [0, 0, 1, 1], [], []>} : vector<2x128xbf16>, vector<128x256xbf16>, vector<2x256xf32> -> vector<2x256xf32>
    %58 = arith.addf %54, %57 : vector<2x256xf32>
    %59 = vector.extract_strided_slice %21 {offsets = [18, 0], sizes = [2, 128], strides = [1, 1]} : vector<32x128xbf16> to vector<2x128xbf16>
    %c1152 = arith.constant 1152 : index
    %c0_36 = arith.constant 0 : index
    %60 = vector.load %arg4[%c1152, %c0_36] : memref<2048x256xbf16, #tpu.memory_space<vmem>>, vector<128x256xbf16>
    %cst_37 = arith.constant dense<0.000000e+00> : vector<2x256xf32>
    %61 = tpu.matmul %59, %60, %cst_37 {dimension_numbers = #tpu.dot_dimension_numbers<[1], [0], [0], [1], [0, 0, 1, 1], [], []>} : vector<2x128xbf16>, vector<128x256xbf16>, vector<2x256xf32> -> vector<2x256xf32>
    %62 = arith.addf %58, %61 : vector<2x256xf32>
    %63 = vector.extract_strided_slice %21 {offsets = [20, 0], sizes = [2, 128], strides = [1, 1]} : vector<32x128xbf16> to vector<2x128xbf16>
    %c1280 = arith.constant 1280 : index
    %c0_38 = arith.constant 0 : index
    %64 = vector.load %arg4[%c1280, %c0_38] : memref<2048x256xbf16, #tpu.memory_space<vmem>>, vector<128x256xbf16>
    %cst_39 = arith.constant dense<0.000000e+00> : vector<2x256xf32>
    %65 = tpu.matmul %63, %64, %cst_39 {dimension_numbers = #tpu.dot_dimension_numbers<[1], [0], [0], [1], [0, 0, 1, 1], [], []>} : vector<2x128xbf16>, vector<128x256xbf16>, vector<2x256xf32> -> vector<2x256xf32>
    %66 = arith.addf %62, %65 : vector<2x256xf32>
    %67 = vector.extract_strided_slice %21 {offsets = [22, 0], sizes = [2, 128], strides = [1, 1]} : vector<32x128xbf16> to vector<2x128xbf16>
    %c1408 = arith.constant 1408 : index
    %c0_40 = arith.constant 0 : index
    %68 = vector.load %arg4[%c1408, %c0_40] : memref<2048x256xbf16, #tpu.memory_space<vmem>>, vector<128x256xbf16>
    %cst_41 = arith.constant dense<0.000000e+00> : vector<2x256xf32>
    %69 = tpu.matmul %67, %68, %cst_41 {dimension_numbers = #tpu.dot_dimension_numbers<[1], [0], [0], [1], [0, 0, 1, 1], [], []>} : vector<2x128xbf16>, vector<128x256xbf16>, vector<2x256xf32> -> vector<2x256xf32>
    %70 = arith.addf %66, %69 : vector<2x256xf32>
    %71 = vector.extract_strided_slice %21 {offsets = [24, 0], sizes = [2, 128], strides = [1, 1]} : vector<32x128xbf16> to vector<2x128xbf16>
    %c1536 = arith.constant 1536 : index
    %c0_42 = arith.constant 0 : index
    %72 = vector.load %arg4[%c1536, %c0_42] : memref<2048x256xbf16, #tpu.memory_space<vmem>>, vector<128x256xbf16>
    %cst_43 = arith.constant dense<0.000000e+00> : vector<2x256xf32>
    %73 = tpu.matmul %71, %72, %cst_43 {dimension_numbers = #tpu.dot_dimension_numbers<[1], [0], [0], [1], [0, 0, 1, 1], [], []>} : vector<2x128xbf16>, vector<128x256xbf16>, vector<2x256xf32> -> vector<2x256xf32>
    %74 = arith.addf %70, %73 : vector<2x256xf32>
    %75 = vector.extract_strided_slice %21 {offsets = [26, 0], sizes = [2, 128], strides = [1, 1]} : vector<32x128xbf16> to vector<2x128xbf16>
    %c1664 = arith.constant 1664 : index
    %c0_44 = arith.constant 0 : index
    %76 = vector.load %arg4[%c1664, %c0_44] : memref<2048x256xbf16, #tpu.memory_space<vmem>>, vector<128x256xbf16>
    %cst_45 = arith.constant dense<0.000000e+00> : vector<2x256xf32>
    %77 = tpu.matmul %75, %76, %cst_45 {dimension_numbers = #tpu.dot_dimension_numbers<[1], [0], [0], [1], [0, 0, 1, 1], [], []>} : vector<2x128xbf16>, vector<128x256xbf16>, vector<2x256xf32> -> vector<2x256xf32>
    %78 = arith.addf %74, %77 : vector<2x256xf32>
    %79 = vector.extract_strided_slice %21 {offsets = [28, 0], sizes = [2, 128], strides = [1, 1]} : vector<32x128xbf16> to vector<2x128xbf16>
    %c1792 = arith.constant 1792 : index
    %c0_46 = arith.constant 0 : index
    %80 = vector.load %arg4[%c1792, %c0_46] : memref<2048x256xbf16, #tpu.memory_space<vmem>>, vector<128x256xbf16>
    %cst_47 = arith.constant dense<0.000000e+00> : vector<2x256xf32>
    %81 = tpu.matmul %79, %80, %cst_47 {dimension_numbers = #tpu.dot_dimension_numbers<[1], [0], [0], [1], [0, 0, 1, 1], [], []>} : vector<2x128xbf16>, vector<128x256xbf16>, vector<2x256xf32> -> vector<2x256xf32>
    %82 = arith.addf %78, %81 : vector<2x256xf32>
    %83 = vector.extract_strided_slice %21 {offsets = [30, 0], sizes = [2, 128], strides = [1, 1]} : vector<32x128xbf16> to vector<2x128xbf16>
    %c1920 = arith.constant 1920 : index
    %c0_48 = arith.constant 0 : index
    %84 = vector.load %arg4[%c1920, %c0_48] : memref<2048x256xbf16, #tpu.memory_space<vmem>>, vector<128x256xbf16>
    %cst_49 = arith.constant dense<0.000000e+00> : vector<2x256xf32>
    %85 = tpu.matmul %83, %84, %cst_49 {dimension_numbers = #tpu.dot_dimension_numbers<[1], [0], [0], [1], [0, 0, 1, 1], [], []>} : vector<2x128xbf16>, vector<128x256xbf16>, vector<2x256xf32> -> vector<2x256xf32>
    %86 = arith.addf %82, %85 : vector<2x256xf32>
    %c0_50 = arith.constant 0 : index
    %c0_51 = arith.constant 0 : index
    %87 = vector.load %arg5[%c0_50, %c0_51] : memref<1x256xf32, #tpu.memory_space<vmem>>, vector<1x256xf32>
    %88 = vector.broadcast %87 : vector<1x256xf32> to vector<2x256xf32>
    %89 = arith.addf %86, %88 : vector<2x256xf32>
    %cst_52 = arith.constant 0.000000e+00 : f32
    %90 = vector.broadcast %cst_52 : f32 to vector<2x256xf32>
    %91 = arith.maximumf %89, %90 : vector<2x256xf32>
    %92 = arith.truncf %91 : vector<2x256xf32> to vector<2x256xbf16>
    %c0_53 = arith.constant 0 : index
    %c0_54 = arith.constant 0 : index
    %93 = vector.load %arg6[%c0_53, %c0_54] : memref<256x128xbf16, #tpu.memory_space<vmem>>, vector<256x128xbf16>
    %cst_55 = arith.constant dense<0.000000e+00> : vector<2x128xf32>
    %94 = tpu.matmul %92, %93, %cst_55 {dimension_numbers = #tpu.dot_dimension_numbers<[1], [0], [0], [1], [0, 0, 1, 1], [], []>} : vector<2x256xbf16>, vector<256x128xbf16>, vector<2x128xf32> -> vector<2x128xf32>
    %c0_56 = arith.constant 0 : index
    %c0_57 = arith.constant 0 : index
    %95 = vector.load %arg7[%c0_56, %c0_57] : memref<1x128xf32, #tpu.memory_space<vmem>>, vector<1x128xf32>
    %96 = vector.broadcast %95 : vector<1x128xf32> to vector<2x128xf32>
    %97 = arith.addf %94, %96 : vector<2x128xf32>
    %c0_58 = arith.constant 0 : index
    %c0_59 = arith.constant 0 : index
    %98 = vector.load %arg8[%c0_58, %c0_59] : memref<2x128xf32, #tpu.memory_space<vmem>>, vector<2x128xf32>
    tpu.vector_store %arg8[%c0_58, %c0_59], %97 {strides = array<i32>} : memref<2x128xf32, #tpu.memory_space<vmem>>, vector<2x128xf32>,
    return
  }
  func.func @transform_0(%arg0: i32) -> (i32, i32, i32) {
    %c0_i32 = arith.constant 0 : i32
    %c0_i32_0 = arith.constant 0 : i32
    %c0_i32_1 = arith.constant 0 : i32
    %c0_i32_2 = arith.constant 0 : i32
    return %c0_i32, %c0_i32_0, %c0_i32_1 : i32, i32, i32
  }
  func.func @transform_1(%arg0: i32) -> (i32, i32) {
    %c0_i32 = arith.constant 0 : i32
    %c0_i32_0 = arith.constant 0 : i32
    %c0_i32_1 = arith.constant 0 : i32
    return %c0_i32, %c0_i32_0 : i32, i32
  }
  func.func @transform_2(%arg0: i32) -> (i32, i32) {
    %c0_i32 = arith.constant 0 : i32
    %c0_i32_0 = arith.constant 0 : i32
    %c0_i32_1 = arith.constant 0 : i32
    return %c0_i32, %c0_i32_0 : i32, i32
  }
  func.func @transform_3(%arg0: i32) -> (i32, i32) {
    %c0_i32 = arith.constant 0 : i32
    %c0_i32_0 = arith.constant 0 : i32
    %c0_i32_1 = arith.constant 0 : i32
    return %c0_i32, %c0_i32_0 : i32, i32
  }
  func.func @transform_4(%arg0: i32) -> (i32, i32) {
    %c0_i32 = arith.constant 0 : i32
    %c0_i32_0 = arith.constant 0 : i32
    %c0_i32_1 = arith.constant 0 : i32
    return %c0_i32, %c0_i32_0 : i32, i32
  }
  func.func @transform_5(%arg0: i32) -> (i32, i32) {
    %c0_i32 = arith.constant 0 : i32
    %c0_i32_0 = arith.constant 0 : i32
    %c0_i32_1 = arith.constant 0 : i32
    return %c0_i32, %c0_i32_0 : i32, i32
  }
  func.func @transform_6(%arg0: i32) -> (i32, i32) {
    %c0_i32 = arith.constant 0 : i32
    %c0_i32_0 = arith.constant 0 : i32
    %c0_i32_1 = arith.constant 0 : i32
    return %c0_i32, %c0_i32_0 : i32, i32
  }
  func.func @transform_7(%arg0: i32) -> (i32, i32) {
    %c0_i32 = arith.constant 0 : i32
    %c0_i32_0 = arith.constant 0 : i32
    %c0_i32_1 = arith.constant 0 : i32
    return %c0_i32, %c0_i32_0 : i32, i32
  }
}

</mosaic_0001>

<bundles_post_ra>
// kernel: net_forward.2
= control target key start
LH: loop header
LB: loop body
LE: loop exit
PB: predicated region body
PF: predicated region fallthrough
CT: control target
= control target key end

     0   :  { %s3236_s1 = inlined_call_operand.vmem [shape: bf16[128,128], index: 1, kind: input, shape index: {}]   ;;  %s3237_s0 = inlined_call_operand.vmem [shape: bf16[4,288,128], index: 0, kind: input, shape index: {}]   ;;  %s3238_s2 = inlined_call_operand.vmem [shape: f32[1,128], index: 2, kind: input, shape index: {}]   ;;  %s3239_s3 = inlined_call_operand.vmem [shape: bf16[288,128], index: 3, kind: output, shape index: {}]  }
   0x1   :  { %v2417_v0 = vld [vmem:[%s3236_s1 + $0x38] sm:$0xff]   ;;  %v2418_v1 = vld [vmem:[%s3236_s1 + $0x30] sm:$0xff]   ;;  %v2526_v2 = vld [vmem:[%s3236_s1 + $0x28] sm:$0xff]  }
   0x2   :  { %2209 = vmatprep.subr.bf16.mxu0 %v2417_v0  ;;  %2261 = vmatprep.subr.bf16.mxu1 %v2417_v0  ;;  %v2531_v3 = vld [vmem:[%s3236_s1 + $0x20] sm:$0xff]   ;;  %v2426_v5 = vld [vmem:[%s3237_s0 + $0x90] sm:$0xff]   ;;  %v2548_v6 = vld [vmem:[%s3236_s1 + $0x18] sm:$0xff]  }
   0x3   :  { %2210 = vmatpush3.bf16.msra.mxu0 %v2417_v0  ;;  %2262 = vmatpush3.bf16.msra.mxu1 %v2417_v0  ;;  %v2425_v4 = vld [vmem:[%s3237_s0] sm:$0xff]   ;;  %v2557_v7 = vld [vmem:[%s3236_s1 + $0x10] sm:$0xff]   ;;  %v2566_v8 = vld [vmem:[%s3236_s1 + $0x8] sm:$0xff]  }
   0x4   :  { %2211 = vmatprep.subr.bf16.mxu0 %v2418_v1  ;;  %2263 = vmatprep.subr.bf16.mxu1 %v2418_v1  ;;  %v2575_v9 = vld [vmem:[%s3236_s1] sm:$0xff]   ;;  %v2427_v10 = vld [vmem:[%s3237_s0 + $0x8] sm:$0xff]   ;;  %v2428_v11 = vld [vmem:[%s3237_s0 + $0x98] sm:$0xff]  }
   0x5   :  { %2225 = vmatprep.mubr.bf16.mxu0 %v2425_v4  ;;  %2277 = vmatprep.mubr.bf16.mxu1 %v2426_v5  ;;  %v2429_v12 = vld [vmem:[%s3237_s0 + $0x10] sm:$0xff]   ;;  %v2430_v13 = vld [vmem:[%s3237_s0 + $0xa0] sm:$0xff]   ;;  %v2431_v14 = vld [vmem:[%s3237_s0 + $0x18] sm:$0xff]  }
   0x6   :  { %v2432_v15 = vld [vmem:[%s3237_s0 + $0xa8] sm:$0xff]   ;;  %v2433_v16 = vld [vmem:[%s3237_s0 + $0x20] sm:$0xff]   ;;  %v2434_v17 = vld [vmem:[%s3237_s0 + $0xb0] sm:$0xff]  }
   0x7   :  { %2212 = vmatpush3.bf16.msra.mxu0 %v2418_v1  ;;  %2264 = vmatpush3.bf16.msra.mxu1 %v2418_v1  ;;  %v2435_v18 = vld [vmem:[%s3237_s0 + $0x28] sm:$0xff]   ;;  %v2436_v19 = vld [vmem:[%s3237_s0 + $0xb8] sm:$0xff]   ;;  %v2437_v20 = vld [vmem:[%s3237_s0 + $0x30] sm:$0xff]  }
   0x8   :  { %2213 = vmatprep.subr.bf16.mxu0 %v2526_v2  ;;  %2265 = vmatprep.subr.bf16.mxu1 %v2526_v2  ;;  %v2438_v21 = vld [vmem:[%s3237_s0 + $0xc0] sm:$0xff]   ;;  %v2439_v22 = vld [vmem:[%s3237_s0 + $0x38] sm:$0xff]   ;;  %v2440_v23 = vld [vmem:[%s3237_s0 + $0xc8] sm:$0xff]  }
   0x9   :  { %v2441_v24 = vld [vmem:[%s3237_s0 + $0x40] sm:$0xff]   ;;  %v2442_v25 = vld [vmem:[%s3237_s0 + $0xd0] sm:$0xff]   ;;  %v2443_v26 = vld [vmem:[%s3237_s0 + $0x48] sm:$0xff]  }
   0xa   :  { %v2444_v27 = vld [vmem:[%s3237_s0 + $0xd8] sm:$0xff]   ;;  %v2445_v28 = vld [vmem:[%s3237_s0 + $0x50] sm:$0xff]   ;;  %v2446_v29 = vld [vmem:[%s3237_s0 + $0xe0] sm:$0xff]  }
   0xb   :  { %2214 = vmatpush3.bf16.msra.mxu0 %v2526_v2  ;;  %2266 = vmatpush3.bf16.msra.mxu1 %v2526_v2  ;;  %v2447_v30 = vld [vmem:[%s3237_s0 + $0x58] sm:$0xff]   ;;  %v2448_v31 = vld [vmem:[%s3237_s0 + $0xe8] sm:$0xff]   ;;  %v2449_v32 = vld [vmem:[%s3237_s0 + $0x60] sm:$0xff]  }
   0xc   :  { %2215 = vmatprep.subr.bf16.mxu0 %v2531_v3  ;;  %2267 = vmatprep.subr.bf16.mxu1 %v2531_v3  ;;  %v2450_v33 = vld [vmem:[%s3237_s0 + $0xf0] sm:$0xff]   ;;  %v2451_v34 = vld [vmem:[%s3237_s0 + $0x68] sm:$0xff]   ;;  %v2452_v35 = vld [vmem:[%s3237_s0 + $0xf8] sm:$0xff]  }
   0xd   :  { %v2453_v36 = vld [vmem:[%s3237_s0 + $0x70] sm:$0xff]   ;;  %v2454_v37 = vld [vmem:[%s3237_s0 + $0x100] sm:$0xff]   ;;  %v2455_v38 = vld [vmem:[%s3237_s0 + $0x78] sm:$0xff]  }
   0xe   :  { %v2456_v39 = vld [vmem:[%s3237_s0 + $0x108] sm:$0xff]   ;;  %v2457_v40 = vld [vmem:[%s3237_s0 + $0x80] sm:$0xff]   ;;  %v2458_v41 = vld [vmem:[%s3237_s0 + $0x110] sm:$0xff]  }
   0xf   :  { %2216 = vmatpush3.bf16.msra.mxu0 %v2531_v3  ;;  %2268 = vmatpush3.bf16.msra.mxu1 %v2531_v3  ;;  %v2459_v42 = vld [vmem:[%s3237_s0 + $0x88] sm:$0xff]   ;;  %v2460_v43 = vld [vmem:[%s3237_s0 + $0x118] sm:$0xff]   ;;  %v2461_v44 = vld [vmem:[%s3237_s0 + $0x120] sm:$0xff]  }
  0x10   :  { %2217 = vmatprep.subr.bf16.mxu0 %v2548_v6  ;;  %2269 = vmatprep.subr.bf16.mxu1 %v2548_v6  ;;  %v2462_v45 = vld [vmem:[%s3237_s0 + $0x1b0] sm:$0xff]   ;;  %v2463_v46 = vld [vmem:[%s3237_s0 + $0x128] sm:$0xff]   ;;  %v2464_v47 = vld [vmem:[%s3237_s0 + $0x1b8] sm:$0xff]  }
  0x11   :  { %v2465_v48 = vld [vmem:[%s3237_s0 + $0x130] sm:$0xff]   ;;  %v2466_v49 = vld [vmem:[%s3237_s0 + $0x1c0] sm:$0xff]   ;;  %v2467_v50 = vld [vmem:[%s3237_s0 + $0x138] sm:$0xff]  }
  0x12   :  { %v2468_v51 = vld [vmem:[%s3237_s0 + $0x1c8] sm:$0xff]   ;;  %v2469_v52 = vld [vmem:[%s3237_s0 + $0x140] sm:$0xff]   ;;  %v2470_v53 = vld [vmem:[%s3237_s0 + $0x1d0] sm:$0xff]  }
  0x13   :  { %2218 = vmatpush3.bf16.msra.mxu0 %v2548_v6  ;;  %2270 = vmatpush3.bf16.msra.mxu1 %v2548_v6  ;;  %v2471_v54 = vld [vmem:[%s3237_s0 + $0x148] sm:$0xff]   ;;  %v2472_v55 = vld [vmem:[%s3237_s0 + $0x1d8] sm:$0xff]   ;;  %v2473_v56 = vld [vmem:[%s3237_s0 + $0x150] sm:$0xff]  }
  0x14   :  { %2219 = vmatprep.subr.bf16.mxu0 %v2557_v7  ;;  %2271 = vmatprep.subr.bf16.mxu1 %v2557_v7  ;;  %v2474_v57 = vld [vmem:[%s3237_s0 + $0x1e0] sm:$0xff]   ;;  %v2475_v58 = vld [vmem:[%s3237_s0 + $0x158] sm:$0xff]   ;;  %v2476_v59 = vld [vmem:[%s3237_s0 + $0x1e8] sm:$0xff]  }
  0x15   :  { %v2477_v60 = vld [vmem:[%s3237_s0 + $0x160] sm:$0xff]   ;;  %v2478_v61 = vld [vmem:[%s3237_s0 + $0x1f0] sm:$0xff]   ;;  %v2479_v62 = vld [vmem:[%s3237_s0 + $0x168] sm:$0xff]  }
  0x16   :  { %v2480_v63 = vld [vmem:[%s3237_s0 + $0x1f8] sm:$0xff]   ;;  %v2485_v4 = vld [vmem:[%s3237_s0 + $0x180] sm:$0xff]   ;;  %v2486_v5 = vld [vmem:[%s3237_s0 + $0x210] sm:$0xff]  }
  0x17   :  { %2220 = vmatpush3.bf16.msra.mxu0 %v2557_v7  ;;  %2272 = vmatpush3.bf16.msra.mxu1 %v2557_v7 }
  0x18   :  { %2221 = vmatprep.subr.bf16.mxu0 %v2566_v8  ;;  %2273 = vmatprep.subr.bf16.mxu1 %v2566_v8 }
  0x1b   :  { %2222 = vmatpush3.bf16.msra.mxu0 %v2566_v8  ;;  %2274 = vmatpush3.bf16.msra.mxu1 %v2566_v8 }
  0x1c   :  { %2223 = vmatprep.subr.bf16.mxu0 %v2575_v9  ;;  %2275 = vmatprep.subr.bf16.mxu1 %v2575_v9 }
  0x1f   :  { %2224 = vmatpush3.bf16.msra.mxu0 %v2575_v9  ;;  %2276 = vmatpush3.bf16.msra.mxu1 %v2575_v9 }
  0x20   :  { %2313 = vmatprep.subr.bf16.mxu0 %v2417_v0  ;;  %2365 = vmatprep.subr.bf16.mxu1 %v2417_v0 }
  0x22   :  { %2226 = vmatmul.mubr.bf16.vlgmr.msra.gmra.mxu0 %v2427_v10  ;;  %2278 = vmatmul.mubr.bf16.vlgmr.msra.gmra.mxu1 %v2428_v11  ;;  %v2491_v10 = vld [vmem:[%s3237_s0 + $0x198] sm:$0xff]   ;;  %v2492_v11 = vld [vmem:[%s3237_s0 + $0x228] sm:$0xff]  }
  0x23   :  { %2314 = vmatpush3.bf16.msra.mxu0 %v2417_v0  ;;  %2366 = vmatpush3.bf16.msra.mxu1 %v2417_v0  ;;  %v2481_v0 = vld [vmem:[%s3237_s0 + $0x170] sm:$0xff]  }
  0x24   :  { %2229 = vmatprep.mubr.bf16.mxu0 %v2429_v12  ;;  %2281 = vmatprep.mubr.bf16.mxu1 %v2430_v13  ;;  %v2493_v12 = vld [vmem:[%s3237_s0 + $0x1a0] sm:$0xff]   ;;  %v2494_v13 = vld [vmem:[%s3237_s0 + $0x230] sm:$0xff]  }
  0x25   :  { %2315 = vmatprep.subr.bf16.mxu0 %v2418_v1  ;;  %2367 = vmatprep.subr.bf16.mxu1 %v2418_v1 }
  0x27   :  { %2316 = vmatpush3.bf16.msra.mxu0 %v2418_v1  ;;  %2368 = vmatpush3.bf16.msra.mxu1 %v2418_v1  ;;  %v2482_v1 = vld [vmem:[%s3237_s0 + $0x200] sm:$0xff]  }
  0x28   :  { %2317 = vmatprep.subr.bf16.mxu0 %v2526_v2  ;;  %2369 = vmatprep.subr.bf16.mxu1 %v2526_v2 }
  0x2a   :  { %2230 = vmatmul.mubr.bf16.gmra.mxu0 %v2431_v14  ;;  %2282 = vmatmul.mubr.bf16.gmra.mxu1 %v2432_v15  ;;  %v2495_v14 = vld [vmem:[%s3237_s0 + $0x1a8] sm:$0xff]   ;;  %v2496_v15 = vld [vmem:[%s3237_s0 + $0x238] sm:$0xff]  }
  0x2b   :  { %2233 = vmatprep.mubr.bf16.mxu0 %v2433_v16  ;;  %2285 = vmatprep.mubr.bf16.mxu1 %v2434_v17 }
  0x2c   :  { %2318 = vmatpush3.bf16.msra.mxu0 %v2526_v2  ;;  %2370 = vmatpush3.bf16.msra.mxu1 %v2526_v2  ;;  %v2483_v2 = vld [vmem:[%s3237_s0 + $0x178] sm:$0xff]  }
  0x2d   :  { %2319 = vmatprep.subr.bf16.mxu0 %v2531_v3  ;;  %2371 = vmatprep.subr.bf16.mxu1 %v2531_v3 }
  0x30   :  { %2320 = vmatpush3.bf16.msra.mxu0 %v2531_v3  ;;  %2372 = vmatpush3.bf16.msra.mxu1 %v2531_v3  ;;  %v2484_v3 = vld [vmem:[%s3237_s0 + $0x208] sm:$0xff]  }
  0x31   :  { %2321 = vmatprep.subr.bf16.mxu0 %v2548_v6  ;;  %2373 = vmatprep.subr.bf16.mxu1 %v2548_v6 }
  0x32   :  { %2234 = vmatmul.mubr.bf16.gmra.mxu0 %v2435_v18  ;;  %2286 = vmatmul.mubr.bf16.gmra.mxu1 %v2436_v19 }
  0x33   :  { %2237 = vmatprep.mubr.bf16.mxu0 %v2437_v20  ;;  %2289 = vmatprep.mubr.bf16.mxu1 %v2438_v21 }
  0x34   :  { %2322 = vmatpush3.bf16.msra.mxu0 %v2548_v6  ;;  %2374 = vmatpush3.bf16.msra.mxu1 %v2548_v6  ;;  %v2487_v6 = vld [vmem:[%s3237_s0 + $0x188] sm:$0xff]  }
  0x35   :  { %2323 = vmatprep.subr.bf16.mxu0 %v2557_v7  ;;  %2375 = vmatprep.subr.bf16.mxu1 %v2557_v7 }
  0x38   :  { %2324 = vmatpush3.bf16.msra.mxu0 %v2557_v7  ;;  %2376 = vmatpush3.bf16.msra.mxu1 %v2557_v7  ;;  %v2488_v7 = vld [vmem:[%s3237_s0 + $0x218] sm:$0xff]  }
  0x39   :  { %2325 = vmatprep.subr.bf16.mxu0 %v2566_v8  ;;  %2377 = vmatprep.subr.bf16.mxu1 %v2566_v8 }
  0x3a   :  { %2238 = vmatmul.mubr.bf16.gmra.mxu0 %v2439_v22  ;;  %2290 = vmatmul.mubr.bf16.gmra.mxu1 %v2440_v23 }
  0x3b   :  { %2241 = vmatprep.mubr.bf16.mxu0 %v2441_v24  ;;  %2293 = vmatprep.mubr.bf16.mxu1 %v2442_v25 }
  0x3c   :  { %2326 = vmatpush3.bf16.msra.mxu0 %v2566_v8  ;;  %2378 = vmatpush3.bf16.msra.mxu1 %v2566_v8  ;;  %v2489_v8 = vld [vmem:[%s3237_s0 + $0x190] sm:$0xff]  }
  0x3d   :  { %2327 = vmatprep.subr.bf16.mxu0 %v2575_v9  ;;  %2379 = vmatprep.subr.bf16.mxu1 %v2575_v9 }
  0x40   :  { %2328 = vmatpush3.bf16.msra.mxu0 %v2575_v9  ;;  %2380 = vmatpush3.bf16.msra.mxu1 %v2575_v9  ;;  %v2490_v9 = vld [vmem:[%s3237_s0 + $0x220] sm:$0xff]  }
  0x42   :  { %2242 = vmatmul.mubr.bf16.gmra.mxu0 %v2443_v26  ;;  %2294 = vmatmul.mubr.bf16.gmra.mxu1 %v2444_v27 }
  0x43   :  { %2245 = vmatprep.mubr.bf16.mxu0 %v2445_v28  ;;  %2297 = vmatprep.mubr.bf16.mxu1 %v2446_v29 }
  0x4a   :  { %2246 = vmatmul.mubr.bf16.gmra.mxu0 %v2447_v30  ;;  %2298 = vmatmul.mubr.bf16.gmra.mxu1 %v2448_v31 }
  0x4b   :  { %2249 = vmatprep.mubr.bf16.mxu0 %v2449_v32  ;;  %2301 = vmatprep.mubr.bf16.mxu1 %v2450_v33 }
  0x52   :  { %2250 = vmatmul.mubr.bf16.gmra.mxu0 %v2451_v34  ;;  %2302 = vmatmul.mubr.bf16.gmra.mxu1 %v2452_v35 }
  0x53   :  { %2253 = vmatprep.mubr.bf16.mxu0 %v2453_v36  ;;  %2305 = vmatprep.mubr.bf16.mxu1 %v2454_v37 }
  0x5a   :  { %2254 = vmatmul.mubr.bf16.gmra.mxu0 %v2455_v38  ;;  %2306 = vmatmul.mubr.bf16.gmra.mxu1 %v2456_v39 }
  0x5b   :  { %2257 = vmatprep.mubr.bf16.mxu0 %v2457_v40  ;;  %2309 = vmatprep.mubr.bf16.mxu1 %v2458_v41 }
  0x62   :  { %2258 = vmatmul.mubr.bf16.gmra.mxu0 %v2459_v42  ;;  %2310 = vmatmul.mubr.bf16.gmra.mxu1 %v2460_v43 }
  0x63   :  { %2329 = vmatprep.mubr.bf16.mxu0 %v2461_v44  ;;  %2381 = vmatprep.mubr.bf16.mxu1 %v2462_v45 }
  0x6a   :  { %2330 = vmatmul.mubr.bf16.vlgmr.msra.gmra.mxu0 %v2463_v46  ;;  %2382 = vmatmul.mubr.bf16.vlgmr.msra.gmra.mxu1 %v2464_v47 }
  0x6b   :  { %2333 = vmatprep.mubr.bf16.mxu0 %v2465_v48  ;;  %2385 = vmatprep.mubr.bf16.mxu1 %v2466_v49 }
  0x72   :  { %2334 = vmatmul.mubr.bf16.gmra.mxu0 %v2467_v50  ;;  %2386 = vmatmul.mubr.bf16.gmra.mxu1 %v2468_v51 }
  0x73   :  { %2337 = vmatprep.mubr.bf16.mxu0 %v2469_v52  ;;  %2389 = vmatprep.mubr.bf16.mxu1 %v2470_v53 }
  0x7a   :  { %2338 = vmatmul.mubr.bf16.gmra.mxu0 %v2471_v54  ;;  %2390 = vmatmul.mubr.bf16.gmra.mxu1 %v2472_v55 }
  0x7b   :  { %2341 = vmatprep.mubr.bf16.mxu0 %v2473_v56  ;;  %2393 = vmatprep.mubr.bf16.mxu1 %v2474_v57 }
  0x82   :  { %2342 = vmatmul.mubr.bf16.gmra.mxu0 %v2475_v58  ;;  %2394 = vmatmul.mubr.bf16.gmra.mxu1 %v2476_v59 }
  0x83   :  { %2345 = vmatprep.mubr.bf16.mxu0 %v2477_v60  ;;  %2397 = vmatprep.mubr.bf16.mxu1 %v2478_v61 }
  0x8a   :  { %2346 = vmatmul.mubr.bf16.gmra.mxu0 %v2479_v62  ;;  %2398 = vmatmul.mubr.bf16.gmra.mxu1 %v2480_v63 }
  0x8b   :  { %2349 = vmatprep.mubr.bf16.mxu0 %v2481_v0  ;;  %2401 = vmatprep.mubr.bf16.mxu1 %v2482_v1 }
  0x92   :  { %2350 = vmatmul.mubr.bf16.gmra.mxu0 %v2483_v2  ;;  %2402 = vmatmul.mubr.bf16.gmra.mxu1 %v2484_v3 }
  0x93   :  { %2353 = vmatprep.mubr.bf16.mxu0 %v2485_v4  ;;  %2405 = vmatprep.mubr.bf16.mxu1 %v2486_v5 }
  0x9a   :  { %2354 = vmatmul.mubr.bf16.gmra.mxu0 %v2487_v6  ;;  %2406 = vmatmul.mubr.bf16.gmra.mxu1 %v2488_v7 }
  0x9b   :  { %2357 = vmatprep.mubr.bf16.mxu0 %v2489_v8  ;;  %2409 = vmatprep.mubr.bf16.mxu1 %v2490_v9 }
  0xa2   :  { %2358 = vmatmul.mubr.bf16.gmra.mxu0 %v2491_v10  ;;  %2410 = vmatmul.mubr.bf16.gmra.mxu1 %v2492_v11 }
  0xa3   :  { %2361 = vmatprep.mubr.bf16.mxu0 %v2493_v12  ;;  %2413 = vmatprep.mubr.bf16.mxu1 %v2494_v13 }
  0xaa   :  { %2362 = vmatmul.mubr.bf16.gmra.mxu0 %v2495_v14  ;;  %2414 = vmatmul.mubr.bf16.gmra.mxu1 %v2496_v15 }
  0xe2   :  { %v2817_v16 = vpop.f32.mrf.mxu0  ;;  %v2819_v17 = vpop.f32.mrf.mxu1 }
  0xe4   :  { %v2823_v19 = vpop.f32.mrf.mxu0  ;;  %v2825_v20 = vpop.f32.mrf.mxu1 }
  0xe6   :  { %v2829_v22 = vpop.f32.mrf.mxu0  ;;  %v2831_v23 = vpop.f32.mrf.mxu1 }
  0xe8   :  { %v2835_v25 = vpop.f32.mrf.mxu0  ;;  %v2837_v26 = vpop.f32.mrf.mxu1 }
  0xea   :  { %v2841_v28 = vpop.f32.mrf.mxu0  ;;  %v2843_v29 = vpop.f32.mrf.mxu1 }
  0xec   :  { %v2847_v31 = vpop.f32.mrf.mxu0  ;;  %v2849_v32 = vpop.f32.mrf.mxu1 }
  0xee   :  { %v2853_v34 = vpop.f32.mrf.mxu0  ;;  %v2855_v35 = vpop.f32.mrf.mxu1 }
  0xf0   :  { %v2859_v37 = vpop.f32.mrf.mxu0  ;;  %v2861_v38 = vpop.f32.mrf.mxu1 }
  0xf2   :  { %v2865_v40 = vpop.f32.mrf.mxu0  ;;  %v2867_v41 = vpop.f32.mrf.mxu1 }
  0xf4   :  { %v2871_v43 = vpop.f32.mrf.mxu0  ;;  %v2873_v44 = vpop.f32.mrf.mxu1 }
  0xf6   :  { %v2877_v46 = vpop.f32.mrf.mxu0  ;;  %v2879_v47 = vpop.f32.mrf.mxu1 }
  0xf8   :  { %v2883_v49 = vpop.f32.mrf.mxu0  ;;  %v2885_v50 = vpop.f32.mrf.mxu1 }
  0xfa   :  { %v2889_v52 = vpop.f32.mrf.mxu0  ;;  %v2891_v53 = vpop.f32.mrf.mxu1 }
  0xfc   :  { %v2895_v55 = vpop.f32.mrf.mxu0  ;;  %v2897_v56 = vpop.f32.mrf.mxu1 }
  0xfe   :  { %v2901_v58 = vpop.f32.mrf.mxu0  ;;  %v2903_v59 = vpop.f32.mrf.mxu1 }
 0x100   :  { %v2907_v61 = vpop.f32.mrf.mxu0  ;;  %v2909_v62 = vpop.f32.mrf.mxu1 }
 0x102   :  { %v2913_v0 = vpop.f32.mrf.mxu0  ;;  %v2915_v1 = vpop.f32.mrf.mxu1 }
 0x104   :  { %v2919_v3 = vpop.f32.mrf.mxu0  ;;  %v2921_v4 = vpop.f32.mrf.mxu1 }
 0x106   :  { %v2925_v6 = vpop.f32.mrf.mxu0  ;;  %v2927_v7 = vpop.f32.mrf.mxu1 }
 0x108   :  { %v2931_v9 = vpop.f32.mrf.mxu0  ;;  %v2933_v10 = vpop.f32.mrf.mxu1 }
 0x10a   :  { %v2937_v12 = vpop.f32.mrf.mxu0  ;;  %v2939_v13 = vpop.f32.mrf.mxu1 }
 0x10c   :  { %v2943_v15 = vpop.f32.mrf.mxu0  ;;  %v2945_v5 = vpop.f32.mrf.mxu1 }
 0x10e   :  { %v2949_v2 = vpop.f32.mrf.mxu0  ;;  %v2951_v63 = vpop.f32.mrf.mxu1 }
 0x110   :  { %v2955_v60 = vpop.f32.mrf.mxu0  ;;  %v2957_v57 = vpop.f32.mrf.mxu1 }
 0x112   :  { %v2961_v54 = vpop.f32.mrf.mxu0  ;;  %v2963_v51 = vpop.f32.mrf.mxu1 }
 0x113   :  { %3263 = vst [vmem:[#allocation2_spill] sm:$0xff] %v2963_v51 }
 0x114   :  { %v2967_v48 = vpop.f32.mrf.mxu0  ;;  %v2969_v45 = vpop.f32.mrf.mxu1 }
 0x115   :  { %3264 = vst [vmem:[#allocation3_spill] sm:$0xff] %v2967_v48  ;;  %3265 = vst [vmem:[#allocation4_spill] sm:$0xff] %v2969_v45  ;;  %v3287_v48 = vmax.f32 %v2823_v19, %v2825_v20  ;;  %v3289_v19 = vmax.f32 %v2835_v25, %v2837_v26  ;;  %v3291_v25 = vmax.f32 %v2847_v31, %v2849_v32 }
 0x116   :  { %v2973_v42 = vpop.f32.mrf.mxu0  ;;  %v2975_v39 = vpop.f32.mrf.mxu1  ;;  %v3293_v31 = vmax.f32 %v2859_v37, %v2861_v38 }
 0x117   :  { %3266 = vst [vmem:[#allocation5_spill] sm:$0xff] %v2973_v42  ;;  %3267 = vst [vmem:[#allocation6_spill] sm:$0xff] %v2975_v39  ;;  %v3286_v42 = vmax.f32 %v2817_v16, %v2819_v17 }
 0x118   :  { %v2979_v36 = vpop.f32.mrf.mxu0  ;;  %v2981_v33 = vpop.f32.mrf.mxu1 }
 0x119   :  { %3268 = vst [vmem:[#allocation7_spill] sm:$0xff] %v2979_v36  ;;  %3269 = vst [vmem:[#allocation8_spill] sm:$0xff] %v2981_v33 }
 0x11a   :  { %v2985_v30 = vpop.f32.mrf.mxu0  ;;  %v2987_v27 = vpop.f32.mrf.mxu1 }
 0x11b   :  { %3270 = vst [vmem:[#allocation9_spill] sm:$0xff] %v2985_v30  ;;  %3271 = vst [vmem:[#allocation10_spill] sm:$0xff] %v2987_v27 }
 0x11c   :  { %v2991_v24 = vpop.f32.mrf.mxu0  ;;  %v2993_v21 = vpop.f32.mrf.mxu1 }
 0x11d   :  { %3272 = vst [vmem:[#allocation11_spill] sm:$0xff] %v2991_v24  ;;  %3273 = vst [vmem:[#allocation12_spill] sm:$0xff] %v2993_v21 }
 0x11e   :  { %v2997_v18 = vpop.f32.mrf.mxu0  ;;  %v2999_v39 = vpop.f32.mrf.mxu1 }
 0x11f   :  { %3274 = vst [vmem:[#allocation13_spill] sm:$0xff] %v2997_v18  ;;  %3275 = vst [vmem:[#allocation14_spill] sm:$0xff] %v2999_v39 }
 0x120   :  { %v3003_v33 = vpop.f32.mrf.mxu0  ;;  %v3005_v36 = vpop.f32.mrf.mxu1 }
 0x121   :  { %3276 = vst [vmem:[#allocation15_spill] sm:$0xff] %v3003_v33  ;;  %3277 = vst [vmem:[#allocation16_spill] sm:$0xff] %v3005_v36 }
 0x122   :  { %v3009_v27 = vpop.f32.mrf.mxu0  ;;  %v3011_v30 = vpop.f32.mrf.mxu1 }
 0x123   :  { %3278 = vst [vmem:[#allocation17_spill] sm:$0xff] %v3009_v27  ;;  %3279 = vst [vmem:[#allocation18_spill] sm:$0xff] %v3011_v30 }
 0x124   :  { %v3015_v21 = vpop.f32.mrf.mxu0  ;;  %v3017_v24 = vpop.f32.mrf.mxu1 }
 0x125   :  { %3280 = vst [vmem:[#allocation19_spill] sm:$0xff] %v3015_v21  ;;  %3281 = vst [vmem:[#allocation20_spill] sm:$0xff] %v3017_v24 }
 0x126   :  { %v3021_v39 = vpop.f32.mrf.mxu0  ;;  %v3023_v18 = vpop.f32.mrf.mxu1 }
 0x127   :  { %3282 = vst [vmem:[#allocation21_spill] sm:$0xff] %v3021_v39  ;;  %3283 = vst [vmem:[#allocation22_spill] sm:$0xff] %v3023_v18  ;;  %v3042_v18 = vld [vmem:[%s3238_s2] ss:$0 sm:$0xff] }
 0x128   :  { %v3027_v36 = vpop.f32.mrf.mxu0  ;;  %v3029_v33 = vpop.f32.mrf.mxu1 }
 0x129   :  { %3284 = vst [vmem:[#allocation23_spill] sm:$0xff] %v3027_v36  ;;  %3285 = vst [vmem:[#allocation24_spill] sm:$0xff] %v3029_v33  ;;  %v3288_v36 = vmax.f32 %v2829_v22, %v2831_v23  ;;  %v3290_v22 = vmax.f32 %v2841_v28, %v2843_v29  ;;  %v3292_v28 = vmax.f32 %v2853_v34, %v2855_v35 }
 0x12a   :  { %v2331_v30 = vpop.f32.mrf.mxu0  ;;  %v2383_v27 = vpop.f32.mrf.mxu1 }
 0x12b   :  { %v1082_v8 = vmax.f32 %v3286_v42, %v2331_v30 }
 0x12c   :  { %v937_v24 = vpop.f32.mrf.mxu0  ;;  %v1295_v21 = vpop.f32.mrf.mxu1 }
 0x12d   :  { %v1440_v45 = vmax.f32 %v1082_v8, %v2383_v27  ;;  %v1080_v11 = vmax.f32 %v3287_v48, %v937_v24 }
 0x12e   :  { %v2332_v39 = vpop.f32.mrf.mxu0  ;;  %v2384_v14 = vpop.f32.mrf.mxu1 }
 0x12f   :  { %v1438_v33 = vmax.f32 %v1080_v11, %v1295_v21  ;;  %v1083_v16 = vmax.f32 %v3288_v36, %v2332_v39  ;;  %v1483_v27 = vadd.f32 %v3042_v18, %v1440_v45 }
 0x130   :  { %v940_v17 = vpop.f32.mrf.mxu0  ;;  %v1298_v30 = vpop.f32.mrf.mxu1 }
 0x131   :  { %v1441_v42 = vmax.f32 %v1083_v16, %v2384_v14  ;;  %v1081_v20 = vmax.f32 %v3289_v19, %v940_v17  ;;  %v1481_v8 = vadd.f32 %v3042_v18, %v1438_v33  ;;  %v1519_v11 = vmax.f32 %v1483_v27, 0.0 }
 0x132   :  { %v2335_v24 = vpop.f32.mrf.mxu0  ;;  %v2387_v48 = vpop.f32.mrf.mxu1 }
 0x133   :  { %v1484_v51 = vadd.f32 %v3042_v18, %v1441_v42  ;;  %v1439_v21 = vmax.f32 %v1081_v20, %v1298_v30  ;;  %v1086_v23 = vmax.f32 %v3290_v22, %v2335_v24  ;;  %v1517_v19 = vmax.f32 %v1481_v8, 0.0 }
 0x134   :  { %v953_v36 = vpop.f32.mrf.mxu0  ;;  %v1311_v39 = vpop.f32.mrf.mxu1 }
 0x135   :  { %v1520_v45 = vmax.f32 %v1484_v51, 0.0  ;;  %v1482_v14 = vadd.f32 %v3042_v18, %v1439_v21  ;;  %v1084_v26 = vmax.f32 %v3291_v25, %v953_v36  ;;  %v1444_v16 = vmax.f32 %v1086_v23, %v2387_v48 }
 0x136   :  { %v2336_v17 = vpop.f32.mrf.mxu0  ;;  %v2388_v33 = vpop.f32.mrf.mxu1  ;;  %v3294_v23 = vmax.f32 %v2865_v40, %v2867_v41  ;;  %v3296_v40 = vmax.f32 %v2877_v46, %v2879_v47  ;;  %v3298_v47 = vmax.f32 %v2889_v52, %v2891_v53  ;;  %v3300_v52 = vmax.f32 %v2901_v58, %v2903_v59 }
 0x137   :  { %v2006_v42 = vpack.c.bf16 %v1520_v45, %v1519_v11  ;;  %v1518_v30 = vmax.f32 %v1482_v14, 0.0  ;;  %v1442_v20 = vmax.f32 %v1084_v26, %v1311_v39  ;;  %v1087_v29 = vmax.f32 %v3292_v28, %v2336_v17 }
 0x138   :  { %v956_v24 = vpop.f32.mrf.mxu0  ;;  %v1314_v27 = vpop.f32.mrf.mxu1  ;;  %v1487_v48 = vadd.f32 %v3042_v18, %v1444_v16  ;;  %v3295_v14 = vmax.f32 %v2871_v43, %v2873_v44  ;;  %v3297_v43 = vmax.f32 %v2883_v49, %v2885_v50 }
 0x139   :  { %2088 = vst [vmem:[%s3239_s3 + $0x8] sm:$0xff] %v2006_v42   ;;  %v2001_v51 = vpack.c.bf16 %v1518_v30, %v1517_v19  ;;  %v1085_v32 = vmax.f32 %v3293_v31, %v956_v24  ;;  %v1445_v8 = vmax.f32 %v1087_v29, %v2388_v33  ;;  %v1485_v34 = vadd.f32 %v3042_v18, %v1442_v20 }
 0x13a   :  { %v2339_v21 = vpop.f32.mrf.mxu0  ;;  %v2391_v22 = vpop.f32.mrf.mxu1  ;;  %v1523_v26 = vmax.f32 %v1487_v48, 0.0 }
 0x13b   :  { %2002 = vst [vmem:[%s3239_s3] sm:$0xff] %v2001_v51   ;;  %v1443_v35 = vmax.f32 %v1085_v32, %v1314_v27  ;;  %v1090_v36 = vmax.f32 %v3294_v23, %v2339_v21  ;;  %v1488_v39 = vadd.f32 %v3042_v18, %v1445_v8  ;;  %v1521_v19 = vmax.f32 %v1485_v34, 0.0 }
 0x13c   :  { %v969_v37 = vpop.f32.mrf.mxu0  ;;  %v1327_v38 = vpop.f32.mrf.mxu1  ;;  %v3299_v23 = vmax.f32 %v2895_v55, %v2897_v56 }
 0x13d   :  { %v1486_v11 = vadd.f32 %v3042_v18, %v1443_v35  ;;  %v1448_v45 = vmax.f32 %v1090_v36, %v2391_v22  ;;  %v1088_v25 = vmax.f32 %v3295_v14, %v969_v37  ;;  %v1524_v16 = vmax.f32 %v1488_v39, 0.0 }
 0x13e   :  { %v2340_v17 = vpop.f32.mrf.mxu0  ;;  %v2392_v33 = vpop.f32.mrf.mxu1 }
 0x13f   :  { %v1522_v42 = vmax.f32 %v1486_v11, 0.0  ;;  %v1091_v41 = vmax.f32 %v3296_v40, %v2340_v17  ;;  %v2016_v30 = vpack.c.bf16 %v1524_v16, %v1523_v26  ;;  %v1446_v20 = vmax.f32 %v1088_v25, %v1327_v38 }
 0x140   :  { %v972_v28 = vpop.f32.mrf.mxu0  ;;  %v1330_v29 = vpop.f32.mrf.mxu1  ;;  %v1491_v27 = vadd.f32 %v3042_v18, %v1448_v45  ;;  %v3301_v17 = vmax.f32 %v2907_v61, %v2909_v62 }
 0x141   :  { %v2011_v24 = vpack.c.bf16 %v1522_v42, %v1521_v19  ;;  %v1449_v51 = vmax.f32 %v1091_v41, %v2392_v33  ;;  %2090 = vst [vmem:[%s3239_s3 + $0x18] sm:$0xff] %v2016_v30   ;;  %v1089_v44 = vmax.f32 %v3297_v43, %v972_v28  ;;  %v1489_v8 = vadd.f32 %v3042_v18, %v1446_v20 }
 0x142   :  { %v2343_v31 = vpop.f32.mrf.mxu0  ;;  %v2395_v32 = vpop.f32.mrf.mxu1  ;;  %v1527_v35 = vmax.f32 %v1491_v27, 0.0  ;;  %v3302_v30 = vmax.f32 %v2913_v0, %v2915_v1  ;;  %v3303_v27 = vmax.f32 %v2919_v3, %v2921_v4  ;;  %v3305_v3 = vmax.f32 %v2931_v9, %v2933_v10 }
 0x143   :  { %2089 = vst [vmem:[%s3239_s3 + $0x10] sm:$0xff] %v2011_v24   ;;  %v1492_v46 = vadd.f32 %v3042_v18, %v1449_v51  ;;  %v1094_v48 = vmax.f32 %v3298_v47, %v2343_v31  ;;  %v1447_v21 = vmax.f32 %v1089_v44, %v1330_v29  ;;  %v1525_v14 = vmax.f32 %v1489_v8, 0.0 }
 0x144   :  { %v985_v22 = vpop.f32.mrf.mxu0  ;;  %v1343_v34 = vpop.f32.mrf.mxu1  ;;  %v3304_v47 = vmax.f32 %v2925_v6, %v2927_v7 }
 0x145   :  { %v1528_v49 = vmax.f32 %v1492_v46, 0.0  ;;  %v1452_v50 = vmax.f32 %v1094_v48, %v2395_v32  ;;  %v1092_v36 = vmax.f32 %v3299_v23, %v985_v22  ;;  %v1490_v39 = vadd.f32 %v3042_v18, %v1447_v21 }
 0x146   :  { %v2344_v37 = vpop.f32.mrf.mxu0  ;;  %v2396_v38 = vpop.f32.mrf.mxu1  ;;  %v3306_v23 = vmax.f32 %v2937_v12, %v2939_v13  ;;  %v3308_v12 = vmax.f32 %v2949_v2, %v2951_v63  ;;  %v3310_v2 = vld [vmem:[#allocation2_spill] sm:$0xff] }
 0x147   :  { %v2026_v11 = vpack.c.bf16 %v1528_v49, %v1527_v35  ;;  %v1450_v45 = vmax.f32 %v1092_v36, %v1343_v34  ;;  %v1095_v53 = vmax.f32 %v3300_v52, %v2344_v37  ;;  %v1526_v25 = vmax.f32 %v1490_v39, 0.0 }
 0x148   :  { %v988_v26 = vpop.f32.mrf.mxu0  ;;  %v1346_v16 = vpop.f32.mrf.mxu1  ;;  %v1495_v55 = vadd.f32 %v3042_v18, %v1452_v50 }
 0x149   :  { %2092 = vst [vmem:[%s3239_s3 + $0x28] sm:$0xff] %v2026_v11   ;;  %v1453_v56 = vmax.f32 %v1095_v53, %v2396_v38  ;;  %v1093_v33 = vmax.f32 %v3301_v17, %v988_v26  ;;  %v2021_v19 = vpack.c.bf16 %v1526_v25, %v1525_v14  ;;  %v1493_v58 = vadd.f32 %v3042_v18, %v1450_v45 }
 0x14a   :  { %v2347_v42 = vpop.f32.mrf.mxu0  ;;  %v2399_v40 = vpop.f32.mrf.mxu1  ;;  %v1531_v61 = vmax.f32 %v1495_v55, 0.0  ;;  %v3307_v11 = vmax.f32 %v2943_v15, %v2945_v5  ;;  %v3309_v5 = vmax.f32 %v2955_v60, %v2957_v57 }
 0x14b   :  { %v1496_v59 = vadd.f32 %v3042_v18, %v1453_v56  ;;  %v1451_v41 = vmax.f32 %v1093_v33, %v1346_v16  ;;  %v1098_v20 = vmax.f32 %v3302_v30, %v2347_v42  ;;  %2091 = vst [vmem:[%s3239_s3 + $0x20] sm:$0xff] %v2021_v19   ;;  %v1529_v32 = vmax.f32 %v1493_v58, 0.0 }
 0x14c   :  { %v1001_v28 = vpop.f32.mrf.mxu0  ;;  %v1359_v29 = vpop.f32.mrf.mxu1 }
 0x14d   :  { %v1532_v62 = vmax.f32 %v1496_v59, 0.0  ;;  %v1494_v24 = vadd.f32 %v3042_v18, %v1451_v41  ;;  %v1096_v51 = vmax.f32 %v3303_v27, %v1001_v28  ;;  %v1456_v43 = vmax.f32 %v1098_v20, %v2399_v40  ;;  %v3313_v27 = vld [vmem:[#allocation4_spill] sm:$0xff] }
 0x14e   :  { %v2348_v44 = vpop.f32.mrf.mxu0  ;;  %v2400_v31 = vpop.f32.mrf.mxu1  ;;  %v3311_v41 = vmax.f32 %v2961_v54, %v3310_v2  ;;  %v3315_v54 = vld [vmem:[#allocation5_spill] sm:$0xff] }
 0x14f   :  { %v2036_v0 = vpack.c.bf16 %v1532_v62, %v1531_v61  ;;  %v1530_v1 = vmax.f32 %v1494_v24, 0.0  ;;  %v1454_v46 = vmax.f32 %v1096_v51, %v1359_v29  ;;  %v1099_v48 = vmax.f32 %v3304_v47, %v2348_v44  ;;  %v3312_v24 = vld [vmem:[#allocation3_spill] sm:$0xff] }
 0x150   :  { %v1004_v8 = vpop.f32.mrf.mxu0  ;;  %v1362_v21 = vpop.f32.mrf.mxu1  ;;  %v1499_v34 = vadd.f32 %v3042_v18, %v1456_v43  ;;  %v3314_v51 = vmax.f32 %v3312_v24, %v3313_v27 }
 0x151   :  { %2094 = vst [vmem:[%s3239_s3 + $0x38] sm:$0xff] %v2036_v0   ;;  %v2031_v22 = vpack.c.bf16 %v1530_v1, %v1529_v32  ;;  %v1097_v4 = vmax.f32 %v3305_v3, %v1004_v8  ;;  %v1457_v35 = vmax.f32 %v1099_v48, %v2400_v31  ;;  %v1497_v6 = vadd.f32 %v3042_v18, %v1454_v46  ;;  %v3316_v46 = vld [vmem:[#allocation6_spill] sm:$0xff] }
 0x152   :  { %v2351_v49 = vpop.f32.mrf.mxu0  ;;  %v2403_v50 = vpop.f32.mrf.mxu1  ;;  %v1535_v52 = vmax.f32 %v1499_v34, 0.0  ;;  %v3317_v47 = vmax.f32 %v3315_v54, %v3316_v46 }
 0x153   :  { %2093 = vst [vmem:[%s3239_s3 + $0x30] sm:$0xff] %v2031_v22   ;;  %v1455_v7 = vmax.f32 %v1097_v4, %v1362_v21  ;;  %v1102_v36 = vmax.f32 %v3306_v23, %v2351_v49  ;;  %v1500_v39 = vadd.f32 %v3042_v18, %v1457_v35  ;;  %v1533_v26 = vmax.f32 %v1497_v6, 0.0  ;;  %v3318_v35 = vld [vmem:[#allocation7_spill] sm:$0xff]  ;;  %v3319_v49 = vld [vmem:[#allocation8_spill] sm:$0xff] }
 0x154   :  { %v1017_v9 = vpop.f32.mrf.mxu0  ;;  %v1375_v10 = vpop.f32.mrf.mxu1 }
 0x155   :  { %v1498_v37 = vadd.f32 %v3042_v18, %v1455_v7  ;;  %v1460_v38 = vmax.f32 %v1102_v36, %v2403_v50  ;;  %v1100_v45 = vmax.f32 %v3307_v11, %v1017_v9  ;;  %v1536_v53 = vmax.f32 %v1500_v39, 0.0 }
 0x156   :  { %v2352_v14 = vpop.f32.mrf.mxu0  ;;  %v2404_v25 = vpop.f32.mrf.mxu1  ;;  %v3320_v50 = vmax.f32 %v3318_v35, %v3319_v49 }
 0x157   :  { %v1534_v16 = vmax.f32 %v1498_v37, 0.0  ;;  %v1103_v13 = vmax.f32 %v3308_v12, %v2352_v14  ;;  %v2046_v55 = vpack.c.bf16 %v1536_v53, %v1535_v52  ;;  %v1458_v56 = vmax.f32 %v1100_v45, %v1375_v10  ;;  %v3321_v37 = vld [vmem:[#allocation9_spill] sm:$0xff]  ;;  %v3325_v12 = vld [vmem:[#allocation12_spill] sm:$0xff] }
 0x158   :  { %v1020_v17 = vpop.f32.mrf.mxu0  ;;  %v1378_v33 = vpop.f32.mrf.mxu1  ;;  %v1503_v42 = vadd.f32 %v3042_v18, %v1460_v38  ;;  %v3322_v38 = vld [vmem:[#allocation10_spill] sm:$0xff] }
 0x159   :  { %v2041_v19 = vpack.c.bf16 %v1534_v16, %v1533_v26  ;;  %v1461_v40 = vmax.f32 %v1103_v13, %v2404_v25  ;;  %2096 = vst [vmem:[%s3239_s3 + $0x48] sm:$0xff] %v2046_v55   ;;  %v1101_v15 = vmax.f32 %v3309_v5, %v1020_v17  ;;  %v1501_v20 = vadd.f32 %v3042_v18, %v1458_v56  ;;  %v3324_v16 = vld [vmem:[#allocation11_spill] sm:$0xff] }
 0x15a   :  { %v2355_v58 = vpop.f32.mrf.mxu0  ;;  %v2407_v59 = vpop.f32.mrf.mxu1  ;;  %v1539_v62 = vmax.f32 %v1503_v42, 0.0  ;;  %v3323_v11 = vmax.f32 %v3321_v37, %v3322_v38  ;;  %v3326_v13 = vmax.f32 %v3324_v16, %v3325_v12 }
 0x15b   :  { %2095 = vst [vmem:[%s3239_s3 + $0x40] sm:$0xff] %v2041_v19   ;;  %v1504_v63 = vadd.f32 %v3042_v18, %v1461_v40  ;;  %v1106_v30 = vmax.f32 %v3311_v41, %v2355_v58  ;;  %v1459_v28 = vmax.f32 %v1101_v15, %v1378_v33  ;;  %v1537_v8 = vmax.f32 %v1501_v20, 0.0  ;;  %v3327_v15 = vld [vmem:[#allocation13_spill] sm:$0xff]  ;;  %v3328_v58 = vld [vmem:[#allocation14_spill] sm:$0xff]  ;;  %v3330_v20 = vld [vmem:[#allocation15_spill] sm:$0xff] }
 0x15c   :  { %v1033_v29 = vpop.f32.mrf.mxu0  ;;  %v1391_v61 = vpop.f32.mrf.mxu1 }
 0x15d   :  { %v1540_v57 = vmax.f32 %v1504_v63, 0.0  ;;  %v1464_v60 = vmax.f32 %v1106_v30, %v2407_v59  ;;  %v1104_v43 = vmax.f32 %v3314_v51, %v1033_v29  ;;  %v1502_v44 = vadd.f32 %v3042_v18, %v1459_v28  ;;  %v3331_v28 = vld [vmem:[#allocation16_spill] sm:$0xff] }
 0x15e   :  { %v2356_v31 = vpop.f32.mrf.mxu0  ;;  %v2408_v32 = vpop.f32.mrf.mxu1  ;;  %v3329_v59 = vmax.f32 %v3327_v15, %v3328_v58  ;;  %v3332_v29 = vmax.f32 %v3330_v20, %v3331_v28 }
 0x15f   :  { %v2056_v0 = vpack.c.bf16 %v1540_v57, %v1539_v62  ;;  %v1462_v1 = vmax.f32 %v1104_v43, %v1391_v61  ;;  %v1107_v48 = vmax.f32 %v3317_v47, %v2356_v31  ;;  %v1538_v21 = vmax.f32 %v1502_v44, 0.0  ;;  %v3333_v43 = vld [vmem:[#allocation17_spill] sm:$0xff]  ;;  %v3334_v44 = vld [vmem:[#allocation18_spill] sm:$0xff] }
 0x160   :  { %v1036_v22 = vpop.f32.mrf.mxu0  ;;  %v1394_v3 = vpop.f32.mrf.mxu1  ;;  %v1507_v4 = vadd.f32 %v3042_v18, %v1464_v60  ;;  %v3335_v31 = vmax.f32 %v3333_v43, %v3334_v44 }
 0x161   :  { %2098 = vst [vmem:[%s3239_s3 + $0x58] sm:$0xff] %v2056_v0   ;;  %v1465_v34 = vmax.f32 %v1107_v48, %v2408_v32  ;;  %v1105_v6 = vmax.f32 %v3320_v50, %v1036_v22  ;;  %v2051_v7 = vpack.c.bf16 %v1538_v21, %v1537_v8  ;;  %v1505_v39 = vadd.f32 %v3042_v18, %v1462_v1  ;;  %v3336_v48 = vld [vmem:[#allocation19_spill] sm:$0xff]  ;;  %v3337_v8 = vld [vmem:[#allocation20_spill] sm:$0xff]  ;;  %v3339_v50 = vld [vmem:[#allocation21_spill] sm:$0xff] }
 0x162   :  { %v2359_v23 = vpop.f32.mrf.mxu0  ;;  %v2411_v36 = vpop.f32.mrf.mxu1  ;;  %v1543_v14 = vmax.f32 %v1507_v4, 0.0  ;;  %v3338_v21 = vmax.f32 %v3336_v48, %v3337_v8 }
 0x163   :  { %v1508_v9 = vadd.f32 %v3042_v18, %v1465_v34  ;;  %v1463_v10 = vmax.f32 %v1105_v6, %v1394_v3  ;;  %v1110_v45 = vmax.f32 %v3323_v11, %v2359_v23  ;;  %2097 = vst [vmem:[%s3239_s3 + $0x50] sm:$0xff] %v2051_v7   ;;  %v1541_v19 = vmax.f32 %v1505_v39, 0.0  ;;  %v3340_v6 = vld [vmem:[#allocation22_spill] sm:$0xff] }
 0x164   :  { %v1049_v52 = vpop.f32.mrf.mxu0  ;;  %v1407_v53 = vpop.f32.mrf.mxu1  ;;  %v3341_v7 = vmax.f32 %v3339_v50, %v3340_v6 }
 0x165   :  { %v1544_v25 = vmax.f32 %v1508_v9, 0.0  ;;  %v1506_v26 = vadd.f32 %v3042_v18, %v1463_v10  ;;  %v1108_v55 = vmax.f32 %v3326_v13, %v1049_v52  ;;  %v1468_v56 = vmax.f32 %v1110_v45, %v2411_v36  ;;  %v3342_v45 = vld [vmem:[#allocation23_spill] sm:$0xff]  ;;  %v3343_v52 = vld [vmem:[#allocation24_spill] sm:$0xff] }
 0x166   :  { %v2360_v17 = vpop.f32.mrf.mxu0  ;;  %v2412_v33 = vpop.f32.mrf.mxu1 }
 0x167   :  { %v2066_v42 = vpack.c.bf16 %v1544_v25, %v1543_v14  ;;  %v1542_v40 = vmax.f32 %v1506_v26, 0.0  ;;  %v1466_v5 = vmax.f32 %v1108_v55, %v1407_v53  ;;  %v1111_v63 = vmax.f32 %v3329_v59, %v2360_v17 }
 0x168   :  { %v1052_v2 = vpop.f32.mrf.mxu0  ;;  %v1410_v41 = vpop.f32.mrf.mxu1  ;;  %v1511_v62 = vadd.f32 %v3042_v18, %v1468_v56  ;;  %v3344_v53 = vmax.f32 %v3342_v45, %v3343_v52 }
 0x169   :  { %2100 = vst [vmem:[%s3239_s3 + $0x68] sm:$0xff] %v2066_v42   ;;  %v2061_v30 = vpack.c.bf16 %v1542_v40, %v1541_v19  ;;  %v1109_v61 = vmax.f32 %v3332_v29, %v1052_v2  ;;  %v1469_v57 = vmax.f32 %v1111_v63, %v2412_v33  ;;  %v1509_v27 = vadd.f32 %v3042_v18, %v1466_v5 }
 0x16a   :  { %v2363_v60 = vpop.f32.mrf.mxu0  ;;  %v2415_v24 = vpop.f32.mrf.mxu1  ;;  %v1547_v3 = vmax.f32 %v1511_v62, 0.0 }
 0x16b   :  { %2099 = vst [vmem:[%s3239_s3 + $0x60] sm:$0xff] %v2061_v30   ;;  %v1467_v51 = vmax.f32 %v1109_v61, %v1410_v41  ;;  %v1114_v32 = vmax.f32 %v3335_v31, %v2363_v60  ;;  %v1512_v0 = vadd.f32 %v3042_v18, %v1469_v57  ;;  %v1545_v35 = vmax.f32 %v1509_v27, 0.0 }
 0x16c   :  { %v1065_v1 = vpop.f32.mrf.mxu0  ;;  %v1423_v54 = vpop.f32.mrf.mxu1 }
 0x16d   :  { %v1510_v46 = vadd.f32 %v3042_v18, %v1467_v51  ;;  %v1472_v47 = vmax.f32 %v1114_v32, %v2415_v24  ;;  %v1112_v22 = vmax.f32 %v3338_v21, %v1065_v1  ;;  %v1548_v4 = vmax.f32 %v1512_v0, 0.0 }
 0x16e   :  { %v2364_v34 = vpop.f32.mrf.mxu0  ;;  %v2416_v36 = vpop.f32.mrf.mxu1 }
 0x16f   :  { %v1546_v49 = vmax.f32 %v1510_v46, 0.0  ;;  %v1115_v23 = vmax.f32 %v3341_v7, %v2364_v34  ;;  %v2076_v39 = vpack.c.bf16 %v1548_v4, %v1547_v3  ;;  %v1470_v9 = vmax.f32 %v1112_v22, %v1423_v54 }
 0x170   :  { %v1068_v10 = vpop.f32.mrf.mxu0  ;;  %v1515_v38 = vadd.f32 %v3042_v18, %v1472_v47  ;;  %v1426_v26 = vpop.f32.mrf.mxu1 }
 0x171   :  { %v2071_v37 = vpack.c.bf16 %v1546_v49, %v1545_v35  ;;  %v1473_v11 = vmax.f32 %v1115_v23, %v2416_v36  ;;  %2102 = vst [vmem:[%s3239_s3 + $0x78] sm:$0xff] %v2076_v39   ;;  %v1113_v14 = vmax.f32 %v3344_v53, %v1068_v10  ;;  %v1513_v16 = vadd.f32 %v3042_v18, %v1470_v9 }
 0x172   :  { %v1551_v13 = vmax.f32 %v1515_v38, 0.0 }
 0x173   :  { %2101 = vst [vmem:[%s3239_s3 + $0x70] sm:$0xff] %v2071_v37   ;;  %v1516_v25 = vadd.f32 %v3042_v18, %v1473_v11  ;;  %v1471_v12 = vmax.f32 %v1113_v14, %v1426_v26  ;;  %v1549_v33 = vmax.f32 %v1513_v16, 0.0 }
 0x175   :  { %v1552_v55 = vmax.f32 %v1516_v25, 0.0  ;;  %v1514_v56 = vadd.f32 %v3042_v18, %v1471_v12 }
 0x177   :  { %v2086_v17 = vpack.c.bf16 %v1552_v55, %v1551_v13  ;;  %v1550_v19 = vmax.f32 %v1514_v56, 0.0 }
 0x179   :  { %2104 = vst [vmem:[%s3239_s3 + $0x88] sm:$0xff] %v2086_v17   ;;  %v2081_v42 = vpack.c.bf16 %v1550_v19, %v1549_v33 }
 0x17b   :  { %2103 = vst [vmem:[%s3239_s3 + $0x80] sm:$0xff] %v2081_v42  }

// kernel: net_forward.3
= control target key start
LH: loop header
LB: loop body
LE: loop exit
PB: predicated region body
PF: predicated region fallthrough
CT: control target
= control target key end

     0   :  { %s15994_s0 = inlined_call_operand.vmem [shape: bf16[4,32,3200], index: 0, kind: input, shape index: {}]   ;;  %s15995_s1 = inlined_call_operand.vmem [shape: bf16[3200,128], index: 1, kind: input, shape index: {}]   ;;  %s15996_s2 = inlined_call_operand.vmem [shape: f32[1,128], index: 2, kind: input, shape index: {}]   ;;  %s15997_s3 = inlined_call_operand.vmem [shape: bf16[2048,256], index: 3, kind: input, shape index: {}]   ;;  %s15998_s4 = inlined_call_operand.vmem [shape: f32[1,256], index: 4, kind: input, shape index: {}]   ;;  %s15999_s5 = inlined_call_operand.vmem [shape: bf16[256,128], index: 5, kind: input, shape index: {}]   ;;  %s16000_s6 = inlined_call_operand.vmem [shape: f32[1,128], index: 6, kind: input, shape index: {}]   ;;  %s16001_s7 = inlined_call_operand.hbm [shape: f32[2,128], index: 7, kind: output, shape index: {}]  }
   0x1   :  { %v10200_v0 = vld [vmem:[%s15995_s1 + $0x78] sm:$0xff]   ;;  %v10204_v4 = vld [vmem:[%s15995_s1 + $0x70] sm:$0xff]   ;;  %v10208_v8 = vld [vmem:[%s15995_s1 + $0x68] sm:$0xff]  }
   0x2   :  { %v10201_v1 = vld [vmem:[%s15995_s1 + $0xf8] sm:$0xff]   ;;  %8712 = vmatprep.subr.bf16.mxu0 %v10200_v0  ;;  %v10205_v5 = vld [vmem:[%s15995_s1 + $0xf0] sm:$0xff]   ;;  %v10209_v9 = vld [vmem:[%s15995_s1 + $0xe8] sm:$0xff]  }
   0x3   :  { %v10202_v2 = vld [vmem:[%s15995_s1 + $0x38] sm:$0xff]   ;;  %8740 = vmatprep.subr.bf16.mxu1 %v10201_v1  ;;  %v10206_v6 = vld [vmem:[%s15995_s1 + $0x30] sm:$0xff]   ;;  %v10210_v10 = vld [vmem:[%s15995_s1 + $0x28] sm:$0xff]  }
   0x4   :  { %v10203_v3 = vld [vmem:[%s15995_s1 + $0xb8] sm:$0xff]   ;;  %8713 = vmatpush3.bf16.msra.mxu0 %v10202_v2  ;;  %v10207_v7 = vld [vmem:[%s15995_s1 + $0xb0] sm:$0xff]   ;;  %v10211_v11 = vld [vmem:[%s15995_s1 + $0xa8] sm:$0xff]  }
   0x5   :  { %8741 = vmatpush3.bf16.msra.mxu1 %v10203_v3  ;;  %8714 = vmatprep.subr.bf16.mxu0 %v10204_v4  ;;  %v10212_v12 = vld [vmem:[%s15995_s1 + $0x60] sm:$0xff]   ;;  %v10216_v16 = vld [vmem:[%s15995_s1 + $0x58] sm:$0xff]   ;;  %v10220_v20 = vld [vmem:[%s15995_s1 + $0x50] sm:$0xff]  }
   0x6   :  { %8742 = vmatprep.subr.bf16.mxu1 %v10205_v5  ;;  %v10213_v13 = vld [vmem:[%s15995_s1 + $0xe0] sm:$0xff]   ;;  %v10217_v17 = vld [vmem:[%s15995_s1 + $0xd8] sm:$0xff]   ;;  %v10221_v21 = vld [vmem:[%s15995_s1 + $0xd0] sm:$0xff]  }
   0x7   :  { %v10214_v14 = vld [vmem:[%s15995_s1 + $0x20] sm:$0xff]   ;;  %v10218_v18 = vld [vmem:[%s15995_s1 + $0x18] sm:$0xff]   ;;  %v10222_v22 = vld [vmem:[%s15995_s1 + $0x10] sm:$0xff]  }
   0x8   :  { %8715 = vmatpush3.bf16.msra.mxu0 %v10206_v6  ;;  %v10215_v15 = vld [vmem:[%s15995_s1 + $0xa0] sm:$0xff]   ;;  %v10219_v19 = vld [vmem:[%s15995_s1 + $0x98] sm:$0xff]   ;;  %v10223_v23 = vld [vmem:[%s15995_s1 + $0x90] sm:$0xff]  }
   0x9   :  { %8743 = vmatpush3.bf16.msra.mxu1 %v10207_v7  ;;  %8716 = vmatprep.subr.bf16.mxu0 %v10208_v8  ;;  %v10224_v24 = vld [vmem:[%s15995_s1 + $0x48] sm:$0xff]   ;;  %v10228_v28 = vld [vmem:[%s15995_s1 + $0x40] sm:$0xff]   ;;  %v10238_v36 = vld [vmem:[%s15995_s1 + $0x178] sm:$0xff]  }
   0xa   :  { %8744 = vmatprep.subr.bf16.mxu1 %v10209_v9  ;;  %v10225_v25 = vld [vmem:[%s15995_s1 + $0xc8] sm:$0xff]   ;;  %v10229_v29 = vld [vmem:[%s15995_s1 + $0xc0] sm:$0xff]   ;;  %v10239_v37 = vld [vmem:[%s15995_s1 + $0x1f8] sm:$0xff]  }
   0xb   :  { %v10226_v26 = vld [vmem:[%s15995_s1 + $0x8] sm:$0xff]   ;;  %v10230_v30 = vld [vmem:[%s15995_s1] sm:$0xff]   ;;  %v10240_v38 = vld [vmem:[%s15995_s1 + $0x138] sm:$0xff]  }
   0xc   :  { %8717 = vmatpush3.bf16.msra.mxu0 %v10210_v10  ;;  %v10227_v27 = vld [vmem:[%s15995_s1 + $0x88] sm:$0xff]   ;;  %v10231_v31 = vld [vmem:[%s15995_s1 + $0x80] sm:$0xff]   ;;  %v10241_v39 = vld [vmem:[%s15995_s1 + $0x1b8] sm:$0xff]  }
   0xd   :  { %8745 = vmatpush3.bf16.msra.mxu1 %v10211_v11  ;;  %8718 = vmatprep.subr.bf16.mxu0 %v10212_v12  ;;  %v10232_v32 = vld [vmem:[%s15994_s0] ss:$100 sps:$4 sm:$0xff]   ;;  %v10235_v34 = vld [vmem:[%s15994_s0 + $0x8] ss:$100 sps:$4 sm:$0xff]   ;;  %v10242_v40 = vld [vmem:[%s15995_s1 + $0x170] sm:$0xff]  }
   0xe   :  { %8746 = vmatprep.subr.bf16.mxu1 %v10213_v13  ;;  %v10234_v33 = vld [vmem:[%s15994_s0 + $0x4] ss:$100 sps:$4 sm:$0xff]   ;;  %v10237_v35 = vld [vmem:[%s15994_s0 + $0xc] ss:$100 sps:$4 sm:$0xff]   ;;  %v10254_v52 = vld [vmem:[%s15995_s1 + $0x158] sm:$0xff]  }
   0xf   :  { %1964 = vmatprep.mubr.bf16.mxu0 %v10234_v33  ;;  %2013 = vmatprep.mubr.bf16.mxu1 %v10237_v35  ;;  %v10243_v41 = vld [vmem:[%s15995_s1 + $0x1f0] sm:$0xff]   ;;  %v10246_v44 = vld [vmem:[%s15995_s1 + $0x168] sm:$0xff]   ;;  %v10250_v48 = vld [vmem:[%s15995_s1 + $0x160] sm:$0xff]  }
  0x10   :  { %8719 = vmatpush3.bf16.msra.mxu0 %v10214_v14  ;;  %v10244_v42 = vld [vmem:[%s15995_s1 + $0x130] sm:$0xff]   ;;  %v10247_v45 = vld [vmem:[%s15995_s1 + $0x1e8] sm:$0xff]   ;;  %v10251_v49 = vld [vmem:[%s15995_s1 + $0x1e0] sm:$0xff]  }
  0x11   :  { %8747 = vmatpush3.bf16.msra.mxu1 %v10215_v15  ;;  %8720 = vmatprep.subr.bf16.mxu0 %v10216_v16  ;;  %v10245_v43 = vld [vmem:[%s15995_s1 + $0x1b0] sm:$0xff]   ;;  %v10248_v46 = vld [vmem:[%s15995_s1 + $0x128] sm:$0xff]   ;;  %v10252_v50 = vld [vmem:[%s15995_s1 + $0x120] sm:$0xff]  }
  0x12   :  { %8748 = vmatprep.subr.bf16.mxu1 %v10217_v17  ;;  %v10249_v47 = vld [vmem:[%s15995_s1 + $0x1a8] sm:$0xff]   ;;  %v10253_v51 = vld [vmem:[%s15995_s1 + $0x1a0] sm:$0xff]   ;;  %v10255_v53 = vld [vmem:[%s15995_s1 + $0x1d8] sm:$0xff]  }
  0x13   :  { %v10256_v54 = vld [vmem:[%s15995_s1 + $0x118] sm:$0xff]   ;;  %v10258_v56 = vld [vmem:[%s15994_s0 + $0xcc] ss:$100 sps:$4 sm:$0xff]   ;;  %v10272_v4 = vld [vmem:[%s15995_s1 + $0x140] sm:$0xff]  }
  0x14   :  { %8721 = vmatpush3.bf16.msra.mxu0 %v10218_v18  ;;  %v10257_v55 = vld [vmem:[%s15995_s1 + $0x198] sm:$0xff]   ;;  %v10262_v58 = vld [vmem:[%s15994_s0 + $0xc8] ss:$100 sps:$4 sm:$0xff]   ;;  %v10263_v59 = vld [vmem:[%s15994_s0 + $0xd0] ss:$100 sps:$4 sm:$0xff]  }
  0x15   :  { %8749 = vmatpush3.bf16.msra.mxu1 %v10219_v19  ;;  %8722 = vmatprep.subr.bf16.mxu0 %v10220_v20  ;;  %v10260_v57 = vld [vmem:[%s15994_s0 + $0xd4] ss:$100 sps:$4 sm:$0xff]   ;;  %v10268_v0 = vld [vmem:[%s15995_s1 + $0x148] sm:$0xff]   ;;  %v10273_v5 = vld [vmem:[%s15995_s1 + $0x1c0] sm:$0xff]  }
  0x16   :  { %8750 = vmatprep.subr.bf16.mxu1 %v10221_v21  ;;  %v10264_v60 = vld [vmem:[%s15995_s1 + $0x150] sm:$0xff]   ;;  %v10269_v1 = vld [vmem:[%s15995_s1 + $0x1c8] sm:$0xff]   ;;  %v10274_v6 = vld [vmem:[%s15995_s1 + $0x100] sm:$0xff]  }
  0x17   :  { %v10265_v61 = vld [vmem:[%s15995_s1 + $0x1d0] sm:$0xff]   ;;  %v10270_v2 = vld [vmem:[%s15995_s1 + $0x108] sm:$0xff]   ;;  %v10275_v7 = vld [vmem:[%s15995_s1 + $0x180] sm:$0xff]  }
  0x18   :  { %8723 = vmatpush3.bf16.msra.mxu0 %v10222_v22  ;;  %v10266_v62 = vld [vmem:[%s15995_s1 + $0x110] sm:$0xff]   ;;  %v10271_v3 = vld [vmem:[%s15995_s1 + $0x188] sm:$0xff]   ;;  %v10279_v10 = vld [vmem:[%s15994_s0 + $0x18] ss:$100 sps:$4 sm:$0xff]  }
  0x19   :  { %8751 = vmatpush3.bf16.msra.mxu1 %v10223_v23  ;;  %8724 = vmatprep.subr.bf16.mxu0 %v10224_v24  ;;  %v10267_v63 = vld [vmem:[%s15995_s1 + $0x190] sm:$0xff]   ;;  %v10281_v11 = vld [vmem:[%s15994_s0 + $0x1c] ss:$100 sps:$4 sm:$0xff]   ;;  %v10293_v22 = vld [vmem:[%s15995_s1 + $0x268] sm:$0xff]  }
  0x1a   :  { %8752 = vmatprep.subr.bf16.mxu1 %v10225_v25  ;;  %v10276_v8 = vld [vmem:[%s15994_s0 + $0x10] ss:$100 sps:$4 sm:$0xff]   ;;  %v10282_v12 = vld [vmem:[%s15995_s1 + $0x278] sm:$0xff]   ;;  %v10294_v23 = vld [vmem:[%s15995_s1 + $0x2e8] sm:$0xff]  }
  0x1b   :  { %v10278_v9 = vld [vmem:[%s15994_s0 + $0x14] ss:$100 sps:$4 sm:$0xff]   ;;  %v10290_v20 = vld [vmem:[%s15994_s0 + $0xdc] ss:$100 sps:$4 sm:$0xff]   ;;  %v10295_v24 = vld [vmem:[%s15994_s0 + $0xe4] ss:$100 sps:$4 sm:$0xff]  }
  0x1c   :  { %8725 = vmatpush3.bf16.msra.mxu0 %v10226_v26  ;;  %v10283_v13 = vld [vmem:[%s15995_s1 + $0x2f8] sm:$0xff]   ;;  %v10286_v16 = vld [vmem:[%s15995_s1 + $0x270] sm:$0xff]   ;;  %v10297_v25 = vld [vmem:[%s15995_s1 + $0x228] sm:$0xff]  }
  0x1d   :  { %8753 = vmatpush3.bf16.msra.mxu1 %v10227_v27  ;;  %8726 = vmatprep.subr.bf16.mxu0 %v10228_v28  ;;  %v10284_v14 = vld [vmem:[%s15995_s1 + $0x238] sm:$0xff]   ;;  %v10287_v17 = vld [vmem:[%s15995_s1 + $0x2f0] sm:$0xff]   ;;  %v10298_v26 = vld [vmem:[%s15995_s1 + $0x2a8] sm:$0xff]  }
  0x1e   :  { %8754 = vmatprep.subr.bf16.mxu1 %v10229_v29  ;;  %v10285_v15 = vld [vmem:[%s15995_s1 + $0x2b8] sm:$0xff]   ;;  %v10288_v18 = vld [vmem:[%s15995_s1 + $0x230] sm:$0xff]   ;;  %v10299_v27 = vld [vmem:[%s15994_s0 + $0xe0] ss:$100 sps:$4 sm:$0xff]  }
  0x1f   :  { %v10289_v19 = vld [vmem:[%s15995_s1 + $0x2b0] sm:$0xff]   ;;  %v10292_v21 = vld [vmem:[%s15994_s0 + $0xd8] ss:$100 sps:$4 sm:$0xff]   ;;  %v10300_v28 = vld [vmem:[%s15995_s1 + $0x260] sm:$0xff]  }
  0x20   :  { %8727 = vmatpush3.bf16.msra.mxu0 %v10230_v30  ;;  %v10301_v29 = vld [vmem:[%s15995_s1 + $0x2e0] sm:$0xff]   ;;  %v10305_v33 = vld [vmem:[%s15995_s1 + $0x2d8] sm:$0xff]  }
  0x21   :  { %8755 = vmatpush3.bf16.msra.mxu1 %v10231_v31  ;;  %8768 = vmatprep.subr.bf16.mxu0 %v10238_v36  ;;  %v10302_v30 = vld [vmem:[%s15995_s1 + $0x220] sm:$0xff]   ;;  %v10307_v35 = vld [vmem:[%s15995_s1 + $0x298] sm:$0xff]   ;;  %v10308_v36 = vld [vmem:[%s15995_s1 + $0x250] sm:$0xff]  }
  0x22   :  { %8796 = vmatprep.subr.bf16.mxu1 %v10239_v37  ;;  %v10303_v31 = vld [vmem:[%s15995_s1 + $0x2a0] sm:$0xff]   ;;  %v10309_v37 = vld [vmem:[%s15995_s1 + $0x2d0] sm:$0xff]  }
  0x23   :  { %1965 = vmatmul.mubr.bf16.vlgmr.msra.gmra.mxu0 %v10232_v32  ;;  %v10304_v32 = vld [vmem:[%s15995_s1 + $0x258] sm:$0xff]  }
  0x24   :  { %2014 = vmatmul.mubr.bf16.vlgmr.msra.gmra.mxu1 %v10235_v34  ;;  %8769 = vmatpush3.bf16.msra.mxu0 %v10240_v38  ;;  %v10306_v34 = vld [vmem:[%s15995_s1 + $0x218] sm:$0xff]   ;;  %v10310_v38 = vld [vmem:[%s15995_s1 + $0x210] sm:$0xff]  }
  0x25   :  { %8797 = vmatpush3.bf16.msra.mxu1 %v10241_v39  ;;  %8770 = vmatprep.subr.bf16.mxu0 %v10242_v40  ;;  %v10311_v39 = vld [vmem:[%s15995_s1 + $0x290] sm:$0xff]   ;;  %v10312_v40 = vld [vmem:[%s15995_s1 + $0x248] sm:$0xff]  }
  0x26   :  { %8798 = vmatprep.subr.bf16.mxu1 %v10243_v41  ;;  %1972 = vmatprep.mubr.bf16.mxu0 %v10258_v56  ;;  %v10313_v41 = vld [vmem:[%s15995_s1 + $0x2c8] sm:$0xff]   ;;  %v10330_v56 = vld [vmem:[%s15995_s1 + $0x370] sm:$0xff]  }
  0x27   :  { %2021 = vmatprep.mubr.bf16.mxu1 %v10260_v57  ;;  %v10331_v57 = vld [vmem:[%s15995_s1 + $0x3f0] sm:$0xff]  }
  0x28   :  { %8771 = vmatpush3.bf16.msra.mxu0 %v10244_v42  ;;  %v10314_v42 = vld [vmem:[%s15995_s1 + $0x208] sm:$0xff]  }
  0x29   :  { %8799 = vmatpush3.bf16.msra.mxu1 %v10245_v43  ;;  %8772 = vmatprep.subr.bf16.mxu0 %v10246_v44  ;;  %v10315_v43 = vld [vmem:[%s15995_s1 + $0x288] sm:$0xff]   ;;  %v10316_v44 = vld [vmem:[%s15995_s1 + $0x240] sm:$0xff]  }
  0x2a   :  { %8800 = vmatprep.subr.bf16.mxu1 %v10247_v45  ;;  %v10317_v45 = vld [vmem:[%s15995_s1 + $0x2c0] sm:$0xff]  }
  0x2b   :  { %1973 = vmatmul.mubr.bf16.gmra.mxu0 %v10262_v58  ;;  %v10332_v58 = vld [vmem:[%s15995_s1 + $0x330] sm:$0xff]  }
  0x2c   :  { %8773 = vmatpush3.bf16.msra.mxu0 %v10248_v46  ;;  %2022 = vmatmul.mubr.bf16.gmra.mxu1 %v10263_v59  ;;  %v10318_v46 = vld [vmem:[%s15995_s1 + $0x200] sm:$0xff]   ;;  %v10333_v59 = vld [vmem:[%s15995_s1 + $0x3b0] sm:$0xff]  }
  0x2d   :  { %8801 = vmatpush3.bf16.msra.mxu1 %v10249_v47  ;;  %8774 = vmatprep.subr.bf16.mxu0 %v10250_v48  ;;  %v10319_v47 = vld [vmem:[%s15995_s1 + $0x280] sm:$0xff]  }
  0x2e   :  { %8802 = vmatprep.subr.bf16.mxu1 %v10251_v49  ;;  %2062 = vmatprep.mubr.bf16.mxu0 %v10278_v9  ;;  %v10320_v48 = vld [vmem:[%s15994_s0 + $0x20] ss:$100 sps:$4 sm:$0xff]   ;;  %v10349_v9 = vld [vmem:[%s15995_s1 + $0x3d8] sm:$0xff]  }
  0x2f   :  { %2111 = vmatprep.mubr.bf16.mxu1 %v10281_v11  ;;  %v10322_v49 = vld [vmem:[%s15994_s0 + $0x24] ss:$100 sps:$4 sm:$0xff]   ;;  %v10351_v11 = vld [vmem:[%s15995_s1 + $0x398] sm:$0xff]  }
  0x30   :  { %8775 = vmatpush3.bf16.msra.mxu0 %v10252_v50  ;;  %v10323_v50 = vld [vmem:[%s15994_s0 + $0x28] ss:$100 sps:$4 sm:$0xff]  }
  0x31   :  { %8803 = vmatpush3.bf16.msra.mxu1 %v10253_v51  ;;  %8776 = vmatprep.subr.bf16.mxu0 %v10254_v52  ;;  %v10325_v51 = vld [vmem:[%s15994_s0 + $0x2c] ss:$100 sps:$4 sm:$0xff]   ;;  %v10326_v52 = vld [vmem:[%s15995_s1 + $0x378] sm:$0xff]  }
  0x32   :  { %8804 = vmatprep.subr.bf16.mxu1 %v10255_v53  ;;  %v10327_v53 = vld [vmem:[%s15995_s1 + $0x3f8] sm:$0xff]  }
  0x34   :  { %8777 = vmatpush3.bf16.msra.mxu0 %v10256_v54  ;;  %v10328_v54 = vld [vmem:[%s15995_s1 + $0x338] sm:$0xff]  }
  0x35   :  { %8805 = vmatpush3.bf16.msra.mxu1 %v10257_v55  ;;  %8778 = vmatprep.subr.bf16.mxu0 %v10264_v60  ;;  %v10329_v55 = vld [vmem:[%s15995_s1 + $0x3b8] sm:$0xff]   ;;  %v10334_v60 = vld [vmem:[%s15994_s0 + $0xec] ss:$100 sps:$4 sm:$0xff]  }
  0x36   :  { %8806 = vmatprep.subr.bf16.mxu1 %v10265_v61  ;;  %v10336_v61 = vld [vmem:[%s15994_s0 + $0xe8] ss:$100 sps:$4 sm:$0xff]  }
  0x38   :  { %8779 = vmatpush3.bf16.msra.mxu0 %v10266_v62  ;;  %v10337_v62 = vld [vmem:[%s15995_s1 + $0x368] sm:$0xff]  }
  0x39   :  { %8807 = vmatpush3.bf16.msra.mxu1 %v10267_v63  ;;  %8780 = vmatprep.subr.bf16.mxu0 %v10268_v0  ;;  %v10338_v63 = vld [vmem:[%s15995_s1 + $0x3e8] sm:$0xff]   ;;  %v10339_v0 = vld [vmem:[%s15994_s0 + $0xf4] ss:$100 sps:$4 sm:$0xff]  }
  0x3a   :  { %8808 = vmatprep.subr.bf16.mxu1 %v10269_v1  ;;  %v10341_v1 = vld [vmem:[%s15995_s1 + $0x328] sm:$0xff]  }
  0x3c   :  { %8781 = vmatpush3.bf16.msra.mxu0 %v10270_v2  ;;  %v10342_v2 = vld [vmem:[%s15995_s1 + $0x3a8] sm:$0xff]  }
  0x3d   :  { %8809 = vmatpush3.bf16.msra.mxu1 %v10271_v3  ;;  %8782 = vmatprep.subr.bf16.mxu0 %v10272_v4  ;;  %v10343_v3 = vld [vmem:[%s15994_s0 + $0xf0] ss:$100 sps:$4 sm:$0xff]   ;;  %v10344_v4 = vld [vmem:[%s15995_s1 + $0x360] sm:$0xff]  }
  0x3e   :  { %8810 = vmatprep.subr.bf16.mxu1 %v10273_v5  ;;  %v10345_v5 = vld [vmem:[%s15995_s1 + $0x3e0] sm:$0xff]  }
  0x40   :  { %8783 = vmatpush3.bf16.msra.mxu0 %v10274_v6  ;;  %v10346_v6 = vld [vmem:[%s15995_s1 + $0x320] sm:$0xff]  }
  0x41   :  { %8811 = vmatpush3.bf16.msra.mxu1 %v10275_v7  ;;  %8824 = vmatprep.subr.bf16.mxu0 %v10282_v12  ;;  %v10347_v7 = vld [vmem:[%s15995_s1 + $0x3a0] sm:$0xff]   ;;  %v10352_v12 = vld [vmem:[%s15995_s1 + $0x350] sm:$0xff]  }
  0x42   :  { %8852 = vmatprep.subr.bf16.mxu1 %v10283_v13  ;;  %v10353_v13 = vld [vmem:[%s15995_s1 + $0x3d0] sm:$0xff]  }
  0x43   :  { %2063 = vmatmul.mubr.bf16.vlgmr.msra.gmra.mxu0 %v10276_v8  ;;  %v10348_v8 = vld [vmem:[%s15995_s1 + $0x358] sm:$0xff]  }
  0x44   :  { %2112 = vmatmul.mubr.bf16.vlgmr.msra.gmra.mxu1 %v10279_v10  ;;  %8825 = vmatpush3.bf16.msra.mxu0 %v10284_v14  ;;  %v10350_v10 = vld [vmem:[%s15995_s1 + $0x318] sm:$0xff]   ;;  %v10354_v14 = vld [vmem:[%s15995_s1 + $0x310] sm:$0xff]  }
  0x45   :  { %8853 = vmatpush3.bf16.msra.mxu1 %v10285_v15  ;;  %8826 = vmatprep.subr.bf16.mxu0 %v10286_v16  ;;  %v10355_v15 = vld [vmem:[%s15995_s1 + $0x390] sm:$0xff]   ;;  %v10356_v16 = vld [vmem:[%s15995_s1 + $0x348] sm:$0xff]  }
  0x46   :  { %8854 = vmatprep.subr.bf16.mxu1 %v10287_v17  ;;  %2070 = vmatprep.mubr.bf16.mxu0 %v10290_v20  ;;  %v10357_v17 = vld [vmem:[%s15995_s1 + $0x3c8] sm:$0xff]   ;;  %v10360_v20 = vld [vmem:[%s15995_s1 + $0x340] sm:$0xff]  }
  0x47   :  { %2119 = vmatprep.mubr.bf16.mxu1 %v10295_v24  ;;  %v10364_v24 = vld [vmem:[%s15994_s0 + $0x30] ss:$100 sps:$4 sm:$0xff]  }
  0x48   :  { %8827 = vmatpush3.bf16.msra.mxu0 %v10288_v18  ;;  %v10358_v18 = vld [vmem:[%s15995_s1 + $0x308] sm:$0xff]  }
  0x49   :  { %8855 = vmatpush3.bf16.msra.mxu1 %v10289_v19  ;;  %8828 = vmatprep.subr.bf16.mxu0 %v10293_v22  ;;  %v10359_v19 = vld [vmem:[%s15995_s1 + $0x388] sm:$0xff]   ;;  %v10362_v22 = vld [vmem:[%s15995_s1 + $0x300] sm:$0xff]  }
  0x4a   :  { %8856 = vmatprep.subr.bf16.mxu1 %v10294_v23  ;;  %v10363_v23 = vld [vmem:[%s15995_s1 + $0x380] sm:$0xff]  }
  0x4b   :  { %2071 = vmatmul.mubr.bf16.gmra.mxu0 %v10292_v21  ;;  %v10361_v21 = vld [vmem:[%s15995_s1 + $0x3c0] sm:$0xff]  }
  0x4c   :  { %8829 = vmatpush3.bf16.msra.mxu0 %v10297_v25  ;;  %2120 = vmatmul.mubr.bf16.gmra.mxu1 %v10299_v27  ;;  %v10366_v25 = vld [vmem:[%s15994_s0 + $0x34] ss:$100 sps:$4 sm:$0xff]   ;;  %v10369_v27 = vld [vmem:[%s15994_s0 + $0x3c] ss:$100 sps:$4 sm:$0xff]  }
  0x4d   :  { %8857 = vmatpush3.bf16.msra.mxu1 %v10298_v26  ;;  %8830 = vmatprep.subr.bf16.mxu0 %v10300_v28  ;;  %v10367_v26 = vld [vmem:[%s15994_s0 + $0x38] ss:$100 sps:$4 sm:$0xff]  }
  0x4e   :  { %8858 = vmatprep.subr.bf16.mxu1 %v10301_v29  ;;  %2160 = vmatprep.mubr.bf16.mxu0 %v10322_v49  ;;  %v10370_v28 = vld [vmem:[%s15995_s1 + $0x478] sm:$0xff]  }
  0x4f   :  { %2209 = vmatprep.mubr.bf16.mxu1 %v10325_v51  ;;  %v10371_v29 = vld [vmem:[%s15995_s1 + $0x4f8] sm:$0xff]  }
  0x50   :  { %8831 = vmatpush3.bf16.msra.mxu0 %v10302_v30  ;;  %v10372_v30 = vld [vmem:[%s15995_s1 + $0x438] sm:$0xff]  }
  0x51   :  { %8859 = vmatpush3.bf16.msra.mxu1 %v10303_v31  ;;  %8832 = vmatprep.subr.bf16.mxu0 %v10304_v32  ;;  %v10373_v31 = vld [vmem:[%s15995_s1 + $0x4b8] sm:$0xff]   ;;  %v10374_v32 = vld [vmem:[%s15995_s1 + $0x470] sm:$0xff]  }
  0x52   :  { %8860 = vmatprep.subr.bf16.mxu1 %v10305_v33  ;;  %v10375_v33 = vld [vmem:[%s15995_s1 + $0x4f0] sm:$0xff]   ;;  %v10393_v49 = vld [vmem:[%s15995_s1 + $0x4d8] sm:$0xff]  }
  0x53   :  { %v10395_v51 = vld [vmem:[%s15995_s1 + $0x498] sm:$0xff]  }
  0x54   :  { %8833 = vmatpush3.bf16.msra.mxu0 %v10306_v34  ;;  %v10376_v34 = vld [vmem:[%s15995_s1 + $0x430] sm:$0xff]  }
  0x55   :  { %8861 = vmatpush3.bf16.msra.mxu1 %v10307_v35  ;;  %8834 = vmatprep.subr.bf16.mxu0 %v10308_v36  ;;  %v10377_v35 = vld [vmem:[%s15995_s1 + $0x4b0] sm:$0xff]   ;;  %v10378_v36 = vld [vmem:[%s15994_s0 + $0xfc] ss:$100 sps:$4 sm:$0xff]  }
  0x56   :  { %8862 = vmatprep.subr.bf16.mxu1 %v10309_v37  ;;  %v10380_v37 = vld [vmem:[%s15994_s0 + $0xf8] ss:$100 sps:$4 sm:$0xff]  }
  0x58   :  { %8835 = vmatpush3.bf16.msra.mxu0 %v10310_v38  ;;  %v10381_v38 = vld [vmem:[%s15995_s1 + $0x468] sm:$0xff]  }
  0x59   :  { %8863 = vmatpush3.bf16.msra.mxu1 %v10311_v39  ;;  %8836 = vmatprep.subr.bf16.mxu0 %v10312_v40  ;;  %v10382_v39 = vld [vmem:[%s15995_s1 + $0x4e8] sm:$0xff]  }
  0x5a   :  { %8864 = vmatprep.subr.bf16.mxu1 %v10313_v41  ;;  %v10383_v40 = vld [vmem:[%s15994_s0 + $0x104] ss:$100 sps:$4 sm:$0xff]  }
  0x5b   :  { %v10385_v41 = vld [vmem:[%s15995_s1 + $0x428] sm:$0xff]  }
  0x5c   :  { %8837 = vmatpush3.bf16.msra.mxu0 %v10314_v42  ;;  %v10386_v42 = vld [vmem:[%s15995_s1 + $0x4a8] sm:$0xff]  }
  0x5d   :  { %8865 = vmatpush3.bf16.msra.mxu1 %v10315_v43  ;;  %8838 = vmatprep.subr.bf16.mxu0 %v10316_v44  ;;  %v10387_v43 = vld [vmem:[%s15994_s0 + $0x100] ss:$100 sps:$4 sm:$0xff]  }
  0x5e   :  { %8866 = vmatprep.subr.bf16.mxu1 %v10317_v45  ;;  %v10388_v44 = vld [vmem:[%s15995_s1 + $0x460] sm:$0xff]  }
  0x5f   :  { %v10389_v45 = vld [vmem:[%s15995_s1 + $0x4e0] sm:$0xff]  }
  0x60   :  { %8839 = vmatpush3.bf16.msra.mxu0 %v10318_v46  ;;  %v10390_v46 = vld [vmem:[%s15995_s1 + $0x420] sm:$0xff]  }
  0x61   :  { %8867 = vmatpush3.bf16.msra.mxu1 %v10319_v47  ;;  %8880 = vmatprep.subr.bf16.mxu0 %v10326_v52  ;;  %v10391_v47 = vld [vmem:[%s15995_s1 + $0x4a0] sm:$0xff]   ;;  %v10396_v52 = vld [vmem:[%s15995_s1 + $0x450] sm:$0xff]  }
  0x62   :  { %8908 = vmatprep.subr.bf16.mxu1 %v10327_v53  ;;  %v10397_v53 = vld [vmem:[%s15995_s1 + $0x4d0] sm:$0xff]  }
  0x63   :  { %2161 = vmatmul.mubr.bf16.vlgmr.msra.gmra.mxu0 %v10320_v48  ;;  %v10392_v48 = vld [vmem:[%s15995_s1 + $0x458] sm:$0xff]  }
  0x64   :  { %2210 = vmatmul.mubr.bf16.vlgmr.msra.gmra.mxu1 %v10323_v50  ;;  %8881 = vmatpush3.bf16.msra.mxu0 %v10328_v54  ;;  %v10394_v50 = vld [vmem:[%s15995_s1 + $0x418] sm:$0xff]   ;;  %v10398_v54 = vld [vmem:[%s15995_s1 + $0x410] sm:$0xff]  }
  0x65   :  { %8909 = vmatpush3.bf16.msra.mxu1 %v10329_v55  ;;  %8882 = vmatprep.subr.bf16.mxu0 %v10330_v56  ;;  %v10399_v55 = vld [vmem:[%s15995_s1 + $0x490] sm:$0xff]   ;;  %v10400_v56 = vld [vmem:[%s15995_s1 + $0x448] sm:$0xff]  }
  0x66   :  { %8910 = vmatprep.subr.bf16.mxu1 %v10331_v57  ;;  %2168 = vmatprep.mubr.bf16.mxu0 %v10334_v60  ;;  %v10401_v57 = vld [vmem:[%s15995_s1 + $0x4c8] sm:$0xff]   ;;  %v10404_v60 = vld [vmem:[%s15995_s1 + $0x440] sm:$0xff]  }
  0x67   :  { %2217 = vmatprep.mubr.bf16.mxu1 %v10339_v0  ;;  %v10408_v0 = vld [vmem:[%s15994_s0 + $0x40] ss:$100 sps:$4 sm:$0xff]  }
  0x68   :  { %8883 = vmatpush3.bf16.msra.mxu0 %v10332_v58  ;;  %v10402_v58 = vld [vmem:[%s15995_s1 + $0x408] sm:$0xff]  }
  0x69   :  { %8911 = vmatpush3.bf16.msra.mxu1 %v10333_v59  ;;  %8884 = vmatprep.subr.bf16.mxu0 %v10337_v62  ;;  %v10403_v59 = vld [vmem:[%s15995_s1 + $0x488] sm:$0xff]   ;;  %v10406_v62 = vld [vmem:[%s15995_s1 + $0x400] sm:$0xff]  }
  0x6a   :  { %8912 = vmatprep.subr.bf16.mxu1 %v10338_v63  ;;  %v10407_v63 = vld [vmem:[%s15995_s1 + $0x480] sm:$0xff]  }
  0x6b   :  { %2169 = vmatmul.mubr.bf16.gmra.mxu0 %v10336_v61  ;;  %v10405_v61 = vld [vmem:[%s15995_s1 + $0x4c0] sm:$0xff]  }
  0x6c   :  { %8885 = vmatpush3.bf16.msra.mxu0 %v10341_v1  ;;  %2218 = vmatmul.mubr.bf16.gmra.mxu1 %v10343_v3  ;;  %v10410_v1 = vld [vmem:[%s15994_s0 + $0x44] ss:$100 sps:$4 sm:$0xff]   ;;  %v10413_v3 = vld [vmem:[%s15994_s0 + $0x4c] ss:$100 sps:$4 sm:$0xff]  }
  0x6d   :  { %8913 = vmatpush3.bf16.msra.mxu1 %v10342_v2  ;;  %8886 = vmatprep.subr.bf16.mxu0 %v10344_v4  ;;  %v10411_v2 = vld [vmem:[%s15994_s0 + $0x48] ss:$100 sps:$4 sm:$0xff]   ;;  %v10414_v4 = vld [vmem:[%s15995_s1 + $0x578] sm:$0xff]  }
  0x6e   :  { %8914 = vmatprep.subr.bf16.mxu1 %v10345_v5  ;;  %2258 = vmatprep.mubr.bf16.mxu0 %v10366_v25  ;;  %v10415_v5 = vld [vmem:[%s15995_s1 + $0x5f8] sm:$0xff]  }
  0x6f   :  { %2307 = vmatprep.mubr.bf16.mxu1 %v10369_v27  ;;  %v10437_v25 = vld [vmem:[%s15995_s1 + $0x5d8] sm:$0xff]  }
  0x70   :  { %8887 = vmatpush3.bf16.msra.mxu0 %v10346_v6  ;;  %v10416_v6 = vld [vmem:[%s15995_s1 + $0x538] sm:$0xff]  }
  0x71   :  { %8915 = vmatpush3.bf16.msra.mxu1 %v10347_v7  ;;  %8888 = vmatprep.subr.bf16.mxu0 %v10348_v8  ;;  %v10417_v7 = vld [vmem:[%s15995_s1 + $0x5b8] sm:$0xff]   ;;  %v10418_v8 = vld [vmem:[%s15995_s1 + $0x570] sm:$0xff]  }
  0x72   :  { %8916 = vmatprep.subr.bf16.mxu1 %v10349_v9  ;;  %v10419_v9 = vld [vmem:[%s15995_s1 + $0x5f0] sm:$0xff]   ;;  %v10439_v27 = vld [vmem:[%s15995_s1 + $0x598] sm:$0xff]  }
  0x74   :  { %8889 = vmatpush3.bf16.msra.mxu0 %v10350_v10  ;;  %v10420_v10 = vld [vmem:[%s15995_s1 + $0x530] sm:$0xff]  }
  0x75   :  { %8917 = vmatpush3.bf16.msra.mxu1 %v10351_v11  ;;  %8890 = vmatprep.subr.bf16.mxu0 %v10352_v12  ;;  %v10421_v11 = vld [vmem:[%s15995_s1 + $0x5b0] sm:$0xff]  }
  0x76   :  { %8918 = vmatprep.subr.bf16.mxu1 %v10353_v13  ;;  %v10422_v12 = vld [vmem:[%s15994_s0 + $0x10c] ss:$100 sps:$4 sm:$0xff]  }
  0x77   :  { %v10424_v13 = vld [vmem:[%s15994_s0 + $0x108] ss:$100 sps:$4 sm:$0xff]  }
  0x78   :  { %8891 = vmatpush3.bf16.msra.mxu0 %v10354_v14  ;;  %v10425_v14 = vld [vmem:[%s15995_s1 + $0x568] sm:$0xff]  }
  0x79   :  { %8919 = vmatpush3.bf16.msra.mxu1 %v10355_v15  ;;  %8892 = vmatprep.subr.bf16.mxu0 %v10356_v16  ;;  %v10426_v15 = vld [vmem:[%s15995_s1 + $0x5e8] sm:$0xff]   ;;  %v10427_v16 = vld [vmem:[%s15994_s0 + $0x114] ss:$100 sps:$4 sm:$0xff]  }
  0x7a   :  { %8920 = vmatprep.subr.bf16.mxu1 %v10357_v17  ;;  %v10429_v17 = vld [vmem:[%s15995_s1 + $0x528] sm:$0xff]  }
  0x7c   :  { %8893 = vmatpush3.bf16.msra.mxu0 %v10358_v18  ;;  %v10430_v18 = vld [vmem:[%s15995_s1 + $0x5a8] sm:$0xff]  }
  0x7d   :  { %8921 = vmatpush3.bf16.msra.mxu1 %v10359_v19  ;;  %8894 = vmatprep.subr.bf16.mxu0 %v10360_v20  ;;  %v10431_v19 = vld [vmem:[%s15994_s0 + $0x110] ss:$100 sps:$4 sm:$0xff]   ;;  %v10432_v20 = vld [vmem:[%s15995_s1 + $0x560] sm:$0xff]  }
  0x7e   :  { %8922 = vmatprep.subr.bf16.mxu1 %v10361_v21  ;;  %v10433_v21 = vld [vmem:[%s15995_s1 + $0x5e0] sm:$0xff]  }
  0x80   :  { %8895 = vmatpush3.bf16.msra.mxu0 %v10362_v22  ;;  %v10434_v22 = vld [vmem:[%s15995_s1 + $0x520] sm:$0xff]  }
  0x81   :  { %8923 = vmatpush3.bf16.msra.mxu1 %v10363_v23  ;;  %8936 = vmatprep.subr.bf16.mxu0 %v10370_v28  ;;  %v10435_v23 = vld [vmem:[%s15995_s1 + $0x5a0] sm:$0xff]   ;;  %v10440_v28 = vld [vmem:[%s15995_s1 + $0x550] sm:$0xff]  }
  0x82   :  { %8964 = vmatprep.subr.bf16.mxu1 %v10371_v29  ;;  %v10441_v29 = vld [vmem:[%s15995_s1 + $0x5d0] sm:$0xff]  }
  0x83   :  { %2259 = vmatmul.mubr.bf16.vlgmr.msra.gmra.mxu0 %v10364_v24  ;;  %v10436_v24 = vld [vmem:[%s15995_s1 + $0x558] sm:$0xff]  }
  0x84   :  { %2308 = vmatmul.mubr.bf16.vlgmr.msra.gmra.mxu1 %v10367_v26  ;;  %8937 = vmatpush3.bf16.msra.mxu0 %v10372_v30  ;;  %v10438_v26 = vld [vmem:[%s15995_s1 + $0x518] sm:$0xff]   ;;  %v10442_v30 = vld [vmem:[%s15995_s1 + $0x510] sm:$0xff]  }
  0x85   :  { %8965 = vmatpush3.bf16.msra.mxu1 %v10373_v31  ;;  %8938 = vmatprep.subr.bf16.mxu0 %v10374_v32  ;;  %v10443_v31 = vld [vmem:[%s15995_s1 + $0x590] sm:$0xff]   ;;  %v10444_v32 = vld [vmem:[%s15995_s1 + $0x548] sm:$0xff]  }
  0x86   :  { %8966 = vmatprep.subr.bf16.mxu1 %v10375_v33  ;;  %2266 = vmatprep.mubr.bf16.mxu0 %v10378_v36  ;;  %v10445_v33 = vld [vmem:[%s15995_s1 + $0x5c8] sm:$0xff]   ;;  %v10448_v36 = vld [vmem:[%s15995_s1 + $0x540] sm:$0xff]  }
  0x87   :  { %2315 = vmatprep.mubr.bf16.mxu1 %v10383_v40  ;;  %v10452_v40 = vld [vmem:[%s15994_s0 + $0x50] ss:$100 sps:$4 sm:$0xff]  }
  0x88   :  { %8939 = vmatpush3.bf16.msra.mxu0 %v10376_v34  ;;  %v10446_v34 = vld [vmem:[%s15995_s1 + $0x508] sm:$0xff]  }
  0x89   :  { %8967 = vmatpush3.bf16.msra.mxu1 %v10377_v35  ;;  %8940 = vmatprep.subr.bf16.mxu0 %v10381_v38  ;;  %v10447_v35 = vld [vmem:[%s15995_s1 + $0x588] sm:$0xff]   ;;  %v10450_v38 = vld [vmem:[%s15995_s1 + $0x500] sm:$0xff]  }
  0x8a   :  { %8968 = vmatprep.subr.bf16.mxu1 %v10382_v39  ;;  %v10451_v39 = vld [vmem:[%s15995_s1 + $0x580] sm:$0xff]  }
  0x8b   :  { %2267 = vmatmul.mubr.bf16.gmra.mxu0 %v10380_v37  ;;  %v10449_v37 = vld [vmem:[%s15995_s1 + $0x5c0] sm:$0xff]  }
  0x8c   :  { %8941 = vmatpush3.bf16.msra.mxu0 %v10385_v41  ;;  %2316 = vmatmul.mubr.bf16.gmra.mxu1 %v10387_v43  ;;  %v10454_v41 = vld [vmem:[%s15994_s0 + $0x54] ss:$100 sps:$4 sm:$0xff]   ;;  %v10457_v43 = vld [vmem:[%s15994_s0 + $0x5c] ss:$100 sps:$4 sm:$0xff]  }
  0x8d   :  { %8969 = vmatpush3.bf16.msra.mxu1 %v10386_v42  ;;  %8942 = vmatprep.subr.bf16.mxu0 %v10388_v44  ;;  %v10455_v42 = vld [vmem:[%s15994_s0 + $0x58] ss:$100 sps:$4 sm:$0xff]  }
  0x8e   :  { %8970 = vmatprep.subr.bf16.mxu1 %v10389_v45  ;;  %2356 = vmatprep.mubr.bf16.mxu0 %v10410_v1  ;;  %v11096_v44 = vld [vmem:[%s15995_s1 + $0x78] sm:$0xff]   ;;  %v11101_v1 = vld [vmem:[%s15995_s1 + $0x28] sm:$0xff]  }
  0x8f   :  { %2405 = vmatprep.mubr.bf16.mxu1 %v10413_v3  ;;  %v10458_v45 = vld [vmem:[%s15995_s1 + $0x638] sm:$0xff]  }
  0x90   :  { %8943 = vmatpush3.bf16.msra.mxu0 %v10390_v46  ;;  %v10459_v46 = vld [vmem:[%s15995_s1 + $0x630] sm:$0xff]  }
  0x91   :  { %8971 = vmatpush3.bf16.msra.mxu1 %v10391_v47  ;;  %8944 = vmatprep.subr.bf16.mxu0 %v10392_v48  ;;  %v10460_v47 = vld [vmem:[%s15994_s0 + $0x11c] ss:$100 sps:$4 sm:$0xff]  }
  0x92   :  { %8972 = vmatprep.subr.bf16.mxu1 %v10393_v49  ;;  %v11097_v48 = vld [vmem:[%s15995_s1 + $0x38] sm:$0xff]  }
  0x93   :  { %v10462_v49 = vld [vmem:[%s15994_s0 + $0x118] ss:$100 sps:$4 sm:$0xff]  }
  0x94   :  { %8945 = vmatpush3.bf16.msra.mxu0 %v10394_v50  ;;  %v11098_v50 = vld [vmem:[%s15995_s1 + $0x70] sm:$0xff]  }
  0x95   :  { %8973 = vmatpush3.bf16.msra.mxu1 %v10395_v51  ;;  %8946 = vmatprep.subr.bf16.mxu0 %v10396_v52  ;;  %v10463_v51 = vld [vmem:[%s15995_s1 + $0x628] sm:$0xff]  }
  0x96   :  { %8974 = vmatprep.subr.bf16.mxu1 %v10397_v53  ;;  %v10464_v52 = vld [vmem:[%s15994_s0 + $0x124] ss:$100 sps:$4 sm:$0xff]  }
  0x97   :  { %v10466_v53 = vld [vmem:[%s15994_s0 + $0x120] ss:$100 sps:$4 sm:$0xff]  }
  0x98   :  { %8947 = vmatpush3.bf16.msra.mxu0 %v10398_v54 }
  0x99   :  { %8975 = vmatpush3.bf16.msra.mxu1 %v10399_v55  ;;  %8948 = vmatprep.subr.bf16.mxu0 %v10400_v56  ;;  %v11099_v55 = vld [vmem:[%s15995_s1 + $0x30] sm:$0xff]  }
  0x9a   :  { %8976 = vmatprep.subr.bf16.mxu1 %v10401_v57  ;;  %v10467_v57 = vld [vmem:[%s15995_s1 + $0x620] sm:$0xff]  }
  0x9c   :  { %8949 = vmatpush3.bf16.msra.mxu0 %v10402_v58 }
  0x9d   :  { %8977 = vmatpush3.bf16.msra.mxu1 %v10403_v59  ;;  %8950 = vmatprep.subr.bf16.mxu0 %v10404_v60  ;;  %v11100_v59 = vld [vmem:[%s15995_s1 + $0x68] sm:$0xff]  }
  0x9e   :  { %8978 = vmatprep.subr.bf16.mxu1 %v10405_v61 }
  0xa0   :  { %8951 = vmatpush3.bf16.msra.mxu0 %v10406_v62  ;;  %v10472_v62 = vld [vmem:[%s15994_s0 + $0x60] ss:$100 sps:$4 sm:$0xff]  }
  0xa1   :  { %8979 = vmatpush3.bf16.msra.mxu1 %v10407_v63  ;;  %8992 = vmatprep.subr.bf16.mxu0 %v10414_v4  ;;  %v11102_v4 = vld [vmem:[%s15995_s1 + $0x60] sm:$0xff]  }
  0xa2   :  { %9020 = vmatprep.subr.bf16.mxu1 %v10415_v5  ;;  %v10475_v5 = vld [vmem:[%s15994_s0 + $0x194] ss:$100 sps:$4 sm:$0xff]  }
  0xa3   :  { %2357 = vmatmul.mubr.bf16.vlgmr.msra.gmra.mxu0 %v10408_v0 }
  0xa4   :  { %2406 = vmatmul.mubr.bf16.vlgmr.msra.gmra.mxu1 %v10411_v2  ;;  %8993 = vmatpush3.bf16.msra.mxu0 %v10416_v6  ;;  %v10468_v2 = vld [vmem:[%s15995_s1 + $0x618] sm:$0xff]  }
  0xa5   :  { %9021 = vmatpush3.bf16.msra.mxu1 %v10417_v7  ;;  %8994 = vmatprep.subr.bf16.mxu0 %v10418_v8 }
  0xa6   :  { %9022 = vmatprep.subr.bf16.mxu1 %v10419_v9  ;;  %2364 = vmatprep.mubr.bf16.mxu0 %v10422_v12  ;;  %v11104_v12 = vld [vmem:[%s15995_s1 + $0x58] sm:$0xff]  }
  0xa7   :  { %2413 = vmatprep.mubr.bf16.mxu1 %v10427_v16  ;;  %v11106_v16 = vld [vmem:[%s15995_s1 + $0x50] sm:$0xff]  }
  0xa8   :  { %8995 = vmatpush3.bf16.msra.mxu0 %v10420_v10 }
  0xa9   :  { %9023 = vmatpush3.bf16.msra.mxu1 %v10421_v11  ;;  %8996 = vmatprep.subr.bf16.mxu0 %v10425_v14  ;;  %v11103_v11 = vld [vmem:[%s15995_s1 + $0x20] sm:$0xff]  }
  0xaa   :  { %9024 = vmatprep.subr.bf16.mxu1 %v10426_v15  ;;  %v11105_v15 = vld [vmem:[%s15995_s1 + $0x18] sm:$0xff]  }
  0xab   :  { %2365 = vmatmul.mubr.bf16.gmra.mxu0 %v10424_v13  ;;  %v10469_v13 = vld [vmem:[%s15995_s1 + $0x610] sm:$0xff]  }
  0xac   :  { %8997 = vmatpush3.bf16.msra.mxu0 %v10429_v17  ;;  %2414 = vmatmul.mubr.bf16.gmra.mxu1 %v10431_v19  ;;  %v10470_v17 = vld [vmem:[%s15995_s1 + $0x608] sm:$0xff]  }
  0xad   :  { %9025 = vmatpush3.bf16.msra.mxu1 %v10430_v18  ;;  %8998 = vmatprep.subr.bf16.mxu0 %v10432_v20  ;;  %v11107_v18 = vld [vmem:[%s15995_s1 + $0x10] sm:$0xff]   ;;  %v11108_v19 = vld [vmem:[%s15995_s1 + $0x48] sm:$0xff]   ;;  %v10471_v20 = vld [vmem:[%s15995_s1 + $0x600] sm:$0xff]  }
  0xae   :  { %9026 = vmatprep.subr.bf16.mxu1 %v10433_v21  ;;  %2454 = vmatprep.mubr.bf16.mxu0 %v10454_v41  ;;  %v11109_v21 = vld [vmem:[%s15995_s1 + $0x8] sm:$0xff]   ;;  %v11115_v41 = vld [vmem:[%s15995_s1 + $0x138] sm:$0xff]  }
  0xaf   :  { %2503 = vmatprep.mubr.bf16.mxu1 %v10457_v43 }
  0xb0   :  { %8999 = vmatpush3.bf16.msra.mxu0 %v10434_v22  ;;  %v11110_v22 = vld [vmem:[%s15995_s1 + $0x40] sm:$0xff]  }
  0xb1   :  { %9027 = vmatpush3.bf16.msra.mxu1 %v10435_v23  ;;  %9000 = vmatprep.subr.bf16.mxu0 %v10436_v24 }
  0xb2   :  { %9028 = vmatprep.subr.bf16.mxu1 %v10437_v25  ;;  %v10473_v25 = vld [vmem:[%s15994_s0 + $0x190] ss:$100 sps:$4 sm:$0xff]  }
  0xb4   :  { %9001 = vmatpush3.bf16.msra.mxu0 %v10438_v26  ;;  %v10476_v26 = vld [vmem:[%s15994_s0 + $0x128] ss:$100 sps:$4 sm:$0xff]  }
  0xb5   :  { %9029 = vmatpush3.bf16.msra.mxu1 %v10439_v27  ;;  %9002 = vmatprep.subr.bf16.mxu0 %v10440_v28  ;;  %v11111_v28 = vld [vmem:[%s15995_s1] sm:$0xff]  }
  0xb6   :  { %9030 = vmatprep.subr.bf16.mxu1 %v10441_v29 }
  0xb8   :  { %9003 = vmatpush3.bf16.msra.mxu0 %v10442_v30 }
  0xb9   :  { %9031 = vmatpush3.bf16.msra.mxu1 %v10443_v31  ;;  %9004 = vmatprep.subr.bf16.mxu0 %v10444_v32  ;;  %v11112_v31 = vld [vmem:[%s15995_s1 + $0xf8] sm:$0xff]  }
  0xba   :  { %9032 = vmatprep.subr.bf16.mxu1 %v10445_v33  ;;  %v11113_v32 = vld [vmem:[%s15995_s1 + $0x178] sm:$0xff]  }
  0xbc   :  { %9005 = vmatpush3.bf16.msra.mxu0 %v10446_v34  ;;  %v10477_v34 = vld [vmem:[%s15994_s0 + $0x25c] ss:$100 sps:$4 sm:$0xff]  }
  0xbd   :  { %9033 = vmatpush3.bf16.msra.mxu1 %v10447_v35  ;;  %9006 = vmatprep.subr.bf16.mxu0 %v10448_v36 }
  0xbe   :  { %9034 = vmatprep.subr.bf16.mxu1 %v10449_v37  ;;  %v10482_v37 = vld [vmem:[%s15994_s0 + $0x19c] ss:$100 sps:$4 sm:$0xff]  }
  0xc0   :  { %9007 = vmatpush3.bf16.msra.mxu0 %v10450_v38 }
  0xc1   :  { %9035 = vmatpush3.bf16.msra.mxu1 %v10451_v39  ;;  %10118 = vmatprep.subr.bf16.mxu0 %v10458_v45 }
  0xc2   :  { %9058 = vmatprep.subr.bf16.mxu1 %v11096_v44  ;;  %v11116_v44 = vld [vmem:[%s15995_s1 + $0xf0] sm:$0xff]  }
  0xc3   :  { %2455 = vmatmul.mubr.bf16.vlgmr.msra.gmra.mxu0 %v10452_v40  ;;  %v11114_v40 = vld [vmem:[%s15995_s1 + $0xb8] sm:$0xff]  }
  0xc4   :  { %2504 = vmatmul.mubr.bf16.vlgmr.msra.gmra.mxu1 %v10455_v42  ;;  %10119 = vmatpush3.bf16.msra.mxu0 %v10458_v45  ;;  %v11117_v45 = vld [vmem:[%s15995_s1 + $0x170] sm:$0xff]  }
  0xc5   :  { %9059 = vmatpush3.bf16.msra.mxu1 %v11097_v48  ;;  %10120 = vmatprep.subr.bf16.mxu0 %v10459_v46 }
  0xc6   :  { %9060 = vmatprep.subr.bf16.mxu1 %v11098_v50  ;;  %2462 = vmatprep.mubr.bf16.mxu0 %v10460_v47  ;;  %v11119_v50 = vld [vmem:[%s15995_s1 + $0x130] sm:$0xff]  }
  0xc7   :  { %2511 = vmatprep.mubr.bf16.mxu1 %v10464_v52  ;;  %v11121_v52 = vld [vmem:[%s15995_s1 + $0x168] sm:$0xff]  }
  0xc8   :  { %10121 = vmatpush3.bf16.msra.mxu0 %v10459_v46  ;;  %v10479_v46 = vld [vmem:[%s15994_s0 + $0x258] ss:$100 sps:$4 sm:$0xff]  }
  0xc9   :  { %9061 = vmatpush3.bf16.msra.mxu1 %v11099_v55  ;;  %10122 = vmatprep.subr.bf16.mxu0 %v10463_v51  ;;  %v11123_v55 = vld [vmem:[%s15995_s1 + $0x128] sm:$0xff]  }
  0xca   :  { %9062 = vmatprep.subr.bf16.mxu1 %v11100_v59 }
  0xcb   :  { %2463 = vmatmul.mubr.bf16.gmra.mxu0 %v10462_v49  ;;  %v11118_v49 = vld [vmem:[%s15995_s1 + $0xb0] sm:$0xff]  }
  0xcc   :  { %2512 = vmatmul.mubr.bf16.gmra.mxu1 %v10466_v53  ;;  %10123 = vmatpush3.bf16.msra.mxu0 %v10463_v51  ;;  %v11120_v51 = vld [vmem:[%s15995_s1 + $0xe8] sm:$0xff]  }
  0xcd   :  { %9063 = vmatpush3.bf16.msra.mxu1 %v11101_v1  ;;  %10124 = vmatprep.subr.bf16.mxu0 %v10467_v57  ;;  %v10485_v53 = vld [vmem:[%s15994_s0 + $0x1a4] ss:$100 sps:$4 sm:$0xff]  }
  0xce   :  { %9064 = vmatprep.subr.bf16.mxu1 %v11102_v4  ;;  %10134 = vmatprep.mubr.bf16.mxu0 %v10472_v62  ;;  %v11129_v4 = vld [vmem:[%s15995_s1 + $0x158] sm:$0xff]  }
  0xcf   :  { %2906 = vmatprep.mubr.bf16.mxu1 %v10475_v5 }
  0xd0   :  { %10125 = vmatpush3.bf16.msra.mxu0 %v10467_v57  ;;  %v11124_v57 = vld [vmem:[%s15995_s1 + $0xe0] sm:$0xff]  }
  0xd1   :  { %9065 = vmatpush3.bf16.msra.mxu1 %v11103_v11  ;;  %10126 = vmatprep.subr.bf16.mxu0 %v10468_v2 }
  0xd2   :  { %9066 = vmatprep.subr.bf16.mxu1 %v11104_v12  ;;  %v11130_v12 = vld [vmem:[%s15995_s1 + $0x98] sm:$0xff]  }
  0xd4   :  { %10127 = vmatpush3.bf16.msra.mxu0 %v10468_v2 }
  0xd5   :  { %9067 = vmatpush3.bf16.msra.mxu1 %v11105_v15  ;;  %10128 = vmatprep.subr.bf16.mxu0 %v10469_v13  ;;  %v11133_v15 = vld [vmem:[%s15995_s1 + $0x150] sm:$0xff]  }
  0xd6   :  { %9068 = vmatprep.subr.bf16.mxu1 %v11106_v16 }
  0xd8   :  { %10129 = vmatpush3.bf16.msra.mxu0 %v10469_v13  ;;  %v11131_v13 = vld [vmem:[%s15995_s1 + $0x118] sm:$0xff]  }
  0xd9   :  { %9069 = vmatpush3.bf16.msra.mxu1 %v11107_v18  ;;  %10130 = vmatprep.subr.bf16.mxu0 %v10470_v17 }
  0xda   :  { %9070 = vmatprep.subr.bf16.mxu1 %v11108_v19 }
  0xdc   :  { %10131 = vmatpush3.bf16.msra.mxu0 %v10470_v17 }
  0xdd   :  { %9071 = vmatpush3.bf16.msra.mxu1 %v11109_v21  ;;  %10132 = vmatprep.subr.bf16.mxu0 %v10471_v20  ;;  %v11135_v21 = vld [vmem:[%s15995_s1 + $0x110] sm:$0xff]  }
  0xde   :  { %9072 = vmatprep.subr.bf16.mxu1 %v11110_v22 }
  0xe0   :  { %10133 = vmatpush3.bf16.msra.mxu0 %v10471_v20  ;;  %v11134_v20 = vld [vmem:[%s15995_s1 + $0x90] sm:$0xff]  }
  0xe1   :  { %9073 = vmatpush3.bf16.msra.mxu1 %v11111_v28  ;;  %9086 = vmatprep.subr.bf16.mxu0 %v11112_v31  ;;  %v11139_v28 = vld [vmem:[%s15995_s1 + $0x108] sm:$0xff]   ;;  %v11140_v31 = vld [vmem:[%s15995_s1 + $0xc0] sm:$0xff]  }
  0xe2   :  { %9114 = vmatprep.subr.bf16.mxu1 %v11113_v32  ;;  %v11141_v32 = vld [vmem:[%s15995_s1 + $0x140] sm:$0xff]  }
  0xe3   :  { %v8728_v54 = vpop.f32.mrf.mxu0  ;;  %10135 = vmatmul.mubr.bf16.vlgmr.msra.gmra.mxu0 %v10476_v26 }
  0xe4   :  { %v8756_v56 = vpop.f32.mrf.mxu1  ;;  %2907 = vmatmul.mubr.bf16.vlgmr.msra.gmra.mxu1 %v10473_v25  ;;  %9087 = vmatpush3.bf16.msra.mxu0 %v11114_v40  ;;  %v11143_v40 = vld [vmem:[%s15995_s1 + $0x100] sm:$0xff]  }
  0xe5   :  { %v8729_v58 = vpop.f32.mrf.mxu0  ;;  %9115 = vmatpush3.bf16.msra.mxu1 %v11115_v41  ;;  %9088 = vmatprep.subr.bf16.mxu0 %v11116_v44  ;;  %v10486_v41 = vld [vmem:[%s15994_s0 + $0x264] ss:$100 sps:$4 sm:$0xff]   ;;  %v11145_v44 = vld [vmem:[%s15995_s1 + $0x278] sm:$0xff]  }
  0xe6   :  { %v8730_v60 = vadd.f32 %v8729_v58, %v8728_v54  ;;  %v8757_v61 = vpop.f32.mrf.mxu1  ;;  %9116 = vmatprep.subr.bf16.mxu1 %v11117_v45  ;;  %2914 = vmatprep.mubr.bf16.mxu1 %v10477_v34  ;;  %v11122_v54 = vld [vmem:[%s15995_s1 + $0xa8] sm:$0xff]   ;;  %v11125_v58 = vld [vmem:[%s15995_s1 + $0x160] sm:$0xff]  }
  0xe7   :  { %v8758_v63 = vadd.f32 %v8757_v61, %v8756_v56  ;;  %v8731_v0 = vpop.f32.mrf.mxu0  ;;  %2955 = vmatprep.mubr.bf16.mxu0 %v10482_v37  ;;  %v10483_v34 = vld [vmem:[%s15994_s0 + $0x1a0] ss:$100 sps:$4 sm:$0xff]   ;;  %v10489_v45 = vld [vmem:[%s15994_s0 + $0x26c] ss:$100 sps:$4 sm:$0xff]  }
  0xe8   :  { %v8759_v3 = vpop.f32.mrf.mxu1  ;;  %9089 = vmatpush3.bf16.msra.mxu0 %v11118_v49  ;;  %v11146_v49 = vld [vmem:[%s15995_s1 + $0x1b8] sm:$0xff]  }
  0xe9   :  { %v12387_v6 = vadd.f32 %v8758_v63, %v8730_v60  ;;  %v8732_v7 = vpop.f32.mrf.mxu0  ;;  %9117 = vmatpush3.bf16.msra.mxu1 %v11119_v50  ;;  %9090 = vmatprep.subr.bf16.mxu0 %v11120_v51  ;;  %v11126_v63 = vld [vmem:[%s15995_s1 + $0xa0] sm:$0xff]   ;;  %v11147_v50 = vld [vmem:[%s15995_s1 + $0x238] sm:$0xff]   ;;  %v11148_v51 = vld [vmem:[%s15995_s1 + $0x1f0] sm:$0xff]  }
  0xea   :  { %v8733_v8 = vadd.f32 %v8732_v7, %v8731_v0  ;;  %v8760_v9 = vpop.f32.mrf.mxu1  ;;  %9118 = vmatprep.subr.bf16.mxu1 %v11121_v52  ;;  %v11127_v0 = vld [vmem:[%s15995_s1 + $0x120] sm:$0xff]   ;;  %v11149_v52 = vld [vmem:[%s15995_s1 + $0x270] sm:$0xff]  }
  0xeb   :  { %v8761_v10 = vadd.f32 %v8760_v9, %v8759_v3  ;;  %v8734_v23 = vpop.f32.mrf.mxu0  ;;  %v11128_v3 = vld [vmem:[%s15995_s1 + $0xd8] sm:$0xff]  }
  0xec   :  { %v8762_v24 = vpop.f32.mrf.mxu1  ;;  %2915 = vmatmul.mubr.bf16.gmra.mxu1 %v10479_v46  ;;  %9091 = vmatpush3.bf16.msra.mxu0 %v11122_v54  ;;  %v10491_v54 = vld [vmem:[%s15994_s0 + $0x268] ss:$100 sps:$4 sm:$0xff]  }
  0xed   :  { %v12398_v14 = vadd.f32 %v8761_v10, %v8733_v8  ;;  %v8735_v27 = vpop.f32.mrf.mxu0  ;;  %9119 = vmatpush3.bf16.msra.mxu1 %v11123_v55  ;;  %9092 = vmatprep.subr.bf16.mxu0 %v11124_v57  ;;  %v11151_v57 = vld [vmem:[%s15995_s1 + $0x230] sm:$0xff]  }
  0xee   :  { %v8736_v29 = vadd.f32 %v8735_v27, %v8734_v23  ;;  %v8763_v30 = vpop.f32.mrf.mxu1  ;;  %9120 = vmatprep.subr.bf16.mxu1 %v11125_v58  ;;  %3004 = vmatprep.mubr.bf16.mxu1 %v10485_v53  ;;  %v11136_v23 = vld [vmem:[%s15995_s1 + $0xc8] sm:$0xff]   ;;  %v10488_v53 = vld [vmem:[%s15994_s0 + $0x260] ss:$100 sps:$4 sm:$0xff]  }
  0xef   :  { %v8764_v33 = vadd.f32 %v8763_v30, %v8762_v24  ;;  %v8737_v35 = vpop.f32.mrf.mxu0  ;;  %v11138_v27 = vld [vmem:[%s15995_s1 + $0x88] sm:$0xff]  }
  0xf0   :  { %v8765_v36 = vpop.f32.mrf.mxu1  ;;  %9093 = vmatpush3.bf16.msra.mxu0 %v11126_v63  ;;  %v11152_v58 = vld [vmem:[%s15995_s1 + $0x1e8] sm:$0xff]  }
  0xf1   :  { %v12445_v38 = vadd.f32 %v8764_v33, %v8736_v29  ;;  %v8738_v39 = vpop.f32.mrf.mxu0  ;;  %9121 = vmatpush3.bf16.msra.mxu1 %v11127_v0  ;;  %9094 = vmatprep.subr.bf16.mxu0 %v11128_v3  ;;  %v10480_v33 = vld [vmem:[%s15994_s0 + $0x198] ss:$100 sps:$4 sm:$0xff]   ;;  %v11155_v63 = vld [vmem:[%s15995_s1 + $0x228] sm:$0xff]   ;;  %v11156_v0 = vld [vmem:[%s15995_s1 + $0x1e0] sm:$0xff]  }
  0xf2   :  { %v8739_v42 = vadd.f32 %v8738_v39, %v8737_v35  ;;  %v8766_v43 = vpop.f32.mrf.mxu1  ;;  %9122 = vmatprep.subr.bf16.mxu1 %v11129_v4  ;;  %v11142_v39 = vld [vmem:[%s15995_s1 + $0x80] sm:$0xff]   ;;  %v11160_v4 = vld [vmem:[%s15995_s1 + $0x1d8] sm:$0xff]  }
  0xf3   :  { %v8767_v47 = vadd.f32 %v8766_v43, %v8765_v36  ;;  %v11144_v43 = vld [vmem:[%s15995_s1 + $0x1f8] sm:$0xff]   ;;  %v11159_v3 = vld [vmem:[%s15995_s1 + $0x220] sm:$0xff]  }
  0xf4   :  { %9095 = vmatpush3.bf16.msra.mxu0 %v11130_v12  ;;  %v11163_v12 = vld [vmem:[%s15995_s1 + $0x218] sm:$0xff]  }
  0xf5   :  { %v12462_v48 = vadd.f32 %v8767_v47, %v8739_v42  ;;  %9123 = vmatpush3.bf16.msra.mxu1 %v11131_v13 }
  0xf6   :  { %9124 = vmatprep.subr.bf16.mxu1 %v11133_v15  ;;  %v11165_v15 = vld [vmem:[%s15995_s1 + $0x250] sm:$0xff]  }
  0xf9   :  { %9125 = vmatpush3.bf16.msra.mxu1 %v11135_v21 }
 0x103   :  { %v8784_v56 = vpop.f32.mrf.mxu0 }
 0x104   :  { %v8812_v59 = vpop.f32.mrf.mxu1 }
 0x105   :  { %v8785_v60 = vpop.f32.mrf.mxu0 }
 0x106   :  { %v8786_v61 = vadd.f32 %v8785_v60, %v8784_v56  ;;  %v8813_v62 = vpop.f32.mrf.mxu1  ;;  %v11150_v56 = vld [vmem:[%s15995_s1 + $0x1b0] sm:$0xff]  }
 0x107   :  { %v8814_v1 = vadd.f32 %v8813_v62, %v8812_v59  ;;  %v8787_v2 = vpop.f32.mrf.mxu0  ;;  %v11153_v59 = vld [vmem:[%s15995_s1 + $0x268] sm:$0xff]  }
 0x108   :  { %v2065_v5 = vadd.f32 %v8786_v61, %v12387_v6  ;;  %v8815_v7 = vpop.f32.mrf.mxu1  ;;  %v11132_v6 = vld [vmem:[%s15995_s1 + $0xd0] sm:$0xff]   ;;  %v11154_v62 = vld [vmem:[%s15995_s1 + $0x1a8] sm:$0xff]  }
 0x109   :  { %v8788_v8 = vpop.f32.mrf.mxu0  ;;  %9096 = vmatprep.subr.bf16.mxu0 %v11132_v6  ;;  %v10494_v60 = vld [vmem:[%s15994_s0 + $0x1ac] ss:$100 sps:$4 sm:$0xff]   ;;  %v10497_v61 = vld [vmem:[%s15994_s0 + $0x1b4] ss:$100 sps:$4 sm:$0xff]  }
 0x10a   :  { %v12504_v9 = vadd.f32 %v8814_v1, %v2065_v5  ;;  %v8789_v10 = vadd.f32 %v8788_v8, %v8787_v2  ;;  %v8816_v11 = vpop.f32.mrf.mxu1  ;;  %9097 = vmatpush3.bf16.msra.mxu0 %v11134_v20  ;;  %v11157_v1 = vld [vmem:[%s15995_s1 + $0x260] sm:$0xff]   ;;  %v11161_v5 = vld [vmem:[%s15995_s1 + $0x258] sm:$0xff]   ;;  %v11164_v6 = vld [vmem:[%s15995_s1 + $0x1d0] sm:$0xff]  }
 0x10b   :  { %v8817_v17 = vadd.f32 %v8816_v11, %v8815_v7  ;;  %v8790_v18 = vpop.f32.mrf.mxu0  ;;  %9098 = vmatprep.subr.bf16.mxu0 %v11136_v23  ;;  %v11158_v2 = vld [vmem:[%s15995_s1 + $0x1a0] sm:$0xff]   ;;  %v11162_v11 = vld [vmem:[%s15995_s1 + $0x198] sm:$0xff]   ;;  %v11166_v23 = vld [vmem:[%s15995_s1 + $0x190] sm:$0xff]  }
 0x10c   :  { %v2068_v16 = vadd.f32 %v8789_v10, %v12398_v14  ;;  %v11137_v14 = vld [vmem:[%s15995_s1 + $0x148] sm:$0xff]   ;;  %v8818_v29 = vpop.f32.mrf.mxu1 }
 0x10d   :  { %v8791_v22 = vpop.f32.mrf.mxu0  ;;  %9126 = vmatprep.subr.bf16.mxu1 %v11137_v14  ;;  %v11167_v14 = vld [vmem:[%s15995_s1 + $0x210] sm:$0xff]  }
 0x10e   :  { %v12519_v19 = vadd.f32 %v8817_v17, %v2068_v16  ;;  %v8792_v24 = vadd.f32 %v8791_v22, %v8790_v18  ;;  %9099 = vmatpush3.bf16.msra.mxu0 %v11138_v27  ;;  %9127 = vmatpush3.bf16.msra.mxu1 %v11139_v28  ;;  %v8819_v36 = vpop.f32.mrf.mxu1 }
 0x10f   :  { %v8793_v25 = vpop.f32.mrf.mxu0  ;;  %9100 = vmatprep.subr.bf16.mxu0 %v11140_v31  ;;  %9128 = vmatprep.subr.bf16.mxu1 %v11141_v32  ;;  %v8820_v37 = vadd.f32 %v8819_v36, %v8818_v29  ;;  %v11171_v31 = vld [vmem:[%s15995_s1 + $0x208] sm:$0xff]   ;;  %v10495_v36 = vld [vmem:[%s15994_s0 + $0x1b0] ss:$100 sps:$4 sm:$0xff]  }
 0x110   :  { %v2073_v26 = vadd.f32 %v8792_v24, %v12445_v38  ;;  %v8821_v42 = vpop.f32.mrf.mxu1 }
 0x111   :  { %v8794_v30 = vpop.f32.mrf.mxu0 }
 0x112   :  { %v8795_v35 = vadd.f32 %v8794_v30, %v8793_v25  ;;  %9101 = vmatpush3.bf16.msra.mxu0 %v11142_v39  ;;  %9129 = vmatpush3.bf16.msra.mxu1 %v11143_v40  ;;  %v12571_v46 = vadd.f32 %v8820_v37, %v2073_v26  ;;  %v8822_v47 = vpop.f32.mrf.mxu1  ;;  %v11169_v26 = vld [vmem:[%s15995_s1 + $0x248] sm:$0xff]   ;;  %v11174_v39 = vld [vmem:[%s15995_s1 + $0x180] sm:$0xff]  }
 0x113   :  { %9142 = vmatprep.subr.bf16.mxu0 %v11144_v43  ;;  %9170 = vmatprep.subr.bf16.mxu1 %v11145_v44  ;;  %v11170_v30 = vld [vmem:[%s15995_s1 + $0x188] sm:$0xff]   ;;  %v11175_v40 = vld [vmem:[%s15995_s1 + $0x200] sm:$0xff]   ;;  %v11176_v43 = vld [vmem:[%s15995_s1 + $0x2f8] sm:$0xff]  }
 0x114   :  { %v2076_v38 = vadd.f32 %v8795_v35, %v12462_v48  ;;  %v8823_v48 = vadd.f32 %v8822_v47, %v8821_v42  ;;  %v10492_v35 = vld [vmem:[%s15994_s0 + $0x1a8] ss:$100 sps:$4 sm:$0xff]   ;;  %v11177_v44 = vld [vmem:[%s15995_s1 + $0x378] sm:$0xff]  }
 0x115   :  { %2956 = vmatmul.mubr.bf16.vlgmr.msra.gmra.mxu0 %v10480_v33  ;;  %3005 = vmatmul.mubr.bf16.vlgmr.msra.gmra.mxu1 %v10483_v34  ;;  %v11172_v34 = vld [vmem:[%s15995_s1 + $0x1c0] sm:$0xff]  }
 0x116   :  { %9143 = vmatpush3.bf16.msra.mxu0 %v11146_v49  ;;  %9171 = vmatpush3.bf16.msra.mxu1 %v11147_v50  ;;  %v12591_v55 = vadd.f32 %v8823_v48, %v2076_v38 }
 0x117   :  { %9144 = vmatprep.subr.bf16.mxu0 %v11148_v51  ;;  %9172 = vmatprep.subr.bf16.mxu1 %v11149_v52  ;;  %v11178_v52 = vld [vmem:[%s15995_s1 + $0x2b8] sm:$0xff]  }
 0x118   :  { %2963 = vmatprep.mubr.bf16.mxu0 %v10486_v41  ;;  %3012 = vmatprep.mubr.bf16.mxu1 %v10489_v45  ;;  %v10498_v41 = vld [vmem:[%s15994_s0 + $0x274] ss:$100 sps:$4 sm:$0xff]   ;;  %v10501_v45 = vld [vmem:[%s15994_s0 + $0x27c] ss:$100 sps:$4 sm:$0xff]  }
 0x11a   :  { %9145 = vmatpush3.bf16.msra.mxu0 %v11150_v56  ;;  %9173 = vmatpush3.bf16.msra.mxu1 %v11151_v57  ;;  %v11181_v56 = vld [vmem:[%s15995_s1 + $0x370] sm:$0xff]  }
 0x11b   :  { %9146 = vmatprep.subr.bf16.mxu0 %v11152_v58  ;;  %9174 = vmatprep.subr.bf16.mxu1 %v11153_v59  ;;  %v10500_v57 = vld [vmem:[%s15994_s0 + $0x270] ss:$100 sps:$4 sm:$0xff]   ;;  %v10503_v58 = vld [vmem:[%s15994_s0 + $0x278] ss:$100 sps:$4 sm:$0xff]  }
 0x11d   :  { %2964 = vmatmul.mubr.bf16.gmra.mxu0 %v10488_v53  ;;  %3013 = vmatmul.mubr.bf16.gmra.mxu1 %v10491_v54  ;;  %v11179_v53 = vld [vmem:[%s15995_s1 + $0x338] sm:$0xff]  }
 0x11e   :  { %9147 = vmatpush3.bf16.msra.mxu0 %v11154_v62  ;;  %9175 = vmatpush3.bf16.msra.mxu1 %v11155_v63  ;;  %v11182_v63 = vld [vmem:[%s15995_s1 + $0x2b0] sm:$0xff]  }
 0x11f   :  { %9148 = vmatprep.subr.bf16.mxu0 %v11156_v0  ;;  %9176 = vmatprep.subr.bf16.mxu1 %v11157_v1  ;;  %v11183_v0 = vld [vmem:[%s15995_s1 + $0x330] sm:$0xff]  }
 0x120   :  { %3053 = vmatprep.mubr.bf16.mxu0 %v10494_v60  ;;  %3102 = vmatprep.mubr.bf16.mxu1 %v10497_v61 }
 0x122   :  { %9149 = vmatpush3.bf16.msra.mxu0 %v11158_v2  ;;  %9177 = vmatpush3.bf16.msra.mxu1 %v11159_v3  ;;  %v11184_v2 = vld [vmem:[%s15995_s1 + $0x2e8] sm:$0xff]  }
 0x123   :  { %9150 = vmatprep.subr.bf16.mxu0 %v11160_v4  ;;  %9178 = vmatprep.subr.bf16.mxu1 %v11161_v5  ;;  %v8840_v7 = vpop.f32.mrf.mxu0  ;;  %v11185_v3 = vld [vmem:[%s15995_s1 + $0x368] sm:$0xff]  }
 0x124   :  { %v8868_v8 = vpop.f32.mrf.mxu1  ;;  %v10509_v4 = vld [vmem:[%s15994_s0 + $0x1c4] ss:$100 sps:$4 sm:$0xff]  }
 0x125   :  { %v8841_v10 = vpop.f32.mrf.mxu0 }
 0x126   :  { %9151 = vmatpush3.bf16.msra.mxu0 %v11162_v11  ;;  %9179 = vmatpush3.bf16.msra.mxu1 %v11163_v12  ;;  %v8842_v13 = vadd.f32 %v8841_v10, %v8840_v7  ;;  %v8869_v16 = vpop.f32.mrf.mxu1  ;;  %v11186_v7 = vld [vmem:[%s15995_s1 + $0x2a8] sm:$0xff]   ;;  %v11188_v10 = vld [vmem:[%s15995_s1 + $0x2e0] sm:$0xff]  }
 0x127   :  { %9152 = vmatprep.subr.bf16.mxu0 %v11164_v6  ;;  %9180 = vmatprep.subr.bf16.mxu1 %v11165_v15  ;;  %v8843_v17 = vpop.f32.mrf.mxu0  ;;  %v8870_v20 = vadd.f32 %v8869_v16, %v8868_v8  ;;  %v11187_v8 = vld [vmem:[%s15995_s1 + $0x328] sm:$0xff]   ;;  %v11189_v11 = vld [vmem:[%s15995_s1 + $0x360] sm:$0xff]   ;;  %v11192_v6 = vld [vmem:[%s15995_s1 + $0x2d8] sm:$0xff]  }
 0x128   :  { %v2163_v18 = vadd.f32 %v8842_v13, %v12504_v9  ;;  %v8871_v21 = vpop.f32.mrf.mxu1  ;;  %v11168_v9 = vld [vmem:[%s15995_s1 + $0x1c8] sm:$0xff]   ;;  %v11190_v12 = vld [vmem:[%s15995_s1 + $0x2a0] sm:$0xff]   ;;  %v11193_v15 = vld [vmem:[%s15995_s1 + $0x358] sm:$0xff]  }
 0x129   :  { %v8844_v22 = vpop.f32.mrf.mxu0  ;;  %v11191_v13 = vld [vmem:[%s15995_s1 + $0x320] sm:$0xff]   ;;  %v11194_v16 = vld [vmem:[%s15995_s1 + $0x298] sm:$0xff]  }
 0x12a   :  { %9153 = vmatpush3.bf16.msra.mxu0 %v11166_v23  ;;  %9181 = vmatpush3.bf16.msra.mxu1 %v11167_v14  ;;  %v12654_v24 = vadd.f32 %v8870_v20, %v2163_v18  ;;  %v8845_v25 = vadd.f32 %v8844_v22, %v8843_v17  ;;  %v8872_v27 = vpop.f32.mrf.mxu1  ;;  %v11195_v17 = vld [vmem:[%s15995_s1 + $0x318] sm:$0xff]   ;;  %v11196_v18 = vld [vmem:[%s15995_s1 + $0x2d0] sm:$0xff]  }
 0x12b   :  { %9154 = vmatprep.subr.bf16.mxu0 %v11168_v9  ;;  %9182 = vmatprep.subr.bf16.mxu1 %v11169_v26  ;;  %v8873_v29 = vadd.f32 %v8872_v27, %v8871_v21  ;;  %v8846_v33 = vpop.f32.mrf.mxu0  ;;  %v11197_v20 = vld [vmem:[%s15995_s1 + $0x350] sm:$0xff]   ;;  %v11201_v9 = vld [vmem:[%s15995_s1 + $0x348] sm:$0xff]  }
 0x12c   :  { %v2166_v28 = vadd.f32 %v8845_v25, %v12519_v19  ;;  %v11173_v19 = vld [vmem:[%s15995_s1 + $0x240] sm:$0xff]   ;;  %v8874_v48 = vpop.f32.mrf.mxu1  ;;  %v11198_v22 = vld [vmem:[%s15995_s1 + $0x290] sm:$0xff]   ;;  %v11200_v25 = vld [vmem:[%s15995_s1 + $0x2c8] sm:$0xff]  }
 0x12d   :  { %v8847_v37 = vpop.f32.mrf.mxu0  ;;  %v11199_v23 = vld [vmem:[%s15995_s1 + $0x310] sm:$0xff]  }
 0x12e   :  { %9155 = vmatpush3.bf16.msra.mxu0 %v11170_v30  ;;  %9183 = vmatpush3.bf16.msra.mxu1 %v11171_v31  ;;  %v12669_v32 = vadd.f32 %v8873_v29, %v2166_v28  ;;  %v8848_v38 = vadd.f32 %v8847_v37, %v8846_v33  ;;  %v8875_v50 = vpop.f32.mrf.mxu1  ;;  %v11202_v31 = vld [vmem:[%s15995_s1 + $0x288] sm:$0xff]   ;;  %v10504_v37 = vld [vmem:[%s15994_s0 + $0x1b8] ss:$100 sps:$4 sm:$0xff]  }
 0x12f   :  { %9156 = vmatprep.subr.bf16.mxu0 %v11172_v34  ;;  %9184 = vmatprep.subr.bf16.mxu1 %v11173_v19  ;;  %v8849_v42 = vpop.f32.mrf.mxu0  ;;  %v8876_v54 = vadd.f32 %v8875_v50, %v8874_v48  ;;  %v11203_v33 = vld [vmem:[%s15995_s1 + $0x308] sm:$0xff]   ;;  %v11208_v48 = vld [vmem:[%s15995_s1 + $0x3f8] sm:$0xff]  }
 0x130   :  { %v2171_v47 = vadd.f32 %v8848_v38, %v12571_v46  ;;  %v11180_v46 = vld [vmem:[%s15995_s1 + $0x2f0] sm:$0xff]   ;;  %v8877_v60 = vpop.f32.mrf.mxu1  ;;  %v10507_v38 = vld [vmem:[%s15994_s0 + $0x1c0] ss:$100 sps:$4 sm:$0xff]  }
 0x131   :  { %v8850_v49 = vpop.f32.mrf.mxu0 }
 0x132   :  { %9157 = vmatpush3.bf16.msra.mxu0 %v11174_v39  ;;  %9185 = vmatpush3.bf16.msra.mxu1 %v11175_v40  ;;  %v8851_v51 = vadd.f32 %v8850_v49, %v8849_v42  ;;  %v12721_v61 = vadd.f32 %v8876_v54, %v2171_v47  ;;  %v8878_v62 = vpop.f32.mrf.mxu1  ;;  %v11206_v42 = vld [vmem:[%s15995_s1 + $0x280] sm:$0xff]   ;;  %v11209_v49 = vld [vmem:[%s15995_s1 + $0x478] sm:$0xff]  }
 0x133   :  { %9198 = vmatprep.subr.bf16.mxu0 %v11176_v43  ;;  %9226 = vmatprep.subr.bf16.mxu1 %v11177_v44  ;;  %v8879_v1 = vadd.f32 %v8878_v62, %v8877_v60  ;;  %v11207_v43 = vld [vmem:[%s15995_s1 + $0x300] sm:$0xff]   ;;  %v11211_v54 = vld [vmem:[%s15995_s1 + $0x438] sm:$0xff]  }
 0x134   :  { %v2174_v59 = vadd.f32 %v8851_v51, %v12591_v55  ;;  %v10506_v55 = vld [vmem:[%s15994_s0 + $0x1bc] ss:$100 sps:$4 sm:$0xff]   ;;  %v10510_v47 = vld [vmem:[%s15994_s0 + $0x284] ss:$100 sps:$4 sm:$0xff]  }
 0x135   :  { %3054 = vmatmul.mubr.bf16.vlgmr.msra.gmra.mxu0 %v10492_v35  ;;  %3103 = vmatmul.mubr.bf16.vlgmr.msra.gmra.mxu1 %v10495_v36  ;;  %v11204_v35 = vld [vmem:[%s15995_s1 + $0x2c0] sm:$0xff]  }
 0x136   :  { %9199 = vmatpush3.bf16.msra.mxu0 %v11178_v52  ;;  %9227 = vmatpush3.bf16.msra.mxu1 %v11179_v53  ;;  %v12741_v5 = vadd.f32 %v8879_v1, %v2174_v59  ;;  %v11205_v36 = vld [vmem:[%s15995_s1 + $0x340] sm:$0xff]   ;;  %v11210_v53 = vld [vmem:[%s15995_s1 + $0x3b8] sm:$0xff]   ;;  %v10515_v59 = vld [vmem:[%s15994_s0 + $0x288] ss:$100 sps:$4 sm:$0xff]  }
 0x137   :  { %9200 = vmatprep.subr.bf16.mxu0 %v11180_v46  ;;  %9228 = vmatprep.subr.bf16.mxu1 %v11181_v56  ;;  %v11212_v56 = vld [vmem:[%s15995_s1 + $0x3f0] sm:$0xff]  }
 0x138   :  { %3061 = vmatprep.mubr.bf16.mxu0 %v10498_v41  ;;  %3110 = vmatprep.mubr.bf16.mxu1 %v10501_v45  ;;  %v11214_v1 = vld [vmem:[%s15995_s1 + $0x3b0] sm:$0xff]  }
 0x13a   :  { %9201 = vmatpush3.bf16.msra.mxu0 %v11182_v63  ;;  %9229 = vmatpush3.bf16.msra.mxu1 %v11183_v0 }
 0x13b   :  { %9202 = vmatprep.subr.bf16.mxu0 %v11184_v2  ;;  %9230 = vmatprep.subr.bf16.mxu1 %v11185_v3 }
 0x13d   :  { %3062 = vmatmul.mubr.bf16.gmra.mxu0 %v10500_v57  ;;  %3111 = vmatmul.mubr.bf16.gmra.mxu1 %v10503_v58  ;;  %v11213_v57 = vld [vmem:[%s15995_s1 + $0x470] sm:$0xff]   ;;  %v10512_v58 = vld [vmem:[%s15994_s0 + $0x280] ss:$100 sps:$4 sm:$0xff]  }
 0x13e   :  { %9203 = vmatpush3.bf16.msra.mxu0 %v11186_v7  ;;  %9231 = vmatpush3.bf16.msra.mxu1 %v11187_v8  ;;  %v11216_v7 = vld [vmem:[%s15995_s1 + $0x3e8] sm:$0xff]  }
 0x13f   :  { %9204 = vmatprep.subr.bf16.mxu0 %v11188_v10  ;;  %9232 = vmatprep.subr.bf16.mxu1 %v11189_v11  ;;  %v11217_v8 = vld [vmem:[%s15995_s1 + $0x468] sm:$0xff]  }
 0x140   :  { %3151 = vmatprep.mubr.bf16.mxu0 %v10506_v55  ;;  %3200 = vmatprep.mubr.bf16.mxu1 %v10509_v4  ;;  %v11215_v55 = vld [vmem:[%s15995_s1 + $0x430] sm:$0xff]  }
 0x141   :  { %v10518_v4 = vld [vmem:[%s15994_s0 + $0x1cc] ss:$100 sps:$4 sm:$0xff]  }
 0x142   :  { %9205 = vmatpush3.bf16.msra.mxu0 %v11190_v12  ;;  %9233 = vmatpush3.bf16.msra.mxu1 %v11191_v13 }
 0x143   :  { %9206 = vmatprep.subr.bf16.mxu0 %v11192_v6  ;;  %9234 = vmatprep.subr.bf16.mxu1 %v11193_v15  ;;  %v8896_v21 = vpop.f32.mrf.mxu0  ;;  %v11218_v6 = vld [vmem:[%s15995_s1 + $0x3a8] sm:$0xff]  }
 0x144   :  { %v8924_v14 = vpop.f32.mrf.mxu1  ;;  %v11219_v15 = vld [vmem:[%s15995_s1 + $0x428] sm:$0xff]  }
 0x145   :  { %v8897_v26 = vpop.f32.mrf.mxu0 }
 0x146   :  { %9207 = vmatpush3.bf16.msra.mxu0 %v11194_v16  ;;  %9235 = vmatpush3.bf16.msra.mxu1 %v11195_v17  ;;  %v8898_v27 = vadd.f32 %v8897_v26, %v8896_v21  ;;  %v8925_v28 = vpop.f32.mrf.mxu1  ;;  %v11221_v17 = vld [vmem:[%s15995_s1 + $0x460] sm:$0xff]   ;;  %v11228_v26 = vld [vmem:[%s15995_s1 + $0x3d0] sm:$0xff]  }
 0x147   :  { %9208 = vmatprep.subr.bf16.mxu0 %v11196_v18  ;;  %9236 = vmatprep.subr.bf16.mxu1 %v11197_v20  ;;  %v8926_v29 = vadd.f32 %v8925_v28, %v8924_v14  ;;  %v8899_v30 = vpop.f32.mrf.mxu0  ;;  %v11222_v21 = vld [vmem:[%s15995_s1 + $0x3a0] sm:$0xff]   ;;  %v11225_v14 = vld [vmem:[%s15995_s1 + $0x458] sm:$0xff]   ;;  %v11230_v28 = vld [vmem:[%s15995_s1 + $0x390] sm:$0xff]  }
 0x148   :  { %v2261_v34 = vadd.f32 %v8898_v27, %v12654_v24  ;;  %v8927_v19 = vpop.f32.mrf.mxu1  ;;  %v11229_v27 = vld [vmem:[%s15995_s1 + $0x450] sm:$0xff]  }
 0x149   :  { %v8900_v24 = vpop.f32.mrf.mxu0 }
 0x14a   :  { %9209 = vmatpush3.bf16.msra.mxu0 %v11198_v22  ;;  %9237 = vmatpush3.bf16.msra.mxu1 %v11199_v23  ;;  %v12810_v39 = vadd.f32 %v8926_v29, %v2261_v34  ;;  %v8901_v40 = vadd.f32 %v8900_v24, %v8899_v30  ;;  %v8928_v41 = vpop.f32.mrf.mxu1  ;;  %v11223_v22 = vld [vmem:[%s15995_s1 + $0x420] sm:$0xff]   ;;  %v11224_v23 = vld [vmem:[%s15995_s1 + $0x3d8] sm:$0xff]   ;;  %v11231_v29 = vld [vmem:[%s15995_s1 + $0x410] sm:$0xff]  }
 0x14b   :  { %9210 = vmatprep.subr.bf16.mxu0 %v11200_v25  ;;  %9238 = vmatprep.subr.bf16.mxu1 %v11201_v9  ;;  %v8929_v45 = vadd.f32 %v8928_v41, %v8927_v19  ;;  %v8902_v50 = vpop.f32.mrf.mxu0  ;;  %v11226_v25 = vld [vmem:[%s15995_s1 + $0x398] sm:$0xff]   ;;  %v11232_v30 = vld [vmem:[%s15995_s1 + $0x3c8] sm:$0xff]  }
 0x14c   :  { %v2264_v44 = vadd.f32 %v8901_v40, %v12669_v32  ;;  %v10513_v32 = vld [vmem:[%s15994_s0 + $0x28c] ss:$100 sps:$4 sm:$0xff]   ;;  %v8930_v63 = vpop.f32.mrf.mxu1  ;;  %v11227_v9 = vld [vmem:[%s15995_s1 + $0x418] sm:$0xff]  }
 0x14d   :  { %v8903_v52 = vpop.f32.mrf.mxu0  ;;  %v11235_v34 = vld [vmem:[%s15995_s1 + $0x408] sm:$0xff]  }
 0x14e   :  { %9211 = vmatpush3.bf16.msra.mxu0 %v11202_v31  ;;  %9239 = vmatpush3.bf16.msra.mxu1 %v11203_v33  ;;  %v12831_v51 = vadd.f32 %v8929_v45, %v2264_v44  ;;  %v8904_v46 = vadd.f32 %v8903_v52, %v8902_v50  ;;  %v8931_v2 = vpop.f32.mrf.mxu1  ;;  %v11233_v31 = vld [vmem:[%s15995_s1 + $0x448] sm:$0xff]   ;;  %v11239_v44 = vld [vmem:[%s15995_s1 + $0x400] sm:$0xff]   ;;  %v11241_v50 = vld [vmem:[%s15995_s1 + $0x578] sm:$0xff]  }
 0x14f   :  { %9212 = vmatprep.subr.bf16.mxu0 %v11204_v35  ;;  %9240 = vmatprep.subr.bf16.mxu1 %v11205_v36  ;;  %v8905_v60 = vpop.f32.mrf.mxu0  ;;  %v8932_v10 = vadd.f32 %v8931_v2, %v8930_v63  ;;  %v11234_v33 = vld [vmem:[%s15995_s1 + $0x388] sm:$0xff]   ;;  %v11236_v35 = vld [vmem:[%s15995_s1 + $0x3c0] sm:$0xff]  }
 0x150   :  { %v2269_v62 = vadd.f32 %v8904_v46, %v12721_v61  ;;  %v10521_v61 = vld [vmem:[%s15994_s0 + $0x1d4] ss:$100 sps:$4 sm:$0xff]   ;;  %v8933_v12 = vpop.f32.mrf.mxu1  ;;  %v11237_v36 = vld [vmem:[%s15995_s1 + $0x440] sm:$0xff]  }
 0x151   :  { %v8906_v0 = vpop.f32.mrf.mxu0 }
 0x152   :  { %9213 = vmatpush3.bf16.msra.mxu0 %v11206_v42  ;;  %9241 = vmatpush3.bf16.msra.mxu1 %v11207_v43  ;;  %v8907_v3 = vadd.f32 %v8906_v0, %v8905_v60  ;;  %v12871_v13 = vadd.f32 %v8932_v10, %v2269_v62  ;;  %v8934_v16 = vpop.f32.mrf.mxu1  ;;  %v11238_v43 = vld [vmem:[%s15995_s1 + $0x380] sm:$0xff]   ;;  %v11245_v60 = vld [vmem:[%s15995_s1 + $0x570] sm:$0xff]  }
 0x153   :  { %9254 = vmatprep.subr.bf16.mxu0 %v11208_v48  ;;  %9282 = vmatprep.subr.bf16.mxu1 %v11209_v49  ;;  %v8935_v18 = vadd.f32 %v8934_v16, %v8933_v12  ;;  %v10522_v48 = vld [vmem:[%s15994_s0 + $0x294] ss:$100 sps:$4 sm:$0xff]   ;;  %v10530_v10 = vld [vmem:[%s15994_s0 + $0x1dc] ss:$100 sps:$4 sm:$0xff]   ;;  %v10533_v12 = vld [vmem:[%s15994_s0 + $0x1e4] ss:$100 sps:$4 sm:$0xff]  }
 0x154   :  { %v2272_v11 = vadd.f32 %v8907_v3, %v12741_v5  ;;  %v11220_v5 = vld [vmem:[%s15995_s1 + $0x3e0] sm:$0xff]   ;;  %v11240_v49 = vld [vmem:[%s15995_s1 + $0x4f8] sm:$0xff]   ;;  %v10524_v0 = vld [vmem:[%s15994_s0 + $0x290] ss:$100 sps:$4 sm:$0xff]  }
 0x155   :  { %3152 = vmatmul.mubr.bf16.vlgmr.msra.gmra.mxu0 %v10504_v37  ;;  %3201 = vmatmul.mubr.bf16.vlgmr.msra.gmra.mxu1 %v10507_v38  ;;  %v10516_v37 = vld [vmem:[%s15994_s0 + $0x1c8] ss:$100 sps:$4 sm:$0xff]   ;;  %v10519_v38 = vld [vmem:[%s15994_s0 + $0x1d0] ss:$100 sps:$4 sm:$0xff]  }
 0x156   :  { %9255 = vmatpush3.bf16.msra.mxu0 %v11210_v53  ;;  %9283 = vmatpush3.bf16.msra.mxu1 %v11211_v54  ;;  %v12885_v20 = vadd.f32 %v8935_v18, %v2272_v11  ;;  %v10525_v53 = vld [vmem:[%s15994_s0 + $0x29c] ss:$100 sps:$4 sm:$0xff]   ;;  %v12992_v3 = vld [vmem:[%s15995_s1 + $0x4b0] sm:$0xff]   ;;  %v11251_v16 = vld [vmem:[%s15995_s1 + $0x528] sm:$0xff]  }
 0x157   :  { %9256 = vmatprep.subr.bf16.mxu0 %v11212_v56  ;;  %9284 = vmatprep.subr.bf16.mxu1 %v11213_v57  ;;  %v13026_v18 = vld [vmem:[%s15995_s1 + $0x4e0] sm:$0xff]  }
 0x158   :  { %3159 = vmatprep.mubr.bf16.mxu0 %v10510_v47  ;;  %3208 = vmatprep.mubr.bf16.mxu1 %v10513_v32 }
 0x15a   :  { %9257 = vmatpush3.bf16.msra.mxu0 %v11214_v1  ;;  %9285 = vmatpush3.bf16.msra.mxu1 %v11215_v55  ;;  %v10527_v1 = vld [vmem:[%s15994_s0 + $0x298] ss:$100 sps:$4 sm:$0xff]  }
 0x15b   :  { %9258 = vmatprep.subr.bf16.mxu0 %v11216_v7  ;;  %9286 = vmatprep.subr.bf16.mxu1 %v11217_v8  ;;  %v11249_v7 = vld [vmem:[%s15995_s1 + $0x568] sm:$0xff]  }
 0x15d   :  { %3160 = vmatmul.mubr.bf16.gmra.mxu0 %v10512_v58  ;;  %3209 = vmatmul.mubr.bf16.gmra.mxu1 %v10515_v59  ;;  %v12965_v58 = vld [vmem:[%s15995_s1 + $0x4b8] sm:$0xff]   ;;  %v12974_v59 = vld [vmem:[%s15995_s1 + $0x4f0] sm:$0xff]  }
 0x15e   :  { %9259 = vmatpush3.bf16.msra.mxu0 %v11218_v6  ;;  %9287 = vmatpush3.bf16.msra.mxu1 %v11219_v15  ;;  %v13017_v15 = vld [vmem:[%s15995_s1 + $0x4a8] sm:$0xff]  }
 0x15f   :  { %9260 = vmatprep.subr.bf16.mxu0 %v11220_v5  ;;  %9288 = vmatprep.subr.bf16.mxu1 %v11221_v17 }
 0x160   :  { %3249 = vmatprep.mubr.bf16.mxu0 %v10518_v4  ;;  %3298 = vmatprep.mubr.bf16.mxu1 %v10521_v61  ;;  %v13001_v61 = vld [vmem:[%s15995_s1 + $0x4e8] sm:$0xff]  }
 0x162   :  { %9261 = vmatpush3.bf16.msra.mxu0 %v11222_v21  ;;  %9289 = vmatpush3.bf16.msra.mxu1 %v11223_v22 }
 0x163   :  { %9262 = vmatprep.subr.bf16.mxu0 %v11224_v23  ;;  %9290 = vmatprep.subr.bf16.mxu1 %v11225_v14  ;;  %v8952_v19 = vpop.f32.mrf.mxu0 }
 0x164   :  { %v8980_v24 = vpop.f32.mrf.mxu1 }
 0x165   :  { %v8953_v40 = vpop.f32.mrf.mxu0 }
 0x166   :  { %9263 = vmatpush3.bf16.msra.mxu0 %v11226_v25  ;;  %9291 = vmatpush3.bf16.msra.mxu1 %v11227_v9  ;;  %v8954_v41 = vadd.f32 %v8953_v40, %v8952_v19  ;;  %v8981_v42 = vpop.f32.mrf.mxu1  ;;  %v13036_v25 = vld [vmem:[%s15995_s1 + $0x4a0] sm:$0xff]   ;;  %v13067_v19 = vld [vmem:[%s15995_s1 + $0x4d0] sm:$0xff]  }
 0x167   :  { %9264 = vmatprep.subr.bf16.mxu0 %v11228_v26  ;;  %9292 = vmatprep.subr.bf16.mxu1 %v11229_v27  ;;  %v8982_v45 = vadd.f32 %v8981_v42, %v8980_v24  ;;  %v8955_v47 = vpop.f32.mrf.mxu0  ;;  %v11255_v9 = vld [vmem:[%s15995_s1 + $0x520] sm:$0xff]  }
 0x168   :  { %v2359_v32 = vadd.f32 %v8954_v41, %v12810_v39  ;;  %v8983_v52 = vpop.f32.mrf.mxu1  ;;  %v11243_v39 = vld [vmem:[%s15995_s1 + $0x538] sm:$0xff]  }
 0x169   :  { %v8956_v54 = vpop.f32.mrf.mxu0 }
 0x16a   :  { %9265 = vmatpush3.bf16.msra.mxu0 %v11230_v28  ;;  %9293 = vmatpush3.bf16.msra.mxu1 %v11231_v29  ;;  %v12960_v46 = vadd.f32 %v8982_v45, %v2359_v32  ;;  %v8957_v56 = vadd.f32 %v8956_v54, %v8955_v47  ;;  %v8984_v57 = vpop.f32.mrf.mxu1  ;;  %v13047_v28 = vld [vmem:[%s15995_s1 + $0x4d8] sm:$0xff]  }
 0x16b   :  { %9266 = vmatprep.subr.bf16.mxu0 %v11232_v30  ;;  %9294 = vmatprep.subr.bf16.mxu1 %v11233_v31  ;;  %v8985_v63 = vadd.f32 %v8984_v57, %v8983_v52  ;;  %v8958_v55 = vpop.f32.mrf.mxu0  ;;  %v13056_v31 = vld [vmem:[%s15995_s1 + $0x498] sm:$0xff]  }
 0x16c   :  { %v2362_v62 = vadd.f32 %v8957_v56, %v12831_v51  ;;  %v11247_v51 = vld [vmem:[%s15995_s1 + $0x530] sm:$0xff]   ;;  %v8986_v5 = vpop.f32.mrf.mxu1 }
 0x16d   :  { %v8959_v4 = vpop.f32.mrf.mxu0 }
 0x16e   :  { %9267 = vmatpush3.bf16.msra.mxu0 %v11234_v33  ;;  %9295 = vmatpush3.bf16.msra.mxu1 %v11235_v34  ;;  %v12987_v2 = vadd.f32 %v8985_v63, %v2362_v62  ;;  %v8960_v8 = vadd.f32 %v8959_v4, %v8958_v55  ;;  %v8987_v22 = vpop.f32.mrf.mxu1  ;;  %v11259_v33 = vld [vmem:[%s15995_s1 + $0x518] sm:$0xff]  }
 0x16f   :  { %9268 = vmatprep.subr.bf16.mxu0 %v11236_v35  ;;  %9296 = vmatprep.subr.bf16.mxu1 %v11237_v36  ;;  %v8961_v11 = vpop.f32.mrf.mxu0  ;;  %v8988_v23 = vadd.f32 %v8987_v22, %v8986_v5  ;;  %v11261_v35 = vld [vmem:[%s15995_s1 + $0x550] sm:$0xff]  }
 0x170   :  { %v2367_v6 = vadd.f32 %v8960_v8, %v12871_v13  ;;  %v11253_v13 = vld [vmem:[%s15995_s1 + $0x560] sm:$0xff]   ;;  %v8989_v26 = vpop.f32.mrf.mxu1 }
 0x171   :  { %v8962_v17 = vpop.f32.mrf.mxu0 }
 0x172   :  { %9269 = vmatpush3.bf16.msra.mxu0 %v11238_v43  ;;  %9297 = vmatpush3.bf16.msra.mxu1 %v11239_v44  ;;  %v8963_v21 = vadd.f32 %v8962_v17, %v8961_v11  ;;  %v13042_v27 = vadd.f32 %v8988_v23, %v2367_v6  ;;  %v8990_v29 = vpop.f32.mrf.mxu1 }
 0x173   :  { %9310 = vmatprep.subr.bf16.mxu0 %v11240_v49  ;;  %9338 = vmatprep.subr.bf16.mxu1 %v11241_v50  ;;  %v8991_v30 = vadd.f32 %v8990_v29, %v8989_v26 }
 0x174   :  { %v2370_v14 = vadd.f32 %v8963_v21, %v12885_v20  ;;  %v11257_v20 = vld [vmem:[%s15995_s1 + $0x558] sm:$0xff]  }
 0x175   :  { %3250 = vmatmul.mubr.bf16.vlgmr.msra.gmra.mxu0 %v10516_v37  ;;  %3299 = vmatmul.mubr.bf16.vlgmr.msra.gmra.mxu1 %v10519_v38 }
 0x176   :  { %9311 = vmatpush3.bf16.msra.mxu0 %v12965_v58  ;;  %9339 = vmatpush3.bf16.msra.mxu1 %v11243_v39  ;;  %v13062_v34 = vadd.f32 %v8991_v30, %v2370_v14 }
 0x177   :  { %9312 = vmatprep.subr.bf16.mxu0 %v12974_v59  ;;  %9340 = vmatprep.subr.bf16.mxu1 %v11245_v60 }
 0x178   :  { %3257 = vmatprep.mubr.bf16.mxu0 %v10522_v48  ;;  %3306 = vmatprep.mubr.bf16.mxu1 %v10525_v53 }
 0x17a   :  { %9313 = vmatpush3.bf16.msra.mxu0 %v12992_v3  ;;  %9341 = vmatpush3.bf16.msra.mxu1 %v11247_v51 }
 0x17b   :  { %9314 = vmatprep.subr.bf16.mxu0 %v13001_v61  ;;  %9342 = vmatprep.subr.bf16.mxu1 %v11249_v7 }
 0x17d   :  { %3258 = vmatmul.mubr.bf16.gmra.mxu0 %v10524_v0  ;;  %3307 = vmatmul.mubr.bf16.gmra.mxu1 %v10527_v1 }
 0x17e   :  { %9315 = vmatpush3.bf16.msra.mxu0 %v13017_v15  ;;  %9343 = vmatpush3.bf16.msra.mxu1 %v11251_v16 }
 0x17f   :  { %9316 = vmatprep.subr.bf16.mxu0 %v13026_v18  ;;  %9344 = vmatprep.subr.bf16.mxu1 %v11253_v13 }
 0x180   :  { %3347 = vmatprep.mubr.bf16.mxu0 %v10530_v10  ;;  %3396 = vmatprep.mubr.bf16.mxu1 %v10533_v12 }
 0x182   :  { %9317 = vmatpush3.bf16.msra.mxu0 %v13036_v25  ;;  %9345 = vmatpush3.bf16.msra.mxu1 %v11255_v9 }
 0x183   :  { %9318 = vmatprep.subr.bf16.mxu0 %v13047_v28  ;;  %9346 = vmatprep.subr.bf16.mxu1 %v11257_v20 }
 0x186   :  { %9319 = vmatpush3.bf16.msra.mxu0 %v13056_v31  ;;  %9347 = vmatpush3.bf16.msra.mxu1 %v11259_v33 }
 0x187   :  { %9320 = vmatprep.subr.bf16.mxu0 %v13067_v19  ;;  %9348 = vmatprep.subr.bf16.mxu1 %v11261_v35 }
 0x188   :  { %12 = vsyncpa [#allocation3], 0  ;;  %v13076_v36 = vld [vmem:[%s15995_s1 + $0x490] sm:$0xff]   ;;  %v13085_v38 = vld [vmem:[%s15995_s1 + $0x4c8] sm:$0xff]   ;;  %v9008_v49 = vpop.f32.mrf.mxu0  ;;  %v9036_v54 = vpop.f32.mrf.mxu1  ;;  %s11584_s29 = smov [#allocation2]  }
 0x189   :  { %v11263_v37 = vld [vmem:[%s15995_s1 + $0x510] sm:$0xff]   ;;  %v11265_v24 = vld [vmem:[%s15995_s1 + $0x548] sm:$0xff]   ;;  %v13103_v42 = vld [vmem:[%s15995_s1 + $0x4c0] sm:$0xff]   ;;  %s7874_s30 = sshll.u32 %s11584_s29, 4  ;;  %s7875_s30 = int_to_ptr.vmem [resolvable:$true] %s7874_s30 }
 0x18a   :  { %9321 = vmatpush3.bf16.msra.mxu0 %v13076_v36  ;;  %9349 = vmatpush3.bf16.msra.mxu1 %v11263_v37  ;;  %v13094_v40 = vld [vmem:[%s15995_s1 + $0x488] sm:$0xff]   ;;  %v11269_v43 = vld [vmem:[%s15995_s1 + $0x540] sm:$0xff]   ;;  %v10528_v44 = vld [vmem:[%s15994_s0 + $0x1d8] ss:$100 sps:$4 sm:$0xff]   ;;  %v9009_v56 = vpop.f32.mrf.mxu0  ;;  %v9037_v60 = vpop.f32.mrf.mxu1  ;;  %s11561_s8 = scalar_lea.vmem %s7875_s30, 32  ;;  %p11566_p1 = scmp.lt.s32.totalorder %s7875_s30, %s7875_s30 }
 0x18b   :  { %9322 = vmatprep.subr.bf16.mxu0 %v13085_v38  ;;  %9350 = vmatprep.subr.bf16.mxu1 %v11265_v24  ;;  %v11267_v41 = vld [vmem:[%s15995_s1 + $0x508] sm:$0xff]   ;;  %v10531_v45 = vld [vmem:[%s15994_s0 + $0x1e0] ss:$100 sps:$4 sm:$0xff]   ;;  %v13127_v50 = vld [vmem:[%s15995_s1 + $0x5f8] sm:$0xff]   ;;  %v9010_v39 = vadd.f32 %v9009_v56, %v9008_v49  ;;  %v9038_v55 = vadd.f32 %v9037_v60, %v9036_v54  ;;  %p11562_p0 = scmp.ne.s32.totalorder %s7875_s30, %s11561_s8  ;;  %p11567_p2 = scmp.lt.s32.totalorder %s11561_s8, %s11561_s8 }
 0x18c   :  { %v13118_v47 = vld [vmem:[%s15995_s1 + $0x480] sm:$0xff]   ;;  %v11273_v32 = vld [vmem:[%s15995_s1 + $0x638] sm:$0xff]   ;;  %v10537_v53 = vld [vmem:[%s15994_s0 + $0x2ac] ss:$100 sps:$4 sm:$0xff]   ;;  %v9011_v62 = vpop.f32.mrf.mxu0  ;;  %v9039_v51 = vpop.f32.mrf.mxu1 }
 0x18d   :  { %v11271_v48 = vld [vmem:[%s15995_s1 + $0x500] sm:$0xff]   ;;  %v13142_v57 = vld [vmem:[%s15995_s1 + $0x5b8] sm:$0xff]   ;;  %v13148_v63 = vld [vmem:[%s15995_s1 + $0x5f0] sm:$0xff]   ;;  %v2457_v1 = vadd.f32 %v9010_v39, %v12960_v46  ;;  %p11568_p3 = por %p11567_p2, %p11566_p1 }
 0x18e   :  { %9323 = vmatpush3.bf16.msra.mxu0 %v13094_v40  ;;  %9351 = vmatpush3.bf16.msra.mxu1 %v11267_v41  ;;  %v10534_v52 = vld [vmem:[%s15994_s0 + $0x2a4] ss:$100 sps:$4 sm:$0xff]   ;;  %v11276_v0 = vld [vmem:[%s15995_s1 + $0x630] sm:$0xff]   ;;  %v9012_v4 = vpop.f32.mrf.mxu0  ;;  %v9040_v12 = vpop.f32.mrf.mxu1  ;;  %v11285_v49 = vld [vmem:[%s15995_s1 + $0x618] sm:$0xff]  }
 0x18f   :  { %9324 = vmatprep.subr.bf16.mxu0 %v13103_v42  ;;  %9352 = vmatprep.subr.bf16.mxu1 %v11269_v43  ;;  %v10536_v7 = vld [vmem:[%s15994_s0 + $0x2a0] ss:$100 sps:$4 sm:$0xff]   ;;  %v10539_v8 = vld [vmem:[%s15994_s0 + $0x2a8] ss:$100 sps:$4 sm:$0xff]   ;;  %v13164_v10 = vld [vmem:[%s15995_s1 + $0x5b0] sm:$0xff]   ;;  %v9013_v46 = vadd.f32 %v9012_v4, %v9011_v62  ;;  %v13167_v11 = vadd.f32 %v9038_v55, %v2457_v1  ;;  %v9041_v13 = vadd.f32 %v9040_v12, %v9039_v51  ;;  %p11569_p4 = pnand %p11568_p3, %p11562_p0 }
 0x190   :  { %v9014_v6 = vpop.f32.mrf.mxu0  ;;  %v13172_v16 = vld [vmem:[%s15995_s1 + $0x5e8] sm:$0xff]   ;;  %v10543_v22 = vld [vmem:[%s15994_s0 + $0x1f0] ss:$100 sps:$4 sm:$0xff]   ;;  %v9042_v14 = vpop.f32.mrf.mxu1  ;;  %v13196_v30 = vld [vmem:[%s15995_s1 + $0x5e0] sm:$0xff]  }
 0x191   :  { %v11279_v5 = vld [vmem:[%s15995_s1 + $0x628] sm:$0xff]   ;;  %v2460_v17 = vadd.f32 %v9013_v46, %v12987_v2  ;;  %v11282_v33 = vld [vmem:[%s15995_s1 + $0x620] sm:$0xff]   ;;  %v13228_v56 = vld [vmem:[%s15995_s1 + $0x5d0] sm:$0xff]  }
 0x192   :  { %9325 = vmatpush3.bf16.msra.mxu0 %v13118_v47  ;;  %9353 = vmatpush3.bf16.msra.mxu1 %v11271_v48  ;;  %v10542_v21 = vld [vmem:[%s15994_s0 + $0x1ec] ss:$100 sps:$4 sm:$0xff]   ;;  %v9015_v23 = vpop.f32.mrf.mxu0  ;;  %v9043_v29 = vpop.f32.mrf.mxu1  ;;  %v13206_v43 = vld [vmem:[%s15995_s1 + $0x5a0] sm:$0xff]   ;;  %v10544_v4 = vld [vmem:[%s15994_s0 + $0x2b8] ss:$100 sps:$4 sm:$0xff]  }
 0x193   :  { %9366 = vmatprep.subr.bf16.mxu0 %v13127_v50  ;;  %10138 = vmatprep.subr.bf16.mxu1 %v11273_v32  ;;  %v13188_v9 = vld [vmem:[%s15995_s1 + $0x5a8] sm:$0xff]   ;;  %v9016_v2 = vadd.f32 %v9015_v23, %v9014_v6  ;;  %v13191_v26 = vadd.f32 %v9041_v13, %v2460_v17  ;;  %v9044_v37 = vadd.f32 %v9043_v29, %v9042_v14  ;;  %v13237_v39 = vld [vmem:[%s15995_s1 + $0x590] sm:$0xff]   ;;  %v13258_v1 = vld [vmem:[%s15995_s1 + $0x5c0] sm:$0xff]  }
 0x194   :  { %v9017_v20 = vpop.f32.mrf.mxu0  ;;  %v9045_v41 = vpop.f32.mrf.mxu1  ;;  %v13243_v60 = vld [vmem:[%s15995_s1 + $0x5c8] sm:$0xff]   ;;  %v11294_v55 = vld [vmem:[%s15995_s1 + $0x600] sm:$0xff]   ;;  %v11297_v46 = vld [vmem:[%s15995_s1 + $0xf8] sm:$0xff]  }
 0x195   :  { %3348 = vmatmul.mubr.bf16.vlgmr.msra.gmra.mxu0 %v10528_v44  ;;  %3397 = vmatmul.mubr.bf16.vlgmr.msra.gmra.mxu1 %v10531_v45  ;;  %v2465_v35 = vadd.f32 %v9016_v2, %v13042_v27  ;;  %v13212_v27 = vld [vmem:[%s15995_s1 + $0x5d8] sm:$0xff]   ;;  %v11291_v62 = vld [vmem:[%s15995_s1 + $0x608] sm:$0xff]   ;;  %v13305_v2 = vld [vmem:[%s15995_s1 + $0x70] sm:$0xff]  }
 0x196   :  { %9367 = vmatpush3.bf16.msra.mxu0 %v13142_v57  ;;  %10139 = vmatpush3.bf16.msra.mxu1 %v11273_v32  ;;  %v9018_v24 = vpop.f32.mrf.mxu0  ;;  %v9046_v48 = vpop.f32.mrf.mxu1  ;;  %v10540_v51 = vld [vmem:[%s15994_s0 + $0x1e8] ss:$100 sps:$4 sm:$0xff]   ;;  %v10545_v12 = vld [vmem:[%s15994_s0 + $0x2b4] ss:$100 sps:$4 sm:$0xff]  }
 0x197   :  { %9368 = vmatprep.subr.bf16.mxu0 %v13148_v63  ;;  %10140 = vmatprep.subr.bf16.mxu1 %v11276_v0  ;;  %v9019_v44 = vadd.f32 %v9018_v24, %v9017_v20  ;;  %v2514_v45 = vadd.f32 %v9044_v37, %v2465_v35  ;;  %v10553_v6 = vld [vmem:[%s15994_s0 + $0x32c] ss:$100 sps:$4 sm:$0xff]  }
 0x198   :  { %3355 = vmatprep.mubr.bf16.mxu0 %v10534_v52  ;;  %3404 = vmatprep.mubr.bf16.mxu1 %v10537_v53  ;;  %v9047_v52 = vadd.f32 %v9046_v48, %v9045_v41  ;;  %v13222_v53 = vld [vmem:[%s15995_s1 + $0x598] sm:$0xff]   ;;  %v11301_v20 = vld [vmem:[%s15995_s1 + $0xf0] sm:$0xff]   ;;  %v13337_v48 = vld [vmem:[%s15995_s1 + $0x68] sm:$0xff]  }
 0x199   :  { %v2468_v32 = vadd.f32 %v9019_v44, %v13062_v34  ;;  %v11288_v34 = vld [vmem:[%s15995_s1 + $0x610] sm:$0xff]  }
 0x19a   :  { %9369 = vmatpush3.bf16.msra.mxu0 %v13164_v10  ;;  %10141 = vmatpush3.bf16.msra.mxu1 %v11276_v0  ;;  %v13252_v0 = vld [vmem:[%s15995_s1 + $0x588] sm:$0xff]   ;;  %v10547_v24 = vld [vmem:[%s15994_s0 + $0x2b0] ss:$100 sps:$4 sm:$0xff]  }
 0x19b   :  { %9370 = vmatprep.subr.bf16.mxu0 %v13172_v16  ;;  %10142 = vmatprep.subr.bf16.mxu1 %v11279_v5  ;;  %v2517_v54 = vadd.f32 %v9047_v52, %v2468_v32  ;;  %v13326_v44 = vld [vmem:[%s15995_s1 + $0x30] sm:$0xff]   ;;  %v10550_v32 = vld [vmem:[%s15994_s0 + $0x324] ss:$100 sps:$4 sm:$0xff]  }
 0x19d   :  { %3356 = vmatmul.mubr.bf16.gmra.mxu0 %v10536_v7  ;;  %3405 = vmatmul.mubr.bf16.gmra.mxu1 %v10539_v8  ;;  %v13273_v7 = vld [vmem:[%s15995_s1 + $0x580] sm:$0xff]   ;;  %v13279_v8 = vld [vmem:[%s15995_s1 + $0x78] sm:$0xff]  }
 0x19e   :  { %9371 = vmatpush3.bf16.msra.mxu0 %v13188_v9  ;;  %10143 = vmatpush3.bf16.msra.mxu1 %v11279_v5 }
 0x19f   :  { %9372 = vmatprep.subr.bf16.mxu0 %v13196_v30  ;;  %10144 = vmatprep.subr.bf16.mxu1 %v11282_v33 }
 0x1a0   :  { %3445 = vmatprep.mubr.bf16.mxu0 %v10542_v21  ;;  %10154 = vmatprep.mubr.bf16.mxu1 %v10543_v22  ;;  %v13296_v21 = vld [vmem:[%s15995_s1 + $0x38] sm:$0xff]  }
 0x1a1   :  { %v11299_v22 = vld [vmem:[%s15995_s1 + $0xb8] sm:$0xff]  }
 0x1a2   :  { %9373 = vmatpush3.bf16.msra.mxu0 %v13206_v43  ;;  %10145 = vmatpush3.bf16.msra.mxu1 %v11282_v33 }
 0x1a3   :  { %9374 = vmatprep.subr.bf16.mxu0 %v13212_v27  ;;  %10146 = vmatprep.subr.bf16.mxu1 %v11285_v49  ;;  %v10136_v5 = vpop.f32.mrf.mxu0 }
 0x1a4   :  { %v9074_v17 = vpop.f32.mrf.mxu1  ;;  %v13291_v13 = vadd.f32 %v10136_v5, %v2514_v45  ;;  %v11313_v5 = vld [vmem:[%s15995_s1 + $0xd8] sm:$0xff]  }
 0x1a5   :  { %v2554_v23 = vpop.f32.mrf.mxu0 }
 0x1a6   :  { %9375 = vmatpush3.bf16.msra.mxu0 %v13222_v53  ;;  %10147 = vmatpush3.bf16.msra.mxu1 %v11285_v49  ;;  %16063 = vst [vmem:[#allocation5_spill] sm:$0xff] %v13291_v13  ;;  %v9075_v14 = vpop.f32.mrf.mxu1  ;;  %v13312_v29 = vadd.f32 %v2554_v23, %v13167_v11  ;;  %v11303_v11 = vld [vmem:[%s15995_s1 + $0xb0] sm:$0xff]   ;;  %v11305_v49 = vld [vmem:[%s15995_s1 + $0xe8] sm:$0xff]  }
 0x1a7   :  { %9376 = vmatprep.subr.bf16.mxu0 %v13228_v56  ;;  %10148 = vmatprep.subr.bf16.mxu1 %v11288_v34  ;;  %v13314_v33 = vadd.f32 %v9075_v14, %v9074_v17  ;;  %v10137_v35 = vpop.f32.mrf.mxu0  ;;  %v13387_v17 = vld [vmem:[%s15995_s1 + $0x18] sm:$0xff]   ;;  %v13396_v23 = vld [vmem:[%s15995_s1 + $0x50] sm:$0xff]  }
 0x1a8   :  { %v13316_v37 = vpop.f32.mrf.mxu1  ;;  %v13321_v41 = vadd.f32 %v10137_v35, %v2517_v54  ;;  %v13349_v54 = vld [vmem:[%s15995_s1 + $0x28] sm:$0xff]   ;;  %16066 = vst [vmem:[#allocation8_spill] sm:$0xff] %v13387_v17  ;;  %16067 = vst [vmem:[#allocation9_spill] sm:$0xff] %v13396_v23  ;;  %v11317_v14 = vld [vmem:[%s15995_s1 + $0xd0] sm:$0xff]  }
 0x1a9   :  { %v11319_v35 = vld [vmem:[%s15995_s1 + $0x90] sm:$0xff]  }
 0x1aa   :  { %9377 = vmatpush3.bf16.msra.mxu0 %v13237_v39  ;;  %10149 = vmatpush3.bf16.msra.mxu1 %v11288_v34  ;;  %16064 = vst [vmem:[#allocation6_spill] sm:$0xff] %v13321_v41  ;;  %v13332_v45 = vpop.f32.mrf.mxu1  ;;  %v11307_v34 = vld [vmem:[%s15995_s1 + $0xa8] sm:$0xff]   ;;  %v13486_v41 = vld [vmem:[%s15995_s1 + $0x170] sm:$0xff]  }
 0x1ab   :  { %9378 = vmatprep.subr.bf16.mxu0 %v13243_v60  ;;  %10150 = vmatprep.subr.bf16.mxu1 %v11291_v62  ;;  %16075 = vst [vmem:[#allocation17_spill] sm:$0xff] %v13486_v41  ;;  %v10559_v13 = vld [vmem:[%s15994_s0 + $0x3f0] ss:$100 sps:$4 sm:$0xff]  }
 0x1ac   :  { %v9080_v52 = vpop.f32.mrf.mxu1 }
 0x1ae   :  { %9379 = vmatpush3.bf16.msra.mxu0 %v13252_v0  ;;  %10151 = vmatpush3.bf16.msra.mxu1 %v11291_v62  ;;  %v13358_v62 = vld [vmem:[%s15995_s1 + $0x60] sm:$0xff]  }
 0x1af   :  { %9380 = vmatprep.subr.bf16.mxu0 %v13258_v1  ;;  %10152 = vmatprep.subr.bf16.mxu1 %v11294_v55 }
 0x1b2   :  { %9381 = vmatpush3.bf16.msra.mxu0 %v13273_v7  ;;  %10153 = vmatpush3.bf16.msra.mxu1 %v11294_v55  ;;  %v11309_v55 = vld [vmem:[%s15995_s1 + $0xe0] sm:$0xff]  }
 0x1b3   :  { %9404 = vmatprep.subr.bf16.mxu0 %v13279_v8  ;;  %9432 = vmatprep.subr.bf16.mxu1 %v11297_v46  ;;  %v13369_v46 = vld [vmem:[%s15995_s1 + $0x20] sm:$0xff]  }
 0x1b5   :  { %3446 = vmatmul.mubr.bf16.vlgmr.msra.gmra.mxu0 %v10540_v51  ;;  %10155 = vmatmul.mubr.bf16.vlgmr.msra.gmra.mxu1 %v10544_v4  ;;  %v9081_v51 = vpop.f32.mrf.mxu1 }
 0x1b6   :  { %9405 = vmatpush3.bf16.msra.mxu0 %v13296_v21  ;;  %9433 = vmatpush3.bf16.msra.mxu1 %v11299_v22  ;;  %v13364_v4 = vadd.f32 %v9081_v51, %v9080_v52  ;;  %v11315_v22 = vld [vmem:[%s15995_s1 + $0x98] sm:$0xff]   ;;  %v11323_v52 = vld [vmem:[%s15995_s1 + $0x88] sm:$0xff]  }
 0x1b7   :  { %9406 = vmatprep.subr.bf16.mxu0 %v13305_v2  ;;  %9434 = vmatprep.subr.bf16.mxu1 %v11301_v20  ;;  %v13405_v20 = vld [vmem:[%s15995_s1 + $0x10] sm:$0xff]  }
 0x1b8   :  { %3453 = vmatprep.mubr.bf16.mxu0 %v10545_v12  ;;  %3901 = vmatprep.mubr.bf16.mxu1 %v10553_v6  ;;  %v11311_v12 = vld [vmem:[%s15995_s1 + $0xa0] sm:$0xff]   ;;  %v13378_v6 = vld [vmem:[%s15995_s1 + $0x58] sm:$0xff]   ;;  %16068 = vst [vmem:[#allocation10_spill] sm:$0xff] %v13405_v20 }
 0x1b9   :  { %16065 = vst [vmem:[#allocation7_spill] sm:$0xff] %v13378_v6 }
 0x1ba   :  { %9407 = vmatpush3.bf16.msra.mxu0 %v13326_v44  ;;  %9435 = vmatpush3.bf16.msra.mxu1 %v11303_v11  ;;  %v11321_v11 = vld [vmem:[%s15995_s1 + $0xc8] sm:$0xff]  }
 0x1bb   :  { %9408 = vmatprep.subr.bf16.mxu0 %v13337_v48  ;;  %9436 = vmatprep.subr.bf16.mxu1 %v11305_v49  ;;  %v13420_v49 = vpop.f32.mrf.mxu1 }
 0x1bd   :  { %3454 = vmatmul.mubr.bf16.gmra.mxu0 %v10547_v24  ;;  %v13414_v24 = vld [vmem:[%s15995_s1 + $0x48] sm:$0xff]   ;;  %v13440_v51 = vpop.f32.mrf.mxu1 }
 0x1be   :  { %9409 = vmatpush3.bf16.msra.mxu0 %v13349_v54  ;;  %9437 = vmatpush3.bf16.msra.mxu1 %v11307_v34  ;;  %16069 = vst [vmem:[#allocation11_spill] sm:$0xff] %v13414_v24  ;;  %v13434_v34 = vld [vmem:[%s15995_s1 + $0x40] sm:$0xff]  }
 0x1bf   :  { %9410 = vmatprep.subr.bf16.mxu0 %v13358_v62  ;;  %9438 = vmatprep.subr.bf16.mxu1 %v11309_v55  ;;  %16071 = vst [vmem:[#allocation13_spill] sm:$0xff] %v13434_v34  ;;  %v11325_v55 = vld [vmem:[%s15995_s1 + $0xc0] sm:$0xff]  }
 0x1c0   :  { %3852 = vmatprep.mubr.bf16.mxu0 %v10550_v32  ;;  %v13425_v32 = vld [vmem:[%s15995_s1 + $0x8] sm:$0xff]  }
 0x1c1   :  { %16070 = vst [vmem:[#allocation12_spill] sm:$0xff] %v13425_v32 }
 0x1c2   :  { %9411 = vmatpush3.bf16.msra.mxu0 %v13369_v46  ;;  %9439 = vmatpush3.bf16.msra.mxu1 %v11311_v12  ;;  %v10548_v12 = vld [vmem:[%s15994_s0 + $0x320] ss:$100 sps:$4 sm:$0xff]  }
 0x1c3   :  { %9412 = vmatprep.subr.bf16.mxu0 %v13378_v6  ;;  %9440 = vmatprep.subr.bf16.mxu1 %v11313_v5  ;;  %v10551_v5 = vld [vmem:[%s15994_s0 + $0x328] ss:$100 sps:$4 sm:$0xff]  }
 0x1c6   :  { %9413 = vmatpush3.bf16.msra.mxu0 %v13387_v17  ;;  %9441 = vmatpush3.bf16.msra.mxu1 %v11315_v22  ;;  %v13451_v22 = vld [vmem:[%s15995_s1] sm:$0xff]  }
 0x1c7   :  { %9414 = vmatprep.subr.bf16.mxu0 %v13396_v23  ;;  %9442 = vmatprep.subr.bf16.mxu1 %v11317_v14  ;;  %16072 = vst [vmem:[#allocation14_spill] sm:$0xff] %v13451_v22  ;;  %v11327_v14 = vld [vmem:[%s15995_s1 + $0x80] sm:$0xff]   ;;  %v10558_v23 = vld [vmem:[%s15994_s0 + $0x3e8] ss:$100 sps:$4 sm:$0xff]  }
 0x1ca   :  { %9415 = vmatpush3.bf16.msra.mxu0 %v13405_v20  ;;  %9443 = vmatpush3.bf16.msra.mxu1 %v11319_v35  ;;  %v13457_v35 = vpop.f32.mrf.mxu0 }
 0x1cb   :  { %9416 = vmatprep.subr.bf16.mxu0 %v13414_v24  ;;  %9444 = vmatprep.subr.bf16.mxu1 %v11321_v11  ;;  %v13462_v11 = vld [vmem:[%s15995_s1 + $0x178] sm:$0xff]  }
 0x1cc   :  { %16073 = vst [vmem:[#allocation15_spill] sm:$0xff] %v13462_v11 }
 0x1ce   :  { %9417 = vmatpush3.bf16.msra.mxu0 %v13425_v32  ;;  %9445 = vmatpush3.bf16.msra.mxu1 %v11323_v52  ;;  %v11329_v52 = vld [vmem:[%s15995_s1 + $0x1f8] sm:$0xff]  }
 0x1cf   :  { %9418 = vmatprep.subr.bf16.mxu0 %v13434_v34  ;;  %9446 = vmatprep.subr.bf16.mxu1 %v11325_v55  ;;  %v10554_v55 = vld [vmem:[%s15994_s0 + $0x3ec] ss:$100 sps:$4 sm:$0xff]  }
 0x1d2   :  { %9419 = vmatpush3.bf16.msra.mxu0 %v13451_v22  ;;  %9447 = vmatpush3.bf16.msra.mxu1 %v11327_v14  ;;  %v10556_v14 = vld [vmem:[%s15994_s0 + $0x3f4] ss:$100 sps:$4 sm:$0xff]  }
 0x1d3   :  { %9460 = vmatprep.subr.bf16.mxu0 %v13462_v11  ;;  %9488 = vmatprep.subr.bf16.mxu1 %v11329_v52  ;;  %v13477_v11 = vld [vmem:[%s15995_s1 + $0x138] sm:$0xff]  }
 0x1d4   :  { %16074 = vst [vmem:[#allocation16_spill] sm:$0xff] %v13477_v11  ;;  %v11331_v52 = vld [vmem:[%s15995_s1 + $0x1b8] sm:$0xff]  }
 0x1d5   :  { %v9102_v22 = vpop.f32.mrf.mxu0  ;;  %v9130_v34 = vpop.f32.mrf.mxu1  ;;  %3853 = vmatmul.mubr.bf16.vlgmr.msra.gmra.mxu0 %v10548_v12  ;;  %3902 = vmatmul.mubr.bf16.vlgmr.msra.gmra.mxu1 %v10551_v5  ;;  %v11333_v12 = vld [vmem:[%s15995_s1 + $0x1f0] sm:$0xff]  }
 0x1d6   :  { %9461 = vmatpush3.bf16.msra.mxu0 %v13477_v11  ;;  %9489 = vmatpush3.bf16.msra.mxu1 %v11331_v52 }
 0x1d7   :  { %v9103_v32 = vpop.f32.mrf.mxu0  ;;  %v9131_v24 = vpop.f32.mrf.mxu1  ;;  %9462 = vmatprep.subr.bf16.mxu0 %v13486_v41  ;;  %9490 = vmatprep.subr.bf16.mxu1 %v11333_v12  ;;  %v13502_v12 = vld [vmem:[%s15995_s1 + $0x130] sm:$0xff]  }
 0x1d8   :  { %v9104_v5 = vadd.f32 %v9103_v32, %v9102_v22  ;;  %v9132_v11 = vadd.f32 %v9131_v24, %v9130_v34  ;;  %3860 = vmatprep.mubr.bf16.mxu0 %v10554_v55  ;;  %3909 = vmatprep.mubr.bf16.mxu1 %v10556_v14  ;;  %16076 = vst [vmem:[#allocation18_spill] sm:$0xff] %v13502_v12  ;;  %v11335_v24 = vld [vmem:[%s15995_s1 + $0x1b0] sm:$0xff]   ;;  %v13511_v22 = vld [vmem:[%s15995_s1 + $0x168] sm:$0xff]  }
 0x1d9   :  { %v9105_v20 = vpop.f32.mrf.mxu0  ;;  %v9133_v52 = vpop.f32.mrf.mxu1  ;;  %16077 = vst [vmem:[#allocation19_spill] sm:$0xff] %v13511_v22  ;;  %v9079_v55 = vadd.f32 %v13332_v45, %v13316_v37  ;;  %v13530_v37 = vld [vmem:[%s15995_s1 + $0x128] sm:$0xff]  }
 0x1da   :  { %v2958_v41 = vadd.f32 %v9104_v5, %v13314_v33  ;;  %9463 = vmatpush3.bf16.msra.mxu0 %v13502_v12  ;;  %9491 = vmatpush3.bf16.msra.mxu1 %v11335_v24  ;;  %v11337_v33 = vld [vmem:[%s15995_s1 + $0x1e8] sm:$0xff]   ;;  %v10562_v24 = vld [vmem:[%s15994_s0 + $0x334] ss:$100 sps:$4 sm:$0xff]   ;;  %v10565_v12 = vld [vmem:[%s15994_s0 + $0x33c] ss:$100 sps:$4 sm:$0xff]  }
 0x1db   :  { %v9106_v32 = vpop.f32.mrf.mxu0  ;;  %v9134_v34 = vpop.f32.mrf.mxu1  ;;  %9464 = vmatprep.subr.bf16.mxu0 %v13511_v22  ;;  %9492 = vmatprep.subr.bf16.mxu1 %v11337_v33 }
 0x1dc   :  { %v13519_v14 = vadd.f32 %v9132_v11, %v2958_v41  ;;  %v9107_v5 = vadd.f32 %v9106_v32, %v9105_v20  ;;  %v9135_v33 = vadd.f32 %v9134_v34, %v9133_v52  ;;  %v11339_v41 = vld [vmem:[%s15995_s1 + $0x1a8] sm:$0xff]  }
 0x1dd   :  { %v9108_v22 = vpop.f32.mrf.mxu0  ;;  %v9136_v17 = vpop.f32.mrf.mxu1  ;;  %3861 = vmatmul.mubr.bf16.gmra.mxu0 %v10558_v23  ;;  %3910 = vmatmul.mubr.bf16.gmra.mxu1 %v10559_v13  ;;  %v13539_v13 = vld [vmem:[%s15995_s1 + $0x160] sm:$0xff]  }
 0x1de   :  { %v2961_v6 = vadd.f32 %v9107_v5, %v9079_v55  ;;  %9465 = vmatpush3.bf16.msra.mxu0 %v13530_v37  ;;  %9493 = vmatpush3.bf16.msra.mxu1 %v11339_v41  ;;  %v11341_v23 = vld [vmem:[%s15995_s1 + $0x1e0] sm:$0xff]  }
 0x1df   :  { %v9109_v45 = vpop.f32.mrf.mxu0  ;;  %v9137_v20 = vpop.f32.mrf.mxu1  ;;  %9466 = vmatprep.subr.bf16.mxu0 %v13539_v13  ;;  %9494 = vmatprep.subr.bf16.mxu1 %v11341_v23  ;;  %v13551_v41 = vld [vmem:[%s15995_s1 + $0x120] sm:$0xff]  }
 0x1e0   :  { %v13545_v11 = vadd.f32 %v9135_v33, %v2961_v6  ;;  %v9110_v52 = vadd.f32 %v9109_v45, %v9108_v22  ;;  %v9138_v32 = vadd.f32 %v9137_v20, %v9136_v17  ;;  %3950 = vmatprep.mubr.bf16.mxu0 %v10562_v24  ;;  %3999 = vmatprep.mubr.bf16.mxu1 %v10565_v12  ;;  %v11343_v6 = vld [vmem:[%s15995_s1 + $0x1a0] sm:$0xff]   ;;  %v13560_v12 = vld [vmem:[%s15995_s1 + $0x158] sm:$0xff]  }
 0x1e1   :  { %v9111_v34 = vpop.f32.mrf.mxu0  ;;  %v9139_v55 = vpop.f32.mrf.mxu1  ;;  %16078 = vst [vmem:[#allocation20_spill] sm:$0xff] %v13551_v41  ;;  %16079 = vst [vmem:[#allocation21_spill] sm:$0xff] %v13560_v12  ;;  %v9085_v24 = vadd.f32 %v13440_v51, %v13420_v49  ;;  %v13582_v49 = vld [vmem:[%s15995_s1 + $0x150] sm:$0xff]  }
 0x1e2   :  { %v2966_v5 = vadd.f32 %v9110_v52, %v13364_v4  ;;  %9467 = vmatpush3.bf16.msra.mxu0 %v13551_v41  ;;  %9495 = vmatpush3.bf16.msra.mxu1 %v11343_v6  ;;  %v11345_v4 = vld [vmem:[%s15995_s1 + $0x1d8] sm:$0xff]   ;;  %16081 = vst [vmem:[#allocation23_spill] sm:$0xff] %v13582_v49  ;;  %v11349_v51 = vld [vmem:[%s15995_s1 + $0x1d0] sm:$0xff]  }
 0x1e3   :  { %v9112_v22 = vpop.f32.mrf.mxu0  ;;  %v9140_v17 = vpop.f32.mrf.mxu1  ;;  %9468 = vmatprep.subr.bf16.mxu0 %v13560_v12  ;;  %9496 = vmatprep.subr.bf16.mxu1 %v11345_v4  ;;  %v13573_v52 = vld [vmem:[%s15995_s1 + $0x118] sm:$0xff]   ;;  %v11355_v4 = vld [vmem:[%s15995_s1 + $0x188] sm:$0xff]  }
 0x1e4   :  { %v13568_v33 = vadd.f32 %v9138_v32, %v2966_v5  ;;  %v9113_v45 = vadd.f32 %v9112_v22, %v9111_v34  ;;  %v9141_v20 = vadd.f32 %v9140_v17, %v9139_v55  ;;  %16080 = vst [vmem:[#allocation22_spill] sm:$0xff] %v13573_v52  ;;  %v11347_v6 = vld [vmem:[%s15995_s1 + $0x198] sm:$0xff]   ;;  %v13593_v34 = vld [vmem:[%s15995_s1 + $0x110] sm:$0xff]   ;;  %v13602_v5 = vld [vmem:[%s15995_s1 + $0x148] sm:$0xff]  }
 0x1e5   :  { %16082 = vst [vmem:[#allocation24_spill] sm:$0xff] %v13593_v34  ;;  %v11351_v55 = vld [vmem:[%s15995_s1 + $0x190] sm:$0xff]   ;;  %16083 = vst [vmem:[#allocation25_spill] sm:$0xff] %v13602_v5  ;;  %v11353_v22 = vld [vmem:[%s15995_s1 + $0x1c8] sm:$0xff]  }
 0x1e6   :  { %v2969_v23 = vadd.f32 %v9113_v45, %v9085_v24  ;;  %9469 = vmatpush3.bf16.msra.mxu0 %v13573_v52  ;;  %9497 = vmatpush3.bf16.msra.mxu1 %v11347_v6  ;;  %v13611_v17 = vld [vmem:[%s15995_s1 + $0x108] sm:$0xff]   ;;  %v13620_v24 = vld [vmem:[%s15995_s1 + $0x140] sm:$0xff]  }
 0x1e7   :  { %9470 = vmatprep.subr.bf16.mxu0 %v13582_v49  ;;  %9498 = vmatprep.subr.bf16.mxu1 %v11349_v51  ;;  %16084 = vst [vmem:[#allocation26_spill] sm:$0xff] %v13611_v17  ;;  %16085 = vst [vmem:[#allocation27_spill] sm:$0xff] %v13620_v24  ;;  %v11357_v45 = vld [vmem:[%s15995_s1 + $0x1c0] sm:$0xff]   ;;  %v10566_v49 = vld [vmem:[%s15994_s0 + $0x3f8] ss:$100 sps:$4 sm:$0xff]  }
 0x1e8   :  { %v13588_v32 = vadd.f32 %v9141_v20, %v2969_v23  ;;  %v10560_v20 = vld [vmem:[%s15994_s0 + $0x330] ss:$100 sps:$4 sm:$0xff]   ;;  %v10563_v23 = vld [vmem:[%s15994_s0 + $0x338] ss:$100 sps:$4 sm:$0xff]   ;;  %v13635_v6 = vld [vmem:[%s15995_s1 + $0x100] sm:$0xff]  }
 0x1e9   :  { %16086 = vst [vmem:[#allocation28_spill] sm:$0xff] %v13635_v6  ;;  %v11359_v51 = vld [vmem:[%s15995_s1 + $0x180] sm:$0xff]  }
 0x1ea   :  { %9471 = vmatpush3.bf16.msra.mxu0 %v13593_v34  ;;  %9499 = vmatpush3.bf16.msra.mxu1 %v11351_v55  ;;  %v13644_v55 = vld [vmem:[%s15995_s1 + $0x278] sm:$0xff]   ;;  %v10569_v52 = vld [vmem:[%s15994_s0 + $0x400] ss:$100 sps:$4 sm:$0xff]  }
 0x1eb   :  { %9472 = vmatprep.subr.bf16.mxu0 %v13602_v5  ;;  %9500 = vmatprep.subr.bf16.mxu1 %v11353_v22  ;;  %16087 = vst [vmem:[#allocation29_spill] sm:$0xff] %v13644_v55  ;;  %v11361_v22 = vld [vmem:[%s15995_s1 + $0x2f8] sm:$0xff]   ;;  %v13668_v5 = vld [vmem:[%s15995_s1 + $0x270] sm:$0xff]  }
 0x1ec   :  { %16089 = vst [vmem:[#allocation31_spill] sm:$0xff] %v13668_v5 }
 0x1ee   :  { %9473 = vmatpush3.bf16.msra.mxu0 %v13611_v17  ;;  %9501 = vmatpush3.bf16.msra.mxu1 %v11355_v4  ;;  %v10568_v4 = vld [vmem:[%s15994_s0 + $0x3fc] ss:$100 sps:$4 sm:$0xff]  }
 0x1ef   :  { %9474 = vmatprep.subr.bf16.mxu0 %v13620_v24  ;;  %9502 = vmatprep.subr.bf16.mxu1 %v11357_v45  ;;  %v10571_v45 = vld [vmem:[%s15994_s0 + $0x404] ss:$100 sps:$4 sm:$0xff]  }
 0x1f2   :  { %9475 = vmatpush3.bf16.msra.mxu0 %v13635_v6  ;;  %9503 = vmatpush3.bf16.msra.mxu1 %v11359_v51 }
 0x1f3   :  { %9516 = vmatprep.subr.bf16.mxu0 %v13644_v55  ;;  %9544 = vmatprep.subr.bf16.mxu1 %v11361_v22  ;;  %v13659_v55 = vld [vmem:[%s15995_s1 + $0x238] sm:$0xff]  }
 0x1f4   :  { %16088 = vst [vmem:[#allocation30_spill] sm:$0xff] %v13659_v55  ;;  %v11363_v22 = vld [vmem:[%s15995_s1 + $0x2b8] sm:$0xff]  }
 0x1f5   :  { %v9158_v51 = vpop.f32.mrf.mxu0  ;;  %v9186_v6 = vpop.f32.mrf.mxu1  ;;  %3951 = vmatmul.mubr.bf16.vlgmr.msra.gmra.mxu0 %v10560_v20  ;;  %4000 = vmatmul.mubr.bf16.vlgmr.msra.gmra.mxu1 %v10563_v23  ;;  %v11365_v20 = vld [vmem:[%s15995_s1 + $0x2f0] sm:$0xff]  }
 0x1f6   :  { %9517 = vmatpush3.bf16.msra.mxu0 %v13659_v55  ;;  %9545 = vmatpush3.bf16.msra.mxu1 %v11363_v22 }
 0x1f7   :  { %v9159_v24 = vpop.f32.mrf.mxu0  ;;  %v9187_v17 = vpop.f32.mrf.mxu1  ;;  %9518 = vmatprep.subr.bf16.mxu0 %v13668_v5  ;;  %9546 = vmatprep.subr.bf16.mxu1 %v11365_v20  ;;  %v13684_v20 = vld [vmem:[%s15995_s1 + $0x230] sm:$0xff]  }
 0x1f8   :  { %v9160_v23 = vadd.f32 %v9159_v24, %v9158_v51  ;;  %v9188_v55 = vadd.f32 %v9187_v17, %v9186_v6  ;;  %3958 = vmatprep.mubr.bf16.mxu0 %v10568_v4  ;;  %4007 = vmatprep.mubr.bf16.mxu1 %v10571_v45  ;;  %16090 = vst [vmem:[#allocation32_spill] sm:$0xff] %v13684_v20  ;;  %v11367_v17 = vld [vmem:[%s15995_s1 + $0x2b0] sm:$0xff]   ;;  %v13693_v4 = vld [vmem:[%s15995_s1 + $0x268] sm:$0xff]  }
 0x1f9   :  { %v9161_v34 = vpop.f32.mrf.mxu0  ;;  %v9189_v22 = vpop.f32.mrf.mxu1  ;;  %16091 = vst [vmem:[#allocation33_spill] sm:$0xff] %v13693_v4 }
 0x1fa   :  { %v3056_v5 = vadd.f32 %v9160_v23, %v13519_v14  ;;  %9519 = vmatpush3.bf16.msra.mxu0 %v13684_v20  ;;  %9547 = vmatpush3.bf16.msra.mxu1 %v11367_v17  ;;  %v11369_v14 = vld [vmem:[%s15995_s1 + $0x2e8] sm:$0xff]  }
 0x1fb   :  { %v9162_v24 = vpop.f32.mrf.mxu0  ;;  %v9190_v6 = vpop.f32.mrf.mxu1  ;;  %9520 = vmatprep.subr.bf16.mxu0 %v13693_v4  ;;  %9548 = vmatprep.subr.bf16.mxu1 %v11369_v14  ;;  %v10574_v23 = vld [vmem:[%s15994_s0 + $0x344] ss:$100 sps:$4 sm:$0xff]   ;;  %v10577_v17 = vld [vmem:[%s15994_s0 + $0x34c] ss:$100 sps:$4 sm:$0xff]  }
 0x1fc   :  { %v13699_v45 = vadd.f32 %v9188_v55, %v3056_v5  ;;  %v9163_v51 = vadd.f32 %v9162_v24, %v9161_v34  ;;  %v9191_v41 = vadd.f32 %v9190_v6, %v9189_v22  ;;  %v13711_v5 = vld [vmem:[%s15995_s1 + $0x228] sm:$0xff]  }
 0x1fd   :  { %v9164_v20 = vpop.f32.mrf.mxu0  ;;  %3959 = vmatmul.mubr.bf16.gmra.mxu0 %v10566_v49  ;;  %v9192_v12 = vpop.f32.mrf.mxu1  ;;  %4008 = vmatmul.mubr.bf16.gmra.mxu1 %v10569_v52  ;;  %16092 = vst [vmem:[#allocation34_spill] sm:$0xff] %v13711_v5  ;;  %v11371_v34 = vld [vmem:[%s15995_s1 + $0x2a8] sm:$0xff]   ;;  %v13720_v52 = vld [vmem:[%s15995_s1 + $0x260] sm:$0xff]  }
 0x1fe   :  { %v3059_v4 = vadd.f32 %v9163_v51, %v13545_v11  ;;  %9521 = vmatpush3.bf16.msra.mxu0 %v13711_v5  ;;  %9549 = vmatpush3.bf16.msra.mxu1 %v11371_v34  ;;  %16093 = vst [vmem:[#allocation35_spill] sm:$0xff] %v13720_v52  ;;  %v11373_v11 = vld [vmem:[%s15995_s1 + $0x2e0] sm:$0xff]  }
 0x1ff   :  { %v9165_v55 = vpop.f32.mrf.mxu0  ;;  %v9193_v24 = vpop.f32.mrf.mxu1  ;;  %9522 = vmatprep.subr.bf16.mxu0 %v13720_v52  ;;  %9550 = vmatprep.subr.bf16.mxu1 %v11373_v11  ;;  %v13732_v5 = vld [vmem:[%s15995_s1 + $0x220] sm:$0xff]   ;;  %v13753_v11 = vld [vmem:[%s15995_s1 + $0x218] sm:$0xff]  }
 0x200   :  { %v13726_v49 = vadd.f32 %v9191_v41, %v3059_v4  ;;  %v9166_v22 = vadd.f32 %v9165_v55, %v9164_v20  ;;  %v9194_v6 = vadd.f32 %v9193_v24, %v9192_v12  ;;  %4048 = vmatprep.mubr.bf16.mxu0 %v10574_v23  ;;  %4097 = vmatprep.mubr.bf16.mxu1 %v10577_v17  ;;  %v11375_v41 = vld [vmem:[%s15995_s1 + $0x2a0] sm:$0xff]   ;;  %v13741_v4 = vld [vmem:[%s15995_s1 + $0x258] sm:$0xff]  }
 0x201   :  { %v9167_v14 = vpop.f32.mrf.mxu0  ;;  %v9195_v51 = vpop.f32.mrf.mxu1  ;;  %16094 = vst [vmem:[#allocation36_spill] sm:$0xff] %v13732_v5  ;;  %16095 = vst [vmem:[#allocation37_spill] sm:$0xff] %v13741_v4 }
 0x202   :  { %v3064_v34 = vadd.f32 %v9166_v22, %v13568_v33  ;;  %9523 = vmatpush3.bf16.msra.mxu0 %v13732_v5  ;;  %9551 = vmatpush3.bf16.msra.mxu1 %v11375_v41  ;;  %v11377_v33 = vld [vmem:[%s15995_s1 + $0x2d8] sm:$0xff]   ;;  %16096 = vst [vmem:[#allocation38_spill] sm:$0xff] %v13753_v11  ;;  %v13782_v41 = vld [vmem:[%s15995_s1 + $0x248] sm:$0xff]  }
 0x203   :  { %v9168_v20 = vpop.f32.mrf.mxu0  ;;  %v9196_v12 = vpop.f32.mrf.mxu1  ;;  %9524 = vmatprep.subr.bf16.mxu0 %v13741_v4  ;;  %9552 = vmatprep.subr.bf16.mxu1 %v11377_v33  ;;  %v11379_v22 = vld [vmem:[%s15995_s1 + $0x298] sm:$0xff]   ;;  %16099 = vst [vmem:[#allocation41_spill] sm:$0xff] %v13782_v41  ;;  %v11387_v33 = vld [vmem:[%s15995_s1 + $0x288] sm:$0xff]   ;;  %v10581_v4 = vld [vmem:[%s15994_s0 + $0x410] ss:$100 sps:$4 sm:$0xff]  }
 0x204   :  { %v13747_v23 = vadd.f32 %v9194_v6, %v3064_v34  ;;  %v9169_v17 = vadd.f32 %v9168_v20, %v9167_v14  ;;  %v9197_v55 = vadd.f32 %v9196_v12, %v9195_v51  ;;  %v13762_v6 = vld [vmem:[%s15995_s1 + $0x250] sm:$0xff]   ;;  %v11385_v20 = vld [vmem:[%s15995_s1 + $0x2c8] sm:$0xff]  }
 0x205   :  { %16097 = vst [vmem:[#allocation39_spill] sm:$0xff] %v13762_v6  ;;  %v13773_v51 = vld [vmem:[%s15995_s1 + $0x210] sm:$0xff]   ;;  %v13791_v12 = vld [vmem:[%s15995_s1 + $0x208] sm:$0xff]  }
 0x206   :  { %v3067_v24 = vadd.f32 %v9169_v17, %v13588_v32  ;;  %9525 = vmatpush3.bf16.msra.mxu0 %v13753_v11  ;;  %9553 = vmatpush3.bf16.msra.mxu1 %v11379_v22  ;;  %v11381_v32 = vld [vmem:[%s15995_s1 + $0x2d0] sm:$0xff]   ;;  %16098 = vst [vmem:[#allocation40_spill] sm:$0xff] %v13773_v51  ;;  %16100 = vst [vmem:[#allocation42_spill] sm:$0xff] %v13791_v12  ;;  %v13800_v17 = vld [vmem:[%s15995_s1 + $0x240] sm:$0xff]  }
 0x207   :  { %9526 = vmatprep.subr.bf16.mxu0 %v13762_v6  ;;  %9554 = vmatprep.subr.bf16.mxu1 %v11381_v32  ;;  %v11383_v34 = vld [vmem:[%s15995_s1 + $0x290] sm:$0xff]   ;;  %16101 = vst [vmem:[#allocation43_spill] sm:$0xff] %v13800_v17  ;;  %v10575_v22 = vld [vmem:[%s15994_s0 + $0x348] ss:$100 sps:$4 sm:$0xff]   ;;  %v13815_v32 = vld [vmem:[%s15995_s1 + $0x200] sm:$0xff]  }
 0x208   :  { %v13768_v14 = vadd.f32 %v9197_v55, %v3067_v24  ;;  %v11389_v55 = vld [vmem:[%s15995_s1 + $0x2c0] sm:$0xff]   ;;  %16102 = vst [vmem:[#allocation44_spill] sm:$0xff] %v13815_v32  ;;  %v10578_v11 = vld [vmem:[%s15994_s0 + $0x408] ss:$100 sps:$4 sm:$0xff]  }
 0x209   :  { %v10572_v24 = vld [vmem:[%s15994_s0 + $0x340] ss:$100 sps:$4 sm:$0xff]  }
 0x20a   :  { %9527 = vmatpush3.bf16.msra.mxu0 %v13773_v51  ;;  %9555 = vmatpush3.bf16.msra.mxu1 %v11383_v34  ;;  %v11391_v34 = vld [vmem:[%s15995_s1 + $0x280] sm:$0xff]   ;;  %v13848_v51 = vld [vmem:[%s15995_s1 + $0x370] sm:$0xff]  }
 0x20b   :  { %9528 = vmatprep.subr.bf16.mxu0 %v13782_v41  ;;  %9556 = vmatprep.subr.bf16.mxu1 %v11385_v20  ;;  %v13824_v20 = vld [vmem:[%s15995_s1 + $0x378] sm:$0xff]   ;;  %16105 = vst [vmem:[#allocation47_spill] sm:$0xff] %v13848_v51 }
 0x20c   :  { %16103 = vst [vmem:[#allocation45_spill] sm:$0xff] %v13824_v20 }
 0x20e   :  { %9529 = vmatpush3.bf16.msra.mxu0 %v13791_v12  ;;  %9557 = vmatpush3.bf16.msra.mxu1 %v11387_v33  ;;  %v11393_v33 = vld [vmem:[%s15995_s1 + $0x3f8] sm:$0xff]  }
 0x20f   :  { %9530 = vmatprep.subr.bf16.mxu0 %v13800_v17  ;;  %9558 = vmatprep.subr.bf16.mxu1 %v11389_v55  ;;  %v10580_v55 = vld [vmem:[%s15994_s0 + $0x40c] ss:$100 sps:$4 sm:$0xff]  }
 0x212   :  { %9531 = vmatpush3.bf16.msra.mxu0 %v13815_v32  ;;  %9559 = vmatpush3.bf16.msra.mxu1 %v11391_v34  ;;  %v10583_v34 = vld [vmem:[%s15994_s0 + $0x414] ss:$100 sps:$4 sm:$0xff]  }
 0x213   :  { %9572 = vmatprep.subr.bf16.mxu0 %v13824_v20  ;;  %9600 = vmatprep.subr.bf16.mxu1 %v11393_v33  ;;  %v13839_v20 = vld [vmem:[%s15995_s1 + $0x338] sm:$0xff]  }
 0x214   :  { %16104 = vst [vmem:[#allocation46_spill] sm:$0xff] %v13839_v20  ;;  %v11395_v33 = vld [vmem:[%s15995_s1 + $0x3b8] sm:$0xff]  }
 0x215   :  { %v9214_v32 = vpop.f32.mrf.mxu0  ;;  %v9242_v17 = vpop.f32.mrf.mxu1  ;;  %4049 = vmatmul.mubr.bf16.vlgmr.msra.gmra.mxu0 %v10572_v24  ;;  %4098 = vmatmul.mubr.bf16.vlgmr.msra.gmra.mxu1 %v10575_v22  ;;  %v11397_v24 = vld [vmem:[%s15995_s1 + $0x3f0] sm:$0xff]  }
 0x216   :  { %9573 = vmatpush3.bf16.msra.mxu0 %v13839_v20  ;;  %9601 = vmatpush3.bf16.msra.mxu1 %v11395_v33 }
 0x217   :  { %v9215_v12 = vpop.f32.mrf.mxu0  ;;  %v9243_v41 = vpop.f32.mrf.mxu1  ;;  %9574 = vmatprep.subr.bf16.mxu0 %v13848_v51  ;;  %9602 = vmatprep.subr.bf16.mxu1 %v11397_v24  ;;  %v13864_v24 = vld [vmem:[%s15995_s1 + $0x330] sm:$0xff]  }
 0x218   :  { %v9216_v22 = vadd.f32 %v9215_v12, %v9214_v32  ;;  %v9244_v20 = vadd.f32 %v9243_v41, %v9242_v17  ;;  %4056 = vmatprep.mubr.bf16.mxu0 %v10580_v55  ;;  %4105 = vmatprep.mubr.bf16.mxu1 %v10583_v34  ;;  %16106 = vst [vmem:[#allocation48_spill] sm:$0xff] %v13864_v24  ;;  %v11399_v41 = vld [vmem:[%s15995_s1 + $0x3b0] sm:$0xff]   ;;  %v13873_v32 = vld [vmem:[%s15995_s1 + $0x368] sm:$0xff]  }
 0x219   :  { %v9217_v6 = vpop.f32.mrf.mxu0  ;;  %v9245_v33 = vpop.f32.mrf.mxu1  ;;  %16107 = vst [vmem:[#allocation49_spill] sm:$0xff] %v13873_v32 }
 0x21a   :  { %v3154_v51 = vadd.f32 %v9216_v22, %v13699_v45  ;;  %9575 = vmatpush3.bf16.msra.mxu0 %v13864_v24  ;;  %9603 = vmatpush3.bf16.msra.mxu1 %v11399_v41  ;;  %v11401_v45 = vld [vmem:[%s15995_s1 + $0x3e8] sm:$0xff]   ;;  %v10586_v22 = vld [vmem:[%s15994_s0 + $0x354] ss:$100 sps:$4 sm:$0xff]   ;;  %v10589_v41 = vld [vmem:[%s15994_s0 + $0x35c] ss:$100 sps:$4 sm:$0xff]  }
 0x21b   :  { %v9218_v12 = vpop.f32.mrf.mxu0  ;;  %v9246_v17 = vpop.f32.mrf.mxu1  ;;  %9576 = vmatprep.subr.bf16.mxu0 %v13873_v32  ;;  %9604 = vmatprep.subr.bf16.mxu1 %v11401_v45 }
 0x21c   :  { %v13879_v55 = vadd.f32 %v9244_v20, %v3154_v51  ;;  %v9219_v34 = vadd.f32 %v9218_v12, %v9217_v6  ;;  %v9247_v52 = vadd.f32 %v9246_v17, %v9245_v33  ;;  %v13891_v51 = vld [vmem:[%s15995_s1 + $0x328] sm:$0xff]  }
 0x21d   :  { %v9220_v24 = vpop.f32.mrf.mxu0  ;;  %4057 = vmatmul.mubr.bf16.gmra.mxu0 %v10578_v11  ;;  %v9248_v5 = vpop.f32.mrf.mxu1  ;;  %4106 = vmatmul.mubr.bf16.gmra.mxu1 %v10581_v4  ;;  %16108 = vst [vmem:[#allocation50_spill] sm:$0xff] %v13891_v51  ;;  %v11403_v6 = vld [vmem:[%s15995_s1 + $0x3a8] sm:$0xff]   ;;  %v13900_v4 = vld [vmem:[%s15995_s1 + $0x360] sm:$0xff]  }
 0x21e   :  { %v3157_v32 = vadd.f32 %v9219_v34, %v13726_v49  ;;  %9577 = vmatpush3.bf16.msra.mxu0 %v13891_v51  ;;  %9605 = vmatpush3.bf16.msra.mxu1 %v11403_v6  ;;  %v11405_v49 = vld [vmem:[%s15995_s1 + $0x3e0] sm:$0xff]  }
 0x21f   :  { %v9221_v20 = vpop.f32.mrf.mxu0  ;;  %v9249_v12 = vpop.f32.mrf.mxu1  ;;  %9578 = vmatprep.subr.bf16.mxu0 %v13900_v4  ;;  %9606 = vmatprep.subr.bf16.mxu1 %v11405_v49  ;;  %v13912_v51 = vld [vmem:[%s15995_s1 + $0x320] sm:$0xff]   ;;  %v13933_v49 = vld [vmem:[%s15995_s1 + $0x318] sm:$0xff]  }
 0x220   :  { %v13906_v11 = vadd.f32 %v9247_v52, %v3157_v32  ;;  %v9222_v33 = vadd.f32 %v9221_v20, %v9220_v24  ;;  %v9250_v17 = vadd.f32 %v9249_v12, %v9248_v5  ;;  %4146 = vmatprep.mubr.bf16.mxu0 %v10586_v22  ;;  %4195 = vmatprep.mubr.bf16.mxu1 %v10589_v41  ;;  %v11407_v52 = vld [vmem:[%s15995_s1 + $0x3a0] sm:$0xff]   ;;  %v13921_v32 = vld [vmem:[%s15995_s1 + $0x358] sm:$0xff]  }
 0x221   :  { %v9223_v45 = vpop.f32.mrf.mxu0  ;;  %v9251_v34 = vpop.f32.mrf.mxu1  ;;  %16109 = vst [vmem:[#allocation51_spill] sm:$0xff] %v13933_v49 }
 0x222   :  { %v3162_v6 = vadd.f32 %v9222_v33, %v13747_v23  ;;  %9579 = vmatpush3.bf16.msra.mxu0 %v13912_v51  ;;  %9607 = vmatpush3.bf16.msra.mxu1 %v11407_v52  ;;  %v11409_v23 = vld [vmem:[%s15995_s1 + $0x3d8] sm:$0xff]   ;;  %v13962_v52 = vld [vmem:[%s15995_s1 + $0x348] sm:$0xff]  }
 0x223   :  { %v9224_v24 = vpop.f32.mrf.mxu0  ;;  %v9252_v5 = vpop.f32.mrf.mxu1  ;;  %9580 = vmatprep.subr.bf16.mxu0 %v13921_v32  ;;  %9608 = vmatprep.subr.bf16.mxu1 %v11409_v23  ;;  %v11411_v33 = vld [vmem:[%s15995_s1 + $0x398] sm:$0xff]   ;;  %16112 = vst [vmem:[#allocation54_spill] sm:$0xff] %v13962_v52  ;;  %v11419_v23 = vld [vmem:[%s15995_s1 + $0x388] sm:$0xff]  }
 0x224   :  { %v13927_v22 = vadd.f32 %v9250_v17, %v3162_v6  ;;  %v9225_v41 = vadd.f32 %v9224_v24, %v9223_v45  ;;  %v9253_v20 = vadd.f32 %v9252_v5, %v9251_v34  ;;  %v13942_v17 = vld [vmem:[%s15995_s1 + $0x350] sm:$0xff]   ;;  %v11417_v24 = vld [vmem:[%s15995_s1 + $0x3c8] sm:$0xff]  }
 0x225   :  { %16110 = vst [vmem:[#allocation52_spill] sm:$0xff] %v13942_v17  ;;  %v13953_v34 = vld [vmem:[%s15995_s1 + $0x310] sm:$0xff]   ;;  %v13971_v5 = vld [vmem:[%s15995_s1 + $0x308] sm:$0xff]  }
 0x226   :  { %v3165_v12 = vadd.f32 %v9225_v41, %v13768_v14  ;;  %9581 = vmatpush3.bf16.msra.mxu0 %v13933_v49  ;;  %9609 = vmatpush3.bf16.msra.mxu1 %v11411_v33  ;;  %v11413_v14 = vld [vmem:[%s15995_s1 + $0x3d0] sm:$0xff]   ;;  %16111 = vst [vmem:[#allocation53_spill] sm:$0xff] %v13953_v34  ;;  %16113 = vst [vmem:[#allocation55_spill] sm:$0xff] %v13971_v5  ;;  %v13980_v41 = vld [vmem:[%s15995_s1 + $0x340] sm:$0xff]  }
 0x227   :  { %9582 = vmatprep.subr.bf16.mxu0 %v13942_v17  ;;  %9610 = vmatprep.subr.bf16.mxu1 %v11413_v14  ;;  %v11415_v6 = vld [vmem:[%s15995_s1 + $0x390] sm:$0xff]   ;;  %16114 = vst [vmem:[#allocation56_spill] sm:$0xff] %v13980_v41  ;;  %v10587_v33 = vld [vmem:[%s15994_s0 + $0x358] ss:$100 sps:$4 sm:$0xff]   ;;  %v13995_v14 = vld [vmem:[%s15995_s1 + $0x300] sm:$0xff]  }
 0x228   :  { %v13948_v45 = vadd.f32 %v9253_v20, %v3165_v12  ;;  %v11421_v20 = vld [vmem:[%s15995_s1 + $0x3c0] sm:$0xff]   ;;  %v10584_v12 = vld [vmem:[%s15994_s0 + $0x350] ss:$100 sps:$4 sm:$0xff]   ;;  %16115 = vst [vmem:[#allocation57_spill] sm:$0xff] %v13995_v14 }
 0x22a   :  { %9583 = vmatpush3.bf16.msra.mxu0 %v13953_v34  ;;  %9611 = vmatpush3.bf16.msra.mxu1 %v11415_v6  ;;  %v11423_v6 = vld [vmem:[%s15995_s1 + $0x380] sm:$0xff]  }
 0x22b   :  { %9584 = vmatprep.subr.bf16.mxu0 %v13962_v52  ;;  %9612 = vmatprep.subr.bf16.mxu1 %v11417_v24  ;;  %v14004_v24 = vld [vmem:[%s15995_s1 + $0x478] sm:$0xff]   ;;  %v14026_v52 = vld [vmem:[%s15995_s1 + $0x470] sm:$0xff]  }
 0x22c   :  { %16116 = vst [vmem:[#allocation58_spill] sm:$0xff] %v14004_v24 }
 0x22e   :  { %9585 = vmatpush3.bf16.msra.mxu0 %v13971_v5  ;;  %9613 = vmatpush3.bf16.msra.mxu1 %v11419_v23  ;;  %v11425_v23 = vld [vmem:[%s15995_s1 + $0x4f8] sm:$0xff]  }
 0x22f   :  { %9586 = vmatprep.subr.bf16.mxu0 %v13980_v41  ;;  %9614 = vmatprep.subr.bf16.mxu1 %v11421_v20  ;;  %v10592_v20 = vld [vmem:[%s15994_s0 + $0x41c] ss:$100 sps:$4 sm:$0xff]  }
 0x232   :  { %9587 = vmatpush3.bf16.msra.mxu0 %v13995_v14  ;;  %9615 = vmatpush3.bf16.msra.mxu1 %v11423_v6  ;;  %v10595_v6 = vld [vmem:[%s15994_s0 + $0x424] ss:$100 sps:$4 sm:$0xff]  }
 0x233   :  { %9628 = vmatprep.subr.bf16.mxu0 %v14004_v24  ;;  %9656 = vmatprep.subr.bf16.mxu1 %v11425_v23  ;;  %v14019_v24 = vld [vmem:[%s15995_s1 + $0x438] sm:$0xff]  }
 0x234   :  { %16117 = vst [vmem:[#allocation59_spill] sm:$0xff] %v14019_v24 }
 0x235   :  { %v9270_v14 = vpop.f32.mrf.mxu0  ;;  %v9298_v41 = vpop.f32.mrf.mxu1  ;;  %4147 = vmatmul.mubr.bf16.vlgmr.msra.gmra.mxu0 %v10584_v12  ;;  %4196 = vmatmul.mubr.bf16.vlgmr.msra.gmra.mxu1 %v10587_v33 }
 0x236   :  { %9629 = vmatpush3.bf16.msra.mxu0 %v14019_v24  ;;  %9657 = vmatpush3.bf16.msra.mxu1 %v12965_v58  ;;  %v10590_v58 = vld [vmem:[%s15994_s0 + $0x418] ss:$100 sps:$4 sm:$0xff]   ;;  %v10593_v24 = vld [vmem:[%s15994_s0 + $0x420] ss:$100 sps:$4 sm:$0xff]  }
 0x237   :  { %v9271_v23 = vpop.f32.mrf.mxu0  ;;  %v9299_v5 = vpop.f32.mrf.mxu1  ;;  %9630 = vmatprep.subr.bf16.mxu0 %v14026_v52  ;;  %9658 = vmatprep.subr.bf16.mxu1 %v12974_v59  ;;  %v14040_v59 = vld [vmem:[%s15995_s1 + $0x430] sm:$0xff]  }
 0x238   :  { %v9272_v12 = vadd.f32 %v9271_v23, %v9270_v14  ;;  %v9300_v33 = vadd.f32 %v9299_v5, %v9298_v41  ;;  %4154 = vmatprep.mubr.bf16.mxu0 %v10592_v20  ;;  %4203 = vmatprep.mubr.bf16.mxu1 %v10595_v6  ;;  %16118 = vst [vmem:[#allocation60_spill] sm:$0xff] %v14040_v59  ;;  %v14047_v14 = vld [vmem:[%s15995_s1 + $0x468] sm:$0xff]  }
 0x239   :  { %v9273_v34 = vpop.f32.mrf.mxu0  ;;  %v9301_v17 = vpop.f32.mrf.mxu1  ;;  %16119 = vst [vmem:[#allocation61_spill] sm:$0xff] %v14047_v14  ;;  %v10598_v6 = vld [vmem:[%s15994_s0 + $0x364] ss:$100 sps:$4 sm:$0xff]  }
 0x23a   :  { %v3252_v49 = vadd.f32 %v9272_v12, %v13879_v55  ;;  %9631 = vmatpush3.bf16.msra.mxu0 %v14040_v59  ;;  %9659 = vmatpush3.bf16.msra.mxu1 %v12992_v3  ;;  %v10601_v3 = vld [vmem:[%s15994_s0 + $0x36c] ss:$100 sps:$4 sm:$0xff]  }
 0x23b   :  { %v9274_v5 = vpop.f32.mrf.mxu0  ;;  %v9302_v41 = vpop.f32.mrf.mxu1  ;;  %9632 = vmatprep.subr.bf16.mxu0 %v14047_v14  ;;  %9660 = vmatprep.subr.bf16.mxu1 %v13001_v61  ;;  %v14063_v61 = vld [vmem:[%s15995_s1 + $0x428] sm:$0xff]  }
 0x23c   :  { %v14051_v55 = vadd.f32 %v9300_v33, %v3252_v49  ;;  %v9275_v20 = vadd.f32 %v9274_v5, %v9273_v34  ;;  %v9303_v14 = vadd.f32 %v9302_v41, %v9301_v17  ;;  %v14070_v33 = vld [vmem:[%s15995_s1 + $0x460] sm:$0xff]  }
 0x23d   :  { %v9276_v23 = vpop.f32.mrf.mxu0  ;;  %4155 = vmatmul.mubr.bf16.gmra.mxu0 %v10590_v58  ;;  %v9304_v12 = vpop.f32.mrf.mxu1  ;;  %4204 = vmatmul.mubr.bf16.gmra.mxu1 %v10593_v24  ;;  %v14080_v41 = vld [vmem:[%s15995_s1 + $0x420] sm:$0xff]  }
 0x23e   :  { %v3255_v59 = vadd.f32 %v9275_v20, %v13906_v11  ;;  %9633 = vmatpush3.bf16.msra.mxu0 %v14063_v61  ;;  %9661 = vmatpush3.bf16.msra.mxu1 %v13017_v15 }
 0x23f   :  { %v9277_v49 = vpop.f32.mrf.mxu0  ;;  %v9305_v34 = vpop.f32.mrf.mxu1  ;;  %9634 = vmatprep.subr.bf16.mxu0 %v14070_v33  ;;  %9662 = vmatprep.subr.bf16.mxu1 %v13026_v18 }
 0x240   :  { %v14074_v11 = vadd.f32 %v9303_v14, %v3255_v59  ;;  %v9278_v17 = vadd.f32 %v9277_v49, %v9276_v23  ;;  %v9306_v24 = vadd.f32 %v9305_v34, %v9304_v12  ;;  %4244 = vmatprep.mubr.bf16.mxu0 %v10598_v6  ;;  %4293 = vmatprep.mubr.bf16.mxu1 %v10601_v3  ;;  %v14087_v14 = vld [vmem:[%s15995_s1 + $0x458] sm:$0xff]   ;;  %v14104_v23 = vld [vmem:[%s15995_s1 + $0x450] sm:$0xff]   ;;  %v10599_v12 = vld [vmem:[%s15994_s0 + $0x368] ss:$100 sps:$4 sm:$0xff]  }
 0x241   :  { %v9279_v58 = vpop.f32.mrf.mxu0  ;;  %v9307_v5 = vpop.f32.mrf.mxu1  ;;  %v10604_v49 = vld [vmem:[%s15994_s0 + $0x42c] ss:$100 sps:$4 sm:$0xff]   ;;  %v10607_v34 = vld [vmem:[%s15994_s0 + $0x434] ss:$100 sps:$4 sm:$0xff]  }
 0x242   :  { %v3260_v15 = vadd.f32 %v9278_v17, %v13927_v22  ;;  %9635 = vmatpush3.bf16.msra.mxu0 %v14080_v41  ;;  %9663 = vmatpush3.bf16.msra.mxu1 %v13036_v25  ;;  %v14097_v25 = vld [vmem:[%s15995_s1 + $0x418] sm:$0xff]  }
 0x243   :  { %v9280_v18 = vpop.f32.mrf.mxu0  ;;  %v9308_v59 = vpop.f32.mrf.mxu1  ;;  %9636 = vmatprep.subr.bf16.mxu0 %v14087_v14  ;;  %9664 = vmatprep.subr.bf16.mxu1 %v13047_v28 }
 0x244   :  { %v14091_v22 = vadd.f32 %v9306_v24, %v3260_v15  ;;  %v9281_v20 = vadd.f32 %v9280_v18, %v9279_v58  ;;  %v9309_v6 = vadd.f32 %v9308_v59, %v9307_v5  ;;  %v14174_v5 = vld [vmem:[%s15995_s1 + $0x570] sm:$0xff]  }
 0x246   :  { %v3263_v3 = vadd.f32 %v9281_v20, %v13948_v45  ;;  %9637 = vmatpush3.bf16.msra.mxu0 %v14097_v25  ;;  %9665 = vmatpush3.bf16.msra.mxu1 %v13056_v31  ;;  %v14113_v45 = vld [vmem:[%s15995_s1 + $0x410] sm:$0xff]   ;;  %v14120_v31 = vld [vmem:[%s15995_s1 + $0x448] sm:$0xff]  }
 0x247   :  { %9638 = vmatprep.subr.bf16.mxu0 %v14104_v23  ;;  %9666 = vmatprep.subr.bf16.mxu1 %v13067_v19  ;;  %v14127_v19 = vld [vmem:[%s15995_s1 + $0x408] sm:$0xff]  }
 0x248   :  { %v14108_v28 = vadd.f32 %v9309_v6, %v3263_v3  ;;  %v10605_v6 = vld [vmem:[%s15994_s0 + $0x430] ss:$100 sps:$4 sm:$0xff]  }
 0x24a   :  { %9639 = vmatpush3.bf16.msra.mxu0 %v14113_v45  ;;  %9667 = vmatpush3.bf16.msra.mxu1 %v13076_v36  ;;  %v14134_v36 = vld [vmem:[%s15995_s1 + $0x440] sm:$0xff]  }
 0x24b   :  { %9640 = vmatprep.subr.bf16.mxu0 %v14120_v31  ;;  %9668 = vmatprep.subr.bf16.mxu1 %v13085_v38  ;;  %v10596_v38 = vld [vmem:[%s15994_s0 + $0x360] ss:$100 sps:$4 sm:$0xff]  }
 0x24e   :  { %9641 = vmatpush3.bf16.msra.mxu0 %v14127_v19  ;;  %9669 = vmatpush3.bf16.msra.mxu1 %v13094_v40  ;;  %v14147_v40 = vld [vmem:[%s15995_s1 + $0x400] sm:$0xff]  }
 0x24f   :  { %9642 = vmatprep.subr.bf16.mxu0 %v14134_v36  ;;  %9670 = vmatprep.subr.bf16.mxu1 %v13103_v42  ;;  %v14154_v42 = vld [vmem:[%s15995_s1 + $0x578] sm:$0xff]  }
 0x252   :  { %9643 = vmatpush3.bf16.msra.mxu0 %v14147_v40  ;;  %9671 = vmatpush3.bf16.msra.mxu1 %v13118_v47  ;;  %v14167_v47 = vld [vmem:[%s15995_s1 + $0x538] sm:$0xff]  }
 0x253   :  { %9684 = vmatprep.subr.bf16.mxu0 %v14154_v42  ;;  %9712 = vmatprep.subr.bf16.mxu1 %v13127_v50 }
 0x255   :  { %v9326_v17 = vpop.f32.mrf.mxu0  ;;  %v9354_v24 = vpop.f32.mrf.mxu1  ;;  %4245 = vmatmul.mubr.bf16.vlgmr.msra.gmra.mxu0 %v10596_v38  ;;  %4294 = vmatmul.mubr.bf16.vlgmr.msra.gmra.mxu1 %v10599_v12 }
 0x256   :  { %9685 = vmatpush3.bf16.msra.mxu0 %v14167_v47  ;;  %9713 = vmatpush3.bf16.msra.mxu1 %v13142_v57  ;;  %v10602_v57 = vld [vmem:[%s15994_s0 + $0x428] ss:$100 sps:$4 sm:$0xff]  }
 0x257   :  { %v9327_v50 = vpop.f32.mrf.mxu0  ;;  %v9355_v58 = vpop.f32.mrf.mxu1  ;;  %9686 = vmatprep.subr.bf16.mxu0 %v14174_v5  ;;  %9714 = vmatprep.subr.bf16.mxu1 %v13148_v63  ;;  %v14188_v63 = vld [vmem:[%s15995_s1 + $0x530] sm:$0xff]  }
 0x258   :  { %v9328_v15 = vadd.f32 %v9327_v50, %v9326_v17  ;;  %v9356_v18 = vadd.f32 %v9355_v58, %v9354_v24  ;;  %4252 = vmatprep.mubr.bf16.mxu0 %v10604_v49  ;;  %4301 = vmatprep.mubr.bf16.mxu1 %v10607_v34  ;;  %v14195_v49 = vld [vmem:[%s15995_s1 + $0x568] sm:$0xff]   ;;  %v10610_v17 = vld [vmem:[%s15994_s0 + $0x374] ss:$100 sps:$4 sm:$0xff]  }
 0x259   :  { %v9329_v59 = vpop.f32.mrf.mxu0  ;;  %v9357_v20 = vpop.f32.mrf.mxu1 }
 0x25a   :  { %v3350_v3 = vadd.f32 %v9328_v15, %v14051_v55  ;;  %9687 = vmatpush3.bf16.msra.mxu0 %v14188_v63  ;;  %9715 = vmatpush3.bf16.msra.mxu1 %v13164_v10  ;;  %v10613_v10 = vld [vmem:[%s15994_s0 + $0x37c] ss:$100 sps:$4 sm:$0xff]  }
 0x25b   :  { %v9330_v38 = vpop.f32.mrf.mxu0  ;;  %v9358_v12 = vpop.f32.mrf.mxu1  ;;  %9688 = vmatprep.subr.bf16.mxu0 %v14195_v49  ;;  %9716 = vmatprep.subr.bf16.mxu1 %v13172_v16  ;;  %v14211_v16 = vld [vmem:[%s15995_s1 + $0x528] sm:$0xff]  }
 0x25c   :  { %v14199_v55 = vadd.f32 %v9356_v18, %v3350_v3  ;;  %v9331_v34 = vadd.f32 %v9330_v38, %v9329_v59  ;;  %v9359_v15 = vadd.f32 %v9358_v12, %v9357_v20  ;;  %v14228_v12 = vld [vmem:[%s15995_s1 + $0x520] sm:$0xff]  }
 0x25d   :  { %v9332_v24 = vpop.f32.mrf.mxu0  ;;  %4253 = vmatmul.mubr.bf16.gmra.mxu0 %v10602_v57  ;;  %v9360_v50 = vpop.f32.mrf.mxu1  ;;  %4302 = vmatmul.mubr.bf16.gmra.mxu1 %v10605_v6  ;;  %v14218_v57 = vld [vmem:[%s15995_s1 + $0x560] sm:$0xff]  }
 0x25e   :  { %v3353_v58 = vadd.f32 %v9331_v34, %v14074_v11  ;;  %9689 = vmatpush3.bf16.msra.mxu0 %v14211_v16  ;;  %9717 = vmatpush3.bf16.msra.mxu1 %v13188_v9 }
 0x25f   :  { %v9333_v18 = vpop.f32.mrf.mxu0  ;;  %v9361_v59 = vpop.f32.mrf.mxu1  ;;  %9690 = vmatprep.subr.bf16.mxu0 %v14218_v57  ;;  %9718 = vmatprep.subr.bf16.mxu1 %v13196_v30 }
 0x260   :  { %v14222_v11 = vadd.f32 %v9359_v15, %v3353_v58  ;;  %v9334_v20 = vadd.f32 %v9333_v18, %v9332_v24  ;;  %v9362_v6 = vadd.f32 %v9361_v59, %v9360_v50  ;;  %4342 = vmatprep.mubr.bf16.mxu0 %v10610_v17  ;;  %4391 = vmatprep.mubr.bf16.mxu1 %v10613_v10  ;;  %v14235_v17 = vld [vmem:[%s15995_s1 + $0x558] sm:$0xff]   ;;  %v14252_v58 = vld [vmem:[%s15995_s1 + $0x550] sm:$0xff]   ;;  %v10619_v59 = vld [vmem:[%s15994_s0 + $0x444] ss:$100 sps:$4 sm:$0xff]  }
 0x261   :  { %v9335_v3 = vpop.f32.mrf.mxu0  ;;  %v9363_v38 = vpop.f32.mrf.mxu1  ;;  %v10611_v15 = vld [vmem:[%s15994_s0 + $0x378] ss:$100 sps:$4 sm:$0xff]  }
 0x262   :  { %v3358_v9 = vadd.f32 %v9334_v20, %v14091_v22  ;;  %9691 = vmatpush3.bf16.msra.mxu0 %v14228_v12  ;;  %9719 = vmatpush3.bf16.msra.mxu1 %v13206_v43  ;;  %v14245_v43 = vld [vmem:[%s15995_s1 + $0x518] sm:$0xff]  }
 0x263   :  { %v9336_v30 = vpop.f32.mrf.mxu0  ;;  %v9364_v34 = vpop.f32.mrf.mxu1  ;;  %9692 = vmatprep.subr.bf16.mxu0 %v14235_v17  ;;  %9720 = vmatprep.subr.bf16.mxu1 %v13212_v27  ;;  %v10616_v18 = vld [vmem:[%s15994_s0 + $0x43c] ss:$100 sps:$4 sm:$0xff]  }
 0x264   :  { %v14239_v22 = vadd.f32 %v9362_v6, %v3358_v9  ;;  %v9337_v10 = vadd.f32 %v9336_v30, %v9335_v3  ;;  %v9365_v24 = vadd.f32 %v9364_v34, %v9363_v38  ;;  %v10614_v30 = vld [vmem:[%s15994_s0 + $0x438] ss:$100 sps:$4 sm:$0xff]  }
 0x266   :  { %v3361_v50 = vadd.f32 %v9337_v10, %v14108_v28  ;;  %9693 = vmatpush3.bf16.msra.mxu0 %v14245_v43  ;;  %9721 = vmatpush3.bf16.msra.mxu1 %v13222_v53  ;;  %v14261_v28 = vld [vmem:[%s15995_s1 + $0x510] sm:$0xff]   ;;  %v14268_v53 = vld [vmem:[%s15995_s1 + $0x548] sm:$0xff]  }
 0x267   :  { %9694 = vmatprep.subr.bf16.mxu0 %v14252_v58  ;;  %9722 = vmatprep.subr.bf16.mxu1 %v13228_v56  ;;  %v14275_v56 = vld [vmem:[%s15995_s1 + $0x508] sm:$0xff]  }
 0x268   :  { %v14256_v27 = vadd.f32 %v9365_v24, %v3361_v50  ;;  %v14333_v24 = vld [vmem:[%s15995_s1 + $0x628] sm:$0xff]  }
 0x26a   :  { %9695 = vmatpush3.bf16.msra.mxu0 %v14261_v28  ;;  %9723 = vmatpush3.bf16.msra.mxu1 %v13237_v39  ;;  %v14282_v39 = vld [vmem:[%s15995_s1 + $0x540] sm:$0xff]  }
 0x26b   :  { %9696 = vmatprep.subr.bf16.mxu0 %v14268_v53  ;;  %9724 = vmatprep.subr.bf16.mxu1 %v13243_v60  ;;  %v10608_v60 = vld [vmem:[%s15994_s0 + $0x370] ss:$100 sps:$4 sm:$0xff]  }
 0x26e   :  { %9697 = vmatpush3.bf16.msra.mxu0 %v14275_v56  ;;  %9725 = vmatpush3.bf16.msra.mxu1 %v13252_v0  ;;  %v14295_v0 = vld [vmem:[%s15995_s1 + $0x500] sm:$0xff]  }
 0x26f   :  { %9698 = vmatprep.subr.bf16.mxu0 %v14282_v39  ;;  %9726 = vmatprep.subr.bf16.mxu1 %v13258_v1  ;;  %v14302_v1 = vld [vmem:[%s15995_s1 + $0x638] sm:$0xff]  }
 0x272   :  { %9699 = vmatpush3.bf16.msra.mxu0 %v14295_v0  ;;  %9727 = vmatpush3.bf16.msra.mxu1 %v13273_v7 }
 0x273   :  { %10158 = vmatprep.subr.bf16.mxu0 %v14302_v1  ;;  %9750 = vmatprep.subr.bf16.mxu1 %v13279_v8  ;;  %v14317_v8 = vld [vmem:[%s15995_s1 + $0x630] sm:$0xff]  }
 0x275   :  { %v9382_v20 = vpop.f32.mrf.mxu0  ;;  %v10156_v6 = vpop.f32.mrf.mxu1  ;;  %4343 = vmatmul.mubr.bf16.vlgmr.msra.gmra.mxu0 %v10608_v60  ;;  %4392 = vmatmul.mubr.bf16.vlgmr.msra.gmra.mxu1 %v10611_v15 }
 0x276   :  { %10159 = vmatpush3.bf16.msra.mxu0 %v14302_v1  ;;  %9751 = vmatpush3.bf16.msra.mxu1 %v13296_v21  ;;  %v10617_v21 = vld [vmem:[%s15994_s0 + $0x440] ss:$100 sps:$4 sm:$0xff]  }
 0x277   :  { %v9383_v7 = vpop.f32.mrf.mxu0  ;;  %v3496_v3 = vpop.f32.mrf.mxu1  ;;  %10160 = vmatprep.subr.bf16.mxu0 %v14317_v8  ;;  %9752 = vmatprep.subr.bf16.mxu1 %v13305_v2 }
 0x278   :  { %v9384_v38 = vadd.f32 %v9383_v7, %v9382_v20  ;;  %4350 = vmatprep.mubr.bf16.mxu0 %v10616_v18  ;;  %4399 = vmatprep.mubr.bf16.mxu1 %v10619_v59  ;;  %v14353_v7 = vld [vmem:[%s15995_s1 + $0x620] sm:$0xff]  }
 0x279   :  { %v9385_v9 = vpop.f32.mrf.mxu0  ;;  %v10157_v10 = vpop.f32.mrf.mxu1 }
 0x27a   :  { %v3448_v34 = vadd.f32 %v9384_v38, %v14199_v55  ;;  %10161 = vmatpush3.bf16.msra.mxu0 %v14317_v8  ;;  %9753 = vmatpush3.bf16.msra.mxu1 %v13326_v44  ;;  %v10620_v55 = vld [vmem:[%s15994_s0 + $0x380] ss:$100 sps:$4 sm:$0xff]   ;;  %v10623_v44 = vld [vmem:[%s15994_s0 + $0x4b4] ss:$100 sps:$4 sm:$0xff]  }
 0x27b   :  { %v9386_v2 = vpop.f32.mrf.mxu0  ;;  %10162 = vmatprep.subr.bf16.mxu0 %v14333_v24  ;;  %9754 = vmatprep.subr.bf16.mxu1 %v13337_v48  ;;  %v3499_v48 = vpop.f32.mrf.mxu1 }
 0x27c   :  { %v14337_v50 = vadd.f32 %v3496_v3, %v3448_v34  ;;  %v9387_v60 = vadd.f32 %v9386_v2, %v9385_v9  ;;  %v14359_v3 = vadd.f32 %v13457_v35, %v13191_v26  ;;  %v14371_v26 = vld [vmem:[%s15995_s1 + $0x618] sm:$0xff]   ;;  %v16136_v9 = vld [vmem:[#allocation17_spill] sm:$0xff] }
 0x27d   :  { %v9388_v15 = vpop.f32.mrf.mxu0  ;;  %4351 = vmatmul.mubr.bf16.gmra.mxu0 %v10614_v30  ;;  %4400 = vmatmul.mubr.bf16.gmra.mxu1 %v10617_v21  ;;  %v16123_v35 = vld [vmem:[#allocation7_spill] sm:$0xff] }
 0x27e   :  { %16120 = vst [vmem:[#allocation62_spill] sm:$0xff] %v14337_v50  ;;  %v3451_v59 = vadd.f32 %v9387_v60, %v14222_v11  ;;  %10163 = vmatpush3.bf16.msra.mxu0 %v14333_v24  ;;  %9755 = vmatpush3.bf16.msra.mxu1 %v13349_v54  ;;  %16121 = vst [vmem:[#allocation63_spill] sm:$0xff] %v14359_v3  ;;  %v11468_v60 = vld [vmem:[%s15995_s1 + $0xb0] sm:$0xff]  }
 0x27f   :  { %v9389_v20 = vpop.f32.mrf.mxu0  ;;  %10164 = vmatprep.subr.bf16.mxu0 %v14353_v7  ;;  %9756 = vmatprep.subr.bf16.mxu1 %v13358_v62 }
 0x280   :  { %v14361_v11 = vadd.f32 %v3499_v48, %v3451_v59  ;;  %v9390_v38 = vadd.f32 %v9389_v20, %v9388_v15  ;;  %10174 = vmatprep.mubr.bf16.mxu0 %v10620_v55  ;;  %4798 = vmatprep.mubr.bf16.mxu1 %v10623_v44  ;;  %v14385_v55 = vld [vmem:[%s15995_s1 + $0x610] sm:$0xff]   ;;  %v16126_v44 = vld [vmem:[#allocation9_spill] sm:$0xff]  ;;  %v16155_v15 = vld [vmem:[#allocation36_spill] sm:$0xff] }
 0x281   :  { %v9391_v54 = vpop.f32.mrf.mxu0  ;;  %v14398_v48 = vld [vmem:[%s15995_s1 + $0x608] sm:$0xff]   ;;  %v16130_v20 = vld [vmem:[#allocation11_spill] sm:$0xff] }
 0x282   :  { %16122 = vst [vmem:[#allocation64_spill] sm:$0xff] %v14361_v11  ;;  %v3456_v30 = vadd.f32 %v9390_v38, %v14239_v22  ;;  %10165 = vmatpush3.bf16.msra.mxu0 %v14353_v7  ;;  %9757 = vmatpush3.bf16.msra.mxu1 %v13369_v46  ;;  %v16124_v22 = vld [vmem:[#allocation8_spill] sm:$0xff]  ;;  %v16125_v46 = vld [vmem:[#allocation5_spill] sm:$0xff] }
 0x283   :  { %v9392_v62 = vpop.f32.mrf.mxu0  ;;  %10166 = vmatprep.subr.bf16.mxu0 %v14371_v26  ;;  %9758 = vmatprep.subr.bf16.mxu1 %v16123_v35  ;;  %v14407_v38 = vld [vmem:[%s15995_s1 + $0x600] sm:$0xff]   ;;  %v16133_v35 = vld [vmem:[#allocation14_spill] sm:$0xff] }
 0x284   :  { %v14375_v21 = vadd.f32 %v10156_v6, %v3456_v30  ;;  %v9393_v34 = vadd.f32 %v9392_v62, %v9391_v54  ;;  %v16132_v54 = vld [vmem:[#allocation13_spill] sm:$0xff]  ;;  %v10621_v30 = vld [vmem:[%s15994_s0 + $0x4b0] ss:$100 sps:$4 sm:$0xff]  }
 0x285   :  { %v10624_v62 = vld [vmem:[%s15994_s0 + $0x448] ss:$100 sps:$4 sm:$0xff]  }
 0x286   :  { %v3459_v2 = vadd.f32 %v9393_v34, %v14256_v27  ;;  %10167 = vmatpush3.bf16.msra.mxu0 %v14371_v26  ;;  %9759 = vmatpush3.bf16.msra.mxu1 %v16124_v22  ;;  %v16128_v27 = vld [vmem:[#allocation10_spill] sm:$0xff]  ;;  %v11465_v34 = vld [vmem:[%s15995_s1 + $0xf8] sm:$0xff]  }
 0x287   :  { %10168 = vmatprep.subr.bf16.mxu0 %v14385_v55  ;;  %9760 = vmatprep.subr.bf16.mxu1 %v16126_v44  ;;  %v10627_v22 = vld [vmem:[%s15994_s0 + $0x57c] ss:$100 sps:$4 sm:$0xff]  }
 0x288   :  { %v14389_v6 = vadd.f32 %v10157_v10, %v3459_v2  ;;  %v16131_v10 = vld [vmem:[#allocation12_spill] sm:$0xff]  ;;  %v16134_v2 = vld [vmem:[#allocation15_spill] sm:$0xff] }
 0x289   :  { %v10630_v44 = vld [vmem:[%s15994_s0 + $0x4bc] ss:$100 sps:$4 sm:$0xff]  }
 0x28a   :  { %16127 = vst [vmem:[#allocation7_spill] sm:$0xff] %v14389_v6  ;;  %10169 = vmatpush3.bf16.msra.mxu0 %v14385_v55  ;;  %9761 = vmatpush3.bf16.msra.mxu1 %v16128_v27 }
 0x28b   :  { %10170 = vmatprep.subr.bf16.mxu0 %v14398_v48  ;;  %9762 = vmatprep.subr.bf16.mxu1 %v16130_v20 }
 0x28e   :  { %10171 = vmatpush3.bf16.msra.mxu0 %v14398_v48  ;;  %9763 = vmatpush3.bf16.msra.mxu1 %v16131_v10  ;;  %v11466_v10 = vld [vmem:[%s15995_s1 + $0xb8] sm:$0xff]  }
 0x28f   :  { %10172 = vmatprep.subr.bf16.mxu0 %v14407_v38  ;;  %9764 = vmatprep.subr.bf16.mxu1 %v16132_v54  ;;  %v16135_v54 = vld [vmem:[#allocation16_spill] sm:$0xff] }
 0x292   :  { %10173 = vmatpush3.bf16.msra.mxu0 %v14407_v38  ;;  %9765 = vmatpush3.bf16.msra.mxu1 %v16133_v35 }
 0x293   :  { %9778 = vmatprep.subr.bf16.mxu0 %v11465_v34  ;;  %9806 = vmatprep.subr.bf16.mxu1 %v16134_v2  ;;  %v11467_v2 = vld [vmem:[%s15995_s1 + $0xf0] sm:$0xff]  }
 0x295   :  { %v9420_v27 = vpop.f32.mrf.mxu0  ;;  %v9448_v20 = vpop.f32.mrf.mxu1  ;;  %10175 = vmatmul.mubr.bf16.vlgmr.msra.gmra.mxu0 %v10624_v62  ;;  %4799 = vmatmul.mubr.bf16.vlgmr.msra.gmra.mxu1 %v10621_v30 }
 0x296   :  { %9779 = vmatpush3.bf16.msra.mxu0 %v11466_v10  ;;  %9807 = vmatpush3.bf16.msra.mxu1 %v16135_v54  ;;  %v10625_v10 = vld [vmem:[%s15994_s0 + $0x578] ss:$100 sps:$4 sm:$0xff]  }
 0x297   :  { %v9421_v35 = vpop.f32.mrf.mxu0  ;;  %v9449_v34 = vpop.f32.mrf.mxu1  ;;  %9780 = vmatprep.subr.bf16.mxu0 %v11467_v2  ;;  %9808 = vmatprep.subr.bf16.mxu1 %v16136_v9  ;;  %v16137_v2 = vld [vmem:[#allocation18_spill] sm:$0xff] }
 0x298   :  { %v9422_v59 = vadd.f32 %v9421_v35, %v9420_v27  ;;  %v9450_v18 = vadd.f32 %v9449_v34, %v9448_v20  ;;  %4806 = vmatprep.mubr.bf16.mxu1 %v10627_v22  ;;  %4847 = vmatprep.mubr.bf16.mxu0 %v10630_v44  ;;  %v11469_v22 = vld [vmem:[%s15995_s1 + $0xe8] sm:$0xff]   ;;  %v16138_v44 = vld [vmem:[#allocation19_spill] sm:$0xff] }
 0x299   :  { %v9423_v30 = vpop.f32.mrf.mxu0  ;;  %v9451_v62 = vpop.f32.mrf.mxu1 }
 0x29a   :  { %v14440_v54 = vadd.f32 %v9450_v18, %v9422_v59  ;;  %9781 = vmatpush3.bf16.msra.mxu0 %v11468_v60  ;;  %9809 = vmatpush3.bf16.msra.mxu1 %v16137_v2  ;;  %v10633_v18 = vld [vmem:[%s15994_s0 + $0x4c4] ss:$100 sps:$4 sm:$0xff]  }
 0x29b   :  { %v9424_v9 = vpop.f32.mrf.mxu0  ;;  %v9452_v27 = vpop.f32.mrf.mxu1  ;;  %9782 = vmatprep.subr.bf16.mxu0 %v11469_v22  ;;  %9810 = vmatprep.subr.bf16.mxu1 %v16138_v44  ;;  %v11470_v2 = vld [vmem:[%s15995_s1 + $0xa8] sm:$0xff]  }
 0x29c   :  { %v9425_v20 = vadd.f32 %v9424_v9, %v9423_v30  ;;  %v9453_v35 = vadd.f32 %v9452_v27, %v9451_v62  ;;  %v11471_v30 = vld [vmem:[%s15995_s1 + $0xe0] sm:$0xff]  }
 0x29d   :  { %v9426_v59 = vpop.f32.mrf.mxu0  ;;  %v9454_v34 = vpop.f32.mrf.mxu1  ;;  %4807 = vmatmul.mubr.bf16.gmra.mxu1 %v10625_v10 }
 0x29e   :  { %v14453_v60 = vadd.f32 %v9453_v35, %v9425_v20  ;;  %9783 = vmatpush3.bf16.msra.mxu0 %v11470_v2  ;;  %9811 = vmatpush3.bf16.msra.mxu1 %v13530_v37  ;;  %v11472_v20 = vld [vmem:[%s15995_s1 + $0xa0] sm:$0xff]  }
 0x29f   :  { %9784 = vmatprep.subr.bf16.mxu0 %v11471_v30  ;;  %9812 = vmatprep.subr.bf16.mxu1 %v13539_v13  ;;  %v9427_v62 = vpop.f32.mrf.mxu0  ;;  %v9455_v9 = vpop.f32.mrf.mxu1  ;;  %v16139_v37 = vld [vmem:[#allocation20_spill] sm:$0xff]  ;;  %v16140_v2 = vld [vmem:[#allocation21_spill] sm:$0xff] }
 0x2a0   :  { %v9428_v27 = vadd.f32 %v9427_v62, %v9426_v59  ;;  %v9456_v10 = vadd.f32 %v9455_v9, %v9454_v34  ;;  %4896 = vmatprep.mubr.bf16.mxu1 %v10633_v18  ;;  %v11473_v13 = vld [vmem:[%s15995_s1 + $0xd8] sm:$0xff]   ;;  %v16141_v9 = vld [vmem:[#allocation22_spill] sm:$0xff] }
 0x2a1   :  { %v9429_v22 = vpop.f32.mrf.mxu0  ;;  %v9457_v44 = vpop.f32.mrf.mxu1  ;;  %v11474_v62 = vld [vmem:[%s15995_s1 + $0x98] sm:$0xff]  }
 0x2a2   :  { %9785 = vmatpush3.bf16.msra.mxu0 %v11472_v20  ;;  %9813 = vmatpush3.bf16.msra.mxu1 %v16139_v37  ;;  %v14467_v35 = vadd.f32 %v9456_v10, %v9428_v27  ;;  %v11475_v10 = vld [vmem:[%s15995_s1 + $0xd0] sm:$0xff]   ;;  %v11477_v37 = vld [vmem:[%s15995_s1 + $0xc8] sm:$0xff]  }
 0x2a3   :  { %9786 = vmatprep.subr.bf16.mxu0 %v11473_v13  ;;  %9814 = vmatprep.subr.bf16.mxu1 %v16140_v2  ;;  %v9430_v59 = vpop.f32.mrf.mxu0  ;;  %v9458_v18 = vpop.f32.mrf.mxu1  ;;  %v16142_v20 = vld [vmem:[#allocation23_spill] sm:$0xff]  ;;  %v16144_v13 = vld [vmem:[#allocation25_spill] sm:$0xff] }
 0x2a4   :  { %v9431_v34 = vadd.f32 %v9430_v59, %v9429_v22  ;;  %v9459_v30 = vadd.f32 %v9458_v18, %v9457_v44  ;;  %v11476_v22 = vld [vmem:[%s15995_s1 + $0x90] sm:$0xff]   ;;  %v16143_v44 = vld [vmem:[#allocation24_spill] sm:$0xff]  ;;  %v11478_v2 = vld [vmem:[%s15995_s1 + $0x88] sm:$0xff]  }
 0x2a5   :  { %v16145_v59 = vld [vmem:[#allocation26_spill] sm:$0xff]  ;;  %v11479_v18 = vld [vmem:[%s15995_s1 + $0xc0] sm:$0xff]  }
 0x2a6   :  { %9787 = vmatpush3.bf16.msra.mxu0 %v11474_v62  ;;  %9815 = vmatpush3.bf16.msra.mxu1 %v16141_v9  ;;  %v14477_v27 = vadd.f32 %v9459_v30, %v9431_v34  ;;  %v16146_v34 = vld [vmem:[#allocation27_spill] sm:$0xff]  ;;  %v10631_v62 = vld [vmem:[%s15994_s0 + $0x4c0] ss:$100 sps:$4 sm:$0xff]  }
 0x2a7   :  { %9788 = vmatprep.subr.bf16.mxu0 %v11475_v10  ;;  %9816 = vmatprep.subr.bf16.mxu1 %v16142_v20  ;;  %v10628_v30 = vld [vmem:[%s15994_s0 + $0x4b8] ss:$100 sps:$4 sm:$0xff]   ;;  %v11480_v9 = vld [vmem:[%s15995_s1 + $0x80] sm:$0xff]  }
 0x2a8   :  { %v16147_v10 = vld [vmem:[#allocation28_spill] sm:$0xff] }
 0x2a9   :  { %v11481_v20 = vld [vmem:[%s15995_s1 + $0x1f8] sm:$0xff]  }
 0x2aa   :  { %9789 = vmatpush3.bf16.msra.mxu0 %v11476_v22  ;;  %9817 = vmatpush3.bf16.msra.mxu1 %v16143_v44  ;;  %v16148_v22 = vld [vmem:[#allocation29_spill] sm:$0xff] }
 0x2ab   :  { %9790 = vmatprep.subr.bf16.mxu0 %v11477_v37  ;;  %9818 = vmatprep.subr.bf16.mxu1 %v16144_v13  ;;  %v10636_v44 = vld [vmem:[%s15994_s0 + $0x584] ss:$100 sps:$4 sm:$0xff]   ;;  %v10639_v37 = vld [vmem:[%s15994_s0 + $0x58c] ss:$100 sps:$4 sm:$0xff]  }
 0x2ae   :  { %9791 = vmatpush3.bf16.msra.mxu0 %v11478_v2  ;;  %9819 = vmatpush3.bf16.msra.mxu1 %v16145_v59  ;;  %v11482_v59 = vld [vmem:[%s15995_s1 + $0x1b8] sm:$0xff]  }
 0x2af   :  { %9792 = vmatprep.subr.bf16.mxu0 %v11479_v18  ;;  %9820 = vmatprep.subr.bf16.mxu1 %v16146_v34  ;;  %v16149_v18 = vld [vmem:[#allocation30_spill] sm:$0xff] }
 0x2b2   :  { %9793 = vmatpush3.bf16.msra.mxu0 %v11480_v9  ;;  %9821 = vmatpush3.bf16.msra.mxu1 %v16147_v10  ;;  %v11483_v10 = vld [vmem:[%s15995_s1 + $0x1f0] sm:$0xff]  }
 0x2b3   :  { %9834 = vmatprep.subr.bf16.mxu0 %v11481_v20  ;;  %9862 = vmatprep.subr.bf16.mxu1 %v16148_v22  ;;  %v16150_v20 = vld [vmem:[#allocation31_spill] sm:$0xff] }
 0x2b5   :  { %v9476_v13 = vpop.f32.mrf.mxu0  ;;  %v9504_v2 = vpop.f32.mrf.mxu1  ;;  %4848 = vmatmul.mubr.bf16.vlgmr.msra.gmra.mxu0 %v10628_v30  ;;  %4897 = vmatmul.mubr.bf16.vlgmr.msra.gmra.mxu1 %v10631_v62 }
 0x2b6   :  { %9835 = vmatpush3.bf16.msra.mxu0 %v11482_v59  ;;  %9863 = vmatpush3.bf16.msra.mxu1 %v16149_v18  ;;  %v10634_v59 = vld [vmem:[%s15994_s0 + $0x580] ss:$100 sps:$4 sm:$0xff]   ;;  %v10637_v18 = vld [vmem:[%s15994_s0 + $0x588] ss:$100 sps:$4 sm:$0xff]  }
 0x2b7   :  { %v9477_v34 = vpop.f32.mrf.mxu0  ;;  %v9505_v9 = vpop.f32.mrf.mxu1  ;;  %9836 = vmatprep.subr.bf16.mxu0 %v11483_v10  ;;  %9864 = vmatprep.subr.bf16.mxu1 %v16150_v20  ;;  %v11484_v10 = vld [vmem:[%s15995_s1 + $0x1b0] sm:$0xff]  }
 0x2b8   :  { %v9478_v22 = vadd.f32 %v9477_v34, %v9476_v13  ;;  %v9506_v11 = vadd.f32 %v9505_v9, %v9504_v2  ;;  %4855 = vmatprep.mubr.bf16.mxu0 %v10636_v44  ;;  %4904 = vmatprep.mubr.bf16.mxu1 %v10639_v37  ;;  %v16151_v13 = vld [vmem:[#allocation32_spill] sm:$0xff]  ;;  %v11485_v2 = vld [vmem:[%s15995_s1 + $0x1e8] sm:$0xff]  }
 0x2b9   :  { %v9479_v30 = vpop.f32.mrf.mxu0  ;;  %v9507_v62 = vpop.f32.mrf.mxu1  ;;  %v16152_v34 = vld [vmem:[#allocation33_spill] sm:$0xff] }
 0x2ba   :  { %v3953_v3 = vadd.f32 %v9478_v22, %v14440_v54  ;;  %9837 = vmatpush3.bf16.msra.mxu0 %v11484_v10  ;;  %9865 = vmatpush3.bf16.msra.mxu1 %v16151_v13  ;;  %v10642_v54 = vld [vmem:[%s15994_s0 + $0x4cc] ss:$100 sps:$4 sm:$0xff]   ;;  %v10645_v22 = vld [vmem:[%s15994_s0 + $0x4d4] ss:$100 sps:$4 sm:$0xff]  }
 0x2bb   :  { %v9480_v44 = vpop.f32.mrf.mxu0  ;;  %v9508_v37 = vpop.f32.mrf.mxu1  ;;  %9838 = vmatprep.subr.bf16.mxu0 %v11485_v2  ;;  %9866 = vmatprep.subr.bf16.mxu1 %v16152_v34  ;;  %v11487_v34 = vld [vmem:[%s15995_s1 + $0x1e0] sm:$0xff]  }
 0x2bc   :  { %v14542_v9 = vadd.f32 %v9506_v11, %v3953_v3  ;;  %v9481_v20 = vadd.f32 %v9480_v44, %v9479_v30  ;;  %v9509_v2 = vadd.f32 %v9508_v37, %v9507_v62  ;;  %v11486_v3 = vld [vmem:[%s15995_s1 + $0x1a8] sm:$0xff]  }
 0x2bd   :  { %v9482_v10 = vpop.f32.mrf.mxu0  ;;  %4856 = vmatmul.mubr.bf16.gmra.mxu0 %v10634_v59  ;;  %v9510_v13 = vpop.f32.mrf.mxu1  ;;  %4905 = vmatmul.mubr.bf16.gmra.mxu1 %v10637_v18  ;;  %v16153_v11 = vld [vmem:[#allocation34_spill] sm:$0xff]  ;;  %v16154_v59 = vld [vmem:[#allocation35_spill] sm:$0xff] }
 0x2be   :  { %v3956_v6 = vadd.f32 %v9481_v20, %v14453_v60  ;;  %9839 = vmatpush3.bf16.msra.mxu0 %v11486_v3  ;;  %9867 = vmatpush3.bf16.msra.mxu1 %v16153_v11  ;;  %v11488_v11 = vld [vmem:[%s15995_s1 + $0x1a0] sm:$0xff]  }
 0x2bf   :  { %v9483_v30 = vpop.f32.mrf.mxu0  ;;  %v9511_v44 = vpop.f32.mrf.mxu1  ;;  %9840 = vmatprep.subr.bf16.mxu0 %v11487_v34  ;;  %9868 = vmatprep.subr.bf16.mxu1 %v16154_v59 }
 0x2c0   :  { %v14559_v18 = vadd.f32 %v9509_v2, %v3956_v6  ;;  %v9484_v60 = vadd.f32 %v9483_v30, %v9482_v10  ;;  %v9512_v62 = vadd.f32 %v9511_v44, %v9510_v13  ;;  %4945 = vmatprep.mubr.bf16.mxu0 %v10642_v54  ;;  %4994 = vmatprep.mubr.bf16.mxu1 %v10645_v22  ;;  %v11489_v6 = vld [vmem:[%s15995_s1 + $0x1d8] sm:$0xff]   ;;  %v16156_v54 = vld [vmem:[#allocation37_spill] sm:$0xff]  ;;  %v11491_v30 = vld [vmem:[%s15995_s1 + $0x1d0] sm:$0xff]  }
 0x2c1   :  { %v9485_v37 = vpop.f32.mrf.mxu0  ;;  %v9513_v20 = vpop.f32.mrf.mxu1  ;;  %v11490_v2 = vld [vmem:[%s15995_s1 + $0x198] sm:$0xff]  }
 0x2c2   :  { %v3961_v3 = vadd.f32 %v9484_v60, %v14467_v35  ;;  %9841 = vmatpush3.bf16.msra.mxu0 %v11488_v11  ;;  %9869 = vmatpush3.bf16.msra.mxu1 %v16155_v15  ;;  %v16157_v15 = vld [vmem:[#allocation38_spill] sm:$0xff]  ;;  %v16158_v44 = vld [vmem:[#allocation39_spill] sm:$0xff] }
 0x2c3   :  { %v9486_v34 = vpop.f32.mrf.mxu0  ;;  %v9514_v50 = vpop.f32.mrf.mxu1  ;;  %9842 = vmatprep.subr.bf16.mxu0 %v11489_v6  ;;  %9870 = vmatprep.subr.bf16.mxu1 %v16156_v54  ;;  %v11493_v60 = vld [vmem:[%s15995_s1 + $0x1c8] sm:$0xff]   ;;  %v16162_v11 = vld [vmem:[#allocation43_spill] sm:$0xff]  ;;  %v11496_v54 = vld [vmem:[%s15995_s1 + $0x180] sm:$0xff]  }
 0x2c4   :  { %v14570_v22 = vadd.f32 %v9512_v62, %v3961_v3  ;;  %v9487_v10 = vadd.f32 %v9486_v34, %v9485_v37  ;;  %v9515_v35 = vadd.f32 %v9514_v50, %v9513_v20  ;;  %v11492_v50 = vld [vmem:[%s15995_s1 + $0x190] sm:$0xff]   ;;  %v16160_v62 = vld [vmem:[#allocation41_spill] sm:$0xff] }
 0x2c5   :  { %v11494_v37 = vld [vmem:[%s15995_s1 + $0x188] sm:$0xff]   ;;  %v11495_v3 = vld [vmem:[%s15995_s1 + $0x1c0] sm:$0xff]   ;;  %v10643_v6 = vld [vmem:[%s15994_s0 + $0x4d0] ss:$100 sps:$4 sm:$0xff]  }
 0x2c6   :  { %v3964_v13 = vadd.f32 %v9487_v10, %v14477_v27  ;;  %9843 = vmatpush3.bf16.msra.mxu0 %v11490_v2  ;;  %9871 = vmatpush3.bf16.msra.mxu1 %v16157_v15  ;;  %v16159_v27 = vld [vmem:[#allocation40_spill] sm:$0xff]  ;;  %v16161_v20 = vld [vmem:[#allocation42_spill] sm:$0xff] }
 0x2c7   :  { %9844 = vmatprep.subr.bf16.mxu0 %v11491_v30  ;;  %9872 = vmatprep.subr.bf16.mxu1 %v16158_v44  ;;  %v10640_v34 = vld [vmem:[%s15994_s0 + $0x4c8] ss:$100 sps:$4 sm:$0xff]   ;;  %v16163_v10 = vld [vmem:[#allocation44_spill] sm:$0xff] }
 0x2c8   :  { %v14581_v59 = vadd.f32 %v9515_v35, %v3964_v13  ;;  %v11497_v35 = vld [vmem:[%s15995_s1 + $0x2f8] sm:$0xff]   ;;  %v16164_v13 = vld [vmem:[#allocation45_spill] sm:$0xff] }
 0x2c9   :  { %v10648_v2 = vld [vmem:[%s15994_s0 + $0x594] ss:$100 sps:$4 sm:$0xff]   ;;  %v10651_v15 = vld [vmem:[%s15994_s0 + $0x59c] ss:$100 sps:$4 sm:$0xff]  }
 0x2ca   :  { %9845 = vmatpush3.bf16.msra.mxu0 %v11492_v50  ;;  %9873 = vmatpush3.bf16.msra.mxu1 %v16159_v27  ;;  %v11498_v50 = vld [vmem:[%s15995_s1 + $0x2b8] sm:$0xff]   ;;  %v16165_v27 = vld [vmem:[#allocation46_spill] sm:$0xff] }
 0x2cb   :  { %9846 = vmatprep.subr.bf16.mxu0 %v11493_v60  ;;  %9874 = vmatprep.subr.bf16.mxu1 %v16160_v62 }
 0x2ce   :  { %9847 = vmatpush3.bf16.msra.mxu0 %v11494_v37  ;;  %9875 = vmatpush3.bf16.msra.mxu1 %v16161_v20  ;;  %v11499_v37 = vld [vmem:[%s15995_s1 + $0x2f0] sm:$0xff]  }
 0x2cf   :  { %9848 = vmatprep.subr.bf16.mxu0 %v11495_v3  ;;  %9876 = vmatprep.subr.bf16.mxu1 %v16162_v11  ;;  %v16166_v20 = vld [vmem:[#allocation47_spill] sm:$0xff] }
 0x2d2   :  { %9849 = vmatpush3.bf16.msra.mxu0 %v11496_v54  ;;  %9877 = vmatpush3.bf16.msra.mxu1 %v16163_v10  ;;  %v10646_v54 = vld [vmem:[%s15994_s0 + $0x590] ss:$100 sps:$4 sm:$0xff]   ;;  %v10649_v10 = vld [vmem:[%s15994_s0 + $0x598] ss:$100 sps:$4 sm:$0xff]  }
 0x2d3   :  { %9890 = vmatprep.subr.bf16.mxu0 %v11497_v35  ;;  %9918 = vmatprep.subr.bf16.mxu1 %v16164_v13  ;;  %v11500_v13 = vld [vmem:[%s15995_s1 + $0x2b0] sm:$0xff]  }
 0x2d5   :  { %v9532_v30 = vpop.f32.mrf.mxu0  ;;  %v9560_v44 = vpop.f32.mrf.mxu1  ;;  %4946 = vmatmul.mubr.bf16.vlgmr.msra.gmra.mxu0 %v10640_v34  ;;  %4995 = vmatmul.mubr.bf16.vlgmr.msra.gmra.mxu1 %v10643_v6 }
 0x2d6   :  { %9891 = vmatpush3.bf16.msra.mxu0 %v11498_v50  ;;  %9919 = vmatpush3.bf16.msra.mxu1 %v16165_v27  ;;  %v16168_v50 = vld [vmem:[#allocation49_spill] sm:$0xff] }
 0x2d7   :  { %v9533_v60 = vpop.f32.mrf.mxu0  ;;  %v9561_v62 = vpop.f32.mrf.mxu1  ;;  %9892 = vmatprep.subr.bf16.mxu0 %v11499_v37  ;;  %9920 = vmatprep.subr.bf16.mxu1 %v16166_v20 }
 0x2d8   :  { %v9534_v3 = vadd.f32 %v9533_v60, %v9532_v30  ;;  %v9562_v11 = vadd.f32 %v9561_v62, %v9560_v44  ;;  %4953 = vmatprep.mubr.bf16.mxu0 %v10648_v2  ;;  %5002 = vmatprep.mubr.bf16.mxu1 %v10651_v15  ;;  %v16167_v30 = vld [vmem:[#allocation48_spill] sm:$0xff]  ;;  %v11501_v44 = vld [vmem:[%s15995_s1 + $0x2e8] sm:$0xff]  }
 0x2d9   :  { %v9535_v34 = vpop.f32.mrf.mxu0  ;;  %v9563_v6 = vpop.f32.mrf.mxu1  ;;  %v10657_v62 = vld [vmem:[%s15994_s0 + $0x4e4] ss:$100 sps:$4 sm:$0xff]  }
 0x2da   :  { %v4051_v35 = vadd.f32 %v9534_v3, %v14542_v9  ;;  %9893 = vmatpush3.bf16.msra.mxu0 %v11500_v13  ;;  %9921 = vmatpush3.bf16.msra.mxu1 %v16167_v30  ;;  %v10654_v9 = vld [vmem:[%s15994_s0 + $0x4dc] ss:$100 sps:$4 sm:$0xff]  }
 0x2db   :  { %v9536_v2 = vpop.f32.mrf.mxu0  ;;  %v9564_v15 = vpop.f32.mrf.mxu1  ;;  %9894 = vmatprep.subr.bf16.mxu0 %v11501_v44  ;;  %9922 = vmatprep.subr.bf16.mxu1 %v16168_v50  ;;  %v11504_v50 = vld [vmem:[%s15995_s1 + $0x2a0] sm:$0xff]  }
 0x2dc   :  { %v14642_v27 = vadd.f32 %v9562_v11, %v4051_v35  ;;  %v9537_v60 = vadd.f32 %v9536_v2, %v9535_v34  ;;  %v9565_v13 = vadd.f32 %v9564_v15, %v9563_v6  ;;  %v11502_v11 = vld [vmem:[%s15995_s1 + $0x2a8] sm:$0xff]   ;;  %v11503_v2 = vld [vmem:[%s15995_s1 + $0x2e0] sm:$0xff]  }
 0x2dd   :  { %v9538_v37 = vpop.f32.mrf.mxu0  ;;  %4954 = vmatmul.mubr.bf16.gmra.mxu0 %v10646_v54  ;;  %v9566_v20 = vpop.f32.mrf.mxu1  ;;  %5003 = vmatmul.mubr.bf16.gmra.mxu1 %v10649_v10  ;;  %v16169_v34 = vld [vmem:[#allocation50_spill] sm:$0xff] }
 0x2de   :  { %v4054_v3 = vadd.f32 %v9537_v60, %v14559_v18  ;;  %9895 = vmatpush3.bf16.msra.mxu0 %v11502_v11  ;;  %9923 = vmatpush3.bf16.msra.mxu1 %v16169_v34  ;;  %v16172_v34 = vld [vmem:[#allocation53_spill] sm:$0xff] }
 0x2df   :  { %v9539_v35 = vpop.f32.mrf.mxu0  ;;  %v9567_v30 = vpop.f32.mrf.mxu1  ;;  %9896 = vmatprep.subr.bf16.mxu0 %v11503_v2  ;;  %9924 = vmatprep.subr.bf16.mxu1 %v13900_v4  ;;  %v11505_v4 = vld [vmem:[%s15995_s1 + $0x2d8] sm:$0xff]   ;;  %v11510_v2 = vld [vmem:[%s15995_s1 + $0x288] sm:$0xff]  }
 0x2e0   :  { %v14659_v54 = vadd.f32 %v9565_v13, %v4054_v3  ;;  %v9540_v18 = vadd.f32 %v9539_v35, %v9538_v37  ;;  %v9568_v6 = vadd.f32 %v9567_v30, %v9566_v20  ;;  %5043 = vmatprep.mubr.bf16.mxu0 %v10654_v9  ;;  %5092 = vmatprep.mubr.bf16.mxu1 %v10657_v62  ;;  %v11506_v20 = vld [vmem:[%s15995_s1 + $0x298] sm:$0xff]   ;;  %v11507_v3 = vld [vmem:[%s15995_s1 + $0x2d0] sm:$0xff]   ;;  %v11509_v35 = vld [vmem:[%s15995_s1 + $0x2c8] sm:$0xff]  }
 0x2e1   :  { %v9541_v10 = vpop.f32.mrf.mxu0  ;;  %v9569_v15 = vpop.f32.mrf.mxu1  ;;  %v16171_v13 = vld [vmem:[#allocation52_spill] sm:$0xff]  ;;  %v16173_v30 = vld [vmem:[#allocation54_spill] sm:$0xff] }
 0x2e2   :  { %v4059_v44 = vadd.f32 %v9540_v18, %v14570_v22  ;;  %9897 = vmatpush3.bf16.msra.mxu0 %v11504_v50  ;;  %9925 = vmatpush3.bf16.msra.mxu1 %v13912_v51  ;;  %v16170_v51 = vld [vmem:[#allocation51_spill] sm:$0xff]  ;;  %v11512_v50 = vld [vmem:[%s15995_s1 + $0x280] sm:$0xff]  }
 0x2e3   :  { %v9542_v60 = vpop.f32.mrf.mxu0  ;;  %v9570_v11 = vpop.f32.mrf.mxu1  ;;  %9898 = vmatprep.subr.bf16.mxu0 %v11505_v4  ;;  %9926 = vmatprep.subr.bf16.mxu1 %v13921_v32  ;;  %v16174_v18 = vld [vmem:[#allocation55_spill] sm:$0xff]  ;;  %v16177_v4 = vld [vmem:[#allocation58_spill] sm:$0xff] }
 0x2e4   :  { %v14670_v9 = vadd.f32 %v9568_v6, %v4059_v44  ;;  %v9543_v62 = vadd.f32 %v9542_v60, %v9541_v10  ;;  %v9571_v22 = vadd.f32 %v9570_v11, %v9569_v15  ;;  %v11511_v6 = vld [vmem:[%s15995_s1 + $0x2c0] sm:$0xff]   ;;  %v10652_v15 = vld [vmem:[%s15994_s0 + $0x4d8] ss:$100 sps:$4 sm:$0xff]  }
 0x2e5   :  { %v16175_v10 = vld [vmem:[#allocation56_spill] sm:$0xff]  ;;  %v16176_v60 = vld [vmem:[#allocation57_spill] sm:$0xff] }
 0x2e6   :  { %v4062_v37 = vadd.f32 %v9543_v62, %v14581_v59  ;;  %9899 = vmatpush3.bf16.msra.mxu0 %v11506_v20  ;;  %9927 = vmatpush3.bf16.msra.mxu1 %v16170_v51  ;;  %v11508_v59 = vld [vmem:[%s15995_s1 + $0x290] sm:$0xff]   ;;  %v10655_v44 = vld [vmem:[%s15994_s0 + $0x4e0] ss:$100 sps:$4 sm:$0xff]   ;;  %v11513_v11 = vld [vmem:[%s15995_s1 + $0x3f8] sm:$0xff]  }
 0x2e7   :  { %9900 = vmatprep.subr.bf16.mxu0 %v11507_v3  ;;  %9928 = vmatprep.subr.bf16.mxu1 %v16171_v13  ;;  %v10660_v62 = vld [vmem:[%s15994_s0 + $0x5a4] ss:$100 sps:$4 sm:$0xff]   ;;  %v11514_v51 = vld [vmem:[%s15995_s1 + $0x3b8] sm:$0xff]  }
 0x2e8   :  { %v14681_v32 = vadd.f32 %v9571_v22, %v4062_v37  ;;  %v10663_v22 = vld [vmem:[%s15994_s0 + $0x5ac] ss:$100 sps:$4 sm:$0xff]  }
 0x2e9   :  { %v16178_v3 = vld [vmem:[#allocation59_spill] sm:$0xff] }
 0x2ea   :  { %9901 = vmatpush3.bf16.msra.mxu0 %v11508_v59  ;;  %9929 = vmatpush3.bf16.msra.mxu1 %v16172_v34  ;;  %v11515_v34 = vld [vmem:[%s15995_s1 + $0x3f0] sm:$0xff]  }
 0x2eb   :  { %9902 = vmatprep.subr.bf16.mxu0 %v11509_v35  ;;  %9930 = vmatprep.subr.bf16.mxu1 %v16173_v30 }
 0x2ee   :  { %9903 = vmatpush3.bf16.msra.mxu0 %v11510_v2  ;;  %9931 = vmatpush3.bf16.msra.mxu1 %v16174_v18 }
 0x2ef   :  { %9904 = vmatprep.subr.bf16.mxu0 %v11511_v6  ;;  %9932 = vmatprep.subr.bf16.mxu1 %v16175_v10  ;;  %v10658_v6 = vld [vmem:[%s15994_s0 + $0x5a0] ss:$100 sps:$4 sm:$0xff]   ;;  %v10661_v10 = vld [vmem:[%s15994_s0 + $0x5a8] ss:$100 sps:$4 sm:$0xff]  }
 0x2f2   :  { %9905 = vmatpush3.bf16.msra.mxu0 %v11512_v50  ;;  %9933 = vmatpush3.bf16.msra.mxu1 %v16176_v60 }
 0x2f3   :  { %9946 = vmatprep.subr.bf16.mxu0 %v11513_v11  ;;  %9974 = vmatprep.subr.bf16.mxu1 %v16177_v4  ;;  %v11517_v11 = vld [vmem:[%s15995_s1 + $0x3e8] sm:$0xff]  }
 0x2f4   :  { %v16180_v4 = vld [vmem:[#allocation61_spill] sm:$0xff] }
 0x2f5   :  { %v9588_v37 = vpop.f32.mrf.mxu0  ;;  %v9616_v20 = vpop.f32.mrf.mxu1  ;;  %5044 = vmatmul.mubr.bf16.vlgmr.msra.gmra.mxu0 %v10652_v15  ;;  %5093 = vmatmul.mubr.bf16.vlgmr.msra.gmra.mxu1 %v10655_v44  ;;  %v16179_v44 = vld [vmem:[#allocation60_spill] sm:$0xff] }
 0x2f6   :  { %9947 = vmatpush3.bf16.msra.mxu0 %v11514_v51  ;;  %9975 = vmatpush3.bf16.msra.mxu1 %v16178_v3 }
 0x2f7   :  { %v9589_v13 = vpop.f32.mrf.mxu0  ;;  %v9617_v59 = vpop.f32.mrf.mxu1  ;;  %9948 = vmatprep.subr.bf16.mxu0 %v11515_v34  ;;  %9976 = vmatprep.subr.bf16.mxu1 %v14026_v52  ;;  %v11516_v52 = vld [vmem:[%s15995_s1 + $0x3b0] sm:$0xff]  }
 0x2f8   :  { %v9590_v35 = vadd.f32 %v9589_v13, %v9588_v37  ;;  %v9618_v30 = vadd.f32 %v9617_v59, %v9616_v20  ;;  %5051 = vmatprep.mubr.bf16.mxu0 %v10660_v62  ;;  %5100 = vmatprep.mubr.bf16.mxu1 %v10663_v22  ;;  %v10666_v37 = vld [vmem:[%s15994_s0 + $0x4ec] ss:$100 sps:$4 sm:$0xff]   ;;  %v10669_v20 = vld [vmem:[%s15994_s0 + $0x4f4] ss:$100 sps:$4 sm:$0xff]  }
 0x2f9   :  { %v9591_v2 = vpop.f32.mrf.mxu0  ;;  %v9619_v18 = vpop.f32.mrf.mxu1  ;;  %v11518_v59 = vld [vmem:[%s15995_s1 + $0x3a8] sm:$0xff]  }
 0x2fa   :  { %v4149_v15 = vadd.f32 %v9590_v35, %v14642_v27  ;;  %9949 = vmatpush3.bf16.msra.mxu0 %v11516_v52  ;;  %9977 = vmatpush3.bf16.msra.mxu1 %v16179_v44 }
 0x2fb   :  { %v9592_v50 = vpop.f32.mrf.mxu0  ;;  %v9620_v60 = vpop.f32.mrf.mxu1  ;;  %9950 = vmatprep.subr.bf16.mxu0 %v11517_v11  ;;  %9978 = vmatprep.subr.bf16.mxu1 %v16180_v4  ;;  %v11522_v4 = vld [vmem:[%s15995_s1 + $0x398] sm:$0xff]  }
 0x2fc   :  { %v14742_v62 = vadd.f32 %v9618_v30, %v4149_v15  ;;  %v9593_v22 = vadd.f32 %v9592_v50, %v9591_v2  ;;  %v9621_v27 = vadd.f32 %v9620_v60, %v9619_v18  ;;  %v11519_v30 = vld [vmem:[%s15995_s1 + $0x3e0] sm:$0xff]  }
 0x2fd   :  { %v9594_v51 = vpop.f32.mrf.mxu0  ;;  %5052 = vmatmul.mubr.bf16.gmra.mxu0 %v10658_v6  ;;  %v9622_v3 = vpop.f32.mrf.mxu1  ;;  %5101 = vmatmul.mubr.bf16.gmra.mxu1 %v10661_v10 }
 0x2fe   :  { %v4152_v13 = vadd.f32 %v9593_v22, %v14659_v54  ;;  %9951 = vmatpush3.bf16.msra.mxu0 %v11518_v59  ;;  %9979 = vmatpush3.bf16.msra.mxu1 %v14063_v61  ;;  %v11520_v61 = vld [vmem:[%s15995_s1 + $0x3a0] sm:$0xff]  }
 0x2ff   :  { %v9595_v34 = vpop.f32.mrf.mxu0  ;;  %v9623_v35 = vpop.f32.mrf.mxu1  ;;  %9952 = vmatprep.subr.bf16.mxu0 %v11519_v30  ;;  %9980 = vmatprep.subr.bf16.mxu1 %v14070_v33  ;;  %v11521_v33 = vld [vmem:[%s15995_s1 + $0x3d8] sm:$0xff]   ;;  %v11527_v22 = vld [vmem:[%s15995_s1 + $0x3c0] sm:$0xff]  }
 0x300   :  { %v14759_v2 = vadd.f32 %v9621_v27, %v4152_v13  ;;  %v9596_v18 = vadd.f32 %v9595_v34, %v9594_v51  ;;  %v9624_v54 = vadd.f32 %v9623_v35, %v9622_v3  ;;  %5141 = vmatprep.mubr.bf16.mxu0 %v10666_v37  ;;  %5190 = vmatprep.mubr.bf16.mxu1 %v10669_v20  ;;  %v11528_v27 = vld [vmem:[%s15995_s1 + $0x380] sm:$0xff]   ;;  %v11531_v13 = vld [vmem:[%s15995_s1 + $0x4f0] sm:$0xff]  }
 0x301   :  { %v9597_v6 = vpop.f32.mrf.mxu0  ;;  %v9625_v10 = vpop.f32.mrf.mxu1  ;;  %v10675_v37 = vld [vmem:[%s15994_s0 + $0x5bc] ss:$100 sps:$4 sm:$0xff]  }
 0x302   :  { %v4157_v15 = vadd.f32 %v9596_v18, %v14670_v9  ;;  %9953 = vmatpush3.bf16.msra.mxu0 %v11520_v61  ;;  %9981 = vmatpush3.bf16.msra.mxu1 %v14080_v41  ;;  %v11523_v41 = vld [vmem:[%s15995_s1 + $0x3d0] sm:$0xff]  }
 0x303   :  { %v9598_v52 = vpop.f32.mrf.mxu0  ;;  %v9626_v44 = vpop.f32.mrf.mxu1  ;;  %9954 = vmatprep.subr.bf16.mxu0 %v11521_v33  ;;  %9982 = vmatprep.subr.bf16.mxu1 %v14087_v14  ;;  %v10670_v18 = vld [vmem:[%s15994_s0 + $0x5b0] ss:$100 sps:$4 sm:$0xff]  }
 0x304   :  { %v14770_v50 = vadd.f32 %v9624_v54, %v4157_v15  ;;  %v9599_v60 = vadd.f32 %v9598_v52, %v9597_v6  ;;  %v9627_v9 = vadd.f32 %v9626_v44, %v9625_v10  ;;  %v11533_v15 = vld [vmem:[%s15995_s1 + $0x4e8] sm:$0xff]   ;;  %v10678_v44 = vld [vmem:[%s15994_s0 + $0x4fc] ss:$100 sps:$4 sm:$0xff]  }
 0x306   :  { %v4160_v11 = vadd.f32 %v9599_v60, %v14681_v32  ;;  %9955 = vmatpush3.bf16.msra.mxu0 %v11522_v4  ;;  %9983 = vmatpush3.bf16.msra.mxu1 %v14097_v25  ;;  %v11524_v32 = vld [vmem:[%s15995_s1 + $0x390] sm:$0xff]   ;;  %v11525_v25 = vld [vmem:[%s15995_s1 + $0x3c8] sm:$0xff]  }
 0x307   :  { %9956 = vmatprep.subr.bf16.mxu0 %v11523_v41  ;;  %9984 = vmatprep.subr.bf16.mxu1 %v14104_v23  ;;  %v11526_v23 = vld [vmem:[%s15995_s1 + $0x388] sm:$0xff]   ;;  %v11535_v41 = vld [vmem:[%s15995_s1 + $0x4e0] sm:$0xff]  }
 0x308   :  { %v14781_v14 = vadd.f32 %v9627_v9, %v4160_v11 }
 0x30a   :  { %9957 = vmatpush3.bf16.msra.mxu0 %v11524_v32  ;;  %9985 = vmatpush3.bf16.msra.mxu1 %v14113_v45  ;;  %v10664_v45 = vld [vmem:[%s15994_s0 + $0x4e8] ss:$100 sps:$4 sm:$0xff]  }
 0x30b   :  { %9958 = vmatprep.subr.bf16.mxu0 %v11525_v25  ;;  %9986 = vmatprep.subr.bf16.mxu1 %v14120_v31  ;;  %v10667_v31 = vld [vmem:[%s15994_s0 + $0x4f0] ss:$100 sps:$4 sm:$0xff]  }
 0x30e   :  { %9959 = vmatpush3.bf16.msra.mxu0 %v11526_v23  ;;  %9987 = vmatpush3.bf16.msra.mxu1 %v14127_v19  ;;  %v11529_v19 = vld [vmem:[%s15995_s1 + $0x4f8] sm:$0xff]  }
 0x30f   :  { %9960 = vmatprep.subr.bf16.mxu0 %v11527_v22  ;;  %9988 = vmatprep.subr.bf16.mxu1 %v14134_v36  ;;  %v10672_v36 = vld [vmem:[%s15994_s0 + $0x5b4] ss:$100 sps:$4 sm:$0xff]  }
 0x312   :  { %9961 = vmatpush3.bf16.msra.mxu0 %v11528_v27  ;;  %9989 = vmatpush3.bf16.msra.mxu1 %v14147_v40  ;;  %v11530_v40 = vld [vmem:[%s15995_s1 + $0x4b8] sm:$0xff]  }
 0x313   :  { %10002 = vmatprep.subr.bf16.mxu0 %v11529_v19  ;;  %10030 = vmatprep.subr.bf16.mxu1 %v14154_v42 }
 0x315   :  { %v9644_v20 = vpop.f32.mrf.mxu0  ;;  %v9672_v51 = vpop.f32.mrf.mxu1  ;;  %5142 = vmatmul.mubr.bf16.vlgmr.msra.gmra.mxu0 %v10664_v45  ;;  %5191 = vmatmul.mubr.bf16.vlgmr.msra.gmra.mxu1 %v10667_v31 }
 0x316   :  { %10003 = vmatpush3.bf16.msra.mxu0 %v11530_v40  ;;  %10031 = vmatpush3.bf16.msra.mxu1 %v14167_v47  ;;  %v10673_v47 = vld [vmem:[%s15994_s0 + $0x5b8] ss:$100 sps:$4 sm:$0xff]   ;;  %v11544_v40 = vld [vmem:[%s15995_s1 + $0x480] sm:$0xff]  }
 0x317   :  { %v9645_v42 = vpop.f32.mrf.mxu0  ;;  %v9673_v3 = vpop.f32.mrf.mxu1  ;;  %10004 = vmatprep.subr.bf16.mxu0 %v11531_v13  ;;  %10032 = vmatprep.subr.bf16.mxu1 %v14174_v5  ;;  %v11532_v5 = vld [vmem:[%s15995_s1 + $0x4b0] sm:$0xff]  }
 0x318   :  { %v9646_v59 = vadd.f32 %v9645_v42, %v9644_v20  ;;  %v9674_v34 = vadd.f32 %v9673_v3, %v9672_v51  ;;  %5149 = vmatprep.mubr.bf16.mxu0 %v10672_v36  ;;  %5198 = vmatprep.mubr.bf16.mxu1 %v10675_v37  ;;  %v11538_v20 = vld [vmem:[%s15995_s1 + $0x498] sm:$0xff]   ;;  %v11543_v51 = vld [vmem:[%s15995_s1 + $0x4c0] sm:$0xff]   ;;  %v10687_v42 = vld [vmem:[%s15994_s0 + $0x5cc] ss:$100 sps:$4 sm:$0xff]  }
 0x319   :  { %v9647_v35 = vpop.f32.mrf.mxu0  ;;  %v9675_v30 = vpop.f32.mrf.mxu1 }
 0x31a   :  { %v4247_v54 = vadd.f32 %v9646_v59, %v14742_v62  ;;  %10005 = vmatpush3.bf16.msra.mxu0 %v11532_v5  ;;  %10033 = vmatpush3.bf16.msra.mxu1 %v14188_v63  ;;  %v10681_v63 = vld [vmem:[%s15994_s0 + $0x504] ss:$100 sps:$4 sm:$0xff]  }
 0x31b   :  { %v9648_v6 = vpop.f32.mrf.mxu0  ;;  %v9676_v10 = vpop.f32.mrf.mxu1  ;;  %10006 = vmatprep.subr.bf16.mxu0 %v11533_v15  ;;  %10034 = vmatprep.subr.bf16.mxu1 %v14195_v49  ;;  %v11534_v49 = vld [vmem:[%s15995_s1 + $0x4a8] sm:$0xff]   ;;  %v10682_v5 = vld [vmem:[%s15994_s0 + $0x5c0] ss:$100 sps:$4 sm:$0xff]  }
 0x31c   :  { %v14842_v61 = vadd.f32 %v9674_v34, %v4247_v54  ;;  %v9649_v52 = vadd.f32 %v9648_v6, %v9647_v35  ;;  %v9677_v62 = vadd.f32 %v9676_v10, %v9675_v30  ;;  %v11547_v35 = vld [vmem:[%s15995_s1 + $0x5f0] sm:$0xff]  }
 0x31d   :  { %v9650_v33 = vpop.f32.mrf.mxu0  ;;  %5150 = vmatmul.mubr.bf16.gmra.mxu0 %v10670_v18  ;;  %v9678_v60 = vpop.f32.mrf.mxu1  ;;  %5199 = vmatmul.mubr.bf16.gmra.mxu1 %v10673_v47  ;;  %v11548_v10 = vld [vmem:[%s15995_s1 + $0x5b0] sm:$0xff]  }
 0x31e   :  { %v4250_v9 = vadd.f32 %v9649_v52, %v14759_v2  ;;  %10007 = vmatpush3.bf16.msra.mxu0 %v11534_v49  ;;  %10035 = vmatpush3.bf16.msra.mxu1 %v14211_v16  ;;  %v11536_v16 = vld [vmem:[%s15995_s1 + $0x4a0] sm:$0xff]  }
 0x31f   :  { %v9651_v11 = vpop.f32.mrf.mxu0  ;;  %v9679_v4 = vpop.f32.mrf.mxu1  ;;  %10008 = vmatprep.subr.bf16.mxu0 %v11535_v41  ;;  %10036 = vmatprep.subr.bf16.mxu1 %v14218_v57  ;;  %v11537_v57 = vld [vmem:[%s15995_s1 + $0x4d8] sm:$0xff]  }
 0x320   :  { %v14859_v32 = vadd.f32 %v9677_v62, %v4250_v9  ;;  %v9652_v25 = vadd.f32 %v9651_v11, %v9650_v33  ;;  %v9680_v2 = vadd.f32 %v9679_v4, %v9678_v60  ;;  %5239 = vmatprep.mubr.bf16.mxu0 %v10678_v44  ;;  %5288 = vmatprep.mubr.bf16.mxu1 %v10681_v63  ;;  %v11549_v62 = vld [vmem:[%s15995_s1 + $0x5e8] sm:$0xff]   ;;  %v10691_v33 = vld [vmem:[%s15994_s0 + $0x510] ss:$100 sps:$4 sm:$0xff]  }
 0x321   :  { %v9653_v23 = vpop.f32.mrf.mxu0  ;;  %v9681_v22 = vpop.f32.mrf.mxu1  ;;  %v11550_v11 = vld [vmem:[%s15995_s1 + $0x5a8] sm:$0xff]  }
 0x322   :  { %v4255_v45 = vadd.f32 %v9652_v25, %v14770_v50  ;;  %10009 = vmatpush3.bf16.msra.mxu0 %v11536_v16  ;;  %10037 = vmatpush3.bf16.msra.mxu1 %v14228_v12  ;;  %v11539_v12 = vld [vmem:[%s15995_s1 + $0x4d0] sm:$0xff]   ;;  %v11551_v25 = vld [vmem:[%s15995_s1 + $0x5e0] sm:$0xff]  }
 0x323   :  { %v9654_v31 = vpop.f32.mrf.mxu0  ;;  %v9682_v27 = vpop.f32.mrf.mxu1  ;;  %10010 = vmatprep.subr.bf16.mxu0 %v11537_v57  ;;  %10038 = vmatprep.subr.bf16.mxu1 %v14235_v17  ;;  %v11553_v57 = vld [vmem:[%s15995_s1 + $0x5d8] sm:$0xff]  }
 0x324   :  { %v14870_v19 = vadd.f32 %v9680_v2, %v4255_v45  ;;  %v9655_v36 = vadd.f32 %v9654_v31, %v9653_v23  ;;  %v9683_v50 = vadd.f32 %v9682_v27, %v9681_v22 }
 0x326   :  { %v4258_v37 = vadd.f32 %v9655_v36, %v14781_v14  ;;  %10011 = vmatpush3.bf16.msra.mxu0 %v11538_v20  ;;  %10039 = vmatpush3.bf16.msra.mxu1 %v14245_v43  ;;  %v11540_v14 = vld [vmem:[%s15995_s1 + $0x490] sm:$0xff]   ;;  %v11541_v43 = vld [vmem:[%s15995_s1 + $0x4c8] sm:$0xff]   ;;  %v11554_v20 = vld [vmem:[%s15995_s1 + $0x598] sm:$0xff]  }
 0x327   :  { %10012 = vmatprep.subr.bf16.mxu0 %v11539_v12  ;;  %10040 = vmatprep.subr.bf16.mxu1 %v14252_v58  ;;  %v11542_v58 = vld [vmem:[%s15995_s1 + $0x488] sm:$0xff]  }
 0x328   :  { %v14881_v17 = vadd.f32 %v9683_v50, %v4258_v37 }
 0x32a   :  { %10013 = vmatpush3.bf16.msra.mxu0 %v11540_v14  ;;  %10041 = vmatpush3.bf16.msra.mxu1 %v14261_v28  ;;  %v10676_v28 = vld [vmem:[%s15994_s0 + $0x4f8] ss:$100 sps:$4 sm:$0xff]   ;;  %v11556_v14 = vld [vmem:[%s15995_s1 + $0x590] sm:$0xff]  }
 0x32b   :  { %10014 = vmatprep.subr.bf16.mxu0 %v11541_v43  ;;  %10042 = vmatprep.subr.bf16.mxu1 %v14268_v53  ;;  %v10679_v53 = vld [vmem:[%s15994_s0 + $0x500] ss:$100 sps:$4 sm:$0xff]  }
 0x32c   :  { %v11559_v43 = vld [vmem:[%s15995_s1 + $0x5c0] sm:$0xff]  }
 0x32e   :  { %10015 = vmatpush3.bf16.msra.mxu0 %v11542_v58  ;;  %10043 = vmatpush3.bf16.msra.mxu1 %v14275_v56  ;;  %v11545_v56 = vld [vmem:[%s15995_s1 + $0x5f8] sm:$0xff]  }
 0x32f   :  { %10016 = vmatprep.subr.bf16.mxu0 %v11543_v51  ;;  %10044 = vmatprep.subr.bf16.mxu1 %v14282_v39  ;;  %v10684_v39 = vld [vmem:[%s15994_s0 + $0x5c4] ss:$100 sps:$4 sm:$0xff]   ;;  %v10692_v58 = vld [vmem:[%s15994_s0 + $0x5d8] ss:$100 sps:$4 sm:$0xff]  }
 0x330   :  { %v11560_v51 = vld [vmem:[%s15995_s1 + $0x580] sm:$0xff]  }
 0x332   :  { %10017 = vmatpush3.bf16.msra.mxu0 %v11544_v40  ;;  %10045 = vmatpush3.bf16.msra.mxu1 %v14295_v0  ;;  %v11546_v0 = vld [vmem:[%s15995_s1 + $0x5b8] sm:$0xff]  }
 0x333   :  { %10058 = vmatprep.subr.bf16.mxu0 %v11545_v56  ;;  %10178 = vmatprep.subr.bf16.mxu1 %v14302_v1 }
 0x335   :  { %v9700_v3 = vpop.f32.mrf.mxu0  ;;  %v9728_v13 = vpop.f32.mrf.mxu1  ;;  %5240 = vmatmul.mubr.bf16.vlgmr.msra.gmra.mxu0 %v10676_v28  ;;  %5289 = vmatmul.mubr.bf16.vlgmr.msra.gmra.mxu1 %v10679_v53 }
 0x336   :  { %10059 = vmatpush3.bf16.msra.mxu0 %v11546_v0  ;;  %10179 = vmatpush3.bf16.msra.mxu1 %v14302_v1  ;;  %v10685_v1 = vld [vmem:[%s15994_s0 + $0x5c8] ss:$100 sps:$4 sm:$0xff]  }
 0x337   :  { %v9701_v59 = vpop.f32.mrf.mxu0  ;;  %v9729_v34 = vpop.f32.mrf.mxu1  ;;  %10060 = vmatprep.subr.bf16.mxu0 %v11547_v35  ;;  %10180 = vmatprep.subr.bf16.mxu1 %v14317_v8  ;;  %v16182_v35 = vld [vmem:[#allocation62_spill] sm:$0xff] }
 0x338   :  { %v9702_v30 = vadd.f32 %v9701_v59, %v9700_v3  ;;  %v9730_v18 = vadd.f32 %v9729_v34, %v9728_v13  ;;  %5247 = vmatprep.mubr.bf16.mxu0 %v10684_v39  ;;  %5296 = vmatprep.mubr.bf16.mxu1 %v10687_v42  ;;  %v16181_v42 = vmax.f32 %v16125_v46, %v14375_v21  ;;  %v10693_v34 = vld [vmem:[%s15994_s0 + $0x5d0] ss:$100 sps:$4 sm:$0xff]  }
 0x339   :  { %v9703_v47 = vpop.f32.mrf.mxu0  ;;  %v9731_v54 = vpop.f32.mrf.mxu1  ;;  %v16184_v21 = vld [vmem:[#allocation6_spill] sm:$0xff]  ;;  %v16185_v46 = vld [vmem:[#allocation7_spill] sm:$0xff] }
 0x33a   :  { %v4345_v6 = vadd.f32 %v9702_v30, %v14842_v61  ;;  %10061 = vmatpush3.bf16.msra.mxu0 %v11548_v10  ;;  %10181 = vmatpush3.bf16.msra.mxu1 %v14317_v8  ;;  %v10690_v61 = vld [vmem:[%s15994_s0 + $0x50c] ss:$100 sps:$4 sm:$0xff]   ;;  %v16183_v30 = vmax.f32 %v13312_v29, %v16182_v35  ;;  %v10714_v35 = vld [vmem:[%s15997_s3 + $0x40] ss:$8 sps:$4 sm:$0xff]  }
 0x33b   :  { %v9704_v15 = vpop.f32.mrf.mxu0  ;;  %v9732_v52 = vpop.f32.mrf.mxu1  ;;  %10062 = vmatprep.subr.bf16.mxu0 %v11549_v62  ;;  %10182 = vmatprep.subr.bf16.mxu1 %v14333_v24  ;;  %v16187_v62 = vld [vmem:[#allocation63_spill] sm:$0xff] }
 0x33c   :  { %v9705_v44 = vadd.f32 %v9704_v15, %v9703_v47  ;;  %v9733_v63 = vadd.f32 %v9732_v52, %v9731_v54  ;;  %v14948_v8 = vadd.f32 %v9730_v18, %v4345_v6 }
 0x33d   :  { %v9706_v60 = vpop.f32.mrf.mxu0  ;;  %5248 = vmatmul.mubr.bf16.gmra.mxu0 %v10682_v5  ;;  %v9734_v9 = vpop.f32.mrf.mxu1  ;;  %5297 = vmatmul.mubr.bf16.gmra.mxu1 %v10685_v1  ;;  %v16186_v1 = vmax.f32 %v16184_v21, %v16185_v46 }
 0x33e   :  { %v4348_v49 = vadd.f32 %v9705_v44, %v14859_v32  ;;  %10063 = vmatpush3.bf16.msra.mxu0 %v11550_v11  ;;  %10183 = vmatpush3.bf16.msra.mxu1 %v14333_v24  ;;  %v11552_v24 = vld [vmem:[%s15995_s1 + $0x5a0] sm:$0xff]  }
 0x33f   :  { %v9707_v4 = vpop.f32.mrf.mxu0  ;;  %v9735_v41 = vpop.f32.mrf.mxu1  ;;  %10064 = vmatprep.subr.bf16.mxu0 %v11551_v25  ;;  %10184 = vmatprep.subr.bf16.mxu1 %v14353_v7  ;;  %v16188_v44 = vld [vmem:[#allocation64_spill] sm:$0xff] }
 0x340   :  { %v9708_v2 = vadd.f32 %v9707_v4, %v9706_v60  ;;  %v9736_v23 = vadd.f32 %v9735_v41, %v9734_v9  ;;  %5337 = vmatprep.mubr.bf16.mxu0 %v10690_v61  ;;  %10194 = vmatprep.mubr.bf16.mxu1 %v10691_v33  ;;  %v4397_v32 = vadd.f32 %v9733_v63, %v4348_v49 }
 0x341   :  { %v9709_v22 = vpop.f32.mrf.mxu0  ;;  %v9737_v45 = vpop.f32.mrf.mxu1  ;;  %v16189_v63 = vmax.f32 %v16187_v62, %v16188_v44  ;;  %v10725_v44 = vld [vmem:[%s15997_s3 + $0xb4] ss:$8 sps:$4 sm:$0xff]  }
 0x342   :  { %v4353_v16 = vadd.f32 %v9708_v2, %v14870_v19  ;;  %10065 = vmatpush3.bf16.msra.mxu0 %v11552_v24  ;;  %10185 = vmatpush3.bf16.msra.mxu1 %v14353_v7  ;;  %v11555_v7 = vld [vmem:[%s15995_s1 + $0x5d0] sm:$0xff]  }
 0x343   :  { %v9710_v31 = vpop.f32.mrf.mxu0  ;;  %v9738_v27 = vpop.f32.mrf.mxu1  ;;  %10066 = vmatprep.subr.bf16.mxu0 %v11553_v57  ;;  %10186 = vmatprep.subr.bf16.mxu1 %v14371_v26 }
 0x344   :  { %v9711_v36 = vadd.f32 %v9710_v31, %v9709_v22  ;;  %v9739_v50 = vadd.f32 %v9738_v27, %v9737_v45  ;;  %v4402_v37 = vadd.f32 %v9736_v23, %v4353_v16 }
 0x346   :  { %v4356_v19 = vadd.f32 %v9711_v36, %v14881_v17  ;;  %10067 = vmatpush3.bf16.msra.mxu0 %v11554_v20  ;;  %10187 = vmatpush3.bf16.msra.mxu1 %v14371_v26  ;;  %v11557_v17 = vld [vmem:[%s15995_s1 + $0x5c8] sm:$0xff]  }
 0x347   :  { %10068 = vmatprep.subr.bf16.mxu0 %v11555_v7  ;;  %10188 = vmatprep.subr.bf16.mxu1 %v14385_v55  ;;  %v11558_v26 = vld [vmem:[%s15995_s1 + $0x588] sm:$0xff]  }
 0x348   :  { %v4405_v12 = vadd.f32 %v9739_v50, %v4356_v19 }
 0x34a   :  { %10069 = vmatpush3.bf16.msra.mxu0 %v11556_v14  ;;  %10189 = vmatpush3.bf16.msra.mxu1 %v14385_v55  ;;  %v10688_v55 = vld [vmem:[%s15994_s0 + $0x508] ss:$100 sps:$4 sm:$0xff]  }
 0x34b   :  { %10070 = vmatprep.subr.bf16.mxu0 %v11557_v17  ;;  %10190 = vmatprep.subr.bf16.mxu1 %v14398_v48 }
 0x34e   :  { %10071 = vmatpush3.bf16.msra.mxu0 %v11558_v26  ;;  %10191 = vmatpush3.bf16.msra.mxu1 %v14398_v48  ;;  %v10695_v48 = vld [vmem:[%s15994_s0 + $0x5d4] ss:$100 sps:$4 sm:$0xff]  }
 0x34f   :  { %10072 = vmatprep.subr.bf16.mxu0 %v11559_v43  ;;  %10192 = vmatprep.subr.bf16.mxu1 %v14407_v38 }
 0x352   :  { %10073 = vmatpush3.bf16.msra.mxu0 %v11560_v51  ;;  %10193 = vmatpush3.bf16.msra.mxu1 %v14407_v38 }
 0x355   :  { %v10176_v28 = vpop.f32.mrf.mxu0  ;;  %v9766_v53 = vpop.f32.mrf.mxu1  ;;  %5338 = vmatmul.mubr.bf16.vlgmr.msra.gmra.mxu0 %v10688_v55  ;;  %10195 = vmatmul.mubr.bf16.vlgmr.msra.gmra.mxu1 %v10692_v58  ;;  %v10698_v58 = vld [vmem:[%s15997_s3 + $0x74] ss:$8 sps:$4 sm:$0xff]  }
 0x356   :  { %v4451_v40 = vadd.f32 %v10176_v28, %v4402_v37  ;;  %5345 = vmatprep.mubr.bf16.mxu0 %v10695_v48  ;;  %v10696_v48 = vld [vmem:[%s15997_s3 + $0x70] ss:$8 sps:$4 sm:$0xff]   ;;  %5660 = vmatprep.subr.bf16.mxu1 %v10698_v58 }
 0x357   :  { %v4442_v56 = vpop.f32.mrf.mxu0  ;;  %v9767_v39 = vpop.f32.mrf.mxu1  ;;  %v10699_v28 = vld [vmem:[%s15997_s3 + $0xf0] ss:$8 sps:$4 sm:$0xff]   ;;  %5661 = vmatpush1.bf16.msra.mxu1 %v10696_v48  ;;  %v10741_v48 = vld [vmem:[%s15997_s3 + $0x80] ss:$8 sps:$4 sm:$0xff]  }
 0x358   :  { %v15009_v3 = vmax.f32 %v16181_v42, %v4451_v40  ;;  %v4443_v13 = vadd.f32 %v4442_v56, %v14948_v8  ;;  %v9768_v38 = vadd.f32 %v9767_v39, %v9766_v53  ;;  %v10701_v53 = vld [vmem:[%s15997_s3 + $0xf4] ss:$8 sps:$4 sm:$0xff]   ;;  %v10704_v40 = vld [vmem:[%s15997_s3 + $0x64] ss:$8 sps:$4 sm:$0xff]   ;;  %v10702_v56 = vld [vmem:[%s15997_s3 + $0x60] ss:$8 sps:$4 sm:$0xff]  }
 0x359   :  { %v10177_v0 = vpop.f32.mrf.mxu0  ;;  %v9769_v59 = vpop.f32.mrf.mxu1  ;;  %5539 = vmatprep.subr.bf16.mxu0 %v10701_v53  ;;  %v10707_v39 = vld [vmem:[%s15997_s3 + $0xe4] ss:$8 sps:$4 sm:$0xff]   ;;  %5662 = vmatprep.subr.bf16.mxu1 %v10704_v40  ;;  %v10705_v42 = vld [vmem:[%s15997_s3 + $0xe0] ss:$8 sps:$4 sm:$0xff]   ;;  %v11583_v40 = vmov 0  }
 0x35a   :  { %v15018_v18 = vmax.f32 %v16183_v30, %v4443_v13  ;;  %v4454_v47 = vadd.f32 %v10177_v0, %v4405_v12  ;;  %5540 = vmatpush1.bf16.msra.mxu0 %v10699_v28  ;;  %v10710_v13 = vld [vmem:[%s15997_s3 + $0x54] ss:$8 sps:$4 sm:$0xff]   ;;  %v10708_v0 = vld [vmem:[%s15997_s3 + $0x50] ss:$8 sps:$4 sm:$0xff]   ;;  %5692 = vmatprep.mubr.bf16.mxu1 %v11583_v40 }
 0x35b   :  { %v4445_v54 = vpop.f32.mrf.mxu0  ;;  %v9770_v5 = vpop.f32.mrf.mxu1  ;;  %5541 = vmatprep.subr.bf16.mxu0 %v10707_v39  ;;  %5663 = vmatpush1.bf16.msra.mxu1 %v10702_v56  ;;  %v10746_v28 = vld [vmem:[%s15997_s3 + $0x1f4] ss:$8 sps:$4 sm:$0xff]  }
 0x35c   :  { %v15023_v6 = vmax.f32 %v16186_v1, %v4454_v47  ;;  %v4446_v10 = vadd.f32 %v4445_v54, %v4397_v32  ;;  %v15025_v15 = vadd.f32 %v9770_v5, %v9769_v59  ;;  %5664 = vmatprep.subr.bf16.mxu1 %v10710_v13  ;;  %v10711_v59 = vld [vmem:[%s15997_s3 + $0xd0] ss:$8 sps:$4 sm:$0xff]   ;;  %v10719_v54 = vld [vmem:[%s15997_s3 + $0xc4] ss:$8 sps:$4 sm:$0xff]   ;;  %v10717_v5 = vld [vmem:[%s15997_s3 + $0xc0] ss:$8 sps:$4 sm:$0xff]  }
 0x35d   :  { %5346 = vmatmul.mubr.bf16.gmra.mxu0 %v10693_v34  ;;  %v9772_v52 = vpop.f32.mrf.mxu1  ;;  %v10716_v34 = vld [vmem:[%s15997_s3 + $0x44] ss:$8 sps:$4 sm:$0xff]   ;;  %v10722_v1 = vld [vmem:[%s15997_s3 + $0x34] ss:$8 sps:$4 sm:$0xff]  }
 0x35e   :  { %v15030_v61 = vmax.f32 %v16189_v63, %v4446_v10  ;;  %5542 = vmatpush1.bf16.msra.mxu0 %v10705_v42  ;;  %v10720_v10 = vld [vmem:[%s15997_s3 + $0x30] ss:$8 sps:$4 sm:$0xff]   ;;  %5571 = vmatprep.mubr.bf16.mxu0 %v11583_v40 }
 0x35f   :  { %v9773_v29 = vpop.f32.mrf.mxu1  ;;  %5665 = vmatpush1.bf16.msra.mxu1 %v10708_v0  ;;  %v10723_v63 = vld [vmem:[%s15997_s3 + $0xb0] ss:$8 sps:$4 sm:$0xff]  }
 0x360   :  { %v9774_v33 = vadd.f32 %v9773_v29, %v9772_v52  ;;  %5666 = vmatprep.subr.bf16.mxu1 %v10716_v34 }
 0x361   :  { %v9775_v8 = vpop.f32.mrf.mxu1 }
 0x363   :  { %v9776_v60 = vpop.f32.mrf.mxu1  ;;  %5667 = vmatpush1.bf16.msra.mxu1 %v10714_v35 }
 0x364   :  { %v9777_v9 = vadd.f32 %v9776_v60, %v9775_v8  ;;  %5668 = vmatprep.subr.bf16.mxu1 %v10722_v1  ;;  %v10728_v8 = vld [vmem:[%s15997_s3 + $0x24] ss:$8 sps:$4 sm:$0xff]   ;;  %v10726_v60 = vld [vmem:[%s15997_s3 + $0x20] ss:$8 sps:$4 sm:$0xff]  }
 0x367   :  { %5669 = vmatpush1.bf16.msra.mxu1 %v10720_v10 }
 0x368   :  { %5670 = vmatprep.subr.bf16.mxu1 %v10728_v8 }
 0x36b   :  { %5671 = vmatpush1.bf16.msra.mxu1 %v10726_v60 }
 0x375   :  { %v9794_v49 = vpop.f32.mrf.mxu0  ;;  %v9822_v11 = vpop.f32.mrf.mxu1 }
 0x377   :  { %v9795_v4 = vpop.f32.mrf.mxu0  ;;  %v9823_v41 = vpop.f32.mrf.mxu1 }
 0x378   :  { %v9796_v25 = vadd.f32 %v9795_v4, %v9794_v49  ;;  %v9824_v2 = vadd.f32 %v9823_v41, %v9822_v11  ;;  %v10731_v11 = vld [vmem:[%s15997_s3 + $0xa4] ss:$8 sps:$4 sm:$0xff]   ;;  %v10729_v4 = vld [vmem:[%s15997_s3 + $0xa0] ss:$8 sps:$4 sm:$0xff]  }
 0x379   :  { %v15032_v23 = vpop.f32.mrf.mxu0  ;;  %v15034_v32 = vpop.f32.mrf.mxu1 }
 0x37a   :  { %v4850_v22 = vadd.f32 %v9796_v25, %v9768_v38  ;;  %v10713_v38 = vld [vmem:[%s15997_s3 + $0xd4] ss:$8 sps:$4 sm:$0xff]  }
 0x37b   :  { %v15036_v45 = vpop.f32.mrf.mxu0  ;;  %v15038_v16 = vpop.f32.mrf.mxu1  ;;  %5543 = vmatprep.subr.bf16.mxu0 %v10713_v38 }
 0x37c   :  { %v15040_v24 = vadd.f32 %v9824_v2, %v4850_v22  ;;  %5544 = vmatpush1.bf16.msra.mxu0 %v10711_v59  ;;  %v10734_v2 = vld [vmem:[%s15997_s3 + $0x14] ss:$8 sps:$4 sm:$0xff]  }
 0x37d   :  { %v9800_v31 = vpop.f32.mrf.mxu0  ;;  %v9828_v27 = vpop.f32.mrf.mxu1  ;;  %5545 = vmatprep.subr.bf16.mxu0 %v10719_v54  ;;  %5672 = vmatprep.subr.bf16.mxu1 %v10734_v2 }
 0x37f   :  { %v9801_v57 = vpop.f32.mrf.mxu0  ;;  %v9829_v36 = vpop.f32.mrf.mxu1 }
 0x380   :  { %v9802_v50 = vadd.f32 %v9801_v57, %v9800_v31  ;;  %v9830_v37 = vadd.f32 %v9829_v36, %v9828_v27  ;;  %5546 = vmatpush1.bf16.msra.mxu0 %v10717_v5  ;;  %v10732_v27 = vld [vmem:[%s15997_s3 + $0x10] ss:$8 sps:$4 sm:$0xff]  }
 0x381   :  { %v9803_v19 = vpop.f32.mrf.mxu0  ;;  %v9831_v20 = vpop.f32.mrf.mxu1  ;;  %5547 = vmatprep.subr.bf16.mxu0 %v10725_v44  ;;  %5673 = vmatpush1.bf16.msra.mxu1 %v10732_v27 }
 0x382   :  { %v4858_v7 = vadd.f32 %v9802_v50, %v9774_v33  ;;  %v10737_v50 = vld [vmem:[%s15997_s3 + $0x94] ss:$8 sps:$4 sm:$0xff]  }
 0x383   :  { %v9804_v12 = vpop.f32.mrf.mxu0  ;;  %v9832_v14 = vpop.f32.mrf.mxu1 }
 0x384   :  { %v15042_v17 = vadd.f32 %v9830_v37, %v4858_v7  ;;  %v9805_v26 = vadd.f32 %v9804_v12, %v9803_v19  ;;  %v9833_v43 = vadd.f32 %v9832_v14, %v9831_v20  ;;  %5548 = vmatpush1.bf16.msra.mxu0 %v10723_v63  ;;  %v10735_v19 = vld [vmem:[%s15997_s3 + $0x90] ss:$8 sps:$4 sm:$0xff]   ;;  %v10740_v12 = vld [vmem:[%s15997_s3 + $0x4] ss:$8 sps:$4 sm:$0xff]  }
 0x385   :  { %5549 = vmatprep.subr.bf16.mxu0 %v10731_v11  ;;  %5674 = vmatprep.subr.bf16.mxu1 %v10740_v12 }
 0x386   :  { %v4861_v55 = vadd.f32 %v9805_v26, %v9777_v9 }
 0x388   :  { %v15047_v51 = vadd.f32 %v9833_v43, %v4861_v55  ;;  %5550 = vmatpush1.bf16.msra.mxu0 %v10729_v4  ;;  %v10743_v55 = vld [vmem:[%s15997_s3 + $0x84] ss:$8 sps:$4 sm:$0xff]  }
 0x389   :  { %5551 = vmatprep.subr.bf16.mxu0 %v10737_v50 }
 0x38c   :  { %5552 = vmatpush1.bf16.msra.mxu0 %v10735_v19 }
 0x38d   :  { %5553 = vmatprep.subr.bf16.mxu0 %v10743_v55 }
 0x390   :  { %5554 = vmatpush1.bf16.msra.mxu0 %v10741_v48 }
 0x395   :  { %v15088_v30 = vpop.f32.mrf.mxu0  ;;  %v15090_v47 = vpop.f32.mrf.mxu1 }
 0x397   :  { %v15098_v21 = vpop.f32.mrf.mxu0  ;;  %v15100_v46 = vpop.f32.mrf.mxu1 }
 0x399   :  { %v15108_v52 = vpop.f32.mrf.mxu0  ;;  %v15110_v62 = vpop.f32.mrf.mxu1 }
 0x39b   :  { %v15118_v29 = vpop.f32.mrf.mxu0  ;;  %v15120_v33 = vpop.f32.mrf.mxu1 }
 0x39d   :  { %v9856_v9 = vpop.f32.mrf.mxu0  ;;  %v9884_v49 = vpop.f32.mrf.mxu1 }
 0x39f   :  { %v9857_v41 = vpop.f32.mrf.mxu0  ;;  %v9885_v25 = vpop.f32.mrf.mxu1 }
 0x3a0   :  { %v9858_v22 = vadd.f32 %v9857_v41, %v9856_v9  ;;  %v9886_v31 = vadd.f32 %v9885_v25, %v9884_v49 }
 0x3a1   :  { %v9859_v57 = vpop.f32.mrf.mxu0  ;;  %v9887_v36 = vpop.f32.mrf.mxu1 }
 0x3a2   :  { %v4956_v37 = vadd.f32 %v9858_v22, %v15042_v17  ;;  %v10738_v17 = vld [vmem:[%s15997_s3] ss:$8 sps:$4 sm:$0xff]  }
 0x3a3   :  { %v9860_v20 = vpop.f32.mrf.mxu0  ;;  %v9888_v7 = vpop.f32.mrf.mxu1  ;;  %5675 = vmatpush1.bf16.msra.mxu1 %v10738_v17 }
 0x3a4   :  { %v5005_v14 = vadd.f32 %v9886_v31, %v4956_v37  ;;  %v9861_v26 = vadd.f32 %v9860_v20, %v9859_v57  ;;  %v9889_v43 = vadd.f32 %v9888_v7, %v9887_v36  ;;  %5940 = vmatprep.subr.bf16.mxu1 %v10746_v28 }
 0x3a6   :  { %v4959_v58 = vadd.f32 %v9861_v26, %v15047_v51  ;;  %v10749_v51 = vld [vmem:[%s15997_s3 + $0x174] ss:$8 sps:$4 sm:$0xff]  }
 0x3a7   :  { %5799 = vmatprep.subr.bf16.mxu0 %v10749_v51 }
 0x3a8   :  { %v5008_v53 = vadd.f32 %v9889_v43, %v4959_v58 }
 0x3b5   :  { %v15168_v56 = vpop.f32.mrf.mxu0  ;;  %v15170_v39 = vpop.f32.mrf.mxu1 }
 0x3b7   :  { %v15172_v42 = vpop.f32.mrf.mxu0  ;;  %v15174_v13 = vpop.f32.mrf.mxu1 }
 0x3b9   :  { %v15176_v38 = vpop.f32.mrf.mxu0  ;;  %v15178_v0 = vpop.f32.mrf.mxu1 }
 0x3bb   :  { %v15180_v59 = vpop.f32.mrf.mxu0  ;;  %v15182_v34 = vpop.f32.mrf.mxu1 }
 0x3bd   :  { %v9912_v35 = vpop.f32.mrf.mxu0  ;;  %v9940_v54 = vpop.f32.mrf.mxu1 }
 0x3bf   :  { %v9913_v5 = vpop.f32.mrf.mxu0  ;;  %v9941_v1 = vpop.f32.mrf.mxu1 }
 0x3c0   :  { %v9914_v10 = vadd.f32 %v9913_v5, %v9912_v35  ;;  %v9942_v44 = vadd.f32 %v9941_v1, %v9940_v54 }
 0x3c1   :  { %v9915_v63 = vpop.f32.mrf.mxu0  ;;  %v9943_v8 = vpop.f32.mrf.mxu1 }
 0x3c2   :  { %v5054_v60 = vadd.f32 %v9914_v10, %v5005_v14 }
 0x3c3   :  { %v9916_v9 = vpop.f32.mrf.mxu0  ;;  %v9944_v49 = vpop.f32.mrf.mxu1 }
 0x3c4   :  { %v5103_v11 = vadd.f32 %v9942_v44, %v5054_v60  ;;  %v9917_v4 = vadd.f32 %v9916_v9, %v9915_v63  ;;  %v9945_v41 = vadd.f32 %v9944_v49, %v9943_v8  ;;  %v9799_v9 = vadd.f32 %v15036_v45, %v15032_v23 }
 0x3c5   :  { %v9880_v45 = vadd.f32 %v15100_v46, %v15090_v47  ;;  %v9936_v46 = vadd.f32 %v15174_v13, %v15170_v39 }
 0x3c6   :  { %v5057_v25 = vadd.f32 %v9917_v4, %v5008_v53 }
 0x3c8   :  { %v5106_v2 = vadd.f32 %v9945_v41, %v5057_v25  ;;  %v9852_v25 = vadd.f32 %v15098_v21, %v15088_v30 }
 0x3ca   :  { %v4948_v23 = vadd.f32 %v9852_v25, %v15040_v24  ;;  %v9883_v24 = vadd.f32 %v15120_v33, %v15110_v62 }
 0x3d5   :  { %v15184_v22 = vpop.f32.mrf.mxu0  ;;  %v15186_v31 = vpop.f32.mrf.mxu1 }
 0x3d7   :  { %v9963_v27 = vpop.f32.mrf.mxu0  ;;  %v15188_v57 = vpop.f32.mrf.mxu1 }
 0x3d8   :  { %v9992_v62 = vadd.f32 %v15188_v57, %v15186_v31 }
 0x3d9   :  { %v15190_v36 = vpop.f32.mrf.mxu0  ;;  %v15192_v50 = vpop.f32.mrf.mxu1 }
 0x3db   :  { %v15194_v37 = vpop.f32.mrf.mxu0  ;;  %v15196_v19 = vpop.f32.mrf.mxu1 }
 0x3dc   :  { %v9967_v33 = vadd.f32 %v15194_v37, %v15190_v36 }
 0x3dd   :  { %v9968_v20 = vpop.f32.mrf.mxu0  ;;  %v9996_v7 = vpop.f32.mrf.mxu1 }
 0x3df   :  { %v9969_v12 = vpop.f32.mrf.mxu0  ;;  %v9997_v14 = vpop.f32.mrf.mxu1 }
 0x3e0   :  { %v9970_v26 = vadd.f32 %v9969_v12, %v9968_v20  ;;  %v9998_v43 = vadd.f32 %v9997_v14, %v9996_v7  ;;  %v4853_v20 = vadd.f32 %v9799_v9, %v15025_v15 }
 0x3e1   :  { %v9971_v17 = vpop.f32.mrf.mxu0  ;;  %v9999_v55 = vpop.f32.mrf.mxu1 }
 0x3e2   :  { %v5152_v58 = vadd.f32 %v9970_v26, %v5103_v11  ;;  %v9827_v26 = vadd.f32 %v15038_v16, %v15034_v32  ;;  %v4997_v16 = vadd.f32 %v9880_v45, %v4948_v23 }
 0x3e3   :  { %v9972_v48 = vpop.f32.mrf.mxu0  ;;  %v10000_v28 = vpop.f32.mrf.mxu1 }
 0x3e4   :  { %v5201_v53 = vadd.f32 %v9998_v43, %v5152_v58  ;;  %v9973_v51 = vadd.f32 %v9972_v48, %v9971_v17  ;;  %v10001_v35 = vadd.f32 %v10000_v28, %v9999_v55  ;;  %v9855_v55 = vadd.f32 %v15118_v29, %v15108_v52 }
 0x3e5   :  { %v4902_v21 = vadd.f32 %v9827_v26, %v4853_v20  ;;  %v9908_v48 = vadd.f32 %v15172_v42, %v15168_v56  ;;  %v9911_v52 = vadd.f32 %v15180_v59, %v15176_v38  ;;  %v9964_v56 = vadd.f32 %v9963_v27, %v15184_v22 }
 0x3e6   :  { %v5155_v54 = vadd.f32 %v9973_v51, %v5106_v2  ;;  %v9995_v59 = vadd.f32 %v15196_v19, %v15192_v50 }
 0x3e7   :  { %v5046_v47 = vadd.f32 %v9908_v48, %v4997_v16 }
 0x3e8   :  { %v5204_v5 = vadd.f32 %v10001_v35, %v5155_v54  ;;  %v4951_v35 = vadd.f32 %v9855_v55, %v4902_v21 }
 0x3e9   :  { %v5095_v42 = vadd.f32 %v9936_v46, %v5046_v47 }
 0x3f5   :  { %v10018_v1 = vpop.f32.mrf.mxu0  ;;  %v10046_v10 = vpop.f32.mrf.mxu1 }
 0x3f7   :  { %v10019_v44 = vpop.f32.mrf.mxu0  ;;  %v10047_v63 = vpop.f32.mrf.mxu1 }
 0x3f8   :  { %v10020_v13 = vadd.f32 %v10019_v44, %v10018_v1  ;;  %v10048_v27 = vadd.f32 %v10047_v63, %v10046_v10  ;;  %v8438_v63 = vld [vmem:[%s15996_s2] ss:$0 sm:$0xff] }
 0x3f9   :  { %v10021_v8 = vpop.f32.mrf.mxu0  ;;  %v10049_v60 = vpop.f32.mrf.mxu1 }
 0x3fb   :  { %v10022_v49 = vpop.f32.mrf.mxu0  ;;  %v10050_v4 = vpop.f32.mrf.mxu1 }
 0x3fc   :  { %v10023_v25 = vadd.f32 %v10022_v49, %v10021_v8  ;;  %v10051_v36 = vadd.f32 %v10050_v4, %v10049_v60 }
 0x3fd   :  { %v10024_v41 = vpop.f32.mrf.mxu0  ;;  %v10052_v11 = vpop.f32.mrf.mxu1 }
 0x3ff   :  { %v10025_v2 = vpop.f32.mrf.mxu0  ;;  %v10053_v7 = vpop.f32.mrf.mxu1 }
 0x400   :  { %v10026_v12 = vadd.f32 %v10025_v2, %v10024_v41  ;;  %v10054_v14 = vadd.f32 %v10053_v7, %v10052_v11  ;;  %v9939_v41 = vadd.f32 %v15182_v34, %v15178_v0 }
 0x401   :  { %v10027_v43 = vpop.f32.mrf.mxu0  ;;  %v10055_v17 = vpop.f32.mrf.mxu1 }
 0x402   :  { %v5250_v30 = vadd.f32 %v10026_v12, %v5201_v53  ;;  %v5000_v53 = vadd.f32 %v9883_v24, %v4951_v35  ;;  %v10744_v35 = vld [vmem:[%s15997_s3 + $0x1f0] ss:$8 sps:$4 sm:$0xff]  }
 0x403   :  { %v10028_v15 = vpop.f32.mrf.mxu0  ;;  %v10056_v58 = vpop.f32.mrf.mxu1 }
 0x404   :  { %v5299_v28 = vadd.f32 %v10054_v14, %v5250_v30  ;;  %v10029_v51 = vadd.f32 %v10028_v15, %v10027_v43  ;;  %v10057_v32 = vadd.f32 %v10056_v58, %v10055_v17  ;;  %v5049_v9 = vadd.f32 %v9911_v52, %v5000_v53  ;;  %v10755_v52 = vld [vmem:[%s15997_s3 + $0x164] ss:$8 sps:$4 sm:$0xff]  }
 0x406   :  { %v5253_v54 = vadd.f32 %v10029_v51, %v5204_v5  ;;  %v5144_v5 = vadd.f32 %v9964_v56, %v5095_v42  ;;  %v5098_v39 = vadd.f32 %v9939_v41, %v5049_v9  ;;  %v10753_v56 = vld [vmem:[%s15997_s3 + $0x160] ss:$8 sps:$4 sm:$0xff]   ;;  %v10761_v41 = vld [vmem:[%s15997_s3 + $0x154] ss:$8 sps:$4 sm:$0xff]  }
 0x408   :  { %v5302_v29 = vadd.f32 %v10057_v32, %v5253_v54  ;;  %v5193_v11 = vadd.f32 %v9992_v62, %v5144_v5  ;;  %v5147_v38 = vadd.f32 %v9967_v33, %v5098_v39  ;;  %v10756_v5 = vld [vmem:[%s15997_s3 + $0x1d0] ss:$8 sps:$4 sm:$0xff]   ;;  %v10764_v33 = vld [vmem:[%s15997_s3 + $0x1c4] ss:$8 sps:$4 sm:$0xff]  }
 0x409   :  { %v10759_v39 = vld [vmem:[%s15997_s3 + $0x150] ss:$8 sps:$4 sm:$0xff]  }
 0x40a   :  { %v5242_v22 = vadd.f32 %v10020_v13, %v5193_v11  ;;  %v5196_v0 = vadd.f32 %v9995_v59, %v5147_v38  ;;  %v10767_v13 = vld [vmem:[%s15997_s3 + $0x144] ss:$8 sps:$4 sm:$0xff]   ;;  %v10762_v11 = vld [vmem:[%s15997_s3 + $0x1c0] ss:$8 sps:$4 sm:$0xff]   ;;  %v10770_v38 = vld [vmem:[%s15997_s3 + $0x1b4] ss:$8 sps:$4 sm:$0xff]  }
 0x40b   :  { %v10765_v59 = vld [vmem:[%s15997_s3 + $0x140] ss:$8 sps:$4 sm:$0xff]  }
 0x40c   :  { %v5291_v12 = vadd.f32 %v10048_v27, %v5242_v22  ;;  %v5245_v31 = vadd.f32 %v10023_v25, %v5196_v0  ;;  %v10773_v22 = vld [vmem:[%s15997_s3 + $0x134] ss:$8 sps:$4 sm:$0xff]   ;;  %v10768_v27 = vld [vmem:[%s15997_s3 + $0x1b0] ss:$8 sps:$4 sm:$0xff]   ;;  %v10776_v25 = vld [vmem:[%s15997_s3 + $0x1a4] ss:$8 sps:$4 sm:$0xff]  }
 0x40d   :  { %v10774_v0 = vld [vmem:[%s15997_s3 + $0x1a0] ss:$8 sps:$4 sm:$0xff]  }
 0x40e   :  { %v5294_v26 = vadd.f32 %v10051_v36, %v5245_v31  ;;  %v10780_v31 = vld [vmem:[%s15997_s3 + $0x190] ss:$8 sps:$4 sm:$0xff]   ;;  %v10791_v36 = vld [vmem:[%s15997_s3 + $0x104] ss:$8 sps:$4 sm:$0xff]  }
 0x415   :  { %v10074_v20 = vpop.f32.mrf.mxu0  ;;  %v10196_v2 = vpop.f32.mrf.mxu1 }
 0x417   :  { %v10075_v34 = vpop.f32.mrf.mxu0  ;;  %v5388_v7 = vpop.f32.mrf.mxu1 }
 0x418   :  { %v10076_v57 = vadd.f32 %v10075_v34, %v10074_v20  ;;  %v10771_v20 = vld [vmem:[%s15997_s3 + $0x130] ss:$8 sps:$4 sm:$0xff]   ;;  %v10782_v34 = vld [vmem:[%s15997_s3 + $0x194] ss:$8 sps:$4 sm:$0xff]  }
 0x419   :  { %v10077_v14 = vpop.f32.mrf.mxu0  ;;  %v10197_v1 = vpop.f32.mrf.mxu1 }
 0x41a   :  { %v5340_v37 = vadd.f32 %v10076_v57, %v5291_v12  ;;  %v10785_v12 = vld [vmem:[%s15997_s3 + $0x114] ss:$8 sps:$4 sm:$0xff]   ;;  %v10788_v57 = vld [vmem:[%s15997_s3 + $0x184] ss:$8 sps:$4 sm:$0xff]  }
 0x41b   :  { %v10078_v44 = vpop.f32.mrf.mxu0  ;;  %v5391_v8 = vpop.f32.mrf.mxu1 }
 0x41c   :  { %v5389_v43 = vadd.f32 %v5388_v7, %v5340_v37  ;;  %v10079_v17 = vadd.f32 %v10078_v44, %v10077_v14  ;;  %v10777_v7 = vld [vmem:[%s15997_s3 + $0x120] ss:$8 sps:$4 sm:$0xff]   ;;  %v10783_v14 = vld [vmem:[%s15997_s3 + $0x110] ss:$8 sps:$4 sm:$0xff]  }
 0x41d   :  { %v10080_v50 = vpop.f32.mrf.mxu0  ;;  %v10786_v37 = vld [vmem:[%s15997_s3 + $0x180] ss:$8 sps:$4 sm:$0xff]  }
 0x41e   :  { %v5403_v19 = vmax.f32 %v15018_v18, %v5389_v43  ;;  %v5343_v10 = vadd.f32 %v10079_v17, %v5294_v26  ;;  %v10789_v44 = vld [vmem:[%s15997_s3 + $0x100] ss:$8 sps:$4 sm:$0xff]   ;;  %v10797_v26 = vld [vmem:[%s15997_s3 + $0x274] ss:$8 sps:$4 sm:$0xff]   ;;  %v10792_v43 = vld [vmem:[%s15997_s3 + $0x2f0] ss:$8 sps:$4 sm:$0xff]  }
 0x41f   :  { %v10081_v49 = vpop.f32.mrf.mxu0 }
 0x420   :  { %v5392_v23 = vadd.f32 %v5391_v8, %v5343_v10  ;;  %v10082_v45 = vadd.f32 %v10081_v49, %v10080_v50  ;;  %v5414_v60 = vadd.f32 %v8438_v63, %v5403_v19  ;;  %v10800_v50 = vld [vmem:[%s15997_s3 + $0x2e4] ss:$8 sps:$4 sm:$0xff]   ;;  %v10795_v19 = vld [vmem:[%s15997_s3 + $0x270] ss:$8 sps:$4 sm:$0xff]   ;;  %v10798_v8 = vld [vmem:[%s15997_s3 + $0x2e0] ss:$8 sps:$4 sm:$0xff]  }
 0x421   :  { %v10083_v55 = vpop.f32.mrf.mxu0  ;;  %v10806_v49 = vld [vmem:[%s15997_s3 + $0x2d4] ss:$8 sps:$4 sm:$0xff]  }
 0x422   :  { %v5404_v4 = vmax.f32 %v15030_v61, %v5392_v23  ;;  %v5348_v30 = vadd.f32 %v10082_v45, %v5299_v28  ;;  %v5418_v51 = vmax.f32 %v5414_v60, 0.0  ;;  %v10752_v61 = vld [vmem:[%s15997_s3 + $0x1e4] ss:$8 sps:$4 sm:$0xff]   ;;  %v10747_v28 = vld [vmem:[%s15997_s3 + $0x170] ss:$8 sps:$4 sm:$0xff]  }
 0x423   :  { %v10084_v21 = vpop.f32.mrf.mxu0  ;;  %v10801_v23 = vld [vmem:[%s15997_s3 + $0x260] ss:$8 sps:$4 sm:$0xff]   ;;  %v10809_v45 = vld [vmem:[%s15997_s3 + $0x254] ss:$8 sps:$4 sm:$0xff]   ;;  %v10812_v60 = vld [vmem:[%s15997_s3 + $0x2c4] ss:$8 sps:$4 sm:$0xff]  }
 0x424   :  { %v5415_v15 = vadd.f32 %v8438_v63, %v5404_v4  ;;  %v5397_v58 = vadd.f32 %v10196_v2, %v5348_v30  ;;  %v10085_v48 = vadd.f32 %v10084_v21, %v10083_v55  ;;  %v10779_v2 = vld [vmem:[%s15997_s3 + $0x124] ss:$8 sps:$4 sm:$0xff]   ;;  %v10804_v55 = vld [vmem:[%s15997_s3 + $0x2d0] ss:$8 sps:$4 sm:$0xff]   ;;  %v10810_v21 = vld [vmem:[%s15997_s3 + $0x2c0] ss:$8 sps:$4 sm:$0xff]  }
 0x425   :  { %v10807_v4 = vld [vmem:[%s15997_s3 + $0x250] ss:$8 sps:$4 sm:$0xff]   ;;  %v10815_v30 = vld [vmem:[%s15997_s3 + $0x244] ss:$8 sps:$4 sm:$0xff]  }
 0x426   :  { %v5419_v18 = vmax.f32 %v5415_v15, 0.0  ;;  %v5405_v32 = vmax.f32 %v15009_v3, %v5397_v58  ;;  %v5351_v16 = vadd.f32 %v10085_v48, %v5302_v29  ;;  %v10750_v29 = vld [vmem:[%s15997_s3 + $0x1e0] ss:$8 sps:$4 sm:$0xff]   ;;  %v10818_v15 = vld [vmem:[%s15997_s3 + $0x2b4] ss:$8 sps:$4 sm:$0xff]  }
 0x427   :  { %v10813_v58 = vld [vmem:[%s15997_s3 + $0x240] ss:$8 sps:$4 sm:$0xff]   ;;  %v10821_v48 = vld [vmem:[%s15997_s3 + $0x234] ss:$8 sps:$4 sm:$0xff]  }
 0x428   :  { %v15236_v54 = vpack.c.bf16 %v5419_v18, %v5418_v51  ;;  %v5416_v24 = vadd.f32 %v8438_v63, %v5405_v32  ;;  %v5400_v47 = vadd.f32 %v10197_v1, %v5351_v16  ;;  %v10794_v1 = vld [vmem:[%s15997_s3 + $0x2f4] ss:$8 sps:$4 sm:$0xff]   ;;  %v10816_v51 = vld [vmem:[%s15997_s3 + $0x2b0] ss:$8 sps:$4 sm:$0xff]   ;;  %v10824_v18 = vld [vmem:[%s15997_s3 + $0x2a4] ss:$8 sps:$4 sm:$0xff]  }
 0x429   :  { %v10819_v32 = vld [vmem:[%s15997_s3 + $0x230] ss:$8 sps:$4 sm:$0xff]   ;;  %v10827_v16 = vld [vmem:[%s15997_s3 + $0x224] ss:$8 sps:$4 sm:$0xff]  }
 0x42a   :  { %v5406_v46 = vmax.f32 %v15023_v6, %v5400_v47  ;;  %5693 = vmatmul.mubr.bf16.vlgmr.msra.gmra.mxu1 %v15236_v54  ;;  %v5457_v3 = vrot.slane %v15236_v54, 1  ;;  %v10758_v6 = vld [vmem:[%s15997_s3 + $0x1d4] ss:$8 sps:$4 sm:$0xff]   ;;  %v5420_v42 = vmax.f32 %v5416_v24, 0.0  ;;  %v5858_v17 = vrot.slane %v15236_v54, 3 }
 0x42b   :  { %5941 = vmatpush1.bf16.msra.mxu1 %v10744_v35  ;;  %5972 = vmatprep.mubr.bf16.mxu1 %v11583_v40  ;;  %v5717_v10 = vrot.slane %v15236_v54, 2  ;;  %v10822_v35 = vld [vmem:[%s15997_s3 + $0x2a0] ss:$8 sps:$4 sm:$0xff]   ;;  %v10830_v24 = vld [vmem:[%s15997_s3 + $0x294] ss:$8 sps:$4 sm:$0xff]  }
 0x42c   :  { %v5417_v53 = vadd.f32 %v8438_v63, %v5406_v46  ;;  %5572 = vmatmul.mubr.bf16.vlgmr.msra.gmra.mxu0 %v5457_v3  ;;  %5942 = vmatprep.subr.bf16.mxu1 %v10752_v61  ;;  %v10803_v63 = vld [vmem:[%s15997_s3 + $0x264] ss:$8 sps:$4 sm:$0xff]   ;;  %v10825_v47 = vld [vmem:[%s15997_s3 + $0x220] ss:$8 sps:$4 sm:$0xff]   ;;  %v10833_v61 = vld [vmem:[%s15997_s3 + $0x214] ss:$8 sps:$4 sm:$0xff]  }
 0x42d   :  { %5800 = vmatpush1.bf16.msra.mxu0 %v10747_v28  ;;  %5831 = vmatprep.mubr.bf16.mxu0 %v11583_v40  ;;  %v10828_v28 = vld [vmem:[%s15997_s3 + $0x290] ss:$8 sps:$4 sm:$0xff]   ;;  %v10836_v46 = vld [vmem:[%s15997_s3 + $0x284] ss:$8 sps:$4 sm:$0xff]  }
 0x42e   :  { %v5421_v9 = vmax.f32 %v5417_v53, 0.0  ;;  %5801 = vmatprep.subr.bf16.mxu0 %v10755_v52  ;;  %v10831_v3 = vld [vmem:[%s15997_s3 + $0x210] ss:$8 sps:$4 sm:$0xff]   ;;  %v10839_v52 = vld [vmem:[%s15997_s3 + $0x204] ss:$8 sps:$4 sm:$0xff]  }
 0x42f   :  { %5943 = vmatpush1.bf16.msra.mxu1 %v10750_v29  ;;  %v10834_v29 = vld [vmem:[%s15997_s3 + $0x280] ss:$8 sps:$4 sm:$0xff]   ;;  %v10842_v53 = vld [vmem:[%s15997_s3 + $0x3f4] ss:$8 sps:$4 sm:$0xff]  }
 0x430   :  { %v15267_v62 = vpack.c.bf16 %v5421_v9, %v5420_v42  ;;  %5944 = vmatprep.subr.bf16.mxu1 %v10758_v6  ;;  %v10837_v6 = vld [vmem:[%s15997_s3 + $0x200] ss:$8 sps:$4 sm:$0xff]   ;;  %v10840_v42 = vld [vmem:[%s15997_s3 + $0x3f0] ss:$8 sps:$4 sm:$0xff]   ;;  %v6140_v9 = vrot.slane %v15236_v54, 5 }
 0x431   :  { %5802 = vmatpush1.bf16.msra.mxu0 %v10753_v56  ;;  %v10845_v56 = vld [vmem:[%s15997_s3 + $0x374] ss:$8 sps:$4 sm:$0xff]  }
 0x432   :  { %5803 = vmatprep.subr.bf16.mxu0 %v10761_v41  ;;  %v10848_v41 = vld [vmem:[%s15997_s3 + $0x3e4] ss:$8 sps:$4 sm:$0xff]  }
 0x433   :  { %5945 = vmatpush1.bf16.msra.mxu1 %v10756_v5  ;;  %v10843_v5 = vld [vmem:[%s15997_s3 + $0x370] ss:$8 sps:$4 sm:$0xff]  }
 0x434   :  { %5946 = vmatprep.subr.bf16.mxu1 %v10764_v33  ;;  %v5999_v33 = vrot.slane %v15236_v54, 4 }
 0x435   :  { %5804 = vmatpush1.bf16.msra.mxu0 %v10759_v39  ;;  %v10851_v39 = vld [vmem:[%s15997_s3 + $0x364] ss:$8 sps:$4 sm:$0xff]  }
 0x436   :  { %5805 = vmatprep.subr.bf16.mxu0 %v10767_v13  ;;  %v10846_v13 = vld [vmem:[%s15997_s3 + $0x3e0] ss:$8 sps:$4 sm:$0xff]  }
 0x437   :  { %5947 = vmatpush1.bf16.msra.mxu1 %v10762_v11  ;;  %v10854_v11 = vld [vmem:[%s15997_s3 + $0x3d4] ss:$8 sps:$4 sm:$0xff]  }
 0x438   :  { %5948 = vmatprep.subr.bf16.mxu1 %v10770_v38  ;;  %v10849_v38 = vld [vmem:[%s15997_s3 + $0x360] ss:$8 sps:$4 sm:$0xff]  }
 0x439   :  { %5806 = vmatpush1.bf16.msra.mxu0 %v10765_v59  ;;  %v10857_v59 = vld [vmem:[%s15997_s3 + $0x354] ss:$8 sps:$4 sm:$0xff]  }
 0x43a   :  { %5807 = vmatprep.subr.bf16.mxu0 %v10773_v22  ;;  %v10852_v22 = vld [vmem:[%s15997_s3 + $0x3d0] ss:$8 sps:$4 sm:$0xff]  }
 0x43b   :  { %5949 = vmatpush1.bf16.msra.mxu1 %v10768_v27  ;;  %v10860_v27 = vld [vmem:[%s15997_s3 + $0x3c4] ss:$8 sps:$4 sm:$0xff]  }
 0x43c   :  { %5950 = vmatprep.subr.bf16.mxu1 %v10776_v25  ;;  %v10855_v25 = vld [vmem:[%s15997_s3 + $0x350] ss:$8 sps:$4 sm:$0xff]  }
 0x43d   :  { %5808 = vmatpush1.bf16.msra.mxu0 %v10771_v20  ;;  %v10863_v20 = vld [vmem:[%s15997_s3 + $0x344] ss:$8 sps:$4 sm:$0xff]  }
 0x43e   :  { %5809 = vmatprep.subr.bf16.mxu0 %v10779_v2  ;;  %v10858_v2 = vld [vmem:[%s15997_s3 + $0x3c0] ss:$8 sps:$4 sm:$0xff]  }
 0x43f   :  { %5951 = vmatpush1.bf16.msra.mxu1 %v10774_v0  ;;  %v10866_v0 = vld [vmem:[%s15997_s3 + $0x3b4] ss:$8 sps:$4 sm:$0xff]  }
 0x440   :  { %5952 = vmatprep.subr.bf16.mxu1 %v10782_v34  ;;  %v10861_v34 = vld [vmem:[%s15997_s3 + $0x340] ss:$8 sps:$4 sm:$0xff]  }
 0x441   :  { %5810 = vmatpush1.bf16.msra.mxu0 %v10777_v7  ;;  %v10869_v7 = vld [vmem:[%s15997_s3 + $0x334] ss:$8 sps:$4 sm:$0xff]  }
 0x442   :  { %5811 = vmatprep.subr.bf16.mxu0 %v10785_v12  ;;  %v10864_v12 = vld [vmem:[%s15997_s3 + $0x3b0] ss:$8 sps:$4 sm:$0xff]  }
 0x443   :  { %5953 = vmatpush1.bf16.msra.mxu1 %v10780_v31  ;;  %v10872_v31 = vld [vmem:[%s15997_s3 + $0x3a4] ss:$8 sps:$4 sm:$0xff]  }
 0x444   :  { %5954 = vmatprep.subr.bf16.mxu1 %v10788_v57  ;;  %v10867_v57 = vld [vmem:[%s15997_s3 + $0x330] ss:$8 sps:$4 sm:$0xff]  }
 0x445   :  { %5812 = vmatpush1.bf16.msra.mxu0 %v10783_v14  ;;  %v10875_v14 = vld [vmem:[%s15997_s3 + $0x324] ss:$8 sps:$4 sm:$0xff]  }
 0x446   :  { %5813 = vmatprep.subr.bf16.mxu0 %v10791_v36  ;;  %v10870_v36 = vld [vmem:[%s15997_s3 + $0x3a0] ss:$8 sps:$4 sm:$0xff]  }
 0x447   :  { %5955 = vmatpush1.bf16.msra.mxu1 %v10786_v37  ;;  %v10878_v37 = vld [vmem:[%s15997_s3 + $0x394] ss:$8 sps:$4 sm:$0xff]  }
 0x448   :  { %6222 = vmatprep.subr.bf16.mxu1 %v10794_v1  ;;  %v10873_v1 = vld [vmem:[%s15997_s3 + $0x320] ss:$8 sps:$4 sm:$0xff]  }
 0x449   :  { %5814 = vmatpush1.bf16.msra.mxu0 %v10789_v44  ;;  %v10881_v44 = vld [vmem:[%s15997_s3 + $0x314] ss:$8 sps:$4 sm:$0xff]  }
 0x44a   :  { %5973 = vmatmul.mubr.bf16.vlgmr.msra.gmra.mxu1 %v5858_v17  ;;  %6081 = vmatprep.subr.bf16.mxu0 %v10797_v26  ;;  %v10876_v26 = vld [vmem:[%s15997_s3 + $0x390] ss:$8 sps:$4 sm:$0xff]  }
 0x44b   :  { %6223 = vmatpush1.bf16.msra.mxu1 %v10792_v43  ;;  %6254 = vmatprep.mubr.bf16.mxu1 %v11583_v40  ;;  %v10884_v43 = vld [vmem:[%s15997_s3 + $0x384] ss:$8 sps:$4 sm:$0xff]   ;;  %v10879_v17 = vld [vmem:[%s15997_s3 + $0x310] ss:$8 sps:$4 sm:$0xff]  }
 0x44c   :  { %5832 = vmatmul.mubr.bf16.vlgmr.msra.gmra.mxu0 %v5717_v10  ;;  %6224 = vmatprep.subr.bf16.mxu1 %v10800_v50  ;;  %v10887_v50 = vld [vmem:[%s15997_s3 + $0x304] ss:$8 sps:$4 sm:$0xff]   ;;  %v10890_v10 = vld [vmem:[%s15997_s3 + $0x4f4] ss:$8 sps:$4 sm:$0xff]  }
 0x44d   :  { %6082 = vmatpush1.bf16.msra.mxu0 %v10795_v19  ;;  %6113 = vmatprep.mubr.bf16.mxu0 %v11583_v40  ;;  %v10882_v19 = vld [vmem:[%s15997_s3 + $0x380] ss:$8 sps:$4 sm:$0xff]  }
 0x44e   :  { %6083 = vmatprep.subr.bf16.mxu0 %v10803_v63  ;;  %v10885_v63 = vld [vmem:[%s15997_s3 + $0x300] ss:$8 sps:$4 sm:$0xff]  }
 0x44f   :  { %6225 = vmatpush1.bf16.msra.mxu1 %v10798_v8  ;;  %v10893_v8 = vld [vmem:[%s15997_s3 + $0x474] ss:$8 sps:$4 sm:$0xff]  }
 0x450   :  { %6226 = vmatprep.subr.bf16.mxu1 %v10806_v49  ;;  %v10888_v49 = vld [vmem:[%s15997_s3 + $0x4f0] ss:$8 sps:$4 sm:$0xff]  }
 0x451   :  { %6084 = vmatpush1.bf16.msra.mxu0 %v10801_v23  ;;  %v6422_v23 = vrot.slane %v15236_v54, 7 }
 0x452   :  { %6085 = vmatprep.subr.bf16.mxu0 %v10809_v45  ;;  %v10896_v45 = vld [vmem:[%s15997_s3 + $0x4e4] ss:$8 sps:$4 sm:$0xff]  }
 0x453   :  { %6227 = vmatpush1.bf16.msra.mxu1 %v10804_v55  ;;  %v10891_v55 = vld [vmem:[%s15997_s3 + $0x470] ss:$8 sps:$4 sm:$0xff]  }
 0x454   :  { %6228 = vmatprep.subr.bf16.mxu1 %v10812_v60  ;;  %v6281_v60 = vrot.slane %v15236_v54, 6  ;;  %v10897_v54 = vld [vmem:[%s15997_s3 + $0x460] ss:$8 sps:$4 sm:$0xff]  }
 0x455   :  { %6086 = vmatpush1.bf16.msra.mxu0 %v10807_v4  ;;  %v10899_v4 = vld [vmem:[%s15997_s3 + $0x464] ss:$8 sps:$4 sm:$0xff]  }
 0x456   :  { %6087 = vmatprep.subr.bf16.mxu0 %v10815_v30  ;;  %v10894_v30 = vld [vmem:[%s15997_s3 + $0x4e0] ss:$8 sps:$4 sm:$0xff]  }
 0x457   :  { %6229 = vmatpush1.bf16.msra.mxu1 %v10810_v21  ;;  %v10902_v21 = vld [vmem:[%s15997_s3 + $0x4d4] ss:$8 sps:$4 sm:$0xff]  }
 0x458   :  { %6230 = vmatprep.subr.bf16.mxu1 %v10818_v15  ;;  %v10905_v15 = vld [vmem:[%s15997_s3 + $0x454] ss:$8 sps:$4 sm:$0xff]  }
 0x459   :  { %6088 = vmatpush1.bf16.msra.mxu0 %v10813_v58  ;;  %v10900_v58 = vld [vmem:[%s15997_s3 + $0x4d0] ss:$8 sps:$4 sm:$0xff]  }
 0x45a   :  { %6089 = vmatprep.subr.bf16.mxu0 %v10821_v48  ;;  %v10908_v48 = vld [vmem:[%s15997_s3 + $0x4c4] ss:$8 sps:$4 sm:$0xff]  }
 0x45b   :  { %6231 = vmatpush1.bf16.msra.mxu1 %v10816_v51  ;;  %v10903_v51 = vld [vmem:[%s15997_s3 + $0x450] ss:$8 sps:$4 sm:$0xff]  }
 0x45c   :  { %6232 = vmatprep.subr.bf16.mxu1 %v10824_v18  ;;  %v10911_v18 = vld [vmem:[%s15997_s3 + $0x444] ss:$8 sps:$4 sm:$0xff]  }
 0x45d   :  { %6090 = vmatpush1.bf16.msra.mxu0 %v10819_v32  ;;  %v10906_v32 = vld [vmem:[%s15997_s3 + $0x4c0] ss:$8 sps:$4 sm:$0xff]  }
 0x45e   :  { %6091 = vmatprep.subr.bf16.mxu0 %v10827_v16  ;;  %v10914_v16 = vld [vmem:[%s15997_s3 + $0x4b4] ss:$8 sps:$4 sm:$0xff]  }
 0x45f   :  { %6233 = vmatpush1.bf16.msra.mxu1 %v10822_v35  ;;  %v10909_v35 = vld [vmem:[%s15997_s3 + $0x440] ss:$8 sps:$4 sm:$0xff]  }
 0x460   :  { %6234 = vmatprep.subr.bf16.mxu1 %v10830_v24  ;;  %v10917_v24 = vld [vmem:[%s15997_s3 + $0x434] ss:$8 sps:$4 sm:$0xff]  }
 0x461   :  { %6092 = vmatpush1.bf16.msra.mxu0 %v10825_v47  ;;  %v10912_v47 = vld [vmem:[%s15997_s3 + $0x4b0] ss:$8 sps:$4 sm:$0xff]  }
 0x462   :  { %6093 = vmatprep.subr.bf16.mxu0 %v10833_v61  ;;  %v10920_v61 = vld [vmem:[%s15997_s3 + $0x4a4] ss:$8 sps:$4 sm:$0xff]  }
 0x463   :  { %6235 = vmatpush1.bf16.msra.mxu1 %v10828_v28  ;;  %v10915_v28 = vld [vmem:[%s15997_s3 + $0x430] ss:$8 sps:$4 sm:$0xff]  }
 0x464   :  { %6236 = vmatprep.subr.bf16.mxu1 %v10836_v46  ;;  %v10923_v46 = vld [vmem:[%s15997_s3 + $0x424] ss:$8 sps:$4 sm:$0xff]  }
 0x465   :  { %6094 = vmatpush1.bf16.msra.mxu0 %v10831_v3  ;;  %v10918_v3 = vld [vmem:[%s15997_s3 + $0x4a0] ss:$8 sps:$4 sm:$0xff]  }
 0x466   :  { %6095 = vmatprep.subr.bf16.mxu0 %v10839_v52  ;;  %v10926_v52 = vld [vmem:[%s15997_s3 + $0x494] ss:$8 sps:$4 sm:$0xff]  }
 0x467   :  { %6237 = vmatpush1.bf16.msra.mxu1 %v10834_v29  ;;  %v10921_v29 = vld [vmem:[%s15997_s3 + $0x420] ss:$8 sps:$4 sm:$0xff]  }
 0x468   :  { %6504 = vmatprep.subr.bf16.mxu1 %v10842_v53  ;;  %v10929_v53 = vld [vmem:[%s15997_s3 + $0x414] ss:$8 sps:$4 sm:$0xff]  }
 0x469   :  { %6096 = vmatpush1.bf16.msra.mxu0 %v10837_v6  ;;  %v10924_v6 = vld [vmem:[%s15997_s3 + $0x490] ss:$8 sps:$4 sm:$0xff]  }
 0x46a   :  { %6255 = vmatmul.mubr.bf16.vlgmr.msra.gmra.mxu1 %v6140_v9  ;;  %6363 = vmatprep.subr.bf16.mxu0 %v10845_v56  ;;  %v10932_v56 = vld [vmem:[%s15997_s3 + $0x484] ss:$8 sps:$4 sm:$0xff]  }
 0x46b   :  { %6505 = vmatpush1.bf16.msra.mxu1 %v10840_v42  ;;  %6536 = vmatprep.mubr.bf16.mxu1 %v11583_v40  ;;  %v10927_v42 = vld [vmem:[%s15997_s3 + $0x410] ss:$8 sps:$4 sm:$0xff]   ;;  %v10935_v9 = vld [vmem:[%s15997_s3 + $0x404] ss:$8 sps:$4 sm:$0xff]  }
 0x46c   :  { %6114 = vmatmul.mubr.bf16.vlgmr.msra.gmra.mxu0 %v5999_v33  ;;  %6506 = vmatprep.subr.bf16.mxu1 %v10848_v41  ;;  %v10930_v41 = vld [vmem:[%s15997_s3 + $0x480] ss:$8 sps:$4 sm:$0xff]  }
 0x46d   :  { %6364 = vmatpush1.bf16.msra.mxu0 %v10843_v5  ;;  %6395 = vmatprep.mubr.bf16.mxu0 %v11583_v40  ;;  %v10938_v5 = vld [vmem:[%s15997_s3 + $0x5f4] ss:$8 sps:$4 sm:$0xff]   ;;  %v10933_v33 = vld [vmem:[%s15997_s3 + $0x400] ss:$8 sps:$4 sm:$0xff]  }
 0x46e   :  { %6365 = vmatprep.subr.bf16.mxu0 %v10851_v39  ;;  %v10941_v39 = vld [vmem:[%s15997_s3 + $0x574] ss:$8 sps:$4 sm:$0xff]  }
 0x46f   :  { %6507 = vmatpush1.bf16.msra.mxu1 %v10846_v13  ;;  %v10936_v13 = vld [vmem:[%s15997_s3 + $0x5f0] ss:$8 sps:$4 sm:$0xff]  }
 0x470   :  { %6508 = vmatprep.subr.bf16.mxu1 %v10854_v11  ;;  %v6703_v11 = vrot.slane %v15267_v62, 1 }
 0x471   :  { %6366 = vmatpush1.bf16.msra.mxu0 %v10849_v38  ;;  %v10944_v38 = vld [vmem:[%s15997_s3 + $0x5e4] ss:$8 sps:$4 sm:$0xff]  }
 0x472   :  { %6367 = vmatprep.subr.bf16.mxu0 %v10857_v59  ;;  %v10939_v59 = vld [vmem:[%s15997_s3 + $0x570] ss:$8 sps:$4 sm:$0xff]  }
 0x473   :  { %6509 = vmatpush1.bf16.msra.mxu1 %v10852_v22  ;;  %v10947_v22 = vld [vmem:[%s15997_s3 + $0x564] ss:$8 sps:$4 sm:$0xff]  }
 0x474   :  { %6510 = vmatprep.subr.bf16.mxu1 %v10860_v27  ;;  %v10942_v27 = vld [vmem:[%s15997_s3 + $0x5e0] ss:$8 sps:$4 sm:$0xff]  }
 0x475   :  { %6368 = vmatpush1.bf16.msra.mxu0 %v10855_v25  ;;  %v10950_v25 = vld [vmem:[%s15997_s3 + $0x5d4] ss:$8 sps:$4 sm:$0xff]  }
 0x476   :  { %6369 = vmatprep.subr.bf16.mxu0 %v10863_v20  ;;  %v10945_v20 = vld [vmem:[%s15997_s3 + $0x560] ss:$8 sps:$4 sm:$0xff]  }
 0x477   :  { %6511 = vmatpush1.bf16.msra.mxu1 %v10858_v2  ;;  %v10953_v2 = vld [vmem:[%s15997_s3 + $0x554] ss:$8 sps:$4 sm:$0xff]  }
 0x478   :  { %6512 = vmatprep.subr.bf16.mxu1 %v10866_v0  ;;  %v10948_v0 = vld [vmem:[%s15997_s3 + $0x5d0] ss:$8 sps:$4 sm:$0xff]  }
 0x479   :  { %6370 = vmatpush1.bf16.msra.mxu0 %v10861_v34  ;;  %v10956_v34 = vld [vmem:[%s15997_s3 + $0x5c4] ss:$8 sps:$4 sm:$0xff]  }
 0x47a   :  { %6371 = vmatprep.subr.bf16.mxu0 %v10869_v7  ;;  %v10951_v7 = vld [vmem:[%s15997_s3 + $0x550] ss:$8 sps:$4 sm:$0xff]  }
 0x47b   :  { %6513 = vmatpush1.bf16.msra.mxu1 %v10864_v12  ;;  %v10959_v12 = vld [vmem:[%s15997_s3 + $0x544] ss:$8 sps:$4 sm:$0xff]  }
 0x47c   :  { %6514 = vmatprep.subr.bf16.mxu1 %v10872_v31  ;;  %v10954_v31 = vld [vmem:[%s15997_s3 + $0x5c0] ss:$8 sps:$4 sm:$0xff]  }
 0x47d   :  { %6372 = vmatpush1.bf16.msra.mxu0 %v10867_v57  ;;  %v10962_v57 = vld [vmem:[%s15997_s3 + $0x5b4] ss:$8 sps:$4 sm:$0xff]  }
 0x47e   :  { %6373 = vmatprep.subr.bf16.mxu0 %v10875_v14  ;;  %v10957_v14 = vld [vmem:[%s15997_s3 + $0x540] ss:$8 sps:$4 sm:$0xff]  }
 0x47f   :  { %6515 = vmatpush1.bf16.msra.mxu1 %v10870_v36  ;;  %v10965_v36 = vld [vmem:[%s15997_s3 + $0x534] ss:$8 sps:$4 sm:$0xff]  }
 0x480   :  { %6516 = vmatprep.subr.bf16.mxu1 %v10878_v37  ;;  %v10960_v37 = vld [vmem:[%s15997_s3 + $0x5b0] ss:$8 sps:$4 sm:$0xff]  }
 0x481   :  { %6374 = vmatpush1.bf16.msra.mxu0 %v10873_v1  ;;  %v10968_v1 = vld [vmem:[%s15997_s3 + $0x5a4] ss:$8 sps:$4 sm:$0xff]  }
 0x482   :  { %6375 = vmatprep.subr.bf16.mxu0 %v10881_v44  ;;  %v10963_v44 = vld [vmem:[%s15997_s3 + $0x530] ss:$8 sps:$4 sm:$0xff]  }
 0x483   :  { %6517 = vmatpush1.bf16.msra.mxu1 %v10876_v26  ;;  %v10971_v26 = vld [vmem:[%s15997_s3 + $0x524] ss:$8 sps:$4 sm:$0xff]  }
 0x484   :  { %6518 = vmatprep.subr.bf16.mxu1 %v10884_v43  ;;  %v10966_v43 = vld [vmem:[%s15997_s3 + $0x5a0] ss:$8 sps:$4 sm:$0xff]  }
 0x485   :  { %6376 = vmatpush1.bf16.msra.mxu0 %v10879_v17  ;;  %v10974_v17 = vld [vmem:[%s15997_s3 + $0x594] ss:$8 sps:$4 sm:$0xff]  }
 0x486   :  { %6377 = vmatprep.subr.bf16.mxu0 %v10887_v50  ;;  %v10969_v50 = vld [vmem:[%s15997_s3 + $0x520] ss:$8 sps:$4 sm:$0xff]  }
 0x487   :  { %6519 = vmatpush1.bf16.msra.mxu1 %v10882_v19  ;;  %v10977_v19 = vld [vmem:[%s15997_s3 + $0x514] ss:$8 sps:$4 sm:$0xff]  }
 0x488   :  { %6785 = vmatprep.subr.bf16.mxu1 %v10890_v10  ;;  %v10972_v10 = vld [vmem:[%s15997_s3 + $0x590] ss:$8 sps:$4 sm:$0xff]  }
 0x489   :  { %6378 = vmatpush1.bf16.msra.mxu0 %v10885_v63  ;;  %v10980_v63 = vld [vmem:[%s15997_s3 + $0x584] ss:$8 sps:$4 sm:$0xff]  }
 0x48a   :  { %6537 = vmatmul.mubr.bf16.vlgmr.msra.gmra.mxu1 %v6422_v23  ;;  %6643 = vmatprep.subr.bf16.mxu0 %v10893_v8  ;;  %v10975_v8 = vld [vmem:[%s15997_s3 + $0x510] ss:$8 sps:$4 sm:$0xff]   ;;  %v10978_v23 = vld [vmem:[%s15997_s3 + $0x580] ss:$8 sps:$4 sm:$0xff]  }
 0x48b   :  { %6786 = vmatpush1.bf16.msra.mxu1 %v10888_v49  ;;  %6817 = vmatprep.mubr.bf16.mxu1 %v11583_v40  ;;  %v10983_v49 = vld [vmem:[%s15997_s3 + $0x504] ss:$8 sps:$4 sm:$0xff]  }
 0x48c   :  { %6396 = vmatmul.mubr.bf16.vlgmr.msra.gmra.mxu0 %v6281_v60  ;;  %6787 = vmatprep.subr.bf16.mxu1 %v10896_v45  ;;  %v10986_v45 = vld [vmem:[%s15997_s3 + $0x6f4] ss:$8 sps:$4 sm:$0xff]  }
 0x48d   :  { %6644 = vmatpush1.bf16.msra.mxu0 %v10891_v55  ;;  %6675 = vmatprep.mubr.bf16.mxu0 %v11583_v40  ;;  %v10981_v55 = vld [vmem:[%s15997_s3 + $0x500] ss:$8 sps:$4 sm:$0xff]   ;;  %v10989_v60 = vld [vmem:[%s15997_s3 + $0x674] ss:$8 sps:$4 sm:$0xff]  }
 0x48e   :  { %6645 = vmatprep.subr.bf16.mxu0 %v10899_v4  ;;  %v10984_v4 = vld [vmem:[%s15997_s3 + $0x6f0] ss:$8 sps:$4 sm:$0xff]  }
 0x48f   :  { %6788 = vmatpush1.bf16.msra.mxu1 %v10894_v30  ;;  %v6985_v30 = vrot.slane %v15267_v62, 3 }
 0x490   :  { %6789 = vmatprep.subr.bf16.mxu1 %v10902_v21  ;;  %v10992_v21 = vld [vmem:[%s15997_s3 + $0x6e4] ss:$8 sps:$4 sm:$0xff]  }
 0x491   :  { %6646 = vmatpush1.bf16.msra.mxu0 %v10897_v54  ;;  %v10987_v54 = vld [vmem:[%s15997_s3 + $0x670] ss:$8 sps:$4 sm:$0xff]  }
 0x492   :  { %6647 = vmatprep.subr.bf16.mxu0 %v10905_v15  ;;  %v6844_v15 = vrot.slane %v15267_v62, 2 }
 0x493   :  { %6790 = vmatpush1.bf16.msra.mxu1 %v10900_v58  ;;  %v10995_v58 = vld [vmem:[%s15997_s3 + $0x664] ss:$8 sps:$4 sm:$0xff]  }
 0x494   :  { %6791 = vmatprep.subr.bf16.mxu1 %v10908_v48  ;;  %v10990_v48 = vld [vmem:[%s15997_s3 + $0x6e0] ss:$8 sps:$4 sm:$0xff]  }
 0x495   :  { %6648 = vmatpush1.bf16.msra.mxu0 %v10903_v51  ;;  %v10998_v51 = vld [vmem:[%s15997_s3 + $0x6d4] ss:$8 sps:$4 sm:$0xff]  }
 0x496   :  { %6649 = vmatprep.subr.bf16.mxu0 %v10911_v18  ;;  %v10993_v18 = vld [vmem:[%s15997_s3 + $0x660] ss:$8 sps:$4 sm:$0xff]  }
 0x497   :  { %6792 = vmatpush1.bf16.msra.mxu1 %v10906_v32  ;;  %v11001_v32 = vld [vmem:[%s15997_s3 + $0x654] ss:$8 sps:$4 sm:$0xff]  }
 0x498   :  { %6793 = vmatprep.subr.bf16.mxu1 %v10914_v16  ;;  %v10996_v16 = vld [vmem:[%s15997_s3 + $0x6d0] ss:$8 sps:$4 sm:$0xff]  }
 0x499   :  { %6650 = vmatpush1.bf16.msra.mxu0 %v10909_v35  ;;  %v11004_v35 = vld [vmem:[%s15997_s3 + $0x6c4] ss:$8 sps:$4 sm:$0xff]  }
 0x49a   :  { %6651 = vmatprep.subr.bf16.mxu0 %v10917_v24  ;;  %v10999_v24 = vld [vmem:[%s15997_s3 + $0x650] ss:$8 sps:$4 sm:$0xff]  }
 0x49b   :  { %6794 = vmatpush1.bf16.msra.mxu1 %v10912_v47  ;;  %v11007_v47 = vld [vmem:[%s15997_s3 + $0x644] ss:$8 sps:$4 sm:$0xff]  }
 0x49c   :  { %6795 = vmatprep.subr.bf16.mxu1 %v10920_v61  ;;  %v11002_v61 = vld [vmem:[%s15997_s3 + $0x6c0] ss:$8 sps:$4 sm:$0xff]  }
 0x49d   :  { %6652 = vmatpush1.bf16.msra.mxu0 %v10915_v28  ;;  %v11010_v28 = vld [vmem:[%s15997_s3 + $0x6b4] ss:$8 sps:$4 sm:$0xff]  }
 0x49e   :  { %6653 = vmatprep.subr.bf16.mxu0 %v10923_v46  ;;  %v11005_v46 = vld [vmem:[%s15997_s3 + $0x640] ss:$8 sps:$4 sm:$0xff]  }
 0x49f   :  { %6796 = vmatpush1.bf16.msra.mxu1 %v10918_v3  ;;  %v11013_v3 = vld [vmem:[%s15997_s3 + $0x634] ss:$8 sps:$4 sm:$0xff]  }
 0x4a0   :  { %6797 = vmatprep.subr.bf16.mxu1 %v10926_v52  ;;  %v11008_v52 = vld [vmem:[%s15997_s3 + $0x6b0] ss:$8 sps:$4 sm:$0xff]  }
 0x4a1   :  { %6654 = vmatpush1.bf16.msra.mxu0 %v10921_v29  ;;  %v11016_v29 = vld [vmem:[%s15997_s3 + $0x6a4] ss:$8 sps:$4 sm:$0xff]  }
 0x4a2   :  { %6655 = vmatprep.subr.bf16.mxu0 %v10929_v53  ;;  %v11011_v53 = vld [vmem:[%s15997_s3 + $0x630] ss:$8 sps:$4 sm:$0xff]  }
 0x4a3   :  { %6798 = vmatpush1.bf16.msra.mxu1 %v10924_v6  ;;  %v11019_v6 = vld [vmem:[%s15997_s3 + $0x624] ss:$8 sps:$4 sm:$0xff]  }
 0x4a4   :  { %6799 = vmatprep.subr.bf16.mxu1 %v10932_v56  ;;  %v11014_v56 = vld [vmem:[%s15997_s3 + $0x6a0] ss:$8 sps:$4 sm:$0xff]  }
 0x4a5   :  { %6656 = vmatpush1.bf16.msra.mxu0 %v10927_v42  ;;  %v11022_v42 = vld [vmem:[%s15997_s3 + $0x694] ss:$8 sps:$4 sm:$0xff]  }
 0x4a6   :  { %6657 = vmatprep.subr.bf16.mxu0 %v10935_v9  ;;  %v11017_v9 = vld [vmem:[%s15997_s3 + $0x620] ss:$8 sps:$4 sm:$0xff]  }
 0x4a7   :  { %6800 = vmatpush1.bf16.msra.mxu1 %v10930_v41  ;;  %v11025_v41 = vld [vmem:[%s15997_s3 + $0x614] ss:$8 sps:$4 sm:$0xff]  }
 0x4a8   :  { %7067 = vmatprep.subr.bf16.mxu1 %v10938_v5  ;;  %v11020_v5 = vld [vmem:[%s15997_s3 + $0x690] ss:$8 sps:$4 sm:$0xff]  }
 0x4a9   :  { %6658 = vmatpush1.bf16.msra.mxu0 %v10933_v33  ;;  %v11028_v33 = vld [vmem:[%s15997_s3 + $0x684] ss:$8 sps:$4 sm:$0xff]  }
 0x4aa   :  { %6818 = vmatmul.mubr.bf16.vlgmr.msra.gmra.mxu1 %v6703_v11  ;;  %6926 = vmatprep.subr.bf16.mxu0 %v10941_v39  ;;  %v11023_v39 = vld [vmem:[%s15997_s3 + $0x610] ss:$8 sps:$4 sm:$0xff]   ;;  %v11026_v11 = vld [vmem:[%s15997_s3 + $0x680] ss:$8 sps:$4 sm:$0xff]  }
 0x4ab   :  { %7068 = vmatpush1.bf16.msra.mxu1 %v10936_v13  ;;  %7099 = vmatprep.mubr.bf16.mxu1 %v11583_v40  ;;  %v11031_v13 = vld [vmem:[%s15997_s3 + $0x604] ss:$8 sps:$4 sm:$0xff]  }
 0x4ac   :  { %6676 = vmatmul.mubr.bf16.vlgmr.msra.gmra.mxu0 %v15267_v62  ;;  %7069 = vmatprep.subr.bf16.mxu1 %v10944_v38  ;;  %v11034_v38 = vld [vmem:[%s15997_s3 + $0x7f4] ss:$8 sps:$4 sm:$0xff]  }
 0x4ad   :  { %6927 = vmatpush1.bf16.msra.mxu0 %v10939_v59  ;;  %6958 = vmatprep.mubr.bf16.mxu0 %v11583_v40  ;;  %v11029_v59 = vld [vmem:[%s15997_s3 + $0x600] ss:$8 sps:$4 sm:$0xff]  }
 0x4ae   :  { %6928 = vmatprep.subr.bf16.mxu0 %v10947_v22  ;;  %v11037_v22 = vld [vmem:[%s15997_s3 + $0x774] ss:$8 sps:$4 sm:$0xff]  }
 0x4af   :  { %7070 = vmatpush1.bf16.msra.mxu1 %v10942_v27  ;;  %v11032_v27 = vld [vmem:[%s15997_s3 + $0x7f0] ss:$8 sps:$4 sm:$0xff]  }
 0x4b0   :  { %7071 = vmatprep.subr.bf16.mxu1 %v10950_v25  ;;  %v7267_v25 = vrot.slane %v15267_v62, 5 }
 0x4b1   :  { %6929 = vmatpush1.bf16.msra.mxu0 %v10945_v20  ;;  %v11040_v20 = vld [vmem:[%s15997_s3 + $0x7e4] ss:$8 sps:$4 sm:$0xff]  }
 0x4b2   :  { %6930 = vmatprep.subr.bf16.mxu0 %v10953_v2  ;;  %v11035_v2 = vld [vmem:[%s15997_s3 + $0x770] ss:$8 sps:$4 sm:$0xff]  }
 0x4b3   :  { %7072 = vmatpush1.bf16.msra.mxu1 %v10948_v0 }
 0x4b4   :  { %7073 = vmatprep.subr.bf16.mxu1 %v10956_v34  ;;  %v7126_v34 = vrot.slane %v15267_v62, 4 }
 0x4b5   :  { %6931 = vmatpush1.bf16.msra.mxu0 %v10951_v7  ;;  %v11043_v7 = vld [vmem:[%s15997_s3 + $0x764] ss:$8 sps:$4 sm:$0xff]  }
 0x4b6   :  { %6932 = vmatprep.subr.bf16.mxu0 %v10959_v12  ;;  %v11038_v12 = vld [vmem:[%s15997_s3 + $0x7e0] ss:$8 sps:$4 sm:$0xff]  }
 0x4b7   :  { %7074 = vmatpush1.bf16.msra.mxu1 %v10954_v31 }
 0x4b8   :  { %7075 = vmatprep.subr.bf16.mxu1 %v10962_v57 }
 0x4b9   :  { %6933 = vmatpush1.bf16.msra.mxu0 %v10957_v14  ;;  %v11046_v14 = vld [vmem:[%s15997_s3 + $0x7d4] ss:$8 sps:$4 sm:$0xff]  }
 0x4ba   :  { %6934 = vmatprep.subr.bf16.mxu0 %v10965_v36 }
 0x4bb   :  { %7076 = vmatpush1.bf16.msra.mxu1 %v10960_v37  ;;  %v11041_v37 = vld [vmem:[%s15997_s3 + $0x760] ss:$8 sps:$4 sm:$0xff]  }
 0x4bc   :  { %7077 = vmatprep.subr.bf16.mxu1 %v10968_v1 }
 0x4bd   :  { %6935 = vmatpush1.bf16.msra.mxu0 %v10963_v44 }
 0x4be   :  { %6936 = vmatprep.subr.bf16.mxu0 %v10971_v26  ;;  %v11049_v26 = vld [vmem:[%s15997_s3 + $0x754] ss:$8 sps:$4 sm:$0xff]  }
 0x4bf   :  { %7078 = vmatpush1.bf16.msra.mxu1 %v10966_v43 }
 0x4c0   :  { %7079 = vmatprep.subr.bf16.mxu1 %v10974_v17  ;;  %v11044_v17 = vld [vmem:[%s15997_s3 + $0x7d0] ss:$8 sps:$4 sm:$0xff]  }
 0x4c1   :  { %6937 = vmatpush1.bf16.msra.mxu0 %v10969_v50 }
 0x4c2   :  { %6938 = vmatprep.subr.bf16.mxu0 %v10977_v19 }
 0x4c3   :  { %7080 = vmatpush1.bf16.msra.mxu1 %v10972_v10  ;;  %v11047_v10 = vld [vmem:[%s15997_s3 + $0x750] ss:$8 sps:$4 sm:$0xff]  }
 0x4c4   :  { %7081 = vmatprep.subr.bf16.mxu1 %v10980_v63 }
 0x4c5   :  { %6939 = vmatpush1.bf16.msra.mxu0 %v10975_v8  ;;  %v11055_v8 = vld [vmem:[%s15997_s3 + $0x744] ss:$8 sps:$4 sm:$0xff]  }
 0x4c6   :  { %6940 = vmatprep.subr.bf16.mxu0 %v10983_v49  ;;  %v11050_v49 = vld [vmem:[%s15997_s3 + $0x7c0] ss:$8 sps:$4 sm:$0xff]  }
 0x4c7   :  { %7082 = vmatpush1.bf16.msra.mxu1 %v10978_v23  ;;  %v11058_v23 = vld [vmem:[%s15997_s3 + $0x7b4] ss:$8 sps:$4 sm:$0xff]  }
 0x4c8   :  { %7349 = vmatprep.subr.bf16.mxu1 %v10986_v45  ;;  %v11053_v45 = vld [vmem:[%s15997_s3 + $0x740] ss:$8 sps:$4 sm:$0xff]  }
 0x4c9   :  { %6941 = vmatpush1.bf16.msra.mxu0 %v10981_v55  ;;  %v11061_v55 = vld [vmem:[%s15997_s3 + $0x734] ss:$8 sps:$4 sm:$0xff]  }
 0x4ca   :  { %7100 = vmatmul.mubr.bf16.vlgmr.msra.gmra.mxu1 %v6985_v30  ;;  %7208 = vmatprep.subr.bf16.mxu0 %v10989_v60  ;;  %v11056_v60 = vld [vmem:[%s15997_s3 + $0x7b0] ss:$8 sps:$4 sm:$0xff]  }
 0x4cb   :  { %7350 = vmatpush1.bf16.msra.mxu1 %v10984_v4  ;;  %7381 = vmatprep.mubr.bf16.mxu1 %v11583_v40  ;;  %v11064_v4 = vld [vmem:[%s15997_s3 + $0x7a4] ss:$8 sps:$4 sm:$0xff]   ;;  %v11059_v30 = vld [vmem:[%s15997_s3 + $0x730] ss:$8 sps:$4 sm:$0xff]  }
 0x4cc   :  { %6959 = vmatmul.mubr.bf16.vlgmr.msra.gmra.mxu0 %v6844_v15  ;;  %7351 = vmatprep.subr.bf16.mxu1 %v10992_v21  ;;  %v11067_v21 = vld [vmem:[%s15997_s3 + $0x724] ss:$8 sps:$4 sm:$0xff]   ;;  %v11070_v15 = vld [vmem:[%s15997_s3 + $0x794] ss:$8 sps:$4 sm:$0xff]  }
 0x4cd   :  { %7209 = vmatpush1.bf16.msra.mxu0 %v10987_v54  ;;  %7240 = vmatprep.mubr.bf16.mxu0 %v11583_v40  ;;  %v11062_v54 = vld [vmem:[%s15997_s3 + $0x7a0] ss:$8 sps:$4 sm:$0xff]  }
 0x4ce   :  { %7210 = vmatprep.subr.bf16.mxu0 %v10995_v58  ;;  %v11065_v58 = vld [vmem:[%s15997_s3 + $0x720] ss:$8 sps:$4 sm:$0xff]  }
 0x4cf   :  { %7352 = vmatpush1.bf16.msra.mxu1 %v10990_v48  ;;  %v11073_v48 = vld [vmem:[%s15997_s3 + $0x714] ss:$8 sps:$4 sm:$0xff]  }
 0x4d0   :  { %7353 = vmatprep.subr.bf16.mxu1 %v10998_v51  ;;  %v11068_v51 = vld [vmem:[%s15997_s3 + $0x790] ss:$8 sps:$4 sm:$0xff]  }
 0x4d1   :  { %7211 = vmatpush1.bf16.msra.mxu0 %v10993_v18  ;;  %v11076_v18 = vld [vmem:[%s15997_s3 + $0x784] ss:$8 sps:$4 sm:$0xff]  }
 0x4d2   :  { %7212 = vmatprep.subr.bf16.mxu0 %v11001_v32  ;;  %v11071_v32 = vld [vmem:[%s15997_s3 + $0x710] ss:$8 sps:$4 sm:$0xff]  }
 0x4d3   :  { %7354 = vmatpush1.bf16.msra.mxu1 %v10996_v16  ;;  %v11079_v16 = vld [vmem:[%s15997_s3 + $0x704] ss:$8 sps:$4 sm:$0xff]  }
 0x4d4   :  { %7355 = vmatprep.subr.bf16.mxu1 %v11004_v35  ;;  %v11074_v35 = vld [vmem:[%s15997_s3 + $0x780] ss:$8 sps:$4 sm:$0xff]  }
 0x4d5   :  { %7213 = vmatpush1.bf16.msra.mxu0 %v10999_v24  ;;  %v11077_v24 = vld [vmem:[%s15997_s3 + $0x700] ss:$8 sps:$4 sm:$0xff]  }
 0x4d6   :  { %7214 = vmatprep.subr.bf16.mxu0 %v11007_v47  ;;  %v7549_v47 = vrot.slane %v15267_v62, 7 }
 0x4d7   :  { %7356 = vmatpush1.bf16.msra.mxu1 %v11002_v61 }
 0x4d8   :  { %7357 = vmatprep.subr.bf16.mxu1 %v11010_v28  ;;  %v7408_v28 = vrot.slane %v15267_v62, 6 }
 0x4d9   :  { %7215 = vmatpush1.bf16.msra.mxu0 %v11005_v46 }
 0x4da   :  { %7216 = vmatprep.subr.bf16.mxu0 %v11013_v3 }
 0x4db   :  { %7358 = vmatpush1.bf16.msra.mxu1 %v11008_v52 }
 0x4dc   :  { %7359 = vmatprep.subr.bf16.mxu1 %v11016_v29 }
 0x4dd   :  { %7217 = vmatpush1.bf16.msra.mxu0 %v11011_v53 }
 0x4de   :  { %7218 = vmatprep.subr.bf16.mxu0 %v11019_v6 }
 0x4df   :  { %7360 = vmatpush1.bf16.msra.mxu1 %v11014_v56 }
 0x4e0   :  { %7361 = vmatprep.subr.bf16.mxu1 %v11022_v42 }
 0x4e1   :  { %7219 = vmatpush1.bf16.msra.mxu0 %v11017_v9 }
 0x4e2   :  { %7220 = vmatprep.subr.bf16.mxu0 %v11025_v41 }
 0x4e3   :  { %7362 = vmatpush1.bf16.msra.mxu1 %v11020_v5 }
 0x4e4   :  { %7363 = vmatprep.subr.bf16.mxu1 %v11028_v33 }
 0x4e5   :  { %7221 = vmatpush1.bf16.msra.mxu0 %v11023_v39 }
 0x4e6   :  { %7222 = vmatprep.subr.bf16.mxu0 %v11031_v13 }
 0x4e7   :  { %7364 = vmatpush1.bf16.msra.mxu1 %v11026_v11 }
 0x4e8   :  { %7631 = vmatprep.subr.bf16.mxu1 %v11034_v38 }
 0x4e9   :  { %7223 = vmatpush1.bf16.msra.mxu0 %v11029_v59 }
 0x4ea   :  { %7382 = vmatmul.mubr.bf16.vlgmr.msra.gmra.mxu1 %v7267_v25  ;;  %v5694_v0 = vpop.f32.mrf.mxu1  ;;  %7490 = vmatprep.subr.bf16.mxu0 %v11037_v22 }
 0x4eb   :  { %7632 = vmatpush1.bf16.msra.mxu1 %v11032_v27  ;;  %7663 = vmatprep.mubr.bf16.mxu1 %v11583_v40 }
 0x4ec   :  { %7241 = vmatmul.mubr.bf16.vlgmr.msra.gmra.mxu0 %v7126_v34  ;;  %v5573_v31 = vpop.f32.mrf.mxu0  ;;  %v5696_v57 = vpop.f32.mrf.mxu1  ;;  %7633 = vmatprep.subr.bf16.mxu1 %v11040_v20  ;;  %v11081_v34 = vld [vmem:[%s15999_s5 + $0x38] sm:$0xff]  }
 0x4ed   :  { %v15859_v36 = vadd.f32 %v5694_v0, %v5573_v31  ;;  %7491 = vmatpush1.bf16.msra.mxu0 %v11035_v2  ;;  %7522 = vmatprep.mubr.bf16.mxu0 %v11583_v40  ;;  %v11052_v40 = vld [vmem:[%s15997_s3 + $0x7c4] ss:$8 sps:$4 sm:$0xff]   ;;  %v11080_v0 = vld [vmem:[%s15999_s5 + $0x78] sm:$0xff]  }
 0x4ee   :  { %v5575_v1 = vpop.f32.mrf.mxu0  ;;  %v5698_v44 = vpop.f32.mrf.mxu1  ;;  %7492 = vmatprep.subr.bf16.mxu0 %v11043_v7  ;;  %v11082_v7 = vld [vmem:[%s15999_s5 + $0x70] sm:$0xff]   ;;  %v11084_v31 = vld [vmem:[%s15999_s5 + $0x68] sm:$0xff]  }
 0x4ef   :  { %v5697_v43 = vadd.f32 %v5696_v57, %v5575_v1  ;;  %7634 = vmatpush1.bf16.msra.mxu1 %v11038_v12  ;;  %v11083_v12 = vld [vmem:[%s15999_s5 + $0x30] sm:$0xff]   ;;  %v11085_v57 = vld [vmem:[%s15999_s5 + $0x28] sm:$0xff]   ;;  %v11089_v44 = vld [vmem:[%s15999_s5 + $0x18] sm:$0xff]  }
 0x4f0   :  { %v5577_v50 = vpop.f32.mrf.mxu0  ;;  %v5699_v19 = vpop.f32.mrf.mxu1  ;;  %7635 = vmatprep.subr.bf16.mxu1 %v11046_v14  ;;  %v11086_v14 = vld [vmem:[%s15999_s5 + $0x60] sm:$0xff]  }
 0x4f1   :  { %7493 = vmatpush1.bf16.msra.mxu0 %v11041_v37  ;;  %v11088_v37 = vld [vmem:[%s15999_s5 + $0x58] sm:$0xff]   ;;  %v11090_v50 = vld [vmem:[%s15999_s5 + $0x50] sm:$0xff]  }
 0x4f2   :  { %v5578_v63 = vpop.f32.mrf.mxu0  ;;  %7494 = vmatprep.subr.bf16.mxu0 %v11049_v26 }
 0x4f3   :  { %7636 = vmatpush1.bf16.msra.mxu1 %v11044_v17 }
 0x4f4   :  { %7637 = vmatprep.subr.bf16.mxu1 %v11052_v40 }
 0x4f5   :  { %7495 = vmatpush1.bf16.msra.mxu0 %v11047_v10  ;;  %v11091_v10 = vld [vmem:[%s15999_s5 + $0x10] sm:$0xff]  }
 0x4f6   :  { %7496 = vmatprep.subr.bf16.mxu0 %v11055_v8 }
 0x4f7   :  { %7638 = vmatpush1.bf16.msra.mxu1 %v11050_v49 }
 0x4f8   :  { %7639 = vmatprep.subr.bf16.mxu1 %v11058_v23 }
 0x4f9   :  { %7497 = vmatpush1.bf16.msra.mxu0 %v11053_v45 }
 0x4fa   :  { %7498 = vmatprep.subr.bf16.mxu0 %v11061_v55  ;;  %v11092_v55 = vld [vmem:[%s15999_s5 + $0x48] sm:$0xff]  }
 0x4fb   :  { %7640 = vmatpush1.bf16.msra.mxu1 %v11056_v60 }
 0x4fc   :  { %7641 = vmatprep.subr.bf16.mxu1 %v11064_v4  ;;  %v11093_v4 = vld [vmem:[%s15999_s5 + $0x8] sm:$0xff]  }
 0x4fd   :  { %7499 = vmatpush1.bf16.msra.mxu0 %v11059_v30  ;;  %v11094_v30 = vld [vmem:[%s15999_s5 + $0x40] sm:$0xff]  }
 0x4fe   :  { %7500 = vmatprep.subr.bf16.mxu0 %v11067_v21  ;;  %v11095_v21 = vld [vmem:[%s15999_s5] sm:$0xff]  }
 0x4ff   :  { %7642 = vmatpush1.bf16.msra.mxu1 %v11062_v54 }
 0x500   :  { %7643 = vmatprep.subr.bf16.mxu1 %v11070_v15 }
 0x501   :  { %7501 = vmatpush1.bf16.msra.mxu0 %v11065_v58 }
 0x502   :  { %7502 = vmatprep.subr.bf16.mxu0 %v11073_v48 }
 0x503   :  { %7644 = vmatpush1.bf16.msra.mxu1 %v11068_v51 }
 0x504   :  { %7645 = vmatprep.subr.bf16.mxu1 %v11076_v18 }
 0x505   :  { %7503 = vmatpush1.bf16.msra.mxu0 %v11071_v32 }
 0x506   :  { %7504 = vmatprep.subr.bf16.mxu0 %v11079_v16 }
 0x507   :  { %7646 = vmatpush1.bf16.msra.mxu1 %v11074_v35 }
 0x509   :  { %7505 = vmatpush1.bf16.msra.mxu0 %v11077_v24 }
 0x50a   :  { %v5974_v61 = vpop.f32.mrf.mxu1  ;;  %7664 = vmatmul.mubr.bf16.vlgmr.msra.gmra.mxu1 %v7549_v47  ;;  %10096 = vmatprep.subr.bf16.mxu0 %v11080_v0 }
 0x50c   :  { %v5833_v46 = vpop.f32.mrf.mxu0  ;;  %v5976_v3 = vpop.f32.mrf.mxu1  ;;  %7523 = vmatmul.mubr.bf16.vlgmr.msra.gmra.mxu0 %v7408_v28 }
 0x50d   :  { %v5840_v52 = vadd.f32 %v5833_v46, %v15859_v36  ;;  %10097 = vmatpush3.bf16.msra.mxu0 %v11081_v34  ;;  %v11087_v36 = vld [vmem:[%s15999_s5 + $0x20] sm:$0xff]  }
 0x50e   :  { %v5835_v29 = vpop.f32.mrf.mxu0  ;;  %v5978_v53 = vpop.f32.mrf.mxu1  ;;  %10098 = vmatprep.subr.bf16.mxu0 %v11082_v7  ;;  %v7674_v7 = vld [vmem:[%s15998_s4] sm:$0x3] }
 0x50f   :  { %v5841_v6 = vadd.f32 %v5835_v29, %v5697_v43  ;;  %v5981_v56 = vadd.f32 %v5974_v61, %v5840_v52 }
 0x510   :  { %v5837_v42 = vpop.f32.mrf.mxu0  ;;  %v5979_v9 = vpop.f32.mrf.mxu1 }
 0x511   :  { %v5982_v41 = vadd.f32 %v5976_v3, %v5841_v6  ;;  %10099 = vmatpush3.bf16.msra.mxu0 %v11083_v12 }
 0x512   :  { %v5838_v5 = vpop.f32.mrf.mxu0  ;;  %10100 = vmatprep.subr.bf16.mxu0 %v11084_v31 }
 0x515   :  { %10101 = vmatpush3.bf16.msra.mxu0 %v11085_v57 }
 0x516   :  { %10102 = vmatprep.subr.bf16.mxu0 %v11086_v14 }
 0x519   :  { %10103 = vmatpush3.bf16.msra.mxu0 %v11087_v36 }
 0x51a   :  { %10104 = vmatprep.subr.bf16.mxu0 %v11088_v37 }
 0x51d   :  { %10105 = vmatpush3.bf16.msra.mxu0 %v11089_v44 }
 0x51e   :  { %10106 = vmatprep.subr.bf16.mxu0 %v11090_v50 }
 0x521   :  { %10107 = vmatpush3.bf16.msra.mxu0 %v11091_v10 }
 0x522   :  { %10108 = vmatprep.subr.bf16.mxu0 %v11092_v55 }
 0x525   :  { %10109 = vmatpush3.bf16.msra.mxu0 %v11093_v4 }
 0x526   :  { %10110 = vmatprep.subr.bf16.mxu0 %v11094_v30 }
 0x529   :  { %10111 = vmatpush3.bf16.msra.mxu0 %v11095_v21  ;;  %v8695_v21 = vld [vmem:[%s16000_s6] ss:$0 sm:$0xff] }
 0x52a   :  { %v6256_v33 = vpop.f32.mrf.mxu1 }
 0x52c   :  { %v6115_v39 = vpop.f32.mrf.mxu0  ;;  %v6258_v13 = vpop.f32.mrf.mxu1 }
 0x52d   :  { %v6122_v11 = vadd.f32 %v6115_v39, %v5981_v56 }
 0x52e   :  { %v6117_v38 = vpop.f32.mrf.mxu0  ;;  %v6260_v59 = vpop.f32.mrf.mxu1 }
 0x52f   :  { %v6123_v62 = vadd.f32 %v6117_v38, %v5982_v41  ;;  %v6263_v22 = vadd.f32 %v6256_v33, %v6122_v11  ;;  %v7676_v59 = vlaneseq }
 0x530   :  { %v6119_v27 = vpop.f32.mrf.mxu0  ;;  %v6261_v25 = vpop.f32.mrf.mxu1 }
 0x531   :  { %v6264_v20 = vadd.f32 %v6258_v13, %v6123_v62  ;;  %v7677_v27 = vshrl.u32 %v7676_v59, 7 }
 0x532   :  { %v6120_v2 = vpop.f32.mrf.mxu0 }
 0x533   :  { %v7678_v0 = vsub.s32 0, %v7677_v27  ;;  %v7682_v31 = vsub.s32 1, %v7677_v27 }
 0x535   :  { %v7679_v37 = vrot.slane %v7674_v7, %v7678_v0  ;;  %v7683_v50 = vrot.slane %v7674_v7, %v7682_v31 }
 0x54a   :  { %v6538_v1 = vpop.f32.mrf.mxu1 }
 0x54c   :  { %v6397_v26 = vpop.f32.mrf.mxu0  ;;  %v6540_v43 = vpop.f32.mrf.mxu1 }
 0x54d   :  { %v6404_v17 = vadd.f32 %v6397_v26, %v6263_v22 }
 0x54e   :  { %v6399_v19 = vpop.f32.mrf.mxu0  ;;  %v6542_v40 = vpop.f32.mrf.mxu1 }
 0x54f   :  { %v6405_v63 = vadd.f32 %v6399_v19, %v6264_v20  ;;  %v6545_v8 = vadd.f32 %v6538_v1, %v6404_v17 }
 0x550   :  { %v6401_v49 = vpop.f32.mrf.mxu0  ;;  %v6543_v23 = vpop.f32.mrf.mxu1 }
 0x551   :  { %v6546_v45 = vadd.f32 %v6540_v43, %v6405_v63 }
 0x552   :  { %v6402_v60 = vpop.f32.mrf.mxu0 }
 0x56a   :  { %v6819_v54 = vpop.f32.mrf.mxu1 }
 0x56c   :  { %v6677_v15 = vpop.f32.mrf.mxu0  ;;  %v6821_v58 = vpop.f32.mrf.mxu1 }
 0x56d   :  { %v6684_v48 = vadd.f32 %v6677_v15, %v6545_v8 }
 0x56e   :  { %v6679_v51 = vpop.f32.mrf.mxu0  ;;  %v6823_v18 = vpop.f32.mrf.mxu1 }
 0x56f   :  { %v6685_v32 = vadd.f32 %v6679_v51, %v6546_v45  ;;  %v6826_v16 = vadd.f32 %v6819_v54, %v6684_v48 }
 0x570   :  { %v6681_v35 = vpop.f32.mrf.mxu0  ;;  %v6824_v24 = vpop.f32.mrf.mxu1 }
 0x571   :  { %v6827_v47 = vadd.f32 %v6821_v58, %v6685_v32 }
 0x572   :  { %v6682_v61 = vpop.f32.mrf.mxu0 }
 0x58a   :  { %v7101_v28 = vpop.f32.mrf.mxu1 }
 0x58c   :  { %v6960_v46 = vpop.f32.mrf.mxu0  ;;  %v7103_v3 = vpop.f32.mrf.mxu1 }
 0x58d   :  { %v6967_v38 = vadd.f32 %v6960_v46, %v6826_v16 }
 0x58e   :  { %v6962_v52 = vpop.f32.mrf.mxu0  ;;  %v7105_v29 = vpop.f32.mrf.mxu1 }
 0x58f   :  { %v6968_v62 = vadd.f32 %v6962_v52, %v6827_v47  ;;  %v7108_v22 = vadd.f32 %v7101_v28, %v6967_v38 }
 0x590   :  { %v6964_v53 = vpop.f32.mrf.mxu0  ;;  %v7106_v6 = vpop.f32.mrf.mxu1 }
 0x591   :  { %v7109_v20 = vadd.f32 %v7103_v3, %v6968_v62 }
 0x592   :  { %v6965_v56 = vpop.f32.mrf.mxu0 }
 0x5aa   :  { %v7383_v42 = vpop.f32.mrf.mxu1 }
 0x5ac   :  { %v7242_v9 = vpop.f32.mrf.mxu0  ;;  %v7385_v41 = vpop.f32.mrf.mxu1 }
 0x5ad   :  { %v7249_v25 = vadd.f32 %v7242_v9, %v7108_v22 }
 0x5ae   :  { %v7244_v5 = vpop.f32.mrf.mxu0  ;;  %v7387_v33 = vpop.f32.mrf.mxu1 }
 0x5af   :  { %v7250_v2 = vadd.f32 %v7244_v5, %v7109_v20  ;;  %v7390_v12 = vadd.f32 %v7383_v42, %v7249_v25 }
 0x5b0   :  { %v7246_v39 = vpop.f32.mrf.mxu0  ;;  %v7388_v13 = vpop.f32.mrf.mxu1 }
 0x5b1   :  { %v7391_v1 = vadd.f32 %v7385_v41, %v7250_v2 }
 0x5b2   :  { %v7247_v11 = vpop.f32.mrf.mxu0 }
 0x5ca   :  { %v7665_v34 = vpop.f32.mrf.mxu1 }
 0x5cc   :  { %v7524_v57 = vpop.f32.mrf.mxu0  ;;  %v7667_v14 = vpop.f32.mrf.mxu1 }
 0x5cd   :  { %v7531_v36 = vadd.f32 %v7524_v57, %v7390_v12 }
 0x5ce   :  { %v7526_v44 = vpop.f32.mrf.mxu0  ;;  %v7669_v26 = vpop.f32.mrf.mxu1 }
 0x5cf   :  { %v7672_v43 = vadd.f32 %v7665_v34, %v7531_v36  ;;  %v7532_v17 = vadd.f32 %v7526_v44, %v7391_v1 }
 0x5d0   :  { %v7528_v19 = vpop.f32.mrf.mxu0  ;;  %v7670_v40 = vpop.f32.mrf.mxu1 }
 0x5d1   :  { %v7686_v10 = vadd.f32 %v7679_v37, %v7672_v43  ;;  %v7673_v63 = vadd.f32 %v7667_v14, %v7532_v17 }
 0x5d2   :  { %v7529_v8 = vpop.f32.mrf.mxu0 }
 0x5d3   :  { %v7687_v49 = vadd.f32 %v7683_v50, %v7673_v63  ;;  %v7688_v23 = vmax.f32 %v7686_v10, 0.0 }
 0x5d5   :  { %v7689_v45 = vmax.f32 %v7687_v49, 0.0  ;;  %v7690_v60 = vpack.c.bf16 %v7688_v23, %v7688_v23 }
 0x5d7   :  { %v7691_v55 = vpack.c.bf16 %v7689_v45, %v7689_v45 }
 0x5d9   :  { %7859 = vmatprep.mubr.bf16.mxu0 %v7691_v55 }
 0x5da   :  { %7860 = vmatmul.mubr.bf16.vlgmr.msra.gmra.mxu0 %v7690_v60 }
 0x69a   :  { %v10112_v4 = vpop.f32.mrf.mxu0 }
 0x69c   :  { %v10113_v30 = vpop.f32.mrf.mxu0 }
 0x69d   :  { %v10114_v54 = vadd.f32 %v10113_v30, %v10112_v4 }
 0x69e   :  { %v10115_v15 = vpop.f32.mrf.mxu0 }
 0x69f   :  { %v7862_v58 = vadd.f32 %v10114_v54, %v8695_v21 }
 0x6a0   :  { %v10116_v48 = vpop.f32.mrf.mxu0 }
 0x6a1   :  { %7867 = vst [vmem:[#allocation2] sm:$0x3] %v7862_v58 }
 0x6a2   :  { %11572 = shalt.err (!%p11569_p4)
}
 0x6a3   :  { %7877 = dma.vmem_to_hbm [thread:$0]  %s7875_s30, 32, %s16001_s7, [#allocation3]  }
 0x6a4   :  { %11581 = dma.done.wait [#allocation3], 32  }
 0x6a5   :  { %11582 = vsyncadd [#allocation3], 4294967264 }
 0x6a6   :  { %7881 = vsyncpa [#allocation3], 1 }

</bundles_post_ra>
